<compile_context>
chip_gen: v7x
topology: tpu7x:2x2x1
jax: 0.10.0
libtpu: 0.0.40
codegen_flags: <defaults>
</compile_context>

<pallas_src>
import math
from functools import partial

import jax
import jax.numpy as jnp
from jax.experimental import pallas as pl
from jax.experimental.pallas import tpu as pltpu


# ----------------------------- helpers -----------------------------

def _round_up(x, m):
    return ((x + m - 1) // m) * m


def _pick_tile(n, cap, step):
    """Largest multiple-of-`step` divisor of n that is <= cap; falls back to the
    full dimension (block == array dim, always legal) if none exists."""
    if n <= cap:
        return n
    best = None
    for t in range(step, cap + 1, step):
        if n % t == 0:
            best = t
    return best if best is not None else n


def _pick_batch_block(batch, t_len, s_len, row_cap=512):
    """Largest divisor of `batch` whose flattened row count stays <= row_cap."""
    rows = max(t_len, s_len, 1)
    best = 1
    for bb in range(1, batch + 1):
        if batch % bb == 0 and bb * rows <= row_cap:
            best = bb
    return best


def _const2d_spec(shape):
    """Constant-index 2-D block (weights / biases), re-used every grid step."""
    # TODO(synk): at production sizes (D>=1024, pf>=4096) mark these with
    # pipeline_mode=pl.Buffered(1) so constant weight blocks are single-buffered
    # (halves weight VMEM, important under v7x's 64 MiB physical VMEM).
    return pl.BlockSpec(shape, lambda b: (0, 0))


# ----------------------------- fused decoder-layer kernel -----------------------------

def _decoder_layer_kernel(x_ref, enc_ref, tkeep_ref, skeep_ref,
                          wqkv_ref, bqkv_ref, wos_ref, bos_ref,
                          wqc_ref, bqc_ref, wkvc_ref, bkvc_ref, woc_ref, boc_ref,
                          w1_ref, b1_ref, w2_ref, b2_ref,
                          g_ref, bln_ref,
                          o_ref, ctx_scr, *, heads, inv_scale):
    """One whole DecoderLayer for a block of Bb batch elements.

    x_ref     : (Bb, T, D)  bf16 residual stream (target side)
    enc_ref   : (Bb, S, D)  bf16 encoder output
    tkeep_ref : (Bb, T, 1)  int32 target pad keep (masks *query* rows, as in torch)
    skeep_ref : (Bb, 1, S)  int32 source pad keep (masks key columns)
    ctx_scr   : (Bb*T, D)   f32 VMEM scratch for the re-assembled attention context
    """
    Bb, T, D = x_ref.shape
    S = enc_ref.shape[1]
    H = heads
    dh = D // H

    x = x_ref[...].astype(jnp.float32).reshape(Bb * T, D)      # residual, f32
    enc = enc_ref[...].reshape(Bb * S, D)                       # bf16

    # --- masks built in-kernel (no O(B*Lq*Lk) HBM traffic) ---
    causal = (jax.lax.broadcasted_iota(jnp.int32, (T, T), 0) >=
              jax.lax.broadcasted_iota(jnp.int32, (T, T), 1))
    keep_self = jnp.logical_and(tkeep_ref[...] != 0, causal[None, :, :])   # (Bb,T,T)
    keep_src = skeep_ref[...] != 0                                          # (Bb,1,S)

    g = g_ref[...]        # (1, D) — the reference layer reuses ONE LayerNorm 3x
    b_ln = bln_ref[...]

    def layer_norm(y):
        mu = jnp.mean(y, axis=-1, keepdims=True)
        var = jnp.mean(jnp.square(y - mu), axis=-1, keepdims=True)
        return (y - mu) * jax.lax.rsqrt(var + jnp.float32(1e-5)) * g + b_ln

    def mha(q2d, k2d, v2d, keep, l_k):
        """Multi-head attention; q2d (Bb*T, D), k2d/v2d (Bb*l_k, D) f32."""
        qb = q2d.astype(jnp.bfloat16)
        kb = k2d.astype(jnp.bfloat16)
        vb = v2d.astype(jnp.bfloat16)
        # TODO(synk): for long sequences tile l_k flash-style (online softmax)
        # and pack heads into a single (Bb*H)-batched matmul to avoid dh-wide
        # contractions; at these sizes the batched per-head einsums suffice.
        for h in range(H):
            lo, hi = h * dh, (h + 1) * dh
            qh = qb[:, lo:hi].reshape(Bb, T, dh)
            kh = kb[:, lo:hi].reshape(Bb, l_k, dh)
            vh = vb[:, lo:hi].reshape(Bb, l_k, dh)
            e = jnp.einsum('bqd,bkd->bqk', qh, kh,
                           preferred_element_type=jnp.float32) * jnp.float32(inv_scale)
            e = jnp.where(keep, e, jnp.float32(-1e10))
            e = e - jnp.max(e, axis=-1, keepdims=True)
            p = jnp.exp(e)
            p = p / jnp.sum(p, axis=-1, keepdims=True)          # exact softmax
            ctx = jnp.einsum('bqk,bkd->bqd', p.astype(jnp.bfloat16), vh,
                             preferred_element_type=jnp.float32)
            ctx_scr[:, lo:hi] = ctx.reshape(Bb * T, dh)          # no concat
        return ctx_scr[...]

    # ---- self-attention: fused [Q|K|V] projection + attention + out-proj + LN ----
    qkv = jnp.dot(x.astype(jnp.bfloat16), wqkv_ref[...],
                  preferred_element_type=jnp.float32) + bqkv_ref[...]
    ctx = mha(qkv[:, :D], qkv[:, D:2 * D], qkv[:, 2 * D:], keep_self, T)
    sa = jnp.dot(ctx.astype(jnp.bfloat16), wos_ref[...],
                 preferred_element_type=jnp.float32) + bos_ref[...]
    x = layer_norm(x + sa)

    # ---- cross-attention: Q from x, fused [K|V] from encoder output + LN ----
    q = jnp.dot(x.astype(jnp.bfloat16), wqc_ref[...],
                preferred_element_type=jnp.float32) + bqc_ref[...]
    kv = jnp.dot(enc, wkvc_ref[...],
                 preferred_element_type=jnp.float32) + bkvc_ref[...]
    ctx = mha(q, kv[:, :D], kv[:, D:], keep_src, S)
    ca = jnp.dot(ctx.astype(jnp.bfloat16), woc_ref[...],
                 preferred_element_type=jnp.float32) + boc_ref[...]
    x = layer_norm(x + ca)

    # ---- position-wise FFN + residual + LN ----
    h1 = jnp.maximum(jnp.dot(x.astype(jnp.bfloat16), w1_ref[...],
                             preferred_element_type=jnp.float32) + b1_ref[...], 0.0)
    ff = jnp.dot(h1.astype(jnp.bfloat16), w2_ref[...],
                 preferred_element_type=jnp.float32) + b2_ref[...]
    x = layer_norm(x + ff)

    o_ref[...] = x.reshape(Bb, T, D).astype(o_ref.dtype)


def decoder_layer(lp, x, enc, trg_keep, src_keep, *, heads, block_b):
    """x: (B, T, D) bf16, enc: (B, S, D) bf16 -> (B, T, D) bf16."""
    B, T, D = x.shape
    S = enc.shape[1]
    pf = lp["ff_w1"].shape[1]
    dh = D // heads
    kern = partial(_decoder_layer_kernel, heads=heads, inv_scale=1.0 / math.sqrt(dh))
    return pl.pallas_call(
        kern,
        out_shape=jax.ShapeDtypeStruct((B, T, D), jnp.bfloat16),
        grid=(B // block_b,),
        in_specs=[
            pl.BlockSpec((block_b, T, D), lambda b: (b, 0, 0)),   # residual stream
            pl.BlockSpec((block_b, S, D), lambda b: (b, 0, 0)),   # encoder output
            pl.BlockSpec((block_b, T, 1), lambda b: (b, 0, 0)),   # trg keep (query rows)
            pl.BlockSpec((block_b, 1, S), lambda b: (b, 0, 0)),   # src keep (key cols)
            _const2d_spec((D, 3 * D)), _const2d_spec((1, 3 * D)),  # self-attn QKV
            _const2d_spec((D, D)), _const2d_spec((1, D)),          # self-attn out
            _const2d_spec((D, D)), _const2d_spec((1, D)),          # cross-attn Q
            _const2d_spec((D, 2 * D)), _const2d_spec((1, 2 * D)),  # cross-attn [K|V]
            _const2d_spec((D, D)), _const2d_spec((1, D)),          # cross-attn out
            _const2d_spec((D, pf)), _const2d_spec((1, pf)),        # FFN linear_1
            _const2d_spec((pf, D)), _const2d_spec((1, D)),         # FFN linear_2
            _const2d_spec((1, D)), _const2d_spec((1, D)),          # shared LayerNorm
        ],
        out_specs=pl.BlockSpec((block_b, T, D), lambda b: (b, 0, 0)),
        scratch_shapes=[pltpu.VMEM((block_b * T, D), jnp.float32)],
        compiler_params=pltpu.CompilerParams(
            dimension_semantics=("parallel",),
            vmem_limit_bytes=48 * 1024 * 1024),   # explicit; safe on v5e/v6e/v7x
    )(x, enc, trg_keep, src_keep,
      lp["sa_wqkv"], lp["sa_bqkv"], lp["sa_wo"], lp["sa_bo"],
      lp["ca_wq"], lp["ca_bq"], lp["ca_wkv"], lp["ca_bkv"], lp["ca_wo"], lp["ca_bo"],
      lp["ff_w1"], lp["ff_b1"], lp["ff_w2"], lp["ff_b2"],
      lp["ln_g"], lp["ln_b"])


# ----------------------------- output (vocab) projection -----------------------------

def _out_proj_kernel(x_ref, w_ref, b_ref, o_ref, acc_ref):
    @pl.when(pl.program_id(2) == 0)
    def _():
        acc_ref[...] = jnp.zeros_like(acc_ref)
    acc_ref[...] += jnp.dot(x_ref[...], w_ref[...], preferred_element_type=jnp.float32)

    @pl.when(pl.program_id(2) == pl.num_programs(2) - 1)
    def _():
        o_ref[...] = acc_ref[...] + b_ref[...]


def output_linear(x2d, w, b, *, tm_cap=512, tn_cap=1024, tk_cap=512):
    """x2d: (N, D) bf16, w: (D, Vpad) bf16 (Vpad % 128 == 0), b: (1, Vpad) f32."""
    N, D = x2d.shape
    vpad = w.shape[1]
    tm = _pick_tile(N, tm_cap, 8)
    tn = _pick_tile(vpad, tn_cap, 128)   # vocab padded to 128 -> always lane-dense
    tk = _pick_tile(D, tk_cap, 128)      # reduction axis bounds VMEM independent of D
    return pl.pallas_call(
        _out_proj_kernel,
        out_shape=jax.ShapeDtypeStruct((N, vpad), jnp.float32),
        grid=(N // tm, vpad // tn, D // tk),
        in_specs=[
            pl.BlockSpec((tm, tk), lambda i, j, k: (i, k)),
            pl.BlockSpec((tk, tn), lambda i, j, k: (k, j)),
            pl.BlockSpec((1, tn), lambda i, j, k: (0, j)),
        ],
        out_specs=pl.BlockSpec((tm, tn), lambda i, j, k: (i, j)),
        scratch_shapes=[pltpu.VMEM((tm, tn), jnp.float32)],
        compiler_params=pltpu.CompilerParams(
            dimension_semantics=("parallel", "parallel", "arbitrary"),
            vmem_limit_bytes=48 * 1024 * 1024),
    )(x2d, w, b)


# ----------------------------- model glue -----------------------------

def make_keep_vectors(src_tokens, src_query_tokens, trg_tokens, pad_id):
    """Tiny pad-keep vectors; 2-D masks (causal & broadcast) are built in-kernel."""
    src_cat = jnp.concatenate([src_tokens != pad_id, src_query_tokens != pad_id], axis=1)
    B, S = src_cat.shape
    T = trg_tokens.shape[1]
    src_keep = src_cat.astype(jnp.int32).reshape(B, 1, S)                    # key cols
    trg_keep = (trg_tokens != pad_id).astype(jnp.int32).reshape(B, T, 1)     # query rows
    return trg_keep, src_keep


def decoder_forward(params, trg_tokens, encoder_out, src_tokens, src_query_tokens,
                    *, pad_id, heads):
    B, T = trg_tokens.shape
    vocab, D = params["embed_tokens"].shape
    trg_keep, src_keep = make_keep_vectors(src_tokens, src_query_tokens, trg_tokens, pad_id)

    # token-embedding gather + sinusoidal positions kept in plain JAX (tiny,
    # gather-shaped); F.dropout(training=False) -> identity.  Residual stream
    # is handed to the kernels in bf16 (halves HBM traffic); all residual /
    # LayerNorm / softmax math is f32 inside the kernels.
    x = params["embed_tokens"][trg_tokens] * math.sqrt(D) + params["pos_embed"][None, :T, :]
    x = x.astype(jnp.bfloat16)
    enc = encoder_out.astype(jnp.bfloat16)

    block_b = _pick_batch_block(B, T, enc.shape[1])
    for lp in params["layers"]:
        x = decoder_layer(lp, x, enc, trg_keep, src_keep, heads=heads, block_b=block_b)

    logits = output_linear(x.reshape(B * T, D), params["w_out"], params["b_out"])
    return logits[:, :vocab].reshape(B, T, vocab)


# ----------------------------- deterministic init -----------------------------

def _init_w(key, din, dout):
    # weights live in bf16 in HBM and feed the MXU in bf16 (f32 accumulation)
    return (jax.random.normal(key, (din, dout), jnp.float32) * 0.02).astype(jnp.bfloat16)


def init_decoder_params(key, vocab, embed_dim, layers, heads, pf_dim, max_positions):
    assert embed_dim % heads == 0
    D = embed_dim
    keys = jax.random.split(key, 2 + layers)
    params = {}
    params["embed_tokens"] = jax.random.normal(keys[0], (vocab, D), jnp.float32) * 0.02

    # sinusoidal positional embedding (PositionalEmbedding)
    pos = jnp.arange(0.0, max_positions, dtype=jnp.float32)[:, None]
    div = jnp.exp(jnp.arange(0.0, D, 2.0, dtype=jnp.float32) * (-math.log(10000.0) / D))
    pe = jnp.zeros((max_positions, D), jnp.float32)
    pe = pe.at[:, 0::2].set(jnp.sin(pos * div))
    pe = pe.at[:, 1::2].set(jnp.cos(pos * div))
    params["pos_embed"] = pe

    layer_params = []
    for li in range(layers):
        lk = jax.random.split(keys[2 + li], 10)
        layer_params.append({
            # self-attention: fused [Q|K|V] projection
            "sa_wqkv": jnp.concatenate([_init_w(lk[0], D, D), _init_w(lk[1], D, D),
                                        _init_w(lk[2], D, D)], axis=1),
            "sa_bqkv": jnp.zeros((1, 3 * D), jnp.float32),
            "sa_wo": _init_w(lk[3], D, D),
            "sa_bo": jnp.zeros((1, D), jnp.float32),
            # cross-attention: Q projection + fused [K|V] projection
            "ca_wq": _init_w(lk[4], D, D),
            "ca_bq": jnp.zeros((1, D), jnp.float32),
            "ca_wkv": jnp.concatenate([_init_w(lk[5], D, D), _init_w(lk[6], D, D)], axis=1),
            "ca_bkv": jnp.zeros((1, 2 * D), jnp.float32),
            "ca_wo": _init_w(lk[7], D, D),
            "ca_bo": jnp.zeros((1, D), jnp.float32),
            # position-wise FFN
            "ff_w1": _init_w(lk[8], D, pf_dim),
            "ff_b1": jnp.zeros((1, pf_dim), jnp.float32),
            "ff_w2": _init_w(lk[9], pf_dim, D),
            "ff_b2": jnp.zeros((1, D), jnp.float32),
            # the reference DecoderLayer reuses ONE nn.LayerNorm for all three adds
            "ln_g": jnp.ones((1, D), jnp.float32),
            "ln_b": jnp.zeros((1, D), jnp.float32),
        })
    params["layers"] = layer_params

    # output projection, vocab padded to a lane-dense multiple of 128
    vpad = _round_up(vocab, 128)
    w_out = _init_w(keys[1], D, vocab)
    if vpad != vocab:
        w_out = jnp.pad(w_out, ((0, 0), (0, vpad - vocab)))
    params["w_out"] = w_out
    params["b_out"] = jnp.zeros((1, vpad), jnp.float32)
    return params


# ----------------------------- main -----------------------------

if __name__ == "__main__":
    # small config consistent with Decoder(__init__)
    VOCAB = 128
    PAD_ID = 0
    EMBED_DIM = 128
    LAYERS = 2
    HEADS = 4
    PF_DIM = 256
    MAX_POS = 16

    B = 2
    TRG_LEN = 8
    SRC_LEN = 4
    SRC_QUERY_LEN = 4
    SRC_TOTAL = SRC_LEN + SRC_QUERY_LEN     # encoder_out length matches concat'd src mask

    root = jax.random.PRNGKey(0)
    k_par, k_trg, k_src, k_srcq, k_enc = jax.random.split(root, 5)

    params = init_decoder_params(k_par, VOCAB, EMBED_DIM, LAYERS, HEADS, PF_DIM, MAX_POS)

    trg_tokens = jax.random.randint(k_trg, (B, TRG_LEN), 2, VOCAB, dtype=jnp.int32)
    trg_tokens = trg_tokens.at[1, -1].set(PAD_ID)   # exercise target padding mask
    src_tokens = jax.random.randint(k_src, (B, SRC_LEN), 2, VOCAB, dtype=jnp.int32)
    src_tokens = src_tokens.at[0, -1].set(PAD_ID)   # exercise source padding mask
    src_query_tokens = jax.random.randint(k_srcq, (B, SRC_QUERY_LEN), 2, VOCAB,
                                          dtype=jnp.int32)
    encoder_out = jax.random.normal(k_enc, (B, SRC_TOTAL, EMBED_DIM), jnp.float32)

    fwd = jax.jit(partial(decoder_forward, pad_id=PAD_ID, heads=HEADS))
    logits = fwd(params, trg_tokens, encoder_out, src_tokens, src_query_tokens)
    logits = jax.block_until_ready(logits)

    assert logits.shape == (B, TRG_LEN, VOCAB), logits.shape
    assert bool(jnp.all(jnp.isfinite(logits)))
    print("KERNEL_OK")
</pallas_src>

<mosaic_0001>
module attributes {stable_mosaic.version = 11 : i64} {
  func.func @_out_proj_kernel(%arg0: i32, %arg1: i32, %arg2: i32, %arg3: memref<16x128xbf16, #tpu.memory_space<vmem>>, %arg4: memref<128x128xbf16, #tpu.memory_space<vmem>>, %arg5: memref<1x128xf32, #tpu.memory_space<vmem>>, %arg6: memref<16x128xf32, #tpu.memory_space<vmem>>, %arg7: memref<16x128xf32, #tpu.memory_space<vmem>>) attributes {dimension_semantics = [#tpu.dimension_semantics<parallel>, #tpu.dimension_semantics<parallel>, #tpu.dimension_semantics<arbitrary>], iteration_bounds = array<i64: 1, 1, 1>, scalar_prefetch = 0 : i64, scratch_operands = 1 : i64, tpu.core_type = #tpu.core_type<tc>, window_params = [{transform_indices = @transform_0, window_bounds = array<i64: 16, 128>}, {transform_indices = @transform_1, window_bounds = array<i64: 128, 128>}, {transform_indices = @transform_2, window_bounds = array<i64: 1, 128>}, {transform_indices = @transform_3, window_bounds = array<i64: 16, 128>}]} {
    %c0_i32 = arith.constant 0 : i32
    %0 = arith.cmpi eq, %arg2, %c0_i32 : i32
    %1 = arith.extui %0 : i1 to i32
    %c0_i32_0 = arith.constant 0 : i32
    %2 = arith.cmpi ne, %1, %c0_i32_0 : i32
    scf.if %2 {
      %cst_10 = arith.constant 0.000000e+00 : f32
      %12 = vector.broadcast %cst_10 : f32 to vector<16x128xf32>
      %c0_11 = arith.constant 0 : index
      %c0_12 = arith.constant 0 : index
      %13 = vector.load %arg7[%c0_11, %c0_12] : memref<16x128xf32, #tpu.memory_space<vmem>>, vector<16x128xf32>
      tpu.vector_store %arg7[%c0_11, %c0_12], %12 {strides = array<i32>} : memref<16x128xf32, #tpu.memory_space<vmem>>, vector<16x128xf32>,
    } else {
    }
    %c0 = arith.constant 0 : index
    %c0_1 = arith.constant 0 : index
    %3 = vector.load %arg7[%c0, %c0_1] : memref<16x128xf32, #tpu.memory_space<vmem>>, vector<16x128xf32>
    %c0_2 = arith.constant 0 : index
    %c0_3 = arith.constant 0 : index
    %4 = vector.load %arg3[%c0_2, %c0_3] : memref<16x128xbf16, #tpu.memory_space<vmem>>, vector<16x128xbf16>
    %c0_4 = arith.constant 0 : index
    %c0_5 = arith.constant 0 : index
    %5 = vector.load %arg4[%c0_4, %c0_5] : memref<128x128xbf16, #tpu.memory_space<vmem>>, vector<128x128xbf16>
    %cst = arith.constant dense<0.000000e+00> : vector<16x128xf32>
    %6 = tpu.matmul %4, %5, %cst {dimension_numbers = #tpu.dot_dimension_numbers<[1], [0], [0], [1], [0, 0, 1, 1], [], []>} : vector<16x128xbf16>, vector<128x128xbf16>, vector<16x128xf32> -> vector<16x128xf32>
    %7 = arith.addf %3, %6 : vector<16x128xf32>
    %c0_6 = arith.constant 0 : index
    %c0_7 = arith.constant 0 : index
    %8 = vector.load %arg7[%c0_6, %c0_7] : memref<16x128xf32, #tpu.memory_space<vmem>>, vector<16x128xf32>
    tpu.vector_store %arg7[%c0_6, %c0_7], %7 {strides = array<i32>} : memref<16x128xf32, #tpu.memory_space<vmem>>, vector<16x128xf32>,
    %c0_i32_8 = arith.constant 0 : i32
    %9 = arith.cmpi eq, %arg2, %c0_i32_8 : i32
    %10 = arith.extui %9 : i1 to i32
    %c0_i32_9 = arith.constant 0 : i32
    %11 = arith.cmpi ne, %10, %c0_i32_9 : i32
    scf.if %11 {
      %c0_10 = arith.constant 0 : index
      %c0_11 = arith.constant 0 : index
      %12 = vector.load %arg7[%c0_10, %c0_11] : memref<16x128xf32, #tpu.memory_space<vmem>>, vector<16x128xf32>
      %c0_12 = arith.constant 0 : index
      %c0_13 = arith.constant 0 : index
      %13 = vector.load %arg5[%c0_12, %c0_13] : memref<1x128xf32, #tpu.memory_space<vmem>>, vector<1x128xf32>
      %14 = vector.broadcast %13 : vector<1x128xf32> to vector<16x128xf32>
      %15 = arith.addf %12, %14 : vector<16x128xf32>
      %c0_14 = arith.constant 0 : index
      %c0_15 = arith.constant 0 : index
      %16 = vector.load %arg6[%c0_14, %c0_15] : memref<16x128xf32, #tpu.memory_space<vmem>>, vector<16x128xf32>
      tpu.vector_store %arg6[%c0_14, %c0_15], %15 {strides = array<i32>} : memref<16x128xf32, #tpu.memory_space<vmem>>, vector<16x128xf32>,
    } else {
    }
    return
  }
  func.func @transform_0(%arg0: i32, %arg1: i32, %arg2: i32) -> (i32, i32) {
    %c0_i32 = arith.constant 0 : i32
    return %arg0, %arg2 : i32, i32
  }
  func.func @transform_1(%arg0: i32, %arg1: i32, %arg2: i32) -> (i32, i32) {
    %c0_i32 = arith.constant 0 : i32
    return %arg2, %arg1 : i32, i32
  }
  func.func @transform_2(%arg0: i32, %arg1: i32, %arg2: i32) -> (i32, i32) {
    %c0_i32 = arith.constant 0 : i32
    %c0_i32_0 = arith.constant 0 : i32
    return %c0_i32, %arg1 : i32, i32
  }
  func.func @transform_3(%arg0: i32, %arg1: i32, %arg2: i32) -> (i32, i32) {
    %c0_i32 = arith.constant 0 : i32
    return %arg0, %arg1 : i32, i32
  }
}

module attributes {stable_mosaic.version = 11 : i64} {
  func.func @_decoder_layer_kernel(%arg0: i32, %arg1: memref<2x8x128xbf16, #tpu.memory_space<vmem>>, %arg2: memref<2x8x128xbf16, #tpu.memory_space<vmem>>, %arg3: memref<2x8x1xi32, #tpu.memory_space<vmem>>, %arg4: memref<2x1x8xi32, #tpu.memory_space<vmem>>, %arg5: memref<128x384xbf16, #tpu.memory_space<vmem>>, %arg6: memref<1x384xf32, #tpu.memory_space<vmem>>, %arg7: memref<128x128xbf16, #tpu.memory_space<vmem>>, %arg8: memref<1x128xf32, #tpu.memory_space<vmem>>, %arg9: memref<128x128xbf16, #tpu.memory_space<vmem>>, %arg10: memref<1x128xf32, #tpu.memory_space<vmem>>, %arg11: memref<128x256xbf16, #tpu.memory_space<vmem>>, %arg12: memref<1x256xf32, #tpu.memory_space<vmem>>, %arg13: memref<128x128xbf16, #tpu.memory_space<vmem>>, %arg14: memref<1x128xf32, #tpu.memory_space<vmem>>, %arg15: memref<128x256xbf16, #tpu.memory_space<vmem>>, %arg16: memref<1x256xf32, #tpu.memory_space<vmem>>, %arg17: memref<256x128xbf16, #tpu.memory_space<vmem>>, %arg18: memref<1x128xf32, #tpu.memory_space<vmem>>, %arg19: memref<1x128xf32, #tpu.memory_space<vmem>>, %arg20: memref<1x128xf32, #tpu.memory_space<vmem>>, %arg21: memref<2x8x128xbf16, #tpu.memory_space<vmem>>, %arg22: memref<16x128xf32, #tpu.memory_space<vmem>>) attributes {dimension_semantics = [#tpu.dimension_semantics<parallel>], iteration_bounds = array<i64: 1>, scalar_prefetch = 0 : i64, scratch_operands = 1 : i64, tpu.core_type = #tpu.core_type<tc>, window_params = [{transform_indices = @transform_0, window_bounds = array<i64: 2, 8, 128>}, {transform_indices = @transform_1, window_bounds = array<i64: 2, 8, 128>}, {transform_indices = @transform_2, window_bounds = array<i64: 2, 8, 1>}, {transform_indices = @transform_3, window_bounds = array<i64: 2, 1, 8>}, {pipeline_mode = #tpu.pipeline_mode<synchronous>, transform_indices = @transform_4, window_bounds = array<i64: 128, 384>}, {pipeline_mode = #tpu.pipeline_mode<synchronous>, transform_indices = @transform_5, window_bounds = array<i64: 1, 384>}, {pipeline_mode = #tpu.pipeline_mode<synchronous>, transform_indices = @transform_6, window_bounds = array<i64: 128, 128>}, {pipeline_mode = #tpu.pipeline_mode<synchronous>, transform_indices = @transform_7, window_bounds = array<i64: 1, 128>}, {pipeline_mode = #tpu.pipeline_mode<synchronous>, transform_indices = @transform_8, window_bounds = array<i64: 128, 128>}, {pipeline_mode = #tpu.pipeline_mode<synchronous>, transform_indices = @transform_9, window_bounds = array<i64: 1, 128>}, {pipeline_mode = #tpu.pipeline_mode<synchronous>, transform_indices = @transform_10, window_bounds = array<i64: 128, 256>}, {pipeline_mode = #tpu.pipeline_mode<synchronous>, transform_indices = @transform_11, window_bounds = array<i64: 1, 256>}, {pipeline_mode = #tpu.pipeline_mode<synchronous>, transform_indices = @transform_12, window_bounds = array<i64: 128, 128>}, {pipeline_mode = #tpu.pipeline_mode<synchronous>, transform_indices = @transform_13, window_bounds = array<i64: 1, 128>}, {pipeline_mode = #tpu.pipeline_mode<synchronous>, transform_indices = @transform_14, window_bounds = array<i64: 128, 256>}, {pipeline_mode = #tpu.pipeline_mode<synchronous>, transform_indices = @transform_15, window_bounds = array<i64: 1, 256>}, {pipeline_mode = #tpu.pipeline_mode<synchronous>, transform_indices = @transform_16, window_bounds = array<i64: 256, 128>}, {pipeline_mode = #tpu.pipeline_mode<synchronous>, transform_indices = @transform_17, window_bounds = array<i64: 1, 128>}, {pipeline_mode = #tpu.pipeline_mode<synchronous>, transform_indices = @transform_18, window_bounds = array<i64: 1, 128>}, {pipeline_mode = #tpu.pipeline_mode<synchronous>, transform_indices = @transform_19, window_bounds = array<i64: 1, 128>}, {transform_indices = @transform_20, window_bounds = array<i64: 2, 8, 128>}]} {
    %c0 = arith.constant 0 : index
    %c0_0 = arith.constant 0 : index
    %c0_1 = arith.constant 0 : index
    %0 = vector.load %arg1[%c0, %c0_0, %c0_1] : memref<2x8x128xbf16, #tpu.memory_space<vmem>>, vector<2x8x128xbf16>
    %1 = arith.extf %0 : vector<2x8x128xbf16> to vector<2x8x128xf32>
    %2 = vector.shape_cast %1 : vector<2x8x128xf32> to vector<16x128xf32>
    %c0_2 = arith.constant 0 : index
    %c0_3 = arith.constant 0 : index
    %c0_4 = arith.constant 0 : index
    %3 = vector.load %arg2[%c0_2, %c0_3, %c0_4] : memref<2x8x128xbf16, #tpu.memory_space<vmem>>, vector<2x8x128xbf16>
    %4 = vector.shape_cast %3 : vector<2x8x128xbf16> to vector<16x128xbf16>
    %5 = tpu.iota {dimensions = array<i32: 0>} : vector<8x8xi32>
    %6 = tpu.iota {dimensions = array<i32: 1>} : vector<8x8xi32>
    %7 = arith.cmpi sge, %5, %6 : vector<8x8xi32>
    %c0_5 = arith.constant 0 : index
    %c0_6 = arith.constant 0 : index
    %c0_7 = arith.constant 0 : index
    %8 = vector.load %arg3[%c0_5, %c0_6, %c0_7] : memref<2x8x1xi32, #tpu.memory_space<vmem>>, vector<2x8x1xi32>
    %c0_i32 = arith.constant 0 : i32
    %9 = vector.broadcast %c0_i32 : i32 to vector<2x8x1xi32>
    %10 = arith.cmpi ne, %8, %9 : vector<2x8x1xi32>
    %11 = vector.shape_cast %7 : vector<8x8xi1> to vector<1x8x8xi1>
    %12 = vector.broadcast %10 : vector<2x8x1xi1> to vector<2x8x8xi1>
    %13 = vector.broadcast %11 : vector<1x8x8xi1> to vector<2x8x8xi1>
    %14 = arith.andi %12, %13 : vector<2x8x8xi1>
    %c0_8 = arith.constant 0 : index
    %c0_9 = arith.constant 0 : index
    %c0_10 = arith.constant 0 : index
    %15 = vector.load %arg4[%c0_8, %c0_9, %c0_10] : memref<2x1x8xi32, #tpu.memory_space<vmem>>, vector<2x1x8xi32>
    %c0_i32_11 = arith.constant 0 : i32
    %16 = vector.broadcast %c0_i32_11 : i32 to vector<2x1x8xi32>
    %17 = arith.cmpi ne, %15, %16 : vector<2x1x8xi32>
    %c0_12 = arith.constant 0 : index
    %c0_13 = arith.constant 0 : index
    %18 = vector.load %arg19[%c0_12, %c0_13] : memref<1x128xf32, #tpu.memory_space<vmem>>, vector<1x128xf32>
    %c0_14 = arith.constant 0 : index
    %c0_15 = arith.constant 0 : index
    %19 = vector.load %arg20[%c0_14, %c0_15] : memref<1x128xf32, #tpu.memory_space<vmem>>, vector<1x128xf32>
    %20 = arith.truncf %2 : vector<16x128xf32> to vector<16x128xbf16>
    %c0_16 = arith.constant 0 : index
    %c0_17 = arith.constant 0 : index
    %21 = vector.load %arg5[%c0_16, %c0_17] : memref<128x384xbf16, #tpu.memory_space<vmem>>, vector<128x384xbf16>
    %cst = arith.constant dense<0.000000e+00> : vector<16x384xf32>
    %22 = tpu.matmul %20, %21, %cst {dimension_numbers = #tpu.dot_dimension_numbers<[1], [0], [0], [1], [0, 0, 1, 1], [], []>} : vector<16x128xbf16>, vector<128x384xbf16>, vector<16x384xf32> -> vector<16x384xf32>
    %c0_18 = arith.constant 0 : index
    %c0_19 = arith.constant 0 : index
    %23 = vector.load %arg6[%c0_18, %c0_19] : memref<1x384xf32, #tpu.memory_space<vmem>>, vector<1x384xf32>
    %24 = vector.broadcast %23 : vector<1x384xf32> to vector<16x384xf32>
    %25 = arith.addf %22, %24 : vector<16x384xf32>
    %26 = vector.extract_strided_slice %25 {offsets = [0, 0], sizes = [16, 128], strides = [1, 1]} : vector<16x384xf32> to vector<16x128xf32>
    %27 = vector.extract_strided_slice %25 {offsets = [0, 128], sizes = [16, 128], strides = [1, 1]} : vector<16x384xf32> to vector<16x128xf32>
    %28 = vector.extract_strided_slice %25 {offsets = [0, 256], sizes = [16, 128], strides = [1, 1]} : vector<16x384xf32> to vector<16x128xf32>
    %29 = arith.truncf %26 : vector<16x128xf32> to vector<16x128xbf16>
    %30 = arith.truncf %27 : vector<16x128xf32> to vector<16x128xbf16>
    %31 = arith.truncf %28 : vector<16x128xf32> to vector<16x128xbf16>
    %32 = vector.extract_strided_slice %29 {offsets = [0, 0], sizes = [16, 32], strides = [1, 1]} : vector<16x128xbf16> to vector<16x32xbf16>
    %33 = vector.shape_cast %32 : vector<16x32xbf16> to vector<2x8x32xbf16>
    %34 = vector.extract_strided_slice %30 {offsets = [0, 0], sizes = [16, 32], strides = [1, 1]} : vector<16x128xbf16> to vector<16x32xbf16>
    %35 = vector.shape_cast %34 : vector<16x32xbf16> to vector<2x8x32xbf16>
    %36 = vector.extract_strided_slice %31 {offsets = [0, 0], sizes = [16, 32], strides = [1, 1]} : vector<16x128xbf16> to vector<16x32xbf16>
    %37 = vector.shape_cast %36 : vector<16x32xbf16> to vector<2x8x32xbf16>
    "tpu.trace_start"() <{level = 10 : i32, message = "bqd,bkd->bqk"}> : () -> ()
    %cst_20 = arith.constant dense<0.000000e+00> : vector<2x8x8xf32>
    %38 = tpu.matmul %33, %35, %cst_20 {dimension_numbers = #tpu.dot_dimension_numbers<[2], [2], [1], [1], [0, 0, 0, 1, 1, 1], [0], [0]>} : vector<2x8x32xbf16>, vector<2x8x32xbf16>, vector<2x8x8xf32> -> vector<2x8x8xf32>
    "tpu.trace_stop"() : () -> ()
    %cst_21 = arith.constant 0.176776692 : f32
    %39 = vector.broadcast %cst_21 : f32 to vector<2x8x8xf32>
    %40 = arith.mulf %38, %39 : vector<2x8x8xf32>
    %cst_22 = arith.constant -1.000000e+10 : f32
    %41 = vector.broadcast %cst_22 : f32 to vector<2x8x8xf32>
    %42 = arith.select %14, %40, %41 : vector<2x8x8xi1>, vector<2x8x8xf32>
    %cst_23 = arith.constant dense<0xFF800000> : vector<2x8xf32>
    %43 = vector.multi_reduction <maximumf>, %42, %cst_23 [2] : vector<2x8x8xf32> to vector<2x8xf32>
    %44 = vector.shape_cast %43 : vector<2x8xf32> to vector<2x8x1xf32>
    %45 = vector.broadcast %44 : vector<2x8x1xf32> to vector<2x8x8xf32>
    %46 = arith.subf %42, %45 : vector<2x8x8xf32>
    %47 = math.exp %46 : vector<2x8x8xf32>
    %cst_24 = arith.constant dense<0.000000e+00> : vector<2x8xf32>
    %48 = vector.multi_reduction <add>, %47, %cst_24 [2] : vector<2x8x8xf32> to vector<2x8xf32>
    %49 = vector.shape_cast %48 : vector<2x8xf32> to vector<2x8x1xf32>
    %50 = vector.broadcast %49 : vector<2x8x1xf32> to vector<2x8x8xf32>
    %51 = arith.divf %47, %50 : vector<2x8x8xf32>
    %52 = arith.truncf %51 : vector<2x8x8xf32> to vector<2x8x8xbf16>
    "tpu.trace_start"() <{level = 10 : i32, message = "bqk,bkd->bqd"}> : () -> ()
    %cst_25 = arith.constant dense<0.000000e+00> : vector<2x8x32xf32>
    %53 = tpu.matmul %52, %37, %cst_25 {dimension_numbers = #tpu.dot_dimension_numbers<[2], [1], [1], [2], [0, 0, 0, 1, 1, 2], [0], [0]>} : vector<2x8x8xbf16>, vector<2x8x32xbf16>, vector<2x8x32xf32> -> vector<2x8x32xf32>
    "tpu.trace_stop"() : () -> ()
    %54 = vector.shape_cast %53 : vector<2x8x32xf32> to vector<16x32xf32>
    %c0_26 = arith.constant 0 : index
    %c0_27 = arith.constant 0 : index
    %55 = vector.load %arg22[%c0_26, %c0_27] : memref<16x128xf32, #tpu.memory_space<vmem>>, vector<16x32xf32>
    tpu.vector_store %arg22[%c0_26, %c0_27], %54 {strides = array<i32>} : memref<16x128xf32, #tpu.memory_space<vmem>>, vector<16x32xf32>,
    %56 = vector.extract_strided_slice %29 {offsets = [0, 32], sizes = [16, 32], strides = [1, 1]} : vector<16x128xbf16> to vector<16x32xbf16>
    %57 = vector.shape_cast %56 : vector<16x32xbf16> to vector<2x8x32xbf16>
    %58 = vector.extract_strided_slice %30 {offsets = [0, 32], sizes = [16, 32], strides = [1, 1]} : vector<16x128xbf16> to vector<16x32xbf16>
    %59 = vector.shape_cast %58 : vector<16x32xbf16> to vector<2x8x32xbf16>
    %60 = vector.extract_strided_slice %31 {offsets = [0, 32], sizes = [16, 32], strides = [1, 1]} : vector<16x128xbf16> to vector<16x32xbf16>
    %61 = vector.shape_cast %60 : vector<16x32xbf16> to vector<2x8x32xbf16>
    "tpu.trace_start"() <{level = 10 : i32, message = "bqd,bkd->bqk"}> : () -> ()
    %cst_28 = arith.constant dense<0.000000e+00> : vector<2x8x8xf32>
    %62 = tpu.matmul %57, %59, %cst_28 {dimension_numbers = #tpu.dot_dimension_numbers<[2], [2], [1], [1], [0, 0, 0, 1, 1, 1], [0], [0]>} : vector<2x8x32xbf16>, vector<2x8x32xbf16>, vector<2x8x8xf32> -> vector<2x8x8xf32>
    "tpu.trace_stop"() : () -> ()
    %cst_29 = arith.constant 0.176776692 : f32
    %63 = vector.broadcast %cst_29 : f32 to vector<2x8x8xf32>
    %64 = arith.mulf %62, %63 : vector<2x8x8xf32>
    %cst_30 = arith.constant -1.000000e+10 : f32
    %65 = vector.broadcast %cst_30 : f32 to vector<2x8x8xf32>
    %66 = arith.select %14, %64, %65 : vector<2x8x8xi1>, vector<2x8x8xf32>
    %cst_31 = arith.constant dense<0xFF800000> : vector<2x8xf32>
    %67 = vector.multi_reduction <maximumf>, %66, %cst_31 [2] : vector<2x8x8xf32> to vector<2x8xf32>
    %68 = vector.shape_cast %67 : vector<2x8xf32> to vector<2x8x1xf32>
    %69 = vector.broadcast %68 : vector<2x8x1xf32> to vector<2x8x8xf32>
    %70 = arith.subf %66, %69 : vector<2x8x8xf32>
    %71 = math.exp %70 : vector<2x8x8xf32>
    %cst_32 = arith.constant dense<0.000000e+00> : vector<2x8xf32>
    %72 = vector.multi_reduction <add>, %71, %cst_32 [2] : vector<2x8x8xf32> to vector<2x8xf32>
    %73 = vector.shape_cast %72 : vector<2x8xf32> to vector<2x8x1xf32>
    %74 = vector.broadcast %73 : vector<2x8x1xf32> to vector<2x8x8xf32>
    %75 = arith.divf %71, %74 : vector<2x8x8xf32>
    %76 = arith.truncf %75 : vector<2x8x8xf32> to vector<2x8x8xbf16>
    "tpu.trace_start"() <{level = 10 : i32, message = "bqk,bkd->bqd"}> : () -> ()
    %cst_33 = arith.constant dense<0.000000e+00> : vector<2x8x32xf32>
    %77 = tpu.matmul %76, %61, %cst_33 {dimension_numbers = #tpu.dot_dimension_numbers<[2], [1], [1], [2], [0, 0, 0, 1, 1, 2], [0], [0]>} : vector<2x8x8xbf16>, vector<2x8x32xbf16>, vector<2x8x32xf32> -> vector<2x8x32xf32>
    "tpu.trace_stop"() : () -> ()
    %78 = vector.shape_cast %77 : vector<2x8x32xf32> to vector<16x32xf32>
    %c0_34 = arith.constant 0 : index
    %c32 = arith.constant 32 : index
    %79 = vector.load %arg22[%c0_34, %c32] : memref<16x128xf32, #tpu.memory_space<vmem>>, vector<16x32xf32>
    tpu.vector_store %arg22[%c0_34, %c32], %78 {strides = array<i32>} : memref<16x128xf32, #tpu.memory_space<vmem>>, vector<16x32xf32>,
    %80 = vector.extract_strided_slice %29 {offsets = [0, 64], sizes = [16, 32], strides = [1, 1]} : vector<16x128xbf16> to vector<16x32xbf16>
    %81 = vector.shape_cast %80 : vector<16x32xbf16> to vector<2x8x32xbf16>
    %82 = vector.extract_strided_slice %30 {offsets = [0, 64], sizes = [16, 32], strides = [1, 1]} : vector<16x128xbf16> to vector<16x32xbf16>
    %83 = vector.shape_cast %82 : vector<16x32xbf16> to vector<2x8x32xbf16>
    %84 = vector.extract_strided_slice %31 {offsets = [0, 64], sizes = [16, 32], strides = [1, 1]} : vector<16x128xbf16> to vector<16x32xbf16>
    %85 = vector.shape_cast %84 : vector<16x32xbf16> to vector<2x8x32xbf16>
    "tpu.trace_start"() <{level = 10 : i32, message = "bqd,bkd->bqk"}> : () -> ()
    %cst_35 = arith.constant dense<0.000000e+00> : vector<2x8x8xf32>
    %86 = tpu.matmul %81, %83, %cst_35 {dimension_numbers = #tpu.dot_dimension_numbers<[2], [2], [1], [1], [0, 0, 0, 1, 1, 1], [0], [0]>} : vector<2x8x32xbf16>, vector<2x8x32xbf16>, vector<2x8x8xf32> -> vector<2x8x8xf32>
    "tpu.trace_stop"() : () -> ()
    %cst_36 = arith.constant 0.176776692 : f32
    %87 = vector.broadcast %cst_36 : f32 to vector<2x8x8xf32>
    %88 = arith.mulf %86, %87 : vector<2x8x8xf32>
    %cst_37 = arith.constant -1.000000e+10 : f32
    %89 = vector.broadcast %cst_37 : f32 to vector<2x8x8xf32>
    %90 = arith.select %14, %88, %89 : vector<2x8x8xi1>, vector<2x8x8xf32>
    %cst_38 = arith.constant dense<0xFF800000> : vector<2x8xf32>
    %91 = vector.multi_reduction <maximumf>, %90, %cst_38 [2] : vector<2x8x8xf32> to vector<2x8xf32>
    %92 = vector.shape_cast %91 : vector<2x8xf32> to vector<2x8x1xf32>
    %93 = vector.broadcast %92 : vector<2x8x1xf32> to vector<2x8x8xf32>
    %94 = arith.subf %90, %93 : vector<2x8x8xf32>
    %95 = math.exp %94 : vector<2x8x8xf32>
    %cst_39 = arith.constant dense<0.000000e+00> : vector<2x8xf32>
    %96 = vector.multi_reduction <add>, %95, %cst_39 [2] : vector<2x8x8xf32> to vector<2x8xf32>
    %97 = vector.shape_cast %96 : vector<2x8xf32> to vector<2x8x1xf32>
    %98 = vector.broadcast %97 : vector<2x8x1xf32> to vector<2x8x8xf32>
    %99 = arith.divf %95, %98 : vector<2x8x8xf32>
    %100 = arith.truncf %99 : vector<2x8x8xf32> to vector<2x8x8xbf16>
    "tpu.trace_start"() <{level = 10 : i32, message = "bqk,bkd->bqd"}> : () -> ()
    %cst_40 = arith.constant dense<0.000000e+00> : vector<2x8x32xf32>
    %101 = tpu.matmul %100, %85, %cst_40 {dimension_numbers = #tpu.dot_dimension_numbers<[2], [1], [1], [2], [0, 0, 0, 1, 1, 2], [0], [0]>} : vector<2x8x8xbf16>, vector<2x8x32xbf16>, vector<2x8x32xf32> -> vector<2x8x32xf32>
    "tpu.trace_stop"() : () -> ()
    %102 = vector.shape_cast %101 : vector<2x8x32xf32> to vector<16x32xf32>
    %c0_41 = arith.constant 0 : index
    %c64 = arith.constant 64 : index
    %103 = vector.load %arg22[%c0_41, %c64] : memref<16x128xf32, #tpu.memory_space<vmem>>, vector<16x32xf32>
    tpu.vector_store %arg22[%c0_41, %c64], %102 {strides = array<i32>} : memref<16x128xf32, #tpu.memory_space<vmem>>, vector<16x32xf32>,
    %104 = vector.extract_strided_slice %29 {offsets = [0, 96], sizes = [16, 32], strides = [1, 1]} : vector<16x128xbf16> to vector<16x32xbf16>
    %105 = vector.shape_cast %104 : vector<16x32xbf16> to vector<2x8x32xbf16>
    %106 = vector.extract_strided_slice %30 {offsets = [0, 96], sizes = [16, 32], strides = [1, 1]} : vector<16x128xbf16> to vector<16x32xbf16>
    %107 = vector.shape_cast %106 : vector<16x32xbf16> to vector<2x8x32xbf16>
    %108 = vector.extract_strided_slice %31 {offsets = [0, 96], sizes = [16, 32], strides = [1, 1]} : vector<16x128xbf16> to vector<16x32xbf16>
    %109 = vector.shape_cast %108 : vector<16x32xbf16> to vector<2x8x32xbf16>
    "tpu.trace_start"() <{level = 10 : i32, message = "bqd,bkd->bqk"}> : () -> ()
    %cst_42 = arith.constant dense<0.000000e+00> : vector<2x8x8xf32>
    %110 = tpu.matmul %105, %107, %cst_42 {dimension_numbers = #tpu.dot_dimension_numbers<[2], [2], [1], [1], [0, 0, 0, 1, 1, 1], [0], [0]>} : vector<2x8x32xbf16>, vector<2x8x32xbf16>, vector<2x8x8xf32> -> vector<2x8x8xf32>
    "tpu.trace_stop"() : () -> ()
    %cst_43 = arith.constant 0.176776692 : f32
    %111 = vector.broadcast %cst_43 : f32 to vector<2x8x8xf32>
    %112 = arith.mulf %110, %111 : vector<2x8x8xf32>
    %cst_44 = arith.constant -1.000000e+10 : f32
    %113 = vector.broadcast %cst_44 : f32 to vector<2x8x8xf32>
    %114 = arith.select %14, %112, %113 : vector<2x8x8xi1>, vector<2x8x8xf32>
    %cst_45 = arith.constant dense<0xFF800000> : vector<2x8xf32>
    %115 = vector.multi_reduction <maximumf>, %114, %cst_45 [2] : vector<2x8x8xf32> to vector<2x8xf32>
    %116 = vector.shape_cast %115 : vector<2x8xf32> to vector<2x8x1xf32>
    %117 = vector.broadcast %116 : vector<2x8x1xf32> to vector<2x8x8xf32>
    %118 = arith.subf %114, %117 : vector<2x8x8xf32>
    %119 = math.exp %118 : vector<2x8x8xf32>
    %cst_46 = arith.constant dense<0.000000e+00> : vector<2x8xf32>
    %120 = vector.multi_reduction <add>, %119, %cst_46 [2] : vector<2x8x8xf32> to vector<2x8xf32>
    %121 = vector.shape_cast %120 : vector<2x8xf32> to vector<2x8x1xf32>
    %122 = vector.broadcast %121 : vector<2x8x1xf32> to vector<2x8x8xf32>
    %123 = arith.divf %119, %122 : vector<2x8x8xf32>
    %124 = arith.truncf %123 : vector<2x8x8xf32> to vector<2x8x8xbf16>
    "tpu.trace_start"() <{level = 10 : i32, message = "bqk,bkd->bqd"}> : () -> ()
    %cst_47 = arith.constant dense<0.000000e+00> : vector<2x8x32xf32>
    %125 = tpu.matmul %124, %109, %cst_47 {dimension_numbers = #tpu.dot_dimension_numbers<[2], [1], [1], [2], [0, 0, 0, 1, 1, 2], [0], [0]>} : vector<2x8x8xbf16>, vector<2x8x32xbf16>, vector<2x8x32xf32> -> vector<2x8x32xf32>
    "tpu.trace_stop"() : () -> ()
    %126 = vector.shape_cast %125 : vector<2x8x32xf32> to vector<16x32xf32>
    %c0_48 = arith.constant 0 : index
    %c96 = arith.constant 96 : index
    %127 = vector.load %arg22[%c0_48, %c96] : memref<16x128xf32, #tpu.memory_space<vmem>>, vector<16x32xf32>
    tpu.vector_store %arg22[%c0_48, %c96], %126 {strides = array<i32>} : memref<16x128xf32, #tpu.memory_space<vmem>>, vector<16x32xf32>,
    %c0_49 = arith.constant 0 : index
    %c0_50 = arith.constant 0 : index
    %128 = vector.load %arg22[%c0_49, %c0_50] : memref<16x128xf32, #tpu.memory_space<vmem>>, vector<16x128xf32>
    %129 = arith.truncf %128 : vector<16x128xf32> to vector<16x128xbf16>
    %c0_51 = arith.constant 0 : index
    %c0_52 = arith.constant 0 : index
    %130 = vector.load %arg7[%c0_51, %c0_52] : memref<128x128xbf16, #tpu.memory_space<vmem>>, vector<128x128xbf16>
    %cst_53 = arith.constant dense<0.000000e+00> : vector<16x128xf32>
    %131 = tpu.matmul %129, %130, %cst_53 {dimension_numbers = #tpu.dot_dimension_numbers<[1], [0], [0], [1], [0, 0, 1, 1], [], []>} : vector<16x128xbf16>, vector<128x128xbf16>, vector<16x128xf32> -> vector<16x128xf32>
    %c0_54 = arith.constant 0 : index
    %c0_55 = arith.constant 0 : index
    %132 = vector.load %arg8[%c0_54, %c0_55] : memref<1x128xf32, #tpu.memory_space<vmem>>, vector<1x128xf32>
    %133 = vector.broadcast %132 : vector<1x128xf32> to vector<16x128xf32>
    %134 = arith.addf %131, %133 : vector<16x128xf32>
    %135 = arith.addf %2, %134 : vector<16x128xf32>
    %cst_56 = arith.constant dense<0.000000e+00> : vector<16xf32>
    %136 = vector.multi_reduction <add>, %135, %cst_56 [1] : vector<16x128xf32> to vector<16xf32>
    %137 = vector.shape_cast %136 : vector<16xf32> to vector<16x1xf32>
    %cst_57 = arith.constant 1.280000e+02 : f32
    %138 = vector.broadcast %cst_57 : f32 to vector<16x1xf32>
    %139 = arith.divf %137, %138 : vector<16x1xf32>
    %140 = vector.broadcast %139 : vector<16x1xf32> to vector<16x128xf32>
    %141 = arith.subf %135, %140 : vector<16x128xf32>
    %142 = arith.mulf %141, %141 : vector<16x128xf32>
    %cst_58 = arith.constant dense<0.000000e+00> : vector<16xf32>
    %143 = vector.multi_reduction <add>, %142, %cst_58 [1] : vector<16x128xf32> to vector<16xf32>
    %144 = vector.shape_cast %143 : vector<16xf32> to vector<16x1xf32>
    %cst_59 = arith.constant 1.280000e+02 : f32
    %145 = vector.broadcast %cst_59 : f32 to vector<16x1xf32>
    %146 = arith.divf %144, %145 : vector<16x1xf32>
    %147 = vector.broadcast %139 : vector<16x1xf32> to vector<16x128xf32>
    %148 = arith.subf %135, %147 : vector<16x128xf32>
    %cst_60 = arith.constant 9.99999974E-6 : f32
    %149 = vector.broadcast %cst_60 : f32 to vector<16x1xf32>
    %150 = arith.addf %146, %149 : vector<16x1xf32>
    %151 = math.rsqrt %150 : vector<16x1xf32>
    %152 = vector.broadcast %151 : vector<16x1xf32> to vector<16x128xf32>
    %153 = arith.mulf %148, %152 : vector<16x128xf32>
    %154 = vector.broadcast %18 : vector<1x128xf32> to vector<16x128xf32>
    %155 = arith.mulf %153, %154 : vector<16x128xf32>
    %156 = vector.broadcast %19 : vector<1x128xf32> to vector<16x128xf32>
    %157 = arith.addf %155, %156 : vector<16x128xf32>
    %158 = arith.truncf %157 : vector<16x128xf32> to vector<16x128xbf16>
    %c0_61 = arith.constant 0 : index
    %c0_62 = arith.constant 0 : index
    %159 = vector.load %arg9[%c0_61, %c0_62] : memref<128x128xbf16, #tpu.memory_space<vmem>>, vector<128x128xbf16>
    %cst_63 = arith.constant dense<0.000000e+00> : vector<16x128xf32>
    %160 = tpu.matmul %158, %159, %cst_63 {dimension_numbers = #tpu.dot_dimension_numbers<[1], [0], [0], [1], [0, 0, 1, 1], [], []>} : vector<16x128xbf16>, vector<128x128xbf16>, vector<16x128xf32> -> vector<16x128xf32>
    %c0_64 = arith.constant 0 : index
    %c0_65 = arith.constant 0 : index
    %161 = vector.load %arg10[%c0_64, %c0_65] : memref<1x128xf32, #tpu.memory_space<vmem>>, vector<1x128xf32>
    %162 = vector.broadcast %161 : vector<1x128xf32> to vector<16x128xf32>
    %163 = arith.addf %160, %162 : vector<16x128xf32>
    %c0_66 = arith.constant 0 : index
    %c0_67 = arith.constant 0 : index
    %164 = vector.load %arg11[%c0_66, %c0_67] : memref<128x256xbf16, #tpu.memory_space<vmem>>, vector<128x256xbf16>
    %cst_68 = arith.constant dense<0.000000e+00> : vector<16x256xf32>
    %165 = tpu.matmul %4, %164, %cst_68 {dimension_numbers = #tpu.dot_dimension_numbers<[1], [0], [0], [1], [0, 0, 1, 1], [], []>} : vector<16x128xbf16>, vector<128x256xbf16>, vector<16x256xf32> -> vector<16x256xf32>
    %c0_69 = arith.constant 0 : index
    %c0_70 = arith.constant 0 : index
    %166 = vector.load %arg12[%c0_69, %c0_70] : memref<1x256xf32, #tpu.memory_space<vmem>>, vector<1x256xf32>
    %167 = vector.broadcast %166 : vector<1x256xf32> to vector<16x256xf32>
    %168 = arith.addf %165, %167 : vector<16x256xf32>
    %169 = vector.extract_strided_slice %168 {offsets = [0, 0], sizes = [16, 128], strides = [1, 1]} : vector<16x256xf32> to vector<16x128xf32>
    %170 = vector.extract_strided_slice %168 {offsets = [0, 128], sizes = [16, 128], strides = [1, 1]} : vector<16x256xf32> to vector<16x128xf32>
    %171 = arith.truncf %163 : vector<16x128xf32> to vector<16x128xbf16>
    %172 = arith.truncf %169 : vector<16x128xf32> to vector<16x128xbf16>
    %173 = arith.truncf %170 : vector<16x128xf32> to vector<16x128xbf16>
    %174 = vector.extract_strided_slice %171 {offsets = [0, 0], sizes = [16, 32], strides = [1, 1]} : vector<16x128xbf16> to vector<16x32xbf16>
    %175 = vector.shape_cast %174 : vector<16x32xbf16> to vector<2x8x32xbf16>
    %176 = vector.extract_strided_slice %172 {offsets = [0, 0], sizes = [16, 32], strides = [1, 1]} : vector<16x128xbf16> to vector<16x32xbf16>
    %177 = vector.shape_cast %176 : vector<16x32xbf16> to vector<2x8x32xbf16>
    %178 = vector.extract_strided_slice %173 {offsets = [0, 0], sizes = [16, 32], strides = [1, 1]} : vector<16x128xbf16> to vector<16x32xbf16>
    %179 = vector.shape_cast %178 : vector<16x32xbf16> to vector<2x8x32xbf16>
    "tpu.trace_start"() <{level = 10 : i32, message = "bqd,bkd->bqk"}> : () -> ()
    %cst_71 = arith.constant dense<0.000000e+00> : vector<2x8x8xf32>
    %180 = tpu.matmul %175, %177, %cst_71 {dimension_numbers = #tpu.dot_dimension_numbers<[2], [2], [1], [1], [0, 0, 0, 1, 1, 1], [0], [0]>} : vector<2x8x32xbf16>, vector<2x8x32xbf16>, vector<2x8x8xf32> -> vector<2x8x8xf32>
    "tpu.trace_stop"() : () -> ()
    %cst_72 = arith.constant 0.176776692 : f32
    %181 = vector.broadcast %cst_72 : f32 to vector<2x8x8xf32>
    %182 = arith.mulf %180, %181 : vector<2x8x8xf32>
    %cst_73 = arith.constant -1.000000e+10 : f32
    %183 = vector.shape_cast %17 : vector<2x1x8xi1> to vector<2x1x8xi1>
    %184 = vector.broadcast %183 : vector<2x1x8xi1> to vector<2x8x8xi1>
    %185 = vector.broadcast %cst_73 : f32 to vector<2x8x8xf32>
    %186 = arith.select %184, %182, %185 : vector<2x8x8xi1>, vector<2x8x8xf32>
    %cst_74 = arith.constant dense<0xFF800000> : vector<2x8xf32>
    %187 = vector.multi_reduction <maximumf>, %186, %cst_74 [2] : vector<2x8x8xf32> to vector<2x8xf32>
    %188 = vector.shape_cast %187 : vector<2x8xf32> to vector<2x8x1xf32>
    %189 = vector.broadcast %188 : vector<2x8x1xf32> to vector<2x8x8xf32>
    %190 = arith.subf %186, %189 : vector<2x8x8xf32>
    %191 = math.exp %190 : vector<2x8x8xf32>
    %cst_75 = arith.constant dense<0.000000e+00> : vector<2x8xf32>
    %192 = vector.multi_reduction <add>, %191, %cst_75 [2] : vector<2x8x8xf32> to vector<2x8xf32>
    %193 = vector.shape_cast %192 : vector<2x8xf32> to vector<2x8x1xf32>
    %194 = vector.broadcast %193 : vector<2x8x1xf32> to vector<2x8x8xf32>
    %195 = arith.divf %191, %194 : vector<2x8x8xf32>
    %196 = arith.truncf %195 : vector<2x8x8xf32> to vector<2x8x8xbf16>
    "tpu.trace_start"() <{level = 10 : i32, message = "bqk,bkd->bqd"}> : () -> ()
    %cst_76 = arith.constant dense<0.000000e+00> : vector<2x8x32xf32>
    %197 = tpu.matmul %196, %179, %cst_76 {dimension_numbers = #tpu.dot_dimension_numbers<[2], [1], [1], [2], [0, 0, 0, 1, 1, 2], [0], [0]>} : vector<2x8x8xbf16>, vector<2x8x32xbf16>, vector<2x8x32xf32> -> vector<2x8x32xf32>
    "tpu.trace_stop"() : () -> ()
    %198 = vector.shape_cast %197 : vector<2x8x32xf32> to vector<16x32xf32>
    %c0_77 = arith.constant 0 : index
    %c0_78 = arith.constant 0 : index
    %199 = vector.load %arg22[%c0_77, %c0_78] : memref<16x128xf32, #tpu.memory_space<vmem>>, vector<16x32xf32>
    tpu.vector_store %arg22[%c0_77, %c0_78], %198 {strides = array<i32>} : memref<16x128xf32, #tpu.memory_space<vmem>>, vector<16x32xf32>,
    %200 = vector.extract_strided_slice %171 {offsets = [0, 32], sizes = [16, 32], strides = [1, 1]} : vector<16x128xbf16> to vector<16x32xbf16>
    %201 = vector.shape_cast %200 : vector<16x32xbf16> to vector<2x8x32xbf16>
    %202 = vector.extract_strided_slice %172 {offsets = [0, 32], sizes = [16, 32], strides = [1, 1]} : vector<16x128xbf16> to vector<16x32xbf16>
    %203 = vector.shape_cast %202 : vector<16x32xbf16> to vector<2x8x32xbf16>
    %204 = vector.extract_strided_slice %173 {offsets = [0, 32], sizes = [16, 32], strides = [1, 1]} : vector<16x128xbf16> to vector<16x32xbf16>
    %205 = vector.shape_cast %204 : vector<16x32xbf16> to vector<2x8x32xbf16>
    "tpu.trace_start"() <{level = 10 : i32, message = "bqd,bkd->bqk"}> : () -> ()
    %cst_79 = arith.constant dense<0.000000e+00> : vector<2x8x8xf32>
    %206 = tpu.matmul %201, %203, %cst_79 {dimension_numbers = #tpu.dot_dimension_numbers<[2], [2], [1], [1], [0, 0, 0, 1, 1, 1], [0], [0]>} : vector<2x8x32xbf16>, vector<2x8x32xbf16>, vector<2x8x8xf32> -> vector<2x8x8xf32>
    "tpu.trace_stop"() : () -> ()
    %cst_80 = arith.constant 0.176776692 : f32
    %207 = vector.broadcast %cst_80 : f32 to vector<2x8x8xf32>
    %208 = arith.mulf %206, %207 : vector<2x8x8xf32>
    %cst_81 = arith.constant -1.000000e+10 : f32
    %209 = vector.shape_cast %17 : vector<2x1x8xi1> to vector<2x1x8xi1>
    %210 = vector.broadcast %209 : vector<2x1x8xi1> to vector<2x8x8xi1>
    %211 = vector.broadcast %cst_81 : f32 to vector<2x8x8xf32>
    %212 = arith.select %210, %208, %211 : vector<2x8x8xi1>, vector<2x8x8xf32>
    %cst_82 = arith.constant dense<0xFF800000> : vector<2x8xf32>
    %213 = vector.multi_reduction <maximumf>, %212, %cst_82 [2] : vector<2x8x8xf32> to vector<2x8xf32>
    %214 = vector.shape_cast %213 : vector<2x8xf32> to vector<2x8x1xf32>
    %215 = vector.broadcast %214 : vector<2x8x1xf32> to vector<2x8x8xf32>
    %216 = arith.subf %212, %215 : vector<2x8x8xf32>
    %217 = math.exp %216 : vector<2x8x8xf32>
    %cst_83 = arith.constant dense<0.000000e+00> : vector<2x8xf32>
    %218 = vector.multi_reduction <add>, %217, %cst_83 [2] : vector<2x8x8xf32> to vector<2x8xf32>
    %219 = vector.shape_cast %218 : vector<2x8xf32> to vector<2x8x1xf32>
    %220 = vector.broadcast %219 : vector<2x8x1xf32> to vector<2x8x8xf32>
    %221 = arith.divf %217, %220 : vector<2x8x8xf32>
    %222 = arith.truncf %221 : vector<2x8x8xf32> to vector<2x8x8xbf16>
    "tpu.trace_start"() <{level = 10 : i32, message = "bqk,bkd->bqd"}> : () -> ()
    %cst_84 = arith.constant dense<0.000000e+00> : vector<2x8x32xf32>
    %223 = tpu.matmul %222, %205, %cst_84 {dimension_numbers = #tpu.dot_dimension_numbers<[2], [1], [1], [2], [0, 0, 0, 1, 1, 2], [0], [0]>} : vector<2x8x8xbf16>, vector<2x8x32xbf16>, vector<2x8x32xf32> -> vector<2x8x32xf32>
    "tpu.trace_stop"() : () -> ()
    %224 = vector.shape_cast %223 : vector<2x8x32xf32> to vector<16x32xf32>
    %c0_85 = arith.constant 0 : index
    %c32_86 = arith.constant 32 : index
    %225 = vector.load %arg22[%c0_85, %c32_86] : memref<16x128xf32, #tpu.memory_space<vmem>>, vector<16x32xf32>
    tpu.vector_store %arg22[%c0_85, %c32_86], %224 {strides = array<i32>} : memref<16x128xf32, #tpu.memory_space<vmem>>, vector<16x32xf32>,
    %226 = vector.extract_strided_slice %171 {offsets = [0, 64], sizes = [16, 32], strides = [1, 1]} : vector<16x128xbf16> to vector<16x32xbf16>
    %227 = vector.shape_cast %226 : vector<16x32xbf16> to vector<2x8x32xbf16>
    %228 = vector.extract_strided_slice %172 {offsets = [0, 64], sizes = [16, 32], strides = [1, 1]} : vector<16x128xbf16> to vector<16x32xbf16>
    %229 = vector.shape_cast %228 : vector<16x32xbf16> to vector<2x8x32xbf16>
    %230 = vector.extract_strided_slice %173 {offsets = [0, 64], sizes = [16, 32], strides = [1, 1]} : vector<16x128xbf16> to vector<16x32xbf16>
    %231 = vector.shape_cast %230 : vector<16x32xbf16> to vector<2x8x32xbf16>
    "tpu.trace_start"() <{level = 10 : i32, message = "bqd,bkd->bqk"}> : () -> ()
    %cst_87 = arith.constant dense<0.000000e+00> : vector<2x8x8xf32>
    %232 = tpu.matmul %227, %229, %cst_87 {dimension_numbers = #tpu.dot_dimension_numbers<[2], [2], [1], [1], [0, 0, 0, 1, 1, 1], [0], [0]>} : vector<2x8x32xbf16>, vector<2x8x32xbf16>, vector<2x8x8xf32> -> vector<2x8x8xf32>
    "tpu.trace_stop"() : () -> ()
    %cst_88 = arith.constant 0.176776692 : f32
    %233 = vector.broadcast %cst_88 : f32 to vector<2x8x8xf32>
    %234 = arith.mulf %232, %233 : vector<2x8x8xf32>
    %cst_89 = arith.constant -1.000000e+10 : f32
    %235 = vector.shape_cast %17 : vector<2x1x8xi1> to vector<2x1x8xi1>
    %236 = vector.broadcast %235 : vector<2x1x8xi1> to vector<2x8x8xi1>
    %237 = vector.broadcast %cst_89 : f32 to vector<2x8x8xf32>
    %238 = arith.select %236, %234, %237 : vector<2x8x8xi1>, vector<2x8x8xf32>
    %cst_90 = arith.constant dense<0xFF800000> : vector<2x8xf32>
    %239 = vector.multi_reduction <maximumf>, %238, %cst_90 [2] : vector<2x8x8xf32> to vector<2x8xf32>
    %240 = vector.shape_cast %239 : vector<2x8xf32> to vector<2x8x1xf32>
    %241 = vector.broadcast %240 : vector<2x8x1xf32> to vector<2x8x8xf32>
    %242 = arith.subf %238, %241 : vector<2x8x8xf32>
    %243 = math.exp %242 : vector<2x8x8xf32>
    %cst_91 = arith.constant dense<0.000000e+00> : vector<2x8xf32>
    %244 = vector.multi_reduction <add>, %243, %cst_91 [2] : vector<2x8x8xf32> to vector<2x8xf32>
    %245 = vector.shape_cast %244 : vector<2x8xf32> to vector<2x8x1xf32>
    %246 = vector.broadcast %245 : vector<2x8x1xf32> to vector<2x8x8xf32>
    %247 = arith.divf %243, %246 : vector<2x8x8xf32>
    %248 = arith.truncf %247 : vector<2x8x8xf32> to vector<2x8x8xbf16>
    "tpu.trace_start"() <{level = 10 : i32, message = "bqk,bkd->bqd"}> : () -> ()
    %cst_92 = arith.constant dense<0.000000e+00> : vector<2x8x32xf32>
    %249 = tpu.matmul %248, %231, %cst_92 {dimension_numbers = #tpu.dot_dimension_numbers<[2], [1], [1], [2], [0, 0, 0, 1, 1, 2], [0], [0]>} : vector<2x8x8xbf16>, vector<2x8x32xbf16>, vector<2x8x32xf32> -> vector<2x8x32xf32>
    "tpu.trace_stop"() : () -> ()
    %250 = vector.shape_cast %249 : vector<2x8x32xf32> to vector<16x32xf32>
    %c0_93 = arith.constant 0 : index
    %c64_94 = arith.constant 64 : index
    %251 = vector.load %arg22[%c0_93, %c64_94] : memref<16x128xf32, #tpu.memory_space<vmem>>, vector<16x32xf32>
    tpu.vector_store %arg22[%c0_93, %c64_94], %250 {strides = array<i32>} : memref<16x128xf32, #tpu.memory_space<vmem>>, vector<16x32xf32>,
    %252 = vector.extract_strided_slice %171 {offsets = [0, 96], sizes = [16, 32], strides = [1, 1]} : vector<16x128xbf16> to vector<16x32xbf16>
    %253 = vector.shape_cast %252 : vector<16x32xbf16> to vector<2x8x32xbf16>
    %254 = vector.extract_strided_slice %172 {offsets = [0, 96], sizes = [16, 32], strides = [1, 1]} : vector<16x128xbf16> to vector<16x32xbf16>
    %255 = vector.shape_cast %254 : vector<16x32xbf16> to vector<2x8x32xbf16>
    %256 = vector.extract_strided_slice %173 {offsets = [0, 96], sizes = [16, 32], strides = [1, 1]} : vector<16x128xbf16> to vector<16x32xbf16>
    %257 = vector.shape_cast %256 : vector<16x32xbf16> to vector<2x8x32xbf16>
    "tpu.trace_start"() <{level = 10 : i32, message = "bqd,bkd->bqk"}> : () -> ()
    %cst_95 = arith.constant dense<0.000000e+00> : vector<2x8x8xf32>
    %258 = tpu.matmul %253, %255, %cst_95 {dimension_numbers = #tpu.dot_dimension_numbers<[2], [2], [1], [1], [0, 0, 0, 1, 1, 1], [0], [0]>} : vector<2x8x32xbf16>, vector<2x8x32xbf16>, vector<2x8x8xf32> -> vector<2x8x8xf32>
    "tpu.trace_stop"() : () -> ()
    %cst_96 = arith.constant 0.176776692 : f32
    %259 = vector.broadcast %cst_96 : f32 to vector<2x8x8xf32>
    %260 = arith.mulf %258, %259 : vector<2x8x8xf32>
    %cst_97 = arith.constant -1.000000e+10 : f32
    %261 = vector.shape_cast %17 : vector<2x1x8xi1> to vector<2x1x8xi1>
    %262 = vector.broadcast %261 : vector<2x1x8xi1> to vector<2x8x8xi1>
    %263 = vector.broadcast %cst_97 : f32 to vector<2x8x8xf32>
    %264 = arith.select %262, %260, %263 : vector<2x8x8xi1>, vector<2x8x8xf32>
    %cst_98 = arith.constant dense<0xFF800000> : vector<2x8xf32>
    %265 = vector.multi_reduction <maximumf>, %264, %cst_98 [2] : vector<2x8x8xf32> to vector<2x8xf32>
    %266 = vector.shape_cast %265 : vector<2x8xf32> to vector<2x8x1xf32>
    %267 = vector.broadcast %266 : vector<2x8x1xf32> to vector<2x8x8xf32>
    %268 = arith.subf %264, %267 : vector<2x8x8xf32>
    %269 = math.exp %268 : vector<2x8x8xf32>
    %cst_99 = arith.constant dense<0.000000e+00> : vector<2x8xf32>
    %270 = vector.multi_reduction <add>, %269, %cst_99 [2] : vector<2x8x8xf32> to vector<2x8xf32>
    %271 = vector.shape_cast %270 : vector<2x8xf32> to vector<2x8x1xf32>
    %272 = vector.broadcast %271 : vector<2x8x1xf32> to vector<2x8x8xf32>
    %273 = arith.divf %269, %272 : vector<2x8x8xf32>
    %274 = arith.truncf %273 : vector<2x8x8xf32> to vector<2x8x8xbf16>
    "tpu.trace_start"() <{level = 10 : i32, message = "bqk,bkd->bqd"}> : () -> ()
    %cst_100 = arith.constant dense<0.000000e+00> : vector<2x8x32xf32>
    %275 = tpu.matmul %274, %257, %cst_100 {dimension_numbers = #tpu.dot_dimension_numbers<[2], [1], [1], [2], [0, 0, 0, 1, 1, 2], [0], [0]>} : vector<2x8x8xbf16>, vector<2x8x32xbf16>, vector<2x8x32xf32> -> vector<2x8x32xf32>
    "tpu.trace_stop"() : () -> ()
    %276 = vector.shape_cast %275 : vector<2x8x32xf32> to vector<16x32xf32>
    %c0_101 = arith.constant 0 : index
    %c96_102 = arith.constant 96 : index
    %277 = vector.load %arg22[%c0_101, %c96_102] : memref<16x128xf32, #tpu.memory_space<vmem>>, vector<16x32xf32>
    tpu.vector_store %arg22[%c0_101, %c96_102], %276 {strides = array<i32>} : memref<16x128xf32, #tpu.memory_space<vmem>>, vector<16x32xf32>,
    %c0_103 = arith.constant 0 : index
    %c0_104 = arith.constant 0 : index
    %278 = vector.load %arg22[%c0_103, %c0_104] : memref<16x128xf32, #tpu.memory_space<vmem>>, vector<16x128xf32>
    %279 = arith.truncf %278 : vector<16x128xf32> to vector<16x128xbf16>
    %c0_105 = arith.constant 0 : index
    %c0_106 = arith.constant 0 : index
    %280 = vector.load %arg13[%c0_105, %c0_106] : memref<128x128xbf16, #tpu.memory_space<vmem>>, vector<128x128xbf16>
    %cst_107 = arith.constant dense<0.000000e+00> : vector<16x128xf32>
    %281 = tpu.matmul %279, %280, %cst_107 {dimension_numbers = #tpu.dot_dimension_numbers<[1], [0], [0], [1], [0, 0, 1, 1], [], []>} : vector<16x128xbf16>, vector<128x128xbf16>, vector<16x128xf32> -> vector<16x128xf32>
    %c0_108 = arith.constant 0 : index
    %c0_109 = arith.constant 0 : index
    %282 = vector.load %arg14[%c0_108, %c0_109] : memref<1x128xf32, #tpu.memory_space<vmem>>, vector<1x128xf32>
    %283 = vector.broadcast %282 : vector<1x128xf32> to vector<16x128xf32>
    %284 = arith.addf %281, %283 : vector<16x128xf32>
    %285 = arith.addf %157, %284 : vector<16x128xf32>
    %cst_110 = arith.constant dense<0.000000e+00> : vector<16xf32>
    %286 = vector.multi_reduction <add>, %285, %cst_110 [1] : vector<16x128xf32> to vector<16xf32>
    %287 = vector.shape_cast %286 : vector<16xf32> to vector<16x1xf32>
    %cst_111 = arith.constant 1.280000e+02 : f32
    %288 = vector.broadcast %cst_111 : f32 to vector<16x1xf32>
    %289 = arith.divf %287, %288 : vector<16x1xf32>
    %290 = vector.broadcast %289 : vector<16x1xf32> to vector<16x128xf32>
    %291 = arith.subf %285, %290 : vector<16x128xf32>
    %292 = arith.mulf %291, %291 : vector<16x128xf32>
    %cst_112 = arith.constant dense<0.000000e+00> : vector<16xf32>
    %293 = vector.multi_reduction <add>, %292, %cst_112 [1] : vector<16x128xf32> to vector<16xf32>
    %294 = vector.shape_cast %293 : vector<16xf32> to vector<16x1xf32>
    %cst_113 = arith.constant 1.280000e+02 : f32
    %295 = vector.broadcast %cst_113 : f32 to vector<16x1xf32>
    %296 = arith.divf %294, %295 : vector<16x1xf32>
    %297 = vector.broadcast %289 : vector<16x1xf32> to vector<16x128xf32>
    %298 = arith.subf %285, %297 : vector<16x128xf32>
    %cst_114 = arith.constant 9.99999974E-6 : f32
    %299 = vector.broadcast %cst_114 : f32 to vector<16x1xf32>
    %300 = arith.addf %296, %299 : vector<16x1xf32>
    %301 = math.rsqrt %300 : vector<16x1xf32>
    %302 = vector.broadcast %301 : vector<16x1xf32> to vector<16x128xf32>
    %303 = arith.mulf %298, %302 : vector<16x128xf32>
    %304 = vector.broadcast %18 : vector<1x128xf32> to vector<16x128xf32>
    %305 = arith.mulf %303, %304 : vector<16x128xf32>
    %306 = vector.broadcast %19 : vector<1x128xf32> to vector<16x128xf32>
    %307 = arith.addf %305, %306 : vector<16x128xf32>
    %308 = arith.truncf %307 : vector<16x128xf32> to vector<16x128xbf16>
    %c0_115 = arith.constant 0 : index
    %c0_116 = arith.constant 0 : index
    %309 = vector.load %arg15[%c0_115, %c0_116] : memref<128x256xbf16, #tpu.memory_space<vmem>>, vector<128x256xbf16>
    %cst_117 = arith.constant dense<0.000000e+00> : vector<16x256xf32>
    %310 = tpu.matmul %308, %309, %cst_117 {dimension_numbers = #tpu.dot_dimension_numbers<[1], [0], [0], [1], [0, 0, 1, 1], [], []>} : vector<16x128xbf16>, vector<128x256xbf16>, vector<16x256xf32> -> vector<16x256xf32>
    %c0_118 = arith.constant 0 : index
    %c0_119 = arith.constant 0 : index
    %311 = vector.load %arg16[%c0_118, %c0_119] : memref<1x256xf32, #tpu.memory_space<vmem>>, vector<1x256xf32>
    %312 = vector.broadcast %311 : vector<1x256xf32> to vector<16x256xf32>
    %313 = arith.addf %310, %312 : vector<16x256xf32>
    %cst_120 = arith.constant 0.000000e+00 : f32
    %314 = vector.broadcast %cst_120 : f32 to vector<16x256xf32>
    %315 = arith.maximumf %313, %314 : vector<16x256xf32>
    %316 = arith.truncf %315 : vector<16x256xf32> to vector<16x256xbf16>
    %c0_121 = arith.constant 0 : index
    %c0_122 = arith.constant 0 : index
    %317 = vector.load %arg17[%c0_121, %c0_122] : memref<256x128xbf16, #tpu.memory_space<vmem>>, vector<256x128xbf16>
    %cst_123 = arith.constant dense<0.000000e+00> : vector<16x128xf32>
    %318 = tpu.matmul %316, %317, %cst_123 {dimension_numbers = #tpu.dot_dimension_numbers<[1], [0], [0], [1], [0, 0, 1, 1], [], []>} : vector<16x256xbf16>, vector<256x128xbf16>, vector<16x128xf32> -> vector<16x128xf32>
    %c0_124 = arith.constant 0 : index
    %c0_125 = arith.constant 0 : index
    %319 = vector.load %arg18[%c0_124, %c0_125] : memref<1x128xf32, #tpu.memory_space<vmem>>, vector<1x128xf32>
    %320 = vector.broadcast %319 : vector<1x128xf32> to vector<16x128xf32>
    %321 = arith.addf %318, %320 : vector<16x128xf32>
    %322 = arith.addf %307, %321 : vector<16x128xf32>
    %cst_126 = arith.constant dense<0.000000e+00> : vector<16xf32>
    %323 = vector.multi_reduction <add>, %322, %cst_126 [1] : vector<16x128xf32> to vector<16xf32>
    %324 = vector.shape_cast %323 : vector<16xf32> to vector<16x1xf32>
    %cst_127 = arith.constant 1.280000e+02 : f32
    %325 = vector.broadcast %cst_127 : f32 to vector<16x1xf32>
    %326 = arith.divf %324, %325 : vector<16x1xf32>
    %327 = vector.broadcast %326 : vector<16x1xf32> to vector<16x128xf32>
    %328 = arith.subf %322, %327 : vector<16x128xf32>
    %329 = arith.mulf %328, %328 : vector<16x128xf32>
    %cst_128 = arith.constant dense<0.000000e+00> : vector<16xf32>
    %330 = vector.multi_reduction <add>, %329, %cst_128 [1] : vector<16x128xf32> to vector<16xf32>
    %331 = vector.shape_cast %330 : vector<16xf32> to vector<16x1xf32>
    %cst_129 = arith.constant 1.280000e+02 : f32
    %332 = vector.broadcast %cst_129 : f32 to vector<16x1xf32>
    %333 = arith.divf %331, %332 : vector<16x1xf32>
    %334 = vector.broadcast %326 : vector<16x1xf32> to vector<16x128xf32>
    %335 = arith.subf %322, %334 : vector<16x128xf32>
    %cst_130 = arith.constant 9.99999974E-6 : f32
    %336 = vector.broadcast %cst_130 : f32 to vector<16x1xf32>
    %337 = arith.addf %333, %336 : vector<16x1xf32>
    %338 = math.rsqrt %337 : vector<16x1xf32>
    %339 = vector.broadcast %338 : vector<16x1xf32> to vector<16x128xf32>
    %340 = arith.mulf %335, %339 : vector<16x128xf32>
    %341 = vector.broadcast %18 : vector<1x128xf32> to vector<16x128xf32>
    %342 = arith.mulf %340, %341 : vector<16x128xf32>
    %343 = vector.broadcast %19 : vector<1x128xf32> to vector<16x128xf32>
    %344 = arith.addf %342, %343 : vector<16x128xf32>
    %345 = vector.shape_cast %344 : vector<16x128xf32> to vector<2x8x128xf32>
    %346 = arith.truncf %345 : vector<2x8x128xf32> to vector<2x8x128xbf16>
    %c0_131 = arith.constant 0 : index
    %c0_132 = arith.constant 0 : index
    %c0_133 = arith.constant 0 : index
    %347 = vector.load %arg21[%c0_131, %c0_132, %c0_133] : memref<2x8x128xbf16, #tpu.memory_space<vmem>>, vector<2x8x128xbf16>
    tpu.vector_store %arg21[%c0_131, %c0_132, %c0_133], %346 {strides = array<i32>} : memref<2x8x128xbf16, #tpu.memory_space<vmem>>, vector<2x8x128xbf16>,
    return
  }
  func.func @transform_0(%arg0: i32) -> (i32, i32, i32) {
    %c0_i32 = arith.constant 0 : i32
    %c0_i32_0 = arith.constant 0 : i32
    %c0_i32_1 = arith.constant 0 : i32
    return %arg0, %c0_i32, %c0_i32_0 : i32, i32, i32
  }
  func.func @transform_1(%arg0: i32) -> (i32, i32, i32) {
    %c0_i32 = arith.constant 0 : i32
    %c0_i32_0 = arith.constant 0 : i32
    %c0_i32_1 = arith.constant 0 : i32
    return %arg0, %c0_i32, %c0_i32_0 : i32, i32, i32
  }
  func.func @transform_2(%arg0: i32) -> (i32, i32, i32) {
    %c0_i32 = arith.constant 0 : i32
    %c0_i32_0 = arith.constant 0 : i32
    %c0_i32_1 = arith.constant 0 : i32
    return %arg0, %c0_i32, %c0_i32_0 : i32, i32, i32
  }
  func.func @transform_3(%arg0: i32) -> (i32, i32, i32) {
    %c0_i32 = arith.constant 0 : i32
    %c0_i32_0 = arith.constant 0 : i32
    %c0_i32_1 = arith.constant 0 : i32
    return %arg0, %c0_i32, %c0_i32_0 : i32, i32, i32
  }
  func.func @transform_4(%arg0: i32) -> (i32, i32) {
    %c0_i32 = arith.constant 0 : i32
    %c0_i32_0 = arith.constant 0 : i32
    %c0_i32_1 = arith.constant 0 : i32
    return %c0_i32, %c0_i32_0 : i32, i32
  }
  func.func @transform_5(%arg0: i32) -> (i32, i32) {
    %c0_i32 = arith.constant 0 : i32
    %c0_i32_0 = arith.constant 0 : i32
    %c0_i32_1 = arith.constant 0 : i32
    return %c0_i32, %c0_i32_0 : i32, i32
  }
  func.func @transform_6(%arg0: i32) -> (i32, i32) {
    %c0_i32 = arith.constant 0 : i32
    %c0_i32_0 = arith.constant 0 : i32
    %c0_i32_1 = arith.constant 0 : i32
    return %c0_i32, %c0_i32_0 : i32, i32
  }
  func.func @transform_7(%arg0: i32) -> (i32, i32) {
    %c0_i32 = arith.constant 0 : i32
    %c0_i32_0 = arith.constant 0 : i32
    %c0_i32_1 = arith.constant 0 : i32
    return %c0_i32, %c0_i32_0 : i32, i32
  }
  func.func @transform_8(%arg0: i32) -> (i32, i32) {
    %c0_i32 = arith.constant 0 : i32
    %c0_i32_0 = arith.constant 0 : i32
    %c0_i32_1 = arith.constant 0 : i32
    return %c0_i32, %c0_i32_0 : i32, i32
  }
  func.func @transform_9(%arg0: i32) -> (i32, i32) {
    %c0_i32 = arith.constant 0 : i32
    %c0_i32_0 = arith.constant 0 : i32
    %c0_i32_1 = arith.constant 0 : i32
    return %c0_i32, %c0_i32_0 : i32, i32
  }
  func.func @transform_10(%arg0: i32) -> (i32, i32) {
    %c0_i32 = arith.constant 0 : i32
    %c0_i32_0 = arith.constant 0 : i32
    %c0_i32_1 = arith.constant 0 : i32
    return %c0_i32, %c0_i32_0 : i32, i32
  }
  func.func @transform_11(%arg0: i32) -> (i32, i32) {
    %c0_i32 = arith.constant 0 : i32
    %c0_i32_0 = arith.constant 0 : i32
    %c0_i32_1 = arith.constant 0 : i32
    return %c0_i32, %c0_i32_0 : i32, i32
  }
  func.func @transform_12(%arg0: i32) -> (i32, i32) {
    %c0_i32 = arith.constant 0 : i32
    %c0_i32_0 = arith.constant 0 : i32
    %c0_i32_1 = arith.constant 0 : i32
    return %c0_i32, %c0_i32_0 : i32, i32
  }
  func.func @transform_13(%arg0: i32) -> (i32, i32) {
    %c0_i32 = arith.constant 0 : i32
    %c0_i32_0 = arith.constant 0 : i32
    %c0_i32_1 = arith.constant 0 : i32
    return %c0_i32, %c0_i32_0 : i32, i32
  }
  func.func @transform_14(%arg0: i32) -> (i32, i32) {
    %c0_i32 = arith.constant 0 : i32
    %c0_i32_0 = arith.constant 0 : i32
    %c0_i32_1 = arith.constant 0 : i32
    return %c0_i32, %c0_i32_0 : i32, i32
  }
  func.func @transform_15(%arg0: i32) -> (i32, i32) {
    %c0_i32 = arith.constant 0 : i32
    %c0_i32_0 = arith.constant 0 : i32
    %c0_i32_1 = arith.constant 0 : i32
    return %c0_i32, %c0_i32_0 : i32, i32
  }
  func.func @transform_16(%arg0: i32) -> (i32, i32) {
    %c0_i32 = arith.constant 0 : i32
    %c0_i32_0 = arith.constant 0 : i32
    %c0_i32_1 = arith.constant 0 : i32
    return %c0_i32, %c0_i32_0 : i32, i32
  }
  func.func @transform_17(%arg0: i32) -> (i32, i32) {
    %c0_i32 = arith.constant 0 : i32
    %c0_i32_0 = arith.constant 0 : i32
    %c0_i32_1 = arith.constant 0 : i32
    return %c0_i32, %c0_i32_0 : i32, i32
  }
  func.func @transform_18(%arg0: i32) -> (i32, i32) {
    %c0_i32 = arith.constant 0 : i32
    %c0_i32_0 = arith.constant 0 : i32
    %c0_i32_1 = arith.constant 0 : i32
    return %c0_i32, %c0_i32_0 : i32, i32
  }
  func.func @transform_19(%arg0: i32) -> (i32, i32) {
    %c0_i32 = arith.constant 0 : i32
    %c0_i32_0 = arith.constant 0 : i32
    %c0_i32_1 = arith.constant 0 : i32
    return %c0_i32, %c0_i32_0 : i32, i32
  }
  func.func @transform_20(%arg0: i32) -> (i32, i32, i32) {
    %c0_i32 = arith.constant 0 : i32
    %c0_i32_0 = arith.constant 0 : i32
    %c0_i32_1 = arith.constant 0 : i32
    return %arg0, %c0_i32, %c0_i32_0 : i32, i32, i32
  }
}

module attributes {stable_mosaic.version = 11 : i64} {
  func.func @_decoder_layer_kernel(%arg0: i32, %arg1: memref<2x8x128xbf16, #tpu.memory_space<vmem>>, %arg2: memref<2x8x128xbf16, #tpu.memory_space<vmem>>, %arg3: memref<2x8x1xi32, #tpu.memory_space<vmem>>, %arg4: memref<2x1x8xi32, #tpu.memory_space<vmem>>, %arg5: memref<128x384xbf16, #tpu.memory_space<vmem>>, %arg6: memref<1x384xf32, #tpu.memory_space<vmem>>, %arg7: memref<128x128xbf16, #tpu.memory_space<vmem>>, %arg8: memref<1x128xf32, #tpu.memory_space<vmem>>, %arg9: memref<128x128xbf16, #tpu.memory_space<vmem>>, %arg10: memref<1x128xf32, #tpu.memory_space<vmem>>, %arg11: memref<128x256xbf16, #tpu.memory_space<vmem>>, %arg12: memref<1x256xf32, #tpu.memory_space<vmem>>, %arg13: memref<128x128xbf16, #tpu.memory_space<vmem>>, %arg14: memref<1x128xf32, #tpu.memory_space<vmem>>, %arg15: memref<128x256xbf16, #tpu.memory_space<vmem>>, %arg16: memref<1x256xf32, #tpu.memory_space<vmem>>, %arg17: memref<256x128xbf16, #tpu.memory_space<vmem>>, %arg18: memref<1x128xf32, #tpu.memory_space<vmem>>, %arg19: memref<1x128xf32, #tpu.memory_space<vmem>>, %arg20: memref<1x128xf32, #tpu.memory_space<vmem>>, %arg21: memref<2x8x128xbf16, #tpu.memory_space<vmem>>, %arg22: memref<16x128xf32, #tpu.memory_space<vmem>>) attributes {dimension_semantics = [#tpu.dimension_semantics<parallel>], iteration_bounds = array<i64: 1>, scalar_prefetch = 0 : i64, scratch_operands = 1 : i64, tpu.core_type = #tpu.core_type<tc>, window_params = [{transform_indices = @transform_0, window_bounds = array<i64: 2, 8, 128>}, {transform_indices = @transform_1, window_bounds = array<i64: 2, 8, 128>}, {transform_indices = @transform_2, window_bounds = array<i64: 2, 8, 1>}, {transform_indices = @transform_3, window_bounds = array<i64: 2, 1, 8>}, {pipeline_mode = #tpu.pipeline_mode<synchronous>, transform_indices = @transform_4, window_bounds = array<i64: 128, 384>}, {pipeline_mode = #tpu.pipeline_mode<synchronous>, transform_indices = @transform_5, window_bounds = array<i64: 1, 384>}, {pipeline_mode = #tpu.pipeline_mode<synchronous>, transform_indices = @transform_6, window_bounds = array<i64: 128, 128>}, {pipeline_mode = #tpu.pipeline_mode<synchronous>, transform_indices = @transform_7, window_bounds = array<i64: 1, 128>}, {pipeline_mode = #tpu.pipeline_mode<synchronous>, transform_indices = @transform_8, window_bounds = array<i64: 128, 128>}, {pipeline_mode = #tpu.pipeline_mode<synchronous>, transform_indices = @transform_9, window_bounds = array<i64: 1, 128>}, {pipeline_mode = #tpu.pipeline_mode<synchronous>, transform_indices = @transform_10, window_bounds = array<i64: 128, 256>}, {pipeline_mode = #tpu.pipeline_mode<synchronous>, transform_indices = @transform_11, window_bounds = array<i64: 1, 256>}, {pipeline_mode = #tpu.pipeline_mode<synchronous>, transform_indices = @transform_12, window_bounds = array<i64: 128, 128>}, {pipeline_mode = #tpu.pipeline_mode<synchronous>, transform_indices = @transform_13, window_bounds = array<i64: 1, 128>}, {pipeline_mode = #tpu.pipeline_mode<synchronous>, transform_indices = @transform_14, window_bounds = array<i64: 128, 256>}, {pipeline_mode = #tpu.pipeline_mode<synchronous>, transform_indices = @transform_15, window_bounds = array<i64: 1, 256>}, {pipeline_mode = #tpu.pipeline_mode<synchronous>, transform_indices = @transform_16, window_bounds = array<i64: 256, 128>}, {pipeline_mode = #tpu.pipeline_mode<synchronous>, transform_indices = @transform_17, window_bounds = array<i64: 1, 128>}, {pipeline_mode = #tpu.pipeline_mode<synchronous>, transform_indices = @transform_18, window_bounds = array<i64: 1, 128>}, {pipeline_mode = #tpu.pipeline_mode<synchronous>, transform_indices = @transform_19, window_bounds = array<i64: 1, 128>}, {transform_indices = @transform_20, window_bounds = array<i64: 2, 8, 128>}]} {
    %c0 = arith.constant 0 : index
    %c0_0 = arith.constant 0 : index
    %c0_1 = arith.constant 0 : index
    %0 = vector.load %arg1[%c0, %c0_0, %c0_1] : memref<2x8x128xbf16, #tpu.memory_space<vmem>>, vector<2x8x128xbf16>
    %1 = arith.extf %0 : vector<2x8x128xbf16> to vector<2x8x128xf32>
    %2 = vector.shape_cast %1 : vector<2x8x128xf32> to vector<16x128xf32>
    %c0_2 = arith.constant 0 : index
    %c0_3 = arith.constant 0 : index
    %c0_4 = arith.constant 0 : index
    %3 = vector.load %arg2[%c0_2, %c0_3, %c0_4] : memref<2x8x128xbf16, #tpu.memory_space<vmem>>, vector<2x8x128xbf16>
    %4 = vector.shape_cast %3 : vector<2x8x128xbf16> to vector<16x128xbf16>
    %5 = tpu.iota {dimensions = array<i32: 0>} : vector<8x8xi32>
    %6 = tpu.iota {dimensions = array<i32: 1>} : vector<8x8xi32>
    %7 = arith.cmpi sge, %5, %6 : vector<8x8xi32>
    %c0_5 = arith.constant 0 : index
    %c0_6 = arith.constant 0 : index
    %c0_7 = arith.constant 0 : index
    %8 = vector.load %arg3[%c0_5, %c0_6, %c0_7] : memref<2x8x1xi32, #tpu.memory_space<vmem>>, vector<2x8x1xi32>
    %c0_i32 = arith.constant 0 : i32
    %9 = vector.broadcast %c0_i32 : i32 to vector<2x8x1xi32>
    %10 = arith.cmpi ne, %8, %9 : vector<2x8x1xi32>
    %11 = vector.shape_cast %7 : vector<8x8xi1> to vector<1x8x8xi1>
    %12 = vector.broadcast %10 : vector<2x8x1xi1> to vector<2x8x8xi1>
    %13 = vector.broadcast %11 : vector<1x8x8xi1> to vector<2x8x8xi1>
    %14 = arith.andi %12, %13 : vector<2x8x8xi1>
    %c0_8 = arith.constant 0 : index
    %c0_9 = arith.constant 0 : index
    %c0_10 = arith.constant 0 : index
    %15 = vector.load %arg4[%c0_8, %c0_9, %c0_10] : memref<2x1x8xi32, #tpu.memory_space<vmem>>, vector<2x1x8xi32>
    %c0_i32_11 = arith.constant 0 : i32
    %16 = vector.broadcast %c0_i32_11 : i32 to vector<2x1x8xi32>
    %17 = arith.cmpi ne, %15, %16 : vector<2x1x8xi32>
    %c0_12 = arith.constant 0 : index
    %c0_13 = arith.constant 0 : index
    %18 = vector.load %arg19[%c0_12, %c0_13] : memref<1x128xf32, #tpu.memory_space<vmem>>, vector<1x128xf32>
    %c0_14 = arith.constant 0 : index
    %c0_15 = arith.constant 0 : index
    %19 = vector.load %arg20[%c0_14, %c0_15] : memref<1x128xf32, #tpu.memory_space<vmem>>, vector<1x128xf32>
    %20 = arith.truncf %2 : vector<16x128xf32> to vector<16x128xbf16>
    %c0_16 = arith.constant 0 : index
    %c0_17 = arith.constant 0 : index
    %21 = vector.load %arg5[%c0_16, %c0_17] : memref<128x384xbf16, #tpu.memory_space<vmem>>, vector<128x384xbf16>
    %cst = arith.constant dense<0.000000e+00> : vector<16x384xf32>
    %22 = tpu.matmul %20, %21, %cst {dimension_numbers = #tpu.dot_dimension_numbers<[1], [0], [0], [1], [0, 0, 1, 1], [], []>} : vector<16x128xbf16>, vector<128x384xbf16>, vector<16x384xf32> -> vector<16x384xf32>
    %c0_18 = arith.constant 0 : index
    %c0_19 = arith.constant 0 : index
    %23 = vector.load %arg6[%c0_18, %c0_19] : memref<1x384xf32, #tpu.memory_space<vmem>>, vector<1x384xf32>
    %24 = vector.broadcast %23 : vector<1x384xf32> to vector<16x384xf32>
    %25 = arith.addf %22, %24 : vector<16x384xf32>
    %26 = vector.extract_strided_slice %25 {offsets = [0, 0], sizes = [16, 128], strides = [1, 1]} : vector<16x384xf32> to vector<16x128xf32>
    %27 = vector.extract_strided_slice %25 {offsets = [0, 128], sizes = [16, 128], strides = [1, 1]} : vector<16x384xf32> to vector<16x128xf32>
    %28 = vector.extract_strided_slice %25 {offsets = [0, 256], sizes = [16, 128], strides = [1, 1]} : vector<16x384xf32> to vector<16x128xf32>
    %29 = arith.truncf %26 : vector<16x128xf32> to vector<16x128xbf16>
    %30 = arith.truncf %27 : vector<16x128xf32> to vector<16x128xbf16>
    %31 = arith.truncf %28 : vector<16x128xf32> to vector<16x128xbf16>
    %32 = vector.extract_strided_slice %29 {offsets = [0, 0], sizes = [16, 32], strides = [1, 1]} : vector<16x128xbf16> to vector<16x32xbf16>
    %33 = vector.shape_cast %32 : vector<16x32xbf16> to vector<2x8x32xbf16>
    %34 = vector.extract_strided_slice %30 {offsets = [0, 0], sizes = [16, 32], strides = [1, 1]} : vector<16x128xbf16> to vector<16x32xbf16>
    %35 = vector.shape_cast %34 : vector<16x32xbf16> to vector<2x8x32xbf16>
    %36 = vector.extract_strided_slice %31 {offsets = [0, 0], sizes = [16, 32], strides = [1, 1]} : vector<16x128xbf16> to vector<16x32xbf16>
    %37 = vector.shape_cast %36 : vector<16x32xbf16> to vector<2x8x32xbf16>
    "tpu.trace_start"() <{level = 10 : i32, message = "bqd,bkd->bqk"}> : () -> ()
    %cst_20 = arith.constant dense<0.000000e+00> : vector<2x8x8xf32>
    %38 = tpu.matmul %33, %35, %cst_20 {dimension_numbers = #tpu.dot_dimension_numbers<[2], [2], [1], [1], [0, 0, 0, 1, 1, 1], [0], [0]>} : vector<2x8x32xbf16>, vector<2x8x32xbf16>, vector<2x8x8xf32> -> vector<2x8x8xf32>
    "tpu.trace_stop"() : () -> ()
    %cst_21 = arith.constant 0.176776692 : f32
    %39 = vector.broadcast %cst_21 : f32 to vector<2x8x8xf32>
    %40 = arith.mulf %38, %39 : vector<2x8x8xf32>
    %cst_22 = arith.constant -1.000000e+10 : f32
    %41 = vector.broadcast %cst_22 : f32 to vector<2x8x8xf32>
    %42 = arith.select %14, %40, %41 : vector<2x8x8xi1>, vector<2x8x8xf32>
    %cst_23 = arith.constant dense<0xFF800000> : vector<2x8xf32>
    %43 = vector.multi_reduction <maximumf>, %42, %cst_23 [2] : vector<2x8x8xf32> to vector<2x8xf32>
    %44 = vector.shape_cast %43 : vector<2x8xf32> to vector<2x8x1xf32>
    %45 = vector.broadcast %44 : vector<2x8x1xf32> to vector<2x8x8xf32>
    %46 = arith.subf %42, %45 : vector<2x8x8xf32>
    %47 = math.exp %46 : vector<2x8x8xf32>
    %cst_24 = arith.constant dense<0.000000e+00> : vector<2x8xf32>
    %48 = vector.multi_reduction <add>, %47, %cst_24 [2] : vector<2x8x8xf32> to vector<2x8xf32>
    %49 = vector.shape_cast %48 : vector<2x8xf32> to vector<2x8x1xf32>
    %50 = vector.broadcast %49 : vector<2x8x1xf32> to vector<2x8x8xf32>
    %51 = arith.divf %47, %50 : vector<2x8x8xf32>
    %52 = arith.truncf %51 : vector<2x8x8xf32> to vector<2x8x8xbf16>
    "tpu.trace_start"() <{level = 10 : i32, message = "bqk,bkd->bqd"}> : () -> ()
    %cst_25 = arith.constant dense<0.000000e+00> : vector<2x8x32xf32>
    %53 = tpu.matmul %52, %37, %cst_25 {dimension_numbers = #tpu.dot_dimension_numbers<[2], [1], [1], [2], [0, 0, 0, 1, 1, 2], [0], [0]>} : vector<2x8x8xbf16>, vector<2x8x32xbf16>, vector<2x8x32xf32> -> vector<2x8x32xf32>
    "tpu.trace_stop"() : () -> ()
    %54 = vector.shape_cast %53 : vector<2x8x32xf32> to vector<16x32xf32>
    %c0_26 = arith.constant 0 : index
    %c0_27 = arith.constant 0 : index
    %55 = vector.load %arg22[%c0_26, %c0_27] : memref<16x128xf32, #tpu.memory_space<vmem>>, vector<16x32xf32>
    tpu.vector_store %arg22[%c0_26, %c0_27], %54 {strides = array<i32>} : memref<16x128xf32, #tpu.memory_space<vmem>>, vector<16x32xf32>,
    %56 = vector.extract_strided_slice %29 {offsets = [0, 32], sizes = [16, 32], strides = [1, 1]} : vector<16x128xbf16> to vector<16x32xbf16>
    %57 = vector.shape_cast %56 : vector<16x32xbf16> to vector<2x8x32xbf16>
    %58 = vector.extract_strided_slice %30 {offsets = [0, 32], sizes = [16, 32], strides = [1, 1]} : vector<16x128xbf16> to vector<16x32xbf16>
    %59 = vector.shape_cast %58 : vector<16x32xbf16> to vector<2x8x32xbf16>
    %60 = vector.extract_strided_slice %31 {offsets = [0, 32], sizes = [16, 32], strides = [1, 1]} : vector<16x128xbf16> to vector<16x32xbf16>
    %61 = vector.shape_cast %60 : vector<16x32xbf16> to vector<2x8x32xbf16>
    "tpu.trace_start"() <{level = 10 : i32, message = "bqd,bkd->bqk"}> : () -> ()
    %cst_28 = arith.constant dense<0.000000e+00> : vector<2x8x8xf32>
    %62 = tpu.matmul %57, %59, %cst_28 {dimension_numbers = #tpu.dot_dimension_numbers<[2], [2], [1], [1], [0, 0, 0, 1, 1, 1], [0], [0]>} : vector<2x8x32xbf16>, vector<2x8x32xbf16>, vector<2x8x8xf32> -> vector<2x8x8xf32>
    "tpu.trace_stop"() : () -> ()
    %cst_29 = arith.constant 0.176776692 : f32
    %63 = vector.broadcast %cst_29 : f32 to vector<2x8x8xf32>
    %64 = arith.mulf %62, %63 : vector<2x8x8xf32>
    %cst_30 = arith.constant -1.000000e+10 : f32
    %65 = vector.broadcast %cst_30 : f32 to vector<2x8x8xf32>
    %66 = arith.select %14, %64, %65 : vector<2x8x8xi1>, vector<2x8x8xf32>
    %cst_31 = arith.constant dense<0xFF800000> : vector<2x8xf32>
    %67 = vector.multi_reduction <maximumf>, %66, %cst_31 [2] : vector<2x8x8xf32> to vector<2x8xf32>
    %68 = vector.shape_cast %67 : vector<2x8xf32> to vector<2x8x1xf32>
    %69 = vector.broadcast %68 : vector<2x8x1xf32> to vector<2x8x8xf32>
    %70 = arith.subf %66, %69 : vector<2x8x8xf32>
    %71 = math.exp %70 : vector<2x8x8xf32>
    %cst_32 = arith.constant dense<0.000000e+00> : vector<2x8xf32>
    %72 = vector.multi_reduction <add>, %71, %cst_32 [2] : vector<2x8x8xf32> to vector<2x8xf32>
    %73 = vector.shape_cast %72 : vector<2x8xf32> to vector<2x8x1xf32>
    %74 = vector.broadcast %73 : vector<2x8x1xf32> to vector<2x8x8xf32>
    %75 = arith.divf %71, %74 : vector<2x8x8xf32>
    %76 = arith.truncf %75 : vector<2x8x8xf32> to vector<2x8x8xbf16>
    "tpu.trace_start"() <{level = 10 : i32, message = "bqk,bkd->bqd"}> : () -> ()
    %cst_33 = arith.constant dense<0.000000e+00> : vector<2x8x32xf32>
    %77 = tpu.matmul %76, %61, %cst_33 {dimension_numbers = #tpu.dot_dimension_numbers<[2], [1], [1], [2], [0, 0, 0, 1, 1, 2], [0], [0]>} : vector<2x8x8xbf16>, vector<2x8x32xbf16>, vector<2x8x32xf32> -> vector<2x8x32xf32>
    "tpu.trace_stop"() : () -> ()
    %78 = vector.shape_cast %77 : vector<2x8x32xf32> to vector<16x32xf32>
    %c0_34 = arith.constant 0 : index
    %c32 = arith.constant 32 : index
    %79 = vector.load %arg22[%c0_34, %c32] : memref<16x128xf32, #tpu.memory_space<vmem>>, vector<16x32xf32>
    tpu.vector_store %arg22[%c0_34, %c32], %78 {strides = array<i32>} : memref<16x128xf32, #tpu.memory_space<vmem>>, vector<16x32xf32>,
    %80 = vector.extract_strided_slice %29 {offsets = [0, 64], sizes = [16, 32], strides = [1, 1]} : vector<16x128xbf16> to vector<16x32xbf16>
    %81 = vector.shape_cast %80 : vector<16x32xbf16> to vector<2x8x32xbf16>
    %82 = vector.extract_strided_slice %30 {offsets = [0, 64], sizes = [16, 32], strides = [1, 1]} : vector<16x128xbf16> to vector<16x32xbf16>
    %83 = vector.shape_cast %82 : vector<16x32xbf16> to vector<2x8x32xbf16>
    %84 = vector.extract_strided_slice %31 {offsets = [0, 64], sizes = [16, 32], strides = [1, 1]} : vector<16x128xbf16> to vector<16x32xbf16>
    %85 = vector.shape_cast %84 : vector<16x32xbf16> to vector<2x8x32xbf16>
    "tpu.trace_start"() <{level = 10 : i32, message = "bqd,bkd->bqk"}> : () -> ()
    %cst_35 = arith.constant dense<0.000000e+00> : vector<2x8x8xf32>
    %86 = tpu.matmul %81, %83, %cst_35 {dimension_numbers = #tpu.dot_dimension_numbers<[2], [2], [1], [1], [0, 0, 0, 1, 1, 1], [0], [0]>} : vector<2x8x32xbf16>, vector<2x8x32xbf16>, vector<2x8x8xf32> -> vector<2x8x8xf32>
    "tpu.trace_stop"() : () -> ()
    %cst_36 = arith.constant 0.176776692 : f32
    %87 = vector.broadcast %cst_36 : f32 to vector<2x8x8xf32>
    %88 = arith.mulf %86, %87 : vector<2x8x8xf32>
    %cst_37 = arith.constant -1.000000e+10 : f32
    %89 = vector.broadcast %cst_37 : f32 to vector<2x8x8xf32>
    %90 = arith.select %14, %88, %89 : vector<2x8x8xi1>, vector<2x8x8xf32>
    %cst_38 = arith.constant dense<0xFF800000> : vector<2x8xf32>
    %91 = vector.multi_reduction <maximumf>, %90, %cst_38 [2] : vector<2x8x8xf32> to vector<2x8xf32>
    %92 = vector.shape_cast %91 : vector<2x8xf32> to vector<2x8x1xf32>
    %93 = vector.broadcast %92 : vector<2x8x1xf32> to vector<2x8x8xf32>
    %94 = arith.subf %90, %93 : vector<2x8x8xf32>
    %95 = math.exp %94 : vector<2x8x8xf32>
    %cst_39 = arith.constant dense<0.000000e+00> : vector<2x8xf32>
    %96 = vector.multi_reduction <add>, %95, %cst_39 [2] : vector<2x8x8xf32> to vector<2x8xf32>
    %97 = vector.shape_cast %96 : vector<2x8xf32> to vector<2x8x1xf32>
    %98 = vector.broadcast %97 : vector<2x8x1xf32> to vector<2x8x8xf32>
    %99 = arith.divf %95, %98 : vector<2x8x8xf32>
    %100 = arith.truncf %99 : vector<2x8x8xf32> to vector<2x8x8xbf16>
    "tpu.trace_start"() <{level = 10 : i32, message = "bqk,bkd->bqd"}> : () -> ()
    %cst_40 = arith.constant dense<0.000000e+00> : vector<2x8x32xf32>
    %101 = tpu.matmul %100, %85, %cst_40 {dimension_numbers = #tpu.dot_dimension_numbers<[2], [1], [1], [2], [0, 0, 0, 1, 1, 2], [0], [0]>} : vector<2x8x8xbf16>, vector<2x8x32xbf16>, vector<2x8x32xf32> -> vector<2x8x32xf32>
    "tpu.trace_stop"() : () -> ()
    %102 = vector.shape_cast %101 : vector<2x8x32xf32> to vector<16x32xf32>
    %c0_41 = arith.constant 0 : index
    %c64 = arith.constant 64 : index
    %103 = vector.load %arg22[%c0_41, %c64] : memref<16x128xf32, #tpu.memory_space<vmem>>, vector<16x32xf32>
    tpu.vector_store %arg22[%c0_41, %c64], %102 {strides = array<i32>} : memref<16x128xf32, #tpu.memory_space<vmem>>, vector<16x32xf32>,
    %104 = vector.extract_strided_slice %29 {offsets = [0, 96], sizes = [16, 32], strides = [1, 1]} : vector<16x128xbf16> to vector<16x32xbf16>
    %105 = vector.shape_cast %104 : vector<16x32xbf16> to vector<2x8x32xbf16>
    %106 = vector.extract_strided_slice %30 {offsets = [0, 96], sizes = [16, 32], strides = [1, 1]} : vector<16x128xbf16> to vector<16x32xbf16>
    %107 = vector.shape_cast %106 : vector<16x32xbf16> to vector<2x8x32xbf16>
    %108 = vector.extract_strided_slice %31 {offsets = [0, 96], sizes = [16, 32], strides = [1, 1]} : vector<16x128xbf16> to vector<16x32xbf16>
    %109 = vector.shape_cast %108 : vector<16x32xbf16> to vector<2x8x32xbf16>
    "tpu.trace_start"() <{level = 10 : i32, message = "bqd,bkd->bqk"}> : () -> ()
    %cst_42 = arith.constant dense<0.000000e+00> : vector<2x8x8xf32>
    %110 = tpu.matmul %105, %107, %cst_42 {dimension_numbers = #tpu.dot_dimension_numbers<[2], [2], [1], [1], [0, 0, 0, 1, 1, 1], [0], [0]>} : vector<2x8x32xbf16>, vector<2x8x32xbf16>, vector<2x8x8xf32> -> vector<2x8x8xf32>
    "tpu.trace_stop"() : () -> ()
    %cst_43 = arith.constant 0.176776692 : f32
    %111 = vector.broadcast %cst_43 : f32 to vector<2x8x8xf32>
    %112 = arith.mulf %110, %111 : vector<2x8x8xf32>
    %cst_44 = arith.constant -1.000000e+10 : f32
    %113 = vector.broadcast %cst_44 : f32 to vector<2x8x8xf32>
    %114 = arith.select %14, %112, %113 : vector<2x8x8xi1>, vector<2x8x8xf32>
    %cst_45 = arith.constant dense<0xFF800000> : vector<2x8xf32>
    %115 = vector.multi_reduction <maximumf>, %114, %cst_45 [2] : vector<2x8x8xf32> to vector<2x8xf32>
    %116 = vector.shape_cast %115 : vector<2x8xf32> to vector<2x8x1xf32>
    %117 = vector.broadcast %116 : vector<2x8x1xf32> to vector<2x8x8xf32>
    %118 = arith.subf %114, %117 : vector<2x8x8xf32>
    %119 = math.exp %118 : vector<2x8x8xf32>
    %cst_46 = arith.constant dense<0.000000e+00> : vector<2x8xf32>
    %120 = vector.multi_reduction <add>, %119, %cst_46 [2] : vector<2x8x8xf32> to vector<2x8xf32>
    %121 = vector.shape_cast %120 : vector<2x8xf32> to vector<2x8x1xf32>
    %122 = vector.broadcast %121 : vector<2x8x1xf32> to vector<2x8x8xf32>
    %123 = arith.divf %119, %122 : vector<2x8x8xf32>
    %124 = arith.truncf %123 : vector<2x8x8xf32> to vector<2x8x8xbf16>
    "tpu.trace_start"() <{level = 10 : i32, message = "bqk,bkd->bqd"}> : () -> ()
    %cst_47 = arith.constant dense<0.000000e+00> : vector<2x8x32xf32>
    %125 = tpu.matmul %124, %109, %cst_47 {dimension_numbers = #tpu.dot_dimension_numbers<[2], [1], [1], [2], [0, 0, 0, 1, 1, 2], [0], [0]>} : vector<2x8x8xbf16>, vector<2x8x32xbf16>, vector<2x8x32xf32> -> vector<2x8x32xf32>
    "tpu.trace_stop"() : () -> ()
    %126 = vector.shape_cast %125 : vector<2x8x32xf32> to vector<16x32xf32>
    %c0_48 = arith.constant 0 : index
    %c96 = arith.constant 96 : index
    %127 = vector.load %arg22[%c0_48, %c96] : memref<16x128xf32, #tpu.memory_space<vmem>>, vector<16x32xf32>
    tpu.vector_store %arg22[%c0_48, %c96], %126 {strides = array<i32>} : memref<16x128xf32, #tpu.memory_space<vmem>>, vector<16x32xf32>,
    %c0_49 = arith.constant 0 : index
    %c0_50 = arith.constant 0 : index
    %128 = vector.load %arg22[%c0_49, %c0_50] : memref<16x128xf32, #tpu.memory_space<vmem>>, vector<16x128xf32>
    %129 = arith.truncf %128 : vector<16x128xf32> to vector<16x128xbf16>
    %c0_51 = arith.constant 0 : index
    %c0_52 = arith.constant 0 : index
    %130 = vector.load %arg7[%c0_51, %c0_52] : memref<128x128xbf16, #tpu.memory_space<vmem>>, vector<128x128xbf16>
    %cst_53 = arith.constant dense<0.000000e+00> : vector<16x128xf32>
    %131 = tpu.matmul %129, %130, %cst_53 {dimension_numbers = #tpu.dot_dimension_numbers<[1], [0], [0], [1], [0, 0, 1, 1], [], []>} : vector<16x128xbf16>, vector<128x128xbf16>, vector<16x128xf32> -> vector<16x128xf32>
    %c0_54 = arith.constant 0 : index
    %c0_55 = arith.constant 0 : index
    %132 = vector.load %arg8[%c0_54, %c0_55] : memref<1x128xf32, #tpu.memory_space<vmem>>, vector<1x128xf32>
    %133 = vector.broadcast %132 : vector<1x128xf32> to vector<16x128xf32>
    %134 = arith.addf %131, %133 : vector<16x128xf32>
    %135 = arith.addf %2, %134 : vector<16x128xf32>
    %cst_56 = arith.constant dense<0.000000e+00> : vector<16xf32>
    %136 = vector.multi_reduction <add>, %135, %cst_56 [1] : vector<16x128xf32> to vector<16xf32>
    %137 = vector.shape_cast %136 : vector<16xf32> to vector<16x1xf32>
    %cst_57 = arith.constant 1.280000e+02 : f32
    %138 = vector.broadcast %cst_57 : f32 to vector<16x1xf32>
    %139 = arith.divf %137, %138 : vector<16x1xf32>
    %140 = vector.broadcast %139 : vector<16x1xf32> to vector<16x128xf32>
    %141 = arith.subf %135, %140 : vector<16x128xf32>
    %142 = arith.mulf %141, %141 : vector<16x128xf32>
    %cst_58 = arith.constant dense<0.000000e+00> : vector<16xf32>
    %143 = vector.multi_reduction <add>, %142, %cst_58 [1] : vector<16x128xf32> to vector<16xf32>
    %144 = vector.shape_cast %143 : vector<16xf32> to vector<16x1xf32>
    %cst_59 = arith.constant 1.280000e+02 : f32
    %145 = vector.broadcast %cst_59 : f32 to vector<16x1xf32>
    %146 = arith.divf %144, %145 : vector<16x1xf32>
    %147 = vector.broadcast %139 : vector<16x1xf32> to vector<16x128xf32>
    %148 = arith.subf %135, %147 : vector<16x128xf32>
    %cst_60 = arith.constant 9.99999974E-6 : f32
    %149 = vector.broadcast %cst_60 : f32 to vector<16x1xf32>
    %150 = arith.addf %146, %149 : vector<16x1xf32>
    %151 = math.rsqrt %150 : vector<16x1xf32>
    %152 = vector.broadcast %151 : vector<16x1xf32> to vector<16x128xf32>
    %153 = arith.mulf %148, %152 : vector<16x128xf32>
    %154 = vector.broadcast %18 : vector<1x128xf32> to vector<16x128xf32>
    %155 = arith.mulf %153, %154 : vector<16x128xf32>
    %156 = vector.broadcast %19 : vector<1x128xf32> to vector<16x128xf32>
    %157 = arith.addf %155, %156 : vector<16x128xf32>
    %158 = arith.truncf %157 : vector<16x128xf32> to vector<16x128xbf16>
    %c0_61 = arith.constant 0 : index
    %c0_62 = arith.constant 0 : index
    %159 = vector.load %arg9[%c0_61, %c0_62] : memref<128x128xbf16, #tpu.memory_space<vmem>>, vector<128x128xbf16>
    %cst_63 = arith.constant dense<0.000000e+00> : vector<16x128xf32>
    %160 = tpu.matmul %158, %159, %cst_63 {dimension_numbers = #tpu.dot_dimension_numbers<[1], [0], [0], [1], [0, 0, 1, 1], [], []>} : vector<16x128xbf16>, vector<128x128xbf16>, vector<16x128xf32> -> vector<16x128xf32>
    %c0_64 = arith.constant 0 : index
    %c0_65 = arith.constant 0 : index
    %161 = vector.load %arg10[%c0_64, %c0_65] : memref<1x128xf32, #tpu.memory_space<vmem>>, vector<1x128xf32>
    %162 = vector.broadcast %161 : vector<1x128xf32> to vector<16x128xf32>
    %163 = arith.addf %160, %162 : vector<16x128xf32>
    %c0_66 = arith.constant 0 : index
    %c0_67 = arith.constant 0 : index
    %164 = vector.load %arg11[%c0_66, %c0_67] : memref<128x256xbf16, #tpu.memory_space<vmem>>, vector<128x256xbf16>
    %cst_68 = arith.constant dense<0.000000e+00> : vector<16x256xf32>
    %165 = tpu.matmul %4, %164, %cst_68 {dimension_numbers = #tpu.dot_dimension_numbers<[1], [0], [0], [1], [0, 0, 1, 1], [], []>} : vector<16x128xbf16>, vector<128x256xbf16>, vector<16x256xf32> -> vector<16x256xf32>
    %c0_69 = arith.constant 0 : index
    %c0_70 = arith.constant 0 : index
    %166 = vector.load %arg12[%c0_69, %c0_70] : memref<1x256xf32, #tpu.memory_space<vmem>>, vector<1x256xf32>
    %167 = vector.broadcast %166 : vector<1x256xf32> to vector<16x256xf32>
    %168 = arith.addf %165, %167 : vector<16x256xf32>
    %169 = vector.extract_strided_slice %168 {offsets = [0, 0], sizes = [16, 128], strides = [1, 1]} : vector<16x256xf32> to vector<16x128xf32>
    %170 = vector.extract_strided_slice %168 {offsets = [0, 128], sizes = [16, 128], strides = [1, 1]} : vector<16x256xf32> to vector<16x128xf32>
    %171 = arith.truncf %163 : vector<16x128xf32> to vector<16x128xbf16>
    %172 = arith.truncf %169 : vector<16x128xf32> to vector<16x128xbf16>
    %173 = arith.truncf %170 : vector<16x128xf32> to vector<16x128xbf16>
    %174 = vector.extract_strided_slice %171 {offsets = [0, 0], sizes = [16, 32], strides = [1, 1]} : vector<16x128xbf16> to vector<16x32xbf16>
    %175 = vector.shape_cast %174 : vector<16x32xbf16> to vector<2x8x32xbf16>
    %176 = vector.extract_strided_slice %172 {offsets = [0, 0], sizes = [16, 32], strides = [1, 1]} : vector<16x128xbf16> to vector<16x32xbf16>
    %177 = vector.shape_cast %176 : vector<16x32xbf16> to vector<2x8x32xbf16>
    %178 = vector.extract_strided_slice %173 {offsets = [0, 0], sizes = [16, 32], strides = [1, 1]} : vector<16x128xbf16> to vector<16x32xbf16>
    %179 = vector.shape_cast %178 : vector<16x32xbf16> to vector<2x8x32xbf16>
    "tpu.trace_start"() <{level = 10 : i32, message = "bqd,bkd->bqk"}> : () -> ()
    %cst_71 = arith.constant dense<0.000000e+00> : vector<2x8x8xf32>
    %180 = tpu.matmul %175, %177, %cst_71 {dimension_numbers = #tpu.dot_dimension_numbers<[2], [2], [1], [1], [0, 0, 0, 1, 1, 1], [0], [0]>} : vector<2x8x32xbf16>, vector<2x8x32xbf16>, vector<2x8x8xf32> -> vector<2x8x8xf32>
    "tpu.trace_stop"() : () -> ()
    %cst_72 = arith.constant 0.176776692 : f32
    %181 = vector.broadcast %cst_72 : f32 to vector<2x8x8xf32>
    %182 = arith.mulf %180, %181 : vector<2x8x8xf32>
    %cst_73 = arith.constant -1.000000e+10 : f32
    %183 = vector.shape_cast %17 : vector<2x1x8xi1> to vector<2x1x8xi1>
    %184 = vector.broadcast %183 : vector<2x1x8xi1> to vector<2x8x8xi1>
    %185 = vector.broadcast %cst_73 : f32 to vector<2x8x8xf32>
    %186 = arith.select %184, %182, %185 : vector<2x8x8xi1>, vector<2x8x8xf32>
    %cst_74 = arith.constant dense<0xFF800000> : vector<2x8xf32>
    %187 = vector.multi_reduction <maximumf>, %186, %cst_74 [2] : vector<2x8x8xf32> to vector<2x8xf32>
    %188 = vector.shape_cast %187 : vector<2x8xf32> to vector<2x8x1xf32>
    %189 = vector.broadcast %188 : vector<2x8x1xf32> to vector<2x8x8xf32>
    %190 = arith.subf %186, %189 : vector<2x8x8xf32>
    %191 = math.exp %190 : vector<2x8x8xf32>
    %cst_75 = arith.constant dense<0.000000e+00> : vector<2x8xf32>
    %192 = vector.multi_reduction <add>, %191, %cst_75 [2] : vector<2x8x8xf32> to vector<2x8xf32>
    %193 = vector.shape_cast %192 : vector<2x8xf32> to vector<2x8x1xf32>
    %194 = vector.broadcast %193 : vector<2x8x1xf32> to vector<2x8x8xf32>
    %195 = arith.divf %191, %194 : vector<2x8x8xf32>
    %196 = arith.truncf %195 : vector<2x8x8xf32> to vector<2x8x8xbf16>
    "tpu.trace_start"() <{level = 10 : i32, message = "bqk,bkd->bqd"}> : () -> ()
    %cst_76 = arith.constant dense<0.000000e+00> : vector<2x8x32xf32>
    %197 = tpu.matmul %196, %179, %cst_76 {dimension_numbers = #tpu.dot_dimension_numbers<[2], [1], [1], [2], [0, 0, 0, 1, 1, 2], [0], [0]>} : vector<2x8x8xbf16>, vector<2x8x32xbf16>, vector<2x8x32xf32> -> vector<2x8x32xf32>
    "tpu.trace_stop"() : () -> ()
    %198 = vector.shape_cast %197 : vector<2x8x32xf32> to vector<16x32xf32>
    %c0_77 = arith.constant 0 : index
    %c0_78 = arith.constant 0 : index
    %199 = vector.load %arg22[%c0_77, %c0_78] : memref<16x128xf32, #tpu.memory_space<vmem>>, vector<16x32xf32>
    tpu.vector_store %arg22[%c0_77, %c0_78], %198 {strides = array<i32>} : memref<16x128xf32, #tpu.memory_space<vmem>>, vector<16x32xf32>,
    %200 = vector.extract_strided_slice %171 {offsets = [0, 32], sizes = [16, 32], strides = [1, 1]} : vector<16x128xbf16> to vector<16x32xbf16>
    %201 = vector.shape_cast %200 : vector<16x32xbf16> to vector<2x8x32xbf16>
    %202 = vector.extract_strided_slice %172 {offsets = [0, 32], sizes = [16, 32], strides = [1, 1]} : vector<16x128xbf16> to vector<16x32xbf16>
    %203 = vector.shape_cast %202 : vector<16x32xbf16> to vector<2x8x32xbf16>
    %204 = vector.extract_strided_slice %173 {offsets = [0, 32], sizes = [16, 32], strides = [1, 1]} : vector<16x128xbf16> to vector<16x32xbf16>
    %205 = vector.shape_cast %204 : vector<16x32xbf16> to vector<2x8x32xbf16>
    "tpu.trace_start"() <{level = 10 : i32, message = "bqd,bkd->bqk"}> : () -> ()
    %cst_79 = arith.constant dense<0.000000e+00> : vector<2x8x8xf32>
    %206 = tpu.matmul %201, %203, %cst_79 {dimension_numbers = #tpu.dot_dimension_numbers<[2], [2], [1], [1], [0, 0, 0, 1, 1, 1], [0], [0]>} : vector<2x8x32xbf16>, vector<2x8x32xbf16>, vector<2x8x8xf32> -> vector<2x8x8xf32>
    "tpu.trace_stop"() : () -> ()
    %cst_80 = arith.constant 0.176776692 : f32
    %207 = vector.broadcast %cst_80 : f32 to vector<2x8x8xf32>
    %208 = arith.mulf %206, %207 : vector<2x8x8xf32>
    %cst_81 = arith.constant -1.000000e+10 : f32
    %209 = vector.shape_cast %17 : vector<2x1x8xi1> to vector<2x1x8xi1>
    %210 = vector.broadcast %209 : vector<2x1x8xi1> to vector<2x8x8xi1>
    %211 = vector.broadcast %cst_81 : f32 to vector<2x8x8xf32>
    %212 = arith.select %210, %208, %211 : vector<2x8x8xi1>, vector<2x8x8xf32>
    %cst_82 = arith.constant dense<0xFF800000> : vector<2x8xf32>
    %213 = vector.multi_reduction <maximumf>, %212, %cst_82 [2] : vector<2x8x8xf32> to vector<2x8xf32>
    %214 = vector.shape_cast %213 : vector<2x8xf32> to vector<2x8x1xf32>
    %215 = vector.broadcast %214 : vector<2x8x1xf32> to vector<2x8x8xf32>
    %216 = arith.subf %212, %215 : vector<2x8x8xf32>
    %217 = math.exp %216 : vector<2x8x8xf32>
    %cst_83 = arith.constant dense<0.000000e+00> : vector<2x8xf32>
    %218 = vector.multi_reduction <add>, %217, %cst_83 [2] : vector<2x8x8xf32> to vector<2x8xf32>
    %219 = vector.shape_cast %218 : vector<2x8xf32> to vector<2x8x1xf32>
    %220 = vector.broadcast %219 : vector<2x8x1xf32> to vector<2x8x8xf32>
    %221 = arith.divf %217, %220 : vector<2x8x8xf32>
    %222 = arith.truncf %221 : vector<2x8x8xf32> to vector<2x8x8xbf16>
    "tpu.trace_start"() <{level = 10 : i32, message = "bqk,bkd->bqd"}> : () -> ()
    %cst_84 = arith.constant dense<0.000000e+00> : vector<2x8x32xf32>
    %223 = tpu.matmul %222, %205, %cst_84 {dimension_numbers = #tpu.dot_dimension_numbers<[2], [1], [1], [2], [0, 0, 0, 1, 1, 2], [0], [0]>} : vector<2x8x8xbf16>, vector<2x8x32xbf16>, vector<2x8x32xf32> -> vector<2x8x32xf32>
    "tpu.trace_stop"() : () -> ()
    %224 = vector.shape_cast %223 : vector<2x8x32xf32> to vector<16x32xf32>
    %c0_85 = arith.constant 0 : index
    %c32_86 = arith.constant 32 : index
    %225 = vector.load %arg22[%c0_85, %c32_86] : memref<16x128xf32, #tpu.memory_space<vmem>>, vector<16x32xf32>
    tpu.vector_store %arg22[%c0_85, %c32_86], %224 {strides = array<i32>} : memref<16x128xf32, #tpu.memory_space<vmem>>, vector<16x32xf32>,
    %226 = vector.extract_strided_slice %171 {offsets = [0, 64], sizes = [16, 32], strides = [1, 1]} : vector<16x128xbf16> to vector<16x32xbf16>
    %227 = vector.shape_cast %226 : vector<16x32xbf16> to vector<2x8x32xbf16>
    %228 = vector.extract_strided_slice %172 {offsets = [0, 64], sizes = [16, 32], strides = [1, 1]} : vector<16x128xbf16> to vector<16x32xbf16>
    %229 = vector.shape_cast %228 : vector<16x32xbf16> to vector<2x8x32xbf16>
    %230 = vector.extract_strided_slice %173 {offsets = [0, 64], sizes = [16, 32], strides = [1, 1]} : vector<16x128xbf16> to vector<16x32xbf16>
    %231 = vector.shape_cast %230 : vector<16x32xbf16> to vector<2x8x32xbf16>
    "tpu.trace_start"() <{level = 10 : i32, message = "bqd,bkd->bqk"}> : () -> ()
    %cst_87 = arith.constant dense<0.000000e+00> : vector<2x8x8xf32>
    %232 = tpu.matmul %227, %229, %cst_87 {dimension_numbers = #tpu.dot_dimension_numbers<[2], [2], [1], [1], [0, 0, 0, 1, 1, 1], [0], [0]>} : vector<2x8x32xbf16>, vector<2x8x32xbf16>, vector<2x8x8xf32> -> vector<2x8x8xf32>
    "tpu.trace_stop"() : () -> ()
    %cst_88 = arith.constant 0.176776692 : f32
    %233 = vector.broadcast %cst_88 : f32 to vector<2x8x8xf32>
    %234 = arith.mulf %232, %233 : vector<2x8x8xf32>
    %cst_89 = arith.constant -1.000000e+10 : f32
    %235 = vector.shape_cast %17 : vector<2x1x8xi1> to vector<2x1x8xi1>
    %236 = vector.broadcast %235 : vector<2x1x8xi1> to vector<2x8x8xi1>
    %237 = vector.broadcast %cst_89 : f32 to vector<2x8x8xf32>
    %238 = arith.select %236, %234, %237 : vector<2x8x8xi1>, vector<2x8x8xf32>
    %cst_90 = arith.constant dense<0xFF800000> : vector<2x8xf32>
    %239 = vector.multi_reduction <maximumf>, %238, %cst_90 [2] : vector<2x8x8xf32> to vector<2x8xf32>
    %240 = vector.shape_cast %239 : vector<2x8xf32> to vector<2x8x1xf32>
    %241 = vector.broadcast %240 : vector<2x8x1xf32> to vector<2x8x8xf32>
    %242 = arith.subf %238, %241 : vector<2x8x8xf32>
    %243 = math.exp %242 : vector<2x8x8xf32>
    %cst_91 = arith.constant dense<0.000000e+00> : vector<2x8xf32>
    %244 = vector.multi_reduction <add>, %243, %cst_91 [2] : vector<2x8x8xf32> to vector<2x8xf32>
    %245 = vector.shape_cast %244 : vector<2x8xf32> to vector<2x8x1xf32>
    %246 = vector.broadcast %245 : vector<2x8x1xf32> to vector<2x8x8xf32>
    %247 = arith.divf %243, %246 : vector<2x8x8xf32>
    %248 = arith.truncf %247 : vector<2x8x8xf32> to vector<2x8x8xbf16>
    "tpu.trace_start"() <{level = 10 : i32, message = "bqk,bkd->bqd"}> : () -> ()
    %cst_92 = arith.constant dense<0.000000e+00> : vector<2x8x32xf32>
    %249 = tpu.matmul %248, %231, %cst_92 {dimension_numbers = #tpu.dot_dimension_numbers<[2], [1], [1], [2], [0, 0, 0, 1, 1, 2], [0], [0]>} : vector<2x8x8xbf16>, vector<2x8x32xbf16>, vector<2x8x32xf32> -> vector<2x8x32xf32>
    "tpu.trace_stop"() : () -> ()
    %250 = vector.shape_cast %249 : vector<2x8x32xf32> to vector<16x32xf32>
    %c0_93 = arith.constant 0 : index
    %c64_94 = arith.constant 64 : index
    %251 = vector.load %arg22[%c0_93, %c64_94] : memref<16x128xf32, #tpu.memory_space<vmem>>, vector<16x32xf32>
    tpu.vector_store %arg22[%c0_93, %c64_94], %250 {strides = array<i32>} : memref<16x128xf32, #tpu.memory_space<vmem>>, vector<16x32xf32>,
    %252 = vector.extract_strided_slice %171 {offsets = [0, 96], sizes = [16, 32], strides = [1, 1]} : vector<16x128xbf16> to vector<16x32xbf16>
    %253 = vector.shape_cast %252 : vector<16x32xbf16> to vector<2x8x32xbf16>
    %254 = vector.extract_strided_slice %172 {offsets = [0, 96], sizes = [16, 32], strides = [1, 1]} : vector<16x128xbf16> to vector<16x32xbf16>
    %255 = vector.shape_cast %254 : vector<16x32xbf16> to vector<2x8x32xbf16>
    %256 = vector.extract_strided_slice %173 {offsets = [0, 96], sizes = [16, 32], strides = [1, 1]} : vector<16x128xbf16> to vector<16x32xbf16>
    %257 = vector.shape_cast %256 : vector<16x32xbf16> to vector<2x8x32xbf16>
    "tpu.trace_start"() <{level = 10 : i32, message = "bqd,bkd->bqk"}> : () -> ()
    %cst_95 = arith.constant dense<0.000000e+00> : vector<2x8x8xf32>
    %258 = tpu.matmul %253, %255, %cst_95 {dimension_numbers = #tpu.dot_dimension_numbers<[2], [2], [1], [1], [0, 0, 0, 1, 1, 1], [0], [0]>} : vector<2x8x32xbf16>, vector<2x8x32xbf16>, vector<2x8x8xf32> -> vector<2x8x8xf32>
    "tpu.trace_stop"() : () -> ()
    %cst_96 = arith.constant 0.176776692 : f32
    %259 = vector.broadcast %cst_96 : f32 to vector<2x8x8xf32>
    %260 = arith.mulf %258, %259 : vector<2x8x8xf32>
    %cst_97 = arith.constant -1.000000e+10 : f32
    %261 = vector.shape_cast %17 : vector<2x1x8xi1> to vector<2x1x8xi1>
    %262 = vector.broadcast %261 : vector<2x1x8xi1> to vector<2x8x8xi1>
    %263 = vector.broadcast %cst_97 : f32 to vector<2x8x8xf32>
    %264 = arith.select %262, %260, %263 : vector<2x8x8xi1>, vector<2x8x8xf32>
    %cst_98 = arith.constant dense<0xFF800000> : vector<2x8xf32>
    %265 = vector.multi_reduction <maximumf>, %264, %cst_98 [2] : vector<2x8x8xf32> to vector<2x8xf32>
    %266 = vector.shape_cast %265 : vector<2x8xf32> to vector<2x8x1xf32>
    %267 = vector.broadcast %266 : vector<2x8x1xf32> to vector<2x8x8xf32>
    %268 = arith.subf %264, %267 : vector<2x8x8xf32>
    %269 = math.exp %268 : vector<2x8x8xf32>
    %cst_99 = arith.constant dense<0.000000e+00> : vector<2x8xf32>
    %270 = vector.multi_reduction <add>, %269, %cst_99 [2] : vector<2x8x8xf32> to vector<2x8xf32>
    %271 = vector.shape_cast %270 : vector<2x8xf32> to vector<2x8x1xf32>
    %272 = vector.broadcast %271 : vector<2x8x1xf32> to vector<2x8x8xf32>
    %273 = arith.divf %269, %272 : vector<2x8x8xf32>
    %274 = arith.truncf %273 : vector<2x8x8xf32> to vector<2x8x8xbf16>
    "tpu.trace_start"() <{level = 10 : i32, message = "bqk,bkd->bqd"}> : () -> ()
    %cst_100 = arith.constant dense<0.000000e+00> : vector<2x8x32xf32>
    %275 = tpu.matmul %274, %257, %cst_100 {dimension_numbers = #tpu.dot_dimension_numbers<[2], [1], [1], [2], [0, 0, 0, 1, 1, 2], [0], [0]>} : vector<2x8x8xbf16>, vector<2x8x32xbf16>, vector<2x8x32xf32> -> vector<2x8x32xf32>
    "tpu.trace_stop"() : () -> ()
    %276 = vector.shape_cast %275 : vector<2x8x32xf32> to vector<16x32xf32>
    %c0_101 = arith.constant 0 : index
    %c96_102 = arith.constant 96 : index
    %277 = vector.load %arg22[%c0_101, %c96_102] : memref<16x128xf32, #tpu.memory_space<vmem>>, vector<16x32xf32>
    tpu.vector_store %arg22[%c0_101, %c96_102], %276 {strides = array<i32>} : memref<16x128xf32, #tpu.memory_space<vmem>>, vector<16x32xf32>,
    %c0_103 = arith.constant 0 : index
    %c0_104 = arith.constant 0 : index
    %278 = vector.load %arg22[%c0_103, %c0_104] : memref<16x128xf32, #tpu.memory_space<vmem>>, vector<16x128xf32>
    %279 = arith.truncf %278 : vector<16x128xf32> to vector<16x128xbf16>
    %c0_105 = arith.constant 0 : index
    %c0_106 = arith.constant 0 : index
    %280 = vector.load %arg13[%c0_105, %c0_106] : memref<128x128xbf16, #tpu.memory_space<vmem>>, vector<128x128xbf16>
    %cst_107 = arith.constant dense<0.000000e+00> : vector<16x128xf32>
    %281 = tpu.matmul %279, %280, %cst_107 {dimension_numbers = #tpu.dot_dimension_numbers<[1], [0], [0], [1], [0, 0, 1, 1], [], []>} : vector<16x128xbf16>, vector<128x128xbf16>, vector<16x128xf32> -> vector<16x128xf32>
    %c0_108 = arith.constant 0 : index
    %c0_109 = arith.constant 0 : index
    %282 = vector.load %arg14[%c0_108, %c0_109] : memref<1x128xf32, #tpu.memory_space<vmem>>, vector<1x128xf32>
    %283 = vector.broadcast %282 : vector<1x128xf32> to vector<16x128xf32>
    %284 = arith.addf %281, %283 : vector<16x128xf32>
    %285 = arith.addf %157, %284 : vector<16x128xf32>
    %cst_110 = arith.constant dense<0.000000e+00> : vector<16xf32>
    %286 = vector.multi_reduction <add>, %285, %cst_110 [1] : vector<16x128xf32> to vector<16xf32>
    %287 = vector.shape_cast %286 : vector<16xf32> to vector<16x1xf32>
    %cst_111 = arith.constant 1.280000e+02 : f32
    %288 = vector.broadcast %cst_111 : f32 to vector<16x1xf32>
    %289 = arith.divf %287, %288 : vector<16x1xf32>
    %290 = vector.broadcast %289 : vector<16x1xf32> to vector<16x128xf32>
    %291 = arith.subf %285, %290 : vector<16x128xf32>
    %292 = arith.mulf %291, %291 : vector<16x128xf32>
    %cst_112 = arith.constant dense<0.000000e+00> : vector<16xf32>
    %293 = vector.multi_reduction <add>, %292, %cst_112 [1] : vector<16x128xf32> to vector<16xf32>
    %294 = vector.shape_cast %293 : vector<16xf32> to vector<16x1xf32>
    %cst_113 = arith.constant 1.280000e+02 : f32
    %295 = vector.broadcast %cst_113 : f32 to vector<16x1xf32>
    %296 = arith.divf %294, %295 : vector<16x1xf32>
    %297 = vector.broadcast %289 : vector<16x1xf32> to vector<16x128xf32>
    %298 = arith.subf %285, %297 : vector<16x128xf32>
    %cst_114 = arith.constant 9.99999974E-6 : f32
    %299 = vector.broadcast %cst_114 : f32 to vector<16x1xf32>
    %300 = arith.addf %296, %299 : vector<16x1xf32>
    %301 = math.rsqrt %300 : vector<16x1xf32>
    %302 = vector.broadcast %301 : vector<16x1xf32> to vector<16x128xf32>
    %303 = arith.mulf %298, %302 : vector<16x128xf32>
    %304 = vector.broadcast %18 : vector<1x128xf32> to vector<16x128xf32>
    %305 = arith.mulf %303, %304 : vector<16x128xf32>
    %306 = vector.broadcast %19 : vector<1x128xf32> to vector<16x128xf32>
    %307 = arith.addf %305, %306 : vector<16x128xf32>
    %308 = arith.truncf %307 : vector<16x128xf32> to vector<16x128xbf16>
    %c0_115 = arith.constant 0 : index
    %c0_116 = arith.constant 0 : index
    %309 = vector.load %arg15[%c0_115, %c0_116] : memref<128x256xbf16, #tpu.memory_space<vmem>>, vector<128x256xbf16>
    %cst_117 = arith.constant dense<0.000000e+00> : vector<16x256xf32>
    %310 = tpu.matmul %308, %309, %cst_117 {dimension_numbers = #tpu.dot_dimension_numbers<[1], [0], [0], [1], [0, 0, 1, 1], [], []>} : vector<16x128xbf16>, vector<128x256xbf16>, vector<16x256xf32> -> vector<16x256xf32>
    %c0_118 = arith.constant 0 : index
    %c0_119 = arith.constant 0 : index
    %311 = vector.load %arg16[%c0_118, %c0_119] : memref<1x256xf32, #tpu.memory_space<vmem>>, vector<1x256xf32>
    %312 = vector.broadcast %311 : vector<1x256xf32> to vector<16x256xf32>
    %313 = arith.addf %310, %312 : vector<16x256xf32>
    %cst_120 = arith.constant 0.000000e+00 : f32
    %314 = vector.broadcast %cst_120 : f32 to vector<16x256xf32>
    %315 = arith.maximumf %313, %314 : vector<16x256xf32>
    %316 = arith.truncf %315 : vector<16x256xf32> to vector<16x256xbf16>
    %c0_121 = arith.constant 0 : index
    %c0_122 = arith.constant 0 : index
    %317 = vector.load %arg17[%c0_121, %c0_122] : memref<256x128xbf16, #tpu.memory_space<vmem>>, vector<256x128xbf16>
    %cst_123 = arith.constant dense<0.000000e+00> : vector<16x128xf32>
    %318 = tpu.matmul %316, %317, %cst_123 {dimension_numbers = #tpu.dot_dimension_numbers<[1], [0], [0], [1], [0, 0, 1, 1], [], []>} : vector<16x256xbf16>, vector<256x128xbf16>, vector<16x128xf32> -> vector<16x128xf32>
    %c0_124 = arith.constant 0 : index
    %c0_125 = arith.constant 0 : index
    %319 = vector.load %arg18[%c0_124, %c0_125] : memref<1x128xf32, #tpu.memory_space<vmem>>, vector<1x128xf32>
    %320 = vector.broadcast %319 : vector<1x128xf32> to vector<16x128xf32>
    %321 = arith.addf %318, %320 : vector<16x128xf32>
    %322 = arith.addf %307, %321 : vector<16x128xf32>
    %cst_126 = arith.constant dense<0.000000e+00> : vector<16xf32>
    %323 = vector.multi_reduction <add>, %322, %cst_126 [1] : vector<16x128xf32> to vector<16xf32>
    %324 = vector.shape_cast %323 : vector<16xf32> to vector<16x1xf32>
    %cst_127 = arith.constant 1.280000e+02 : f32
    %325 = vector.broadcast %cst_127 : f32 to vector<16x1xf32>
    %326 = arith.divf %324, %325 : vector<16x1xf32>
    %327 = vector.broadcast %326 : vector<16x1xf32> to vector<16x128xf32>
    %328 = arith.subf %322, %327 : vector<16x128xf32>
    %329 = arith.mulf %328, %328 : vector<16x128xf32>
    %cst_128 = arith.constant dense<0.000000e+00> : vector<16xf32>
    %330 = vector.multi_reduction <add>, %329, %cst_128 [1] : vector<16x128xf32> to vector<16xf32>
    %331 = vector.shape_cast %330 : vector<16xf32> to vector<16x1xf32>
    %cst_129 = arith.constant 1.280000e+02 : f32
    %332 = vector.broadcast %cst_129 : f32 to vector<16x1xf32>
    %333 = arith.divf %331, %332 : vector<16x1xf32>
    %334 = vector.broadcast %326 : vector<16x1xf32> to vector<16x128xf32>
    %335 = arith.subf %322, %334 : vector<16x128xf32>
    %cst_130 = arith.constant 9.99999974E-6 : f32
    %336 = vector.broadcast %cst_130 : f32 to vector<16x1xf32>
    %337 = arith.addf %333, %336 : vector<16x1xf32>
    %338 = math.rsqrt %337 : vector<16x1xf32>
    %339 = vector.broadcast %338 : vector<16x1xf32> to vector<16x128xf32>
    %340 = arith.mulf %335, %339 : vector<16x128xf32>
    %341 = vector.broadcast %18 : vector<1x128xf32> to vector<16x128xf32>
    %342 = arith.mulf %340, %341 : vector<16x128xf32>
    %343 = vector.broadcast %19 : vector<1x128xf32> to vector<16x128xf32>
    %344 = arith.addf %342, %343 : vector<16x128xf32>
    %345 = vector.shape_cast %344 : vector<16x128xf32> to vector<2x8x128xf32>
    %346 = arith.truncf %345 : vector<2x8x128xf32> to vector<2x8x128xbf16>
    %c0_131 = arith.constant 0 : index
    %c0_132 = arith.constant 0 : index
    %c0_133 = arith.constant 0 : index
    %347 = vector.load %arg21[%c0_131, %c0_132, %c0_133] : memref<2x8x128xbf16, #tpu.memory_space<vmem>>, vector<2x8x128xbf16>
    tpu.vector_store %arg21[%c0_131, %c0_132, %c0_133], %346 {strides = array<i32>} : memref<2x8x128xbf16, #tpu.memory_space<vmem>>, vector<2x8x128xbf16>,
    return
  }
  func.func @transform_0(%arg0: i32) -> (i32, i32, i32) {
    %c0_i32 = arith.constant 0 : i32
    %c0_i32_0 = arith.constant 0 : i32
    %c0_i32_1 = arith.constant 0 : i32
    return %arg0, %c0_i32, %c0_i32_0 : i32, i32, i32
  }
  func.func @transform_1(%arg0: i32) -> (i32, i32, i32) {
    %c0_i32 = arith.constant 0 : i32
    %c0_i32_0 = arith.constant 0 : i32
    %c0_i32_1 = arith.constant 0 : i32
    return %arg0, %c0_i32, %c0_i32_0 : i32, i32, i32
  }
  func.func @transform_2(%arg0: i32) -> (i32, i32, i32) {
    %c0_i32 = arith.constant 0 : i32
    %c0_i32_0 = arith.constant 0 : i32
    %c0_i32_1 = arith.constant 0 : i32
    return %arg0, %c0_i32, %c0_i32_0 : i32, i32, i32
  }
  func.func @transform_3(%arg0: i32) -> (i32, i32, i32) {
    %c0_i32 = arith.constant 0 : i32
    %c0_i32_0 = arith.constant 0 : i32
    %c0_i32_1 = arith.constant 0 : i32
    return %arg0, %c0_i32, %c0_i32_0 : i32, i32, i32
  }
  func.func @transform_4(%arg0: i32) -> (i32, i32) {
    %c0_i32 = arith.constant 0 : i32
    %c0_i32_0 = arith.constant 0 : i32
    %c0_i32_1 = arith.constant 0 : i32
    return %c0_i32, %c0_i32_0 : i32, i32
  }
  func.func @transform_5(%arg0: i32) -> (i32, i32) {
    %c0_i32 = arith.constant 0 : i32
    %c0_i32_0 = arith.constant 0 : i32
    %c0_i32_1 = arith.constant 0 : i32
    return %c0_i32, %c0_i32_0 : i32, i32
  }
  func.func @transform_6(%arg0: i32) -> (i32, i32) {
    %c0_i32 = arith.constant 0 : i32
    %c0_i32_0 = arith.constant 0 : i32
    %c0_i32_1 = arith.constant 0 : i32
    return %c0_i32, %c0_i32_0 : i32, i32
  }
  func.func @transform_7(%arg0: i32) -> (i32, i32) {
    %c0_i32 = arith.constant 0 : i32
    %c0_i32_0 = arith.constant 0 : i32
    %c0_i32_1 = arith.constant 0 : i32
    return %c0_i32, %c0_i32_0 : i32, i32
  }
  func.func @transform_8(%arg0: i32) -> (i32, i32) {
    %c0_i32 = arith.constant 0 : i32
    %c0_i32_0 = arith.constant 0 : i32
    %c0_i32_1 = arith.constant 0 : i32
    return %c0_i32, %c0_i32_0 : i32, i32
  }
  func.func @transform_9(%arg0: i32) -> (i32, i32) {
    %c0_i32 = arith.constant 0 : i32
    %c0_i32_0 = arith.constant 0 : i32
    %c0_i32_1 = arith.constant 0 : i32
    return %c0_i32, %c0_i32_0 : i32, i32
  }
  func.func @transform_10(%arg0: i32) -> (i32, i32) {
    %c0_i32 = arith.constant 0 : i32
    %c0_i32_0 = arith.constant 0 : i32
    %c0_i32_1 = arith.constant 0 : i32
    return %c0_i32, %c0_i32_0 : i32, i32
  }
  func.func @transform_11(%arg0: i32) -> (i32, i32) {
    %c0_i32 = arith.constant 0 : i32
    %c0_i32_0 = arith.constant 0 : i32
    %c0_i32_1 = arith.constant 0 : i32
    return %c0_i32, %c0_i32_0 : i32, i32
  }
  func.func @transform_12(%arg0: i32) -> (i32, i32) {
    %c0_i32 = arith.constant 0 : i32
    %c0_i32_0 = arith.constant 0 : i32
    %c0_i32_1 = arith.constant 0 : i32
    return %c0_i32, %c0_i32_0 : i32, i32
  }
  func.func @transform_13(%arg0: i32) -> (i32, i32) {
    %c0_i32 = arith.constant 0 : i32
    %c0_i32_0 = arith.constant 0 : i32
    %c0_i32_1 = arith.constant 0 : i32
    return %c0_i32, %c0_i32_0 : i32, i32
  }
  func.func @transform_14(%arg0: i32) -> (i32, i32) {
    %c0_i32 = arith.constant 0 : i32
    %c0_i32_0 = arith.constant 0 : i32
    %c0_i32_1 = arith.constant 0 : i32
    return %c0_i32, %c0_i32_0 : i32, i32
  }
  func.func @transform_15(%arg0: i32) -> (i32, i32) {
    %c0_i32 = arith.constant 0 : i32
    %c0_i32_0 = arith.constant 0 : i32
    %c0_i32_1 = arith.constant 0 : i32
    return %c0_i32, %c0_i32_0 : i32, i32
  }
  func.func @transform_16(%arg0: i32) -> (i32, i32) {
    %c0_i32 = arith.constant 0 : i32
    %c0_i32_0 = arith.constant 0 : i32
    %c0_i32_1 = arith.constant 0 : i32
    return %c0_i32, %c0_i32_0 : i32, i32
  }
  func.func @transform_17(%arg0: i32) -> (i32, i32) {
    %c0_i32 = arith.constant 0 : i32
    %c0_i32_0 = arith.constant 0 : i32
    %c0_i32_1 = arith.constant 0 : i32
    return %c0_i32, %c0_i32_0 : i32, i32
  }
  func.func @transform_18(%arg0: i32) -> (i32, i32) {
    %c0_i32 = arith.constant 0 : i32
    %c0_i32_0 = arith.constant 0 : i32
    %c0_i32_1 = arith.constant 0 : i32
    return %c0_i32, %c0_i32_0 : i32, i32
  }
  func.func @transform_19(%arg0: i32) -> (i32, i32) {
    %c0_i32 = arith.constant 0 : i32
    %c0_i32_0 = arith.constant 0 : i32
    %c0_i32_1 = arith.constant 0 : i32
    return %c0_i32, %c0_i32_0 : i32, i32
  }
  func.func @transform_20(%arg0: i32) -> (i32, i32, i32) {
    %c0_i32 = arith.constant 0 : i32
    %c0_i32_0 = arith.constant 0 : i32
    %c0_i32_1 = arith.constant 0 : i32
    return %arg0, %c0_i32, %c0_i32_0 : i32, i32, i32
  }
}

</mosaic_0001>

<bundles_post_ra>
// kernel: decoder_forward.5
= control target key start
LH: loop header
LB: loop body
LE: loop exit
PB: predicated region body
PF: predicated region fallthrough
CT: control target
= control target key end

     0   :  { %v250_v1 = vmov 0.0   ;;  %vm251_vm0 = vmmov 0   ;;  %s317_s0 = inlined_call_operand.vmem [shape: bf16[16,128], index: 0, kind: input, shape index: {}]   ;;  %s318_s1 = inlined_call_operand.vmem [shape: bf16[128,128], index: 1, kind: input, shape index: {}]   ;;  %s319_s2 = inlined_call_operand.vmem [shape: f32[1,128], index: 2, kind: input, shape index: {}]   ;;  %s320_s3 = inlined_call_operand.hbm [shape: f32[16,128], index: 3, kind: output, shape index: {}]  }
   0x1   :  { %v217_v0 = vld [vmem:[%s318_s1] sm:$0xff]   ;;  %192 = vmatprep.subr.bf16.mxu0 %v250_v1  ;;  %v218_v2 = vld [vmem:[%s318_s1 + $0x8] sm:$0xff]   ;;  %208 = vmatprep.mubr.msk.bf16.mxu0 %vm251_vm0, %v250_v1  ;;  %v219_v3 = vld [vmem:[%s318_s1 + $0x10] sm:$0xff]  }
   0x2   :  { %193 = vmatpush3.bf16.msra.mxu0 %v217_v0 }
   0x3   :  { %194 = vmatprep.subr.bf16.mxu0 %v250_v1 }
   0x6   :  { %195 = vmatpush3.bf16.msra.mxu0 %v218_v2 }
   0x7   :  { %196 = vmatprep.subr.bf16.mxu0 %v250_v1 }
   0x8   :  { %8 = vsyncpa [#allocation4], 0  ;;  %v220_v4 = vld [vmem:[%s318_s1 + $0x18] sm:$0xff]   ;;  %v221_v5 = vld [vmem:[%s318_s1 + $0x20] sm:$0xff]   ;;  %s252_s5 = smov [#allocation3]  }
   0x9   :  { %v222_v6 = vld [vmem:[%s318_s1 + $0x28] sm:$0xff]   ;;  %v223_v7 = vld [vmem:[%s318_s1 + $0x30] sm:$0xff]   ;;  %v224_v8 = vld [vmem:[%s318_s1 + $0x38] sm:$0xff]   ;;  %s162_s6 = sshll.u32 %s252_s5, 4  ;;  %s163_s6 = int_to_ptr.vmem [resolvable:$true] %s162_s6 }
   0xa   :  { %197 = vmatpush3.bf16.msra.mxu0 %v219_v3  ;;  %v225_v9 = vld [vmem:[%s317_s0] sm:$0xff]   ;;  %s226_s1 = scalar_lea.vmem %s163_s6, 256  ;;  %p231_p1 = scmp.lt.s32.totalorder %s163_s6, %s163_s6 }
   0xb   :  { %198 = vmatprep.subr.bf16.mxu0 %v250_v1  ;;  %v182_v10 = vld [vmem:[%s319_s2] ss:$0 sm:$0xff]  ;;  %p227_p0 = scmp.ne.s32.totalorder %s163_s6, %s226_s1  ;;  %p232_p2 = scmp.lt.s32.totalorder %s226_s1, %s226_s1 }
   0xd   :  { %p233_p3 = por %p232_p2, %p231_p1 }
   0xe   :  { %199 = vmatpush3.bf16.msra.mxu0 %v220_v4 }
   0xf   :  { %200 = vmatprep.subr.bf16.mxu0 %v250_v1  ;;  %p234_p4 = pnand %p233_p3, %p227_p0 }
  0x12   :  { %201 = vmatpush3.bf16.msra.mxu0 %v221_v5 }
  0x13   :  { %202 = vmatprep.subr.bf16.mxu0 %v250_v1 }
  0x16   :  { %203 = vmatpush3.bf16.msra.mxu0 %v222_v6 }
  0x17   :  { %204 = vmatprep.subr.bf16.mxu0 %v250_v1 }
  0x1a   :  { %205 = vmatpush3.bf16.msra.mxu0 %v223_v7 }
  0x1b   :  { %206 = vmatprep.subr.bf16.mxu0 %v250_v1 }
  0x1e   :  { %207 = vmatpush3.bf16.msra.mxu0 %v224_v8 }
  0x21   :  { %209 = vmatmul.mubr.bf16.vlgmr.msra.gmra.mrb[0].mxu0 %v225_v9 }
  0xf4   :  { %v130_v11 = vpop.f32.mrb[0].mxu0 }
  0xf5   :  { %v153_v12 = vadd.f32 %v182_v10, %v130_v11  ;;  %v210_v13 = vpop.f32.mrb[1].mxu0 }
  0xf6   :  { %v133_v14 = vpop.f32.mrb[2].mxu0 }
  0xf7   :  { %155 = vst [vmem:[#allocation3] sm:$0xff] %v153_v12  ;;  %v154_v15 = vadd.f32 %v182_v10, %v133_v14  ;;  %v211_v16 = vpop.f32.mrb[3].mxu0 }
  0xf9   :  { %156 = vst [vmem:[#allocation3 + $0x8] sm:$0xff] %v154_v15 }
  0xfa   :  { %237 = shalt.err (!%p234_p4)
}
  0xfb   :  { %s238_s7 = scalar_lea.hbm %s320_s3, 256 }
  0xfc   :  { %p239_p5 = scmp.ne.s32.totalorder %s320_s3, %s238_s7  ;;  %p242_p6 = scmp.lt.u32.totalorder %s238_s7, %s320_s3 }
  0xfe   :  { %p244_p7 = pnand %p242_p6, %p239_p5 }
 0x100   :  { %247 = shalt.err (!%p244_p7)
}
 0x101   :  { %s253_s12 = smov 128   ;;  %s254_s13 = smov 8  }
 0x102   :  { %168 = dma.vmem_to_hbm [thread:$0]  %s163_s6, 256, %s320_s3, [#allocation4], %s253_s12, %s253_s12, %s254_s13  }
 0x103   :  { %248 = dma.done.wait [#allocation4], 256  }
 0x104   :  { %249 = vsyncadd [#allocation4], 4294967040 }
 0x105   :  { %172 = vsyncpa [#allocation4], 1 }

// kernel: decoder_forward.3
= control target key start
LH: loop header
LB: loop body
LE: loop exit
PB: predicated region body
PF: predicated region fallthrough
CT: control target
= control target key end

     0   :  { %s5385_s0 = inlined_call_operand.vmem [shape: bf16[2,8,128], index: 0, kind: input, shape index: {}]   ;;  %s5386_s1 = inlined_call_operand.vmem [shape: bf16[2,8,128], index: 1, kind: input, shape index: {}]   ;;  %s5387_s2 = inlined_call_operand.vmem [shape: s32[2,8,1], index: 2, kind: input, shape index: {}]   ;;  %s5388_s3 = inlined_call_operand.vmem [shape: s32[2,1,8], index: 3, kind: input, shape index: {}]   ;;  %s5389_s4 = inlined_call_operand.vmem [shape: bf16[128,384], index: 4, kind: input, shape index: {}]   ;;  %s5390_s5 = inlined_call_operand.hbm [shape: f32[1,384], index: 5, kind: input, shape index: {}]   ;;  %s5391_s6 = inlined_call_operand.vmem [shape: bf16[128,128], index: 6, kind: input, shape index: {}]   ;;  %s5392_s7 = inlined_call_operand.hbm [shape: f32[1,128], index: 7, kind: input, shape index: {}]   ;;  %s5393_s8 = inlined_call_operand.hbm [shape: bf16[128,128], index: 8, kind: input, shape index: {}]   ;;  %s5394_s9 = inlined_call_operand.hbm [shape: f32[1,128], index: 9, kind: input, shape index: {}]   ;;  %s5395_s10 = inlined_call_operand.vmem [shape: bf16[128,256], index: 10, kind: input, shape index: {}]   ;;  %s5396_s11 = inlined_call_operand.hbm [shape: f32[1,256], index: 11, kind: input, shape index: {}]   ;;  %s5397_s12 = inlined_call_operand.hbm [shape: bf16[128,128], index: 12, kind: input, shape index: {}]   ;;  %s5398_s13 = inlined_call_operand.hbm [shape: f32[1,128], index: 13, kind: input, shape index: {}]   ;;  %s5399_s14 = inlined_call_operand.hbm [shape: bf16[128,256], index: 14, kind: input, shape index: {}]   ;;  %s5400_s15 = inlined_call_operand.hbm [shape: f32[1,256], index: 15, kind: input, shape index: {}]   ;;  %s5401_s16 = inlined_call_operand.hbm [shape: bf16[256,128], index: 16, kind: input, shape index: {}]   ;;  %s5402_s17 = inlined_call_operand.hbm [shape: f32[1,128], index: 17, kind: input, shape index: {}]   ;;  %s5403_s18 = inlined_call_operand.hbm [shape: f32[1,128], index: 18, kind: input, shape index: {}]   ;;  %s5404_s19 = inlined_call_operand.hbm [shape: f32[1,128], index: 19, kind: input, shape index: {}]   ;;  %s5405_s20 = inlined_call_operand.vmem [shape: bf16[2,8,128], index: 20, kind: output, shape index: {}]  }
   0x1   :  { %5410 = sst [smem:[#allocation30_spill]] %s5385_s0 }
   0x2   :  { %5411 = sst [smem:[#allocation31_spill]] %s5386_s1 }
   0x3   :  { %5412 = sst [smem:[#allocation32_spill]] %s5387_s2 }
   0x4   :  { %5413 = sst [smem:[#allocation33_spill]] %s5388_s3 }
   0x5   :  { %5414 = sst [smem:[#allocation34_spill]] %s5389_s4 }
   0x6   :  { %25 = vsyncpa [#allocation4], 0 }
   0x7   :  { %26 = vsyncpa [#allocation6], 0 }
   0x8   :  { %27 = vsyncpa [#allocation9], 0 }
   0x9   :  { %28 = vsyncpa [#allocation12], 0 }
   0xa   :  { %29 = vsyncpa [#allocation15], 0 }
   0xb   :  { %30 = vsyncpa [#allocation18], 0 }
   0xc   :  { %31 = vsyncpa [#allocation21], 0  ;;  %s4437_s1 = smov [#allocation5]   ;;  %s4438_s23 = smov [#allocation8]  }
   0xd   :  { %s60_s22 = sshll.u32 %s4437_s1, 4  ;;  %s82_s24 = sshll.u32 %s4438_s23, 4  ;;  %s61_s22 = int_to_ptr.vmem [resolvable:$true] %s60_s22  ;;  %s83_s24 = int_to_ptr.vmem [resolvable:$true] %s82_s24 }
   0xe   :  { %s4137_s3 = scalar_lea.hbm %s5392_s7, 16 }
   0xf   :  { %p4138_p0 = scmp.ne.s32.totalorder %s5392_s7, %s4137_s3  ;;  %p4141_p1 = scmp.lt.u32.totalorder %s4137_s3, %s5392_s7 }
  0x11   :  { %p4143_p2 = pnand %p4141_p1, %p4138_p0 }
  0x13   :  { %4146 = shalt.err (!%p4143_p2)
}
  0x14   :  { %s4147_s29 = scalar_lea.vmem %s61_s22, 16  ;;  %s4151_s30 = scalar_lea.vmem %s61_s22, 32 }
  0x15   :  { %p4148_p3 = scmp.ne.s32.totalorder %s61_s22, %s4147_s29  ;;  %p4152_p4 = scmp.lt.s32.totalorder %s61_s22, %s61_s22 }
  0x16   :  { %p4153_p5 = scmp.lt.s32.totalorder %s4151_s30, %s4147_s29 }
  0x18   :  { %p4154_p6 = por %p4153_p5, %p4152_p4 }
  0x1a   :  { %p4155_p7 = pnand %p4154_p6, %p4148_p3 }
  0x1c   :  { %4158 = shalt.err (!%p4155_p7)
}
  0x1d   :  { %63 = dma.hbm_to_vmem [thread:$0]  %s5392_s7, 16, %s61_s22, [#allocation6]  }
  0x1e   :  { %s4159_s2 = scalar_lea.hbm %s5394_s9, 16 }
  0x1f   :  { %p4160_p8 = scmp.ne.s32.totalorder %s5394_s9, %s4159_s2  ;;  %p4163_p9 = scmp.lt.u32.totalorder %s4159_s2, %s5394_s9 }
  0x21   :  { %p4165_p10 = pnand %p4163_p9, %p4160_p8 }
  0x23   :  { %4168 = shalt.err (!%p4165_p10)
}
  0x24   :  { %s4169_s28 = scalar_lea.vmem %s83_s24, 16  ;;  %s4173_s4 = scalar_lea.vmem %s83_s24, 32 }
  0x25   :  { %p4170_p11 = scmp.ne.s32.totalorder %s83_s24, %s4169_s28  ;;  %p4174_p12 = scmp.lt.s32.totalorder %s83_s24, %s83_s24 }
  0x26   :  { %p4175_p13 = scmp.lt.s32.totalorder %s4173_s4, %s4169_s28 }
  0x28   :  { %p4176_p0 = por %p4175_p13, %p4174_p12 }
  0x2a   :  { %p4177_p1 = pnand %p4176_p0, %p4170_p11 }
  0x2c   :  { %4180 = shalt.err (!%p4177_p1)
}
  0x2d   :  { %85 = dma.hbm_to_vmem [thread:$0]  %s5394_s9, 16, %s83_s24, [#allocation9]  }
  0x2e   :  { %s4439_s29 = smov [#allocation11]   ;;  %s4440_s0 = smov [#allocation14]  }
  0x2f   :  { %s103_s30 = sshll.u32 %s4439_s29, 4  ;;  %s125_s21 = sshll.u32 %s4440_s0, 4  ;;  %s104_s30 = int_to_ptr.vmem [resolvable:$true] %s103_s30  ;;  %s4588_s21 = int_to_ptr.vmem [resolvable:$true] %s125_s21 }
  0x30   :  { %s4181_s2 = scalar_lea.hbm %s5397_s12, 1024 }
  0x31   :  { %p4182_p2 = scmp.ne.s32.totalorder %s5397_s12, %s4181_s2  ;;  %p4185_p3 = scmp.lt.u32.totalorder %s4181_s2, %s5397_s12 }
  0x33   :  { %p4187_p4 = pnand %p4185_p3, %p4182_p2 }
  0x35   :  { %4190 = shalt.err (!%p4187_p4)
}
  0x36   :  { %s4191_s9 = scalar_lea.vmem %s104_s30, 1024  ;;  %p4196_p6 = scmp.lt.s32.totalorder %s104_s30, %s104_s30 }
  0x37   :  { %p4192_p5 = scmp.ne.s32.totalorder %s104_s30, %s4191_s9  ;;  %p4197_p7 = scmp.lt.s32.totalorder %s4191_s9, %s4191_s9 }
  0x39   :  { %p4198_p8 = por %p4197_p7, %p4196_p6 }
  0x3b   :  { %p4199_p9 = pnand %p4198_p8, %p4192_p5 }
  0x3d   :  { %4202 = shalt.err (!%p4199_p9)
}
  0x3e   :  { %s4441_s24 = smov 64   ;;  %s4442_s28 = smov 4  }
  0x3f   :  { %109 = dma.hbm_to_vmem [thread:$0]  %s5397_s12, 1024, %s104_s30, [#allocation12], %s4441_s24, %s4441_s24, %s4442_s28  }
  0x40   :  { %s4203_s0 = scalar_lea.hbm %s5399_s14, 2048 }
  0x41   :  { %p4204_p10 = scmp.ne.s32.totalorder %s5399_s14, %s4203_s0  ;;  %p4207_p11 = scmp.lt.u32.totalorder %s4203_s0, %s5399_s14 }
  0x43   :  { %p4209_p12 = pnand %p4207_p11, %p4204_p10 }
  0x45   :  { %4212 = shalt.err (!%p4209_p12)
}
  0x46   :  { %s4213_s3 = scalar_lea.vmem %s4588_s21, 2048  ;;  %p4218_p0 = scmp.lt.s32.totalorder %s4588_s21, %s4588_s21 }
  0x47   :  { %p4214_p13 = scmp.ne.s32.totalorder %s4588_s21, %s4213_s3  ;;  %p4219_p1 = scmp.lt.s32.totalorder %s4213_s3, %s4213_s3 }
  0x49   :  { %p4220_p2 = por %p4219_p1, %p4218_p0 }
  0x4b   :  { %p4221_p3 = pnand %p4220_p2, %p4214_p13 }
  0x4d   :  { %4224 = shalt.err (!%p4221_p3)
}
  0x4e   :  { %s4443_s12 = smov 128   ;;  %s4444_s30 = smov 8  }
  0x4f   :  { %131 = dma.hbm_to_vmem [thread:$0]  %s5399_s14, 2048, %s4588_s21, [#allocation15], %s4443_s12, %s4443_s12, %s4444_s30  }
  0x50   :  { %s4445_s9 = smov [#allocation17]   ;;  %s4446_s7 = smov [#allocation20]  }
  0x51   :  { %s147_s4 = sshll.u32 %s4445_s9, 4  ;;  %s170_s22 = sshll.u32 %s4446_s7, 4  ;;  %s148_s4 = int_to_ptr.vmem [resolvable:$true] %s147_s4  ;;  %s171_s22 = int_to_ptr.vmem [resolvable:$true] %s170_s22 }
  0x52   :  { %s4225_s1 = scalar_lea.hbm %s5401_s16, 2048 }
  0x53   :  { %p4226_p4 = scmp.ne.s32.totalorder %s5401_s16, %s4225_s1  ;;  %p4229_p5 = scmp.lt.u32.totalorder %s4225_s1, %s5401_s16 }
  0x55   :  { %p4231_p6 = pnand %p4229_p5, %p4226_p4 }
  0x57   :  { %4234 = shalt.err (!%p4231_p6)
}
  0x58   :  { %s4235_s14 = scalar_lea.vmem %s148_s4, 2048  ;;  %p4240_p8 = scmp.lt.s32.totalorder %s148_s4, %s148_s4 }
  0x59   :  { %p4236_p7 = scmp.ne.s32.totalorder %s148_s4, %s4235_s14  ;;  %p4241_p9 = scmp.lt.s32.totalorder %s4235_s14, %s4235_s14 }
  0x5b   :  { %p4242_p10 = por %p4241_p9, %p4240_p8 }
  0x5d   :  { %p4243_p11 = pnand %p4242_p10, %p4236_p7 }
  0x5f   :  { %4246 = shalt.err (!%p4243_p11)
}
  0x60   :  { %153 = dma.hbm_to_vmem [thread:$0]  %s5401_s16, 2048, %s148_s4, [#allocation18], %s4441_s24, %s4441_s24, %s4442_s28  }
  0x61   :  { %s4247_s27 = scalar_lea.hbm %s5403_s18, 16 }
  0x62   :  { %p4248_p12 = scmp.ne.s32.totalorder %s5403_s18, %s4247_s27  ;;  %p4251_p13 = scmp.lt.u32.totalorder %s4247_s27, %s5403_s18 }
  0x64   :  { %p4253_p0 = pnand %p4251_p13, %p4248_p12 }
  0x66   :  { %4256 = shalt.err (!%p4253_p0)
}
  0x67   :  { %s4257_s1 = scalar_lea.vmem %s171_s22, 16  ;;  %s4261_s23 = scalar_lea.vmem %s171_s22, 32 }
  0x68   :  { %p4258_p1 = scmp.ne.s32.totalorder %s171_s22, %s4257_s1  ;;  %p4262_p2 = scmp.lt.s32.totalorder %s171_s22, %s171_s22 }
  0x69   :  { %p4263_p3 = scmp.lt.s32.totalorder %s4261_s23, %s4257_s1 }
  0x6b   :  { %p4264_p4 = por %p4263_p3, %p4262_p2 }
  0x6d   :  { %p4265_p5 = pnand %p4264_p4, %p4258_p1 }
  0x6f   :  { %4268 = shalt.err (!%p4265_p5)
}
  0x70   :  { %173 = dma.hbm_to_vmem [thread:$0]  %s5403_s18, 16, %s171_s22, [#allocation21]  }
  0x71   :  { %s4447_s2 = smov [#allocation3]   ;;  %s4448_s3 = smov [#allocation7]  }
  0x72   :  { %s48_s25 = sshll.u32 %s4447_s2, 4  ;;  %s69_s14 = sshll.u32 %s4448_s3, 4  ;;  %s49_s25 = int_to_ptr.vmem [resolvable:$true] %s48_s25  ;;  %s4649_s14 = int_to_ptr.vmem [resolvable:$true] %s69_s14 }
  0x73   :  { %s4269_s30 = scalar_lea.hbm %s5390_s5, 48 }
  0x74   :  { %p4270_p6 = scmp.ne.s32.totalorder %s5390_s5, %s4269_s30  ;;  %p4273_p7 = scmp.lt.u32.totalorder %s4269_s30, %s5390_s5 }
  0x76   :  { %p4275_p8 = pnand %p4273_p7, %p4270_p6 }
  0x78   :  { %4278 = shalt.err (!%p4275_p8)
}
  0x79   :  { %s4279_s18 = scalar_lea.vmem %s49_s25, 48  ;;  %s4283_s22 = scalar_lea.vmem %s49_s25, 64 }
  0x7a   :  { %p4280_p9 = scmp.ne.s32.totalorder %s49_s25, %s4279_s18  ;;  %p4284_p10 = scmp.lt.s32.totalorder %s49_s25, %s49_s25 }
  0x7b   :  { %p4285_p11 = scmp.lt.s32.totalorder %s4283_s22, %s4279_s18 }
  0x7d   :  { %p4286_p12 = por %p4285_p11, %p4284_p10 }
  0x7f   :  { %p4287_p13 = pnand %p4286_p12, %p4280_p9 }
  0x81   :  { %4290 = shalt.err (!%p4287_p13)
}
  0x82   :  { %51 = dma.hbm_to_vmem [thread:$0]  %s5390_s5, 48, %s49_s25, [#allocation4]  }
  0x83   :  { %s4291_s16 = scalar_lea.hbm %s5393_s8, 1024 }
  0x84   :  { %p4292_p0 = scmp.ne.s32.totalorder %s5393_s8, %s4291_s16  ;;  %p4295_p1 = scmp.lt.u32.totalorder %s4291_s16, %s5393_s8 }
  0x86   :  { %p4297_p2 = pnand %p4295_p1, %p4292_p0 }
  0x88   :  { %4300 = shalt.err (!%p4297_p2)
}
  0x89   :  { %s4301_s12 = scalar_lea.vmem %s4649_s14, 1024  ;;  %p4306_p4 = scmp.lt.s32.totalorder %s4649_s14, %s4649_s14 }
  0x8a   :  { %p4302_p3 = scmp.ne.s32.totalorder %s4649_s14, %s4301_s12  ;;  %p4307_p5 = scmp.lt.s32.totalorder %s4301_s12, %s4301_s12 }
  0x8c   :  { %p4308_p6 = por %p4307_p5, %p4306_p4 }
  0x8e   :  { %p4309_p7 = pnand %p4308_p6, %p4302_p3 }
  0x90   :  { %4312 = shalt.err (!%p4309_p7)
}
  0x91   :  { %75 = dma.hbm_to_vmem [thread:$0]  %s5393_s8, 1024, %s4649_s14, [#allocation6], %s4441_s24, %s4441_s24, %s4442_s28  }
  0x92   :  { %s4449_s30 = smov [#allocation10]   ;;  %s4450_s27 = smov [#allocation13]  }
  0x93   :  { %s94_s26 = sshll.u32 %s4449_s30, 4  ;;  %s116_s9 = sshll.u32 %s4450_s27, 4  ;;  %s95_s26 = int_to_ptr.vmem [resolvable:$true] %s94_s26  ;;  %s117_s9 = int_to_ptr.vmem [resolvable:$true] %s116_s9 }
  0x94   :  { %s4313_s22 = scalar_lea.hbm %s5396_s11, 32 }
  0x95   :  { %p4314_p8 = scmp.ne.s32.totalorder %s5396_s11, %s4313_s22  ;;  %p4317_p9 = scmp.lt.u32.totalorder %s4313_s22, %s5396_s11 }
  0x97   :  { %p4319_p10 = pnand %p4317_p9, %p4314_p8 }
  0x99   :  { %4322 = shalt.err (!%p4319_p10)
}
  0x9a   :  { %s4323_s8 = scalar_lea.vmem %s95_s26, 32  ;;  %p4328_p12 = scmp.lt.s32.totalorder %s95_s26, %s95_s26 }
  0x9b   :  { %p4324_p11 = scmp.ne.s32.totalorder %s95_s26, %s4323_s8  ;;  %p4329_p13 = scmp.lt.s32.totalorder %s4323_s8, %s4323_s8 }
  0x9d   :  { %p4330_p0 = por %p4329_p13, %p4328_p12 }
  0x9f   :  { %p4331_p1 = pnand %p4330_p0, %p4324_p11 }
  0xa1   :  { %4334 = shalt.err (!%p4331_p1)
}
  0xa2   :  { %97 = dma.hbm_to_vmem [thread:$0]  %s5396_s11, 32, %s95_s26, [#allocation9]  }
  0xa3   :  { %s4335_s2 = scalar_lea.hbm %s5398_s13, 16 }
  0xa4   :  { %p4336_p2 = scmp.ne.s32.totalorder %s5398_s13, %s4335_s2  ;;  %p4339_p3 = scmp.lt.u32.totalorder %s4335_s2, %s5398_s13 }
  0xa6   :  { %p4341_p4 = pnand %p4339_p3, %p4336_p2 }
  0xa8   :  { %4344 = shalt.err (!%p4341_p4)
}
  0xa9   :  { %s4345_s25 = scalar_lea.vmem %s117_s9, 16  ;;  %s4349_s30 = scalar_lea.vmem %s117_s9, 32 }
  0xaa   :  { %p4346_p5 = scmp.ne.s32.totalorder %s117_s9, %s4345_s25  ;;  %p4350_p6 = scmp.lt.s32.totalorder %s117_s9, %s117_s9 }
  0xab   :  { %p4351_p7 = scmp.lt.s32.totalorder %s4349_s30, %s4345_s25 }
  0xad   :  { %p4352_p8 = por %p4351_p7, %p4350_p6 }
  0xaf   :  { %p4353_p9 = pnand %p4352_p8, %p4346_p5 }
  0xb1   :  { %4356 = shalt.err (!%p4353_p9)
}
  0xb2   :  { %119 = dma.hbm_to_vmem [thread:$0]  %s5398_s13, 16, %s117_s9, [#allocation12]  }
  0xb3   :  { %s4451_s27 = smov [#allocation16]   ;;  %s4452_s18 = smov [#allocation19]  }
  0xb4   :  { %s138_s7 = sshll.u32 %s4451_s27, 4  ;;  %s160_s22 = sshll.u32 %s4452_s18, 4  ;;  %s139_s7 = int_to_ptr.vmem [resolvable:$true] %s138_s7  ;;  %s161_s22 = int_to_ptr.vmem [resolvable:$true] %s160_s22 }
  0xb5   :  { %s4357_s1 = scalar_lea.hbm %s5400_s15, 32 }
  0xb6   :  { %p4358_p10 = scmp.ne.s32.totalorder %s5400_s15, %s4357_s1  ;;  %p4361_p11 = scmp.lt.u32.totalorder %s4357_s1, %s5400_s15 }
  0xb8   :  { %p4363_p12 = pnand %p4361_p11, %p4358_p10 }
  0xba   :  { %4366 = shalt.err (!%p4363_p12)
}
  0xbb   :  { %s4367_s13 = scalar_lea.vmem %s139_s7, 32  ;;  %p4372_p0 = scmp.lt.s32.totalorder %s139_s7, %s139_s7 }
  0xbc   :  { %p4368_p13 = scmp.ne.s32.totalorder %s139_s7, %s4367_s13  ;;  %p4373_p1 = scmp.lt.s32.totalorder %s4367_s13, %s4367_s13 }
  0xbe   :  { %p4374_p2 = por %p4373_p1, %p4372_p0 }
  0xc0   :  { %p4375_p3 = pnand %p4374_p2, %p4368_p13 }
  0xc2   :  { %4378 = shalt.err (!%p4375_p3)
}
  0xc3   :  { %141 = dma.hbm_to_vmem [thread:$0]  %s5400_s15, 32, %s139_s7, [#allocation15]  }
  0xc4   :  { %s4379_s3 = scalar_lea.hbm %s5402_s17, 16 }
  0xc5   :  { %p4380_p4 = scmp.ne.s32.totalorder %s5402_s17, %s4379_s3  ;;  %p4383_p5 = scmp.lt.u32.totalorder %s4379_s3, %s5402_s17 }
  0xc7   :  { %p4385_p6 = pnand %p4383_p5, %p4380_p4 }
  0xc9   :  { %4388 = shalt.err (!%p4385_p6)
}
  0xca   :  { %s4389_s30 = scalar_lea.vmem %s161_s22, 16  ;;  %s4393_s11 = scalar_lea.vmem %s161_s22, 32 }
  0xcb   :  { %p4390_p7 = scmp.ne.s32.totalorder %s161_s22, %s4389_s30  ;;  %p4394_p8 = scmp.lt.s32.totalorder %s161_s22, %s161_s22 }
  0xcc   :  { %p4395_p9 = scmp.lt.s32.totalorder %s4393_s11, %s4389_s30 }
  0xce   :  { %p4396_p10 = por %p4395_p9, %p4394_p8 }
  0xd0   :  { %p4397_p11 = pnand %p4396_p10, %p4390_p7 }
  0xd2   :  { %4400 = shalt.err (!%p4397_p11)
}
  0xd3   :  { %163 = dma.hbm_to_vmem [thread:$0]  %s5402_s17, 16, %s161_s22, [#allocation18]  }
  0xd4   :  { %s4453_s27 = smov [#allocation22]   ;;  %s4401_s0 = scalar_lea.hbm %s5404_s19, 16 }
  0xd5   :  { %s180_s7 = sshll.u32 %s4453_s27, 4  ;;  %p4402_p12 = scmp.ne.s32.totalorder %s5404_s19, %s4401_s0  ;;  %s181_s7 = int_to_ptr.vmem [resolvable:$true] %s180_s7 }
  0xd6   :  { %p4405_p13 = scmp.lt.u32.totalorder %s4401_s0, %s5404_s19 }
  0xd8   :  { %p4407_p0 = pnand %p4405_p13, %p4402_p12 }
  0xda   :  { %4410 = shalt.err (!%p4407_p0)
}
  0xdb   :  { %s4411_s14 = scalar_lea.vmem %s181_s7, 16  ;;  %s4415_s17 = scalar_lea.vmem %s181_s7, 32 }
  0xdc   :  { %p4412_p1 = scmp.ne.s32.totalorder %s181_s7, %s4411_s14  ;;  %p4416_p2 = scmp.lt.s32.totalorder %s181_s7, %s181_s7 }
  0xdd   :  { %p4417_p3 = scmp.lt.s32.totalorder %s4415_s17, %s4411_s14 }
  0xdf   :  { %p4418_p4 = por %p4417_p3, %p4416_p2 }
  0xe1   :  { %p4419_p5 = pnand %p4418_p4, %p4412_p1 }
  0xe3   :  { %4422 = shalt.err (!%p4419_p5)
}
  0xe4   :  { %183 = dma.hbm_to_vmem [thread:$0]  %s5404_s19, 16, %s181_s7, [#allocation21]  }
  0xe5   :  { %4423 = dma.done.wait [#allocation4], 48  }
  0xe6   :  { %4424 = vsyncadd [#allocation4], 4294967248 }
  0xe7   :  { %4425 = dma.done.wait [#allocation6], 1040  }
  0xe8   :  { %4426 = vsyncadd [#allocation6], 4294966256 }
  0xe9   :  { %4427 = dma.done.wait [#allocation9], 48  }
  0xea   :  { %4428 = vsyncadd [#allocation9], 4294967248 }
  0xeb   :  { %4429 = dma.done.wait [#allocation12], 1040  }
  0xec   :  { %4430 = vsyncadd [#allocation12], 4294966256 }
  0xed   :  { %4431 = dma.done.wait [#allocation15], 2080  }
  0xee   :  { %4432 = vsyncadd [#allocation15], 4294965216 }
  0xef   :  { %4433 = dma.done.wait [#allocation18], 2064  }
  0xf0   :  { %4434 = vsyncadd [#allocation18], 4294965232 }
  0xf1   :  { %4435 = dma.done.wait [#allocation21], 32  }
  0xf2   :  { %4436 = vsyncadd [#allocation21], 4294967264  ;;  %v4454_v0 = vmov 0   ;;  %v4455_v1 = vmov 0.0   ;;  %s5415_s16 = sld [smem:[#allocation34_spill]]  ;;  %s5416_s1 = sld [smem:[#allocation30_spill]]  ;;  %v230_v31 = vlaneseq }
  0xf3   :  { %469 = vmatprep.mubr.bf16.mxu0 %v4454_v0  ;;  %3640 = vmatprep.subr.bf16.mxu1 %v4455_v1  ;;  %vm4456_vm0 = vmmov 0   ;;  %v292_v34 = vld [vmem:[#allocation3] sm:$0x7]  ;;  %vm539_vm3 = vcmask 261120   ;;  %vm664_vm4 = vcmask 1043456   ;;  %vm636_vm8 = vcmask 64512  }
  0xf4   :  { %3934 = vset.pattern.permute.xlu0 %v4454_v0  ;;  %3656 = vmatprep.mubr.msk.bf16.mxu1 %vm4456_vm0, %v4455_v1  ;;  %v231_v32 = vshrl.u32 %v230_v31, 7  ;;  %v233_v62 = vand.u32 127, %v230_v31  ;;  %s4457_s2 = smov 96   ;;  %s4458_s3 = smov 32   ;;  %vm988_vm11 = vcmask 523520   ;;  %vm1223_vm12 = vcmask 785920  }
  0xf5   :  { %vm1458_vm13 = vcmask 1048320   ;;  %s5422_s21 = sld [smem:[#allocation31_spill]]  ;;  %s5423_s5 = sld [smem:[#allocation33_spill]] }
  0xf6   :  { %v4844_v33 = vsub.s32 1, %v231_v32  ;;  %v4847_v36 = vsub.s32 0, %v231_v32  ;;  %v304_v52 = vsub.s32 2, %v231_v32  ;;  %vm234_vm5 = vcmp.ge.s32.totalorder %v231_v32, %v233_v62 }
  0xf8   :  { %v3935_v2 = vld [vmem:[%s5415_s16 + $0x4] ss:$12 sps:$4 sm:$0xff]   ;;  %v3937_v3 = vld [vmem:[%s5415_s16] ss:$12 sps:$4 sm:$0xff]   ;;  %v3938_v4 = vld [vmem:[%s5415_s16 + $0x1c] ss:$12 sps:$4 sm:$0xff]   ;;  %v301_v35 = vrot.slane %v292_v34, %v4844_v33  ;;  %v297_v42 = vrot.slane %v292_v34, %v4847_v36  ;;  %v305_v53 = vrot.slane %v292_v34, %v304_v52 }
  0xf9   :  { %437 = vmatprep.subr.bf16.mxu0 %v3935_v2  ;;  %v3940_v5 = vld [vmem:[%s5415_s16 + $0x18] ss:$12 sps:$4 sm:$0xff]   ;;  %v3941_v6 = vld [vmem:[%s5415_s16 + $0x34] ss:$12 sps:$4 sm:$0xff]   ;;  %v3943_v7 = vld [vmem:[%s5415_s16 + $0x30] ss:$12 sps:$4 sm:$0xff]  }
  0xfa   :  { %438 = vmatpush1.bf16.msra.mxu0 %v3937_v3  ;;  %v3944_v8 = vld [vmem:[%s5415_s16 + $0x4c] ss:$12 sps:$4 sm:$0xff]   ;;  %v3946_v9 = vld [vmem:[%s5415_s16 + $0x48] ss:$12 sps:$4 sm:$0xff]   ;;  %v3947_v11 = vld [vmem:[%s5415_s16 + $0x64] ss:$12 sps:$4 sm:$0xff]  }
  0xfb   :  { %439 = vmatprep.subr.bf16.mxu0 %v3938_v4  ;;  %v3960_v10 = vld [vmem:[%s5415_s16 + $0x8] ss:$12 sps:$4 sm:$0xff]   ;;  %v3961_v12 = vld [vmem:[%s5415_s16 + $0x20] ss:$12 sps:$4 sm:$0xff]   ;;  %v3952_v15 = vld [vmem:[%s5415_s16 + $0x78] ss:$12 sps:$4 sm:$0xff]  }
  0xfc   :  { %3641 = vmatpush3.bf16.msra.mxu1 %v3960_v10  ;;  %v3949_v13 = vld [vmem:[%s5415_s16 + $0x60] ss:$12 sps:$4 sm:$0xff]   ;;  %v3950_v14 = vld [vmem:[%s5415_s16 + $0x7c] ss:$12 sps:$4 sm:$0xff]   ;;  %v3962_v16 = vld [vmem:[%s5415_s16 + $0x38] ss:$12 sps:$4 sm:$0xff]  }
  0xfd   :  { %3642 = vmatprep.subr.bf16.mxu1 %v4455_v1  ;;  %v3953_v17 = vld [vmem:[%s5415_s16 + $0x94] ss:$12 sps:$4 sm:$0xff]   ;;  %v3963_v18 = vld [vmem:[%s5415_s16 + $0x50] ss:$12 sps:$4 sm:$0xff]   ;;  %v3956_v20 = vld [vmem:[%s5415_s16 + $0xac] ss:$12 sps:$4 sm:$0xff]  }
  0xfe   :  { %440 = vmatpush1.bf16.msra.mxu0 %v3940_v5  ;;  %v3955_v19 = vld [vmem:[%s5415_s16 + $0x90] ss:$12 sps:$4 sm:$0xff]   ;;  %v3964_v21 = vld [vmem:[%s5415_s16 + $0x68] ss:$12 sps:$4 sm:$0xff]   ;;  %v224_v23 = vld [vmem:[%s5416_s1] sm:$0xff]  }
  0xff   :  { %441 = vmatprep.subr.bf16.mxu0 %v3941_v6  ;;  %v3958_v22 = vld [vmem:[%s5415_s16 + $0xa8] ss:$12 sps:$4 sm:$0xff]   ;;  %v3965_v24 = vld [vmem:[%s5415_s16 + $0x80] ss:$12 sps:$4 sm:$0xff]   ;;  %v3966_v25 = vld [vmem:[%s5415_s16 + $0x98] ss:$12 sps:$4 sm:$0xff]  }
 0x100   :  { %3643 = vmatpush3.bf16.msra.mxu1 %v3961_v12  ;;  %v3967_v26 = vld [vmem:[%s5415_s16 + $0xb0] ss:$12 sps:$4 sm:$0xff]   ;;  %s5417_s16 = sld [smem:[#allocation32_spill]] }
 0x101   :  { %3644 = vmatprep.subr.bf16.mxu1 %v4455_v1 }
 0x102   :  { %442 = vmatpush1.bf16.msra.mxu0 %v3943_v7 }
 0x103   :  { %443 = vmatprep.subr.bf16.mxu0 %v3944_v8 }
 0x104   :  { %3645 = vmatpush3.bf16.msra.mxu1 %v3962_v16 }
 0x105   :  { %3646 = vmatprep.subr.bf16.mxu1 %v4455_v1 }
 0x106   :  { %444 = vmatpush1.bf16.msra.mxu0 %v3946_v9  ;;  %v235_v27 = vld [vmem:[%s5417_s16] sm:$0xff]  ;;  %v236_v28 = vld [vmem:[%s5417_s16 + $0x8] sm:$0xff] }
 0x107   :  { %445 = vmatprep.subr.bf16.mxu0 %v3947_v11  ;;  %vm237_vm1 = vcmp.ne.s32.totalorder %v235_v27, 0  ;;  %vm238_vm2 = vcmp.ne.s32.totalorder %v236_v28, 0 }
 0x108   :  { %3647 = vmatpush3.bf16.msra.mxu1 %v3963_v18  ;;  %v239_v29 = vsel %vm237_vm1, 1, %v4454_v0  ;;  %v240_v30 = vsel %vm238_vm2, 1, %v4454_v0 }
 0x109   :  { %3648 = vmatprep.subr.bf16.mxu1 %v4455_v1  ;;  %242 = vperm.xlu0 %3934, %v239_v29  }
 0x10a   :  { %446 = vmatpush1.bf16.msra.mxu0 %v3949_v13 }
 0x10b   :  { %447 = vmatprep.subr.bf16.mxu0 %v3950_v14 }
 0x10c   :  { %3649 = vmatpush3.bf16.msra.mxu1 %v3964_v21 }
 0x10d   :  { %3650 = vmatprep.subr.bf16.mxu1 %v4455_v1  ;;  %245 = vperm.xlu0 %3934, %v240_v30  }
 0x10e   :  { %448 = vmatpush1.bf16.msra.mxu0 %v3952_v15 }
 0x10f   :  { %449 = vmatprep.subr.bf16.mxu0 %v3953_v17 }
 0x110   :  { %3651 = vmatpush3.bf16.msra.mxu1 %v3965_v24 }
 0x111   :  { %3652 = vmatprep.subr.bf16.mxu1 %v4455_v1 }
 0x112   :  { %450 = vmatpush1.bf16.msra.mxu0 %v3955_v19 }
 0x113   :  { %451 = vmatprep.subr.bf16.mxu0 %v3956_v20 }
 0x114   :  { %3653 = vmatpush3.bf16.msra.mxu1 %v3966_v25 }
 0x115   :  { %3654 = vmatprep.subr.bf16.mxu1 %v4455_v1 }
 0x116   :  { %452 = vmatpush1.bf16.msra.mxu0 %v3958_v22 }
 0x117   :  { %3684 = vmatprep.subr.bf16.mxu0 %v4455_v1 }
 0x118   :  { %3655 = vmatpush3.bf16.msra.mxu1 %v3967_v26 }
 0x119   :  { %470 = vmatmul.mubr.bf16.vlgmr.msra.gmra.mrb[0].mxu0 %v224_v23  ;;  %3660 = vmatprep.subr.bf16.mxu1 %v4455_v1 }
 0x11a   :  { %3686 = vmatprep.mubr.msk.bf16.mxu0 %vm4456_vm0, %v4455_v1 }
 0x11b   :  { %3657 = vmatmul.mubr.bf16.vlgmr.msra.gmra.mrb[0].mxu1 %v224_v23 }
 0x11c   :  { %3662 = vmatprep.mubr.msk.bf16.mxu1 %vm4456_vm0, %v4455_v1 }
 0x188   :  { %v243_v63 = vpop.permute.xlu0 %242 }
 0x189   :  { %vm247_vm6 = vcmp.eq.s32.totalorder %v243_v63, 1 }
 0x18a   :  { %vm4878_vm7 = vmand %vm247_vm6, %vm234_vm5 }
 0x18c   :  { %v246_v9 = vpop.permute.xlu0 %245 }
 0x18d   :  { %vm248_vm9 = vcmp.eq.s32.totalorder %v246_v9, 1 }
 0x18e   :  { %vm4886_vm10 = vmand %vm248_vm9, %vm234_vm5 }
 0x1ec   :  { %v471_v37 = vpop.f32.mrb[0].mxu0 }
 0x1ed   :  { %v473_v38 = vpop.f32.mrb[1].mxu0  ;;  %v472_v46 = vadd.f32 %v471_v37, %v297_v42 }
 0x1ee   :  { %v474_v39 = vadd.f32 %v473_v38, %v301_v35  ;;  %v475_v40 = vpop.f32.mrb[2].mxu0  ;;  %v514_v54 = vpop.f32.mrb[0].mxu1 }
 0x1ef   :  { %v477_v41 = vpop.f32.mrb[3].mxu0  ;;  %v4857_v48 = vpack.c.bf16 %v472_v46, %v472_v46  ;;  %v476_v50 = vadd.f32 %v475_v40, %v297_v42  ;;  %v515_v55 = vadd.f32 %v514_v54, %v305_v53  ;;  %v3658_v56 = vpop.f32.mrb[1].mxu1 }
 0x1f0   :  { %v4850_v43 = vpack.c.bf16 %v474_v39, %v474_v39  ;;  %v478_v44 = vadd.f32 %v477_v41, %v301_v35  ;;  %v517_v57 = vpop.f32.mrb[2].mxu1 }
 0x1f1   :  { %v4866_v51 = vpack.c.bf16 %v476_v50, %v476_v50  ;;  %v4872_v58 = vpack.c.bf16 %v515_v55, %v515_v55  ;;  %v518_v59 = vadd.f32 %v517_v57, %v305_v53  ;;  %v3659_v60 = vpop.f32.mrb[3].mxu1 }
 0x1f2   :  { %v544_v45 = vsel %vm539_vm3, %v4850_v43, 0  ;;  %v4855_v47 = vpack.c.bf16 %v478_v44, %v478_v44 }
 0x1f3   :  { %3661 = vmatpush3.bf16.xpose.msra.mxu1 %v544_v45  ;;  %v666_v61 = vsel %vm664_vm4, %v4872_v58, 0  ;;  %v4905_v37 = vpack.c.bf16 %v518_v59, %v518_v59 }
 0x1f4   :  { %3666 = vmatprep.subr.bf16.mxu1 %v4455_v1  ;;  %v590_v49 = vsel %vm539_vm3, %v4855_v47, 0 }
 0x1f5   :  { %v712_v41 = vsel %vm664_vm4, %v4905_v37, 0 }
 0x1fa   :  { %3663 = vmatmul.mubr.msk.bf16.vlgmr.msra.gmra.mrb[4].mxu1 %vm539_vm3, %v4857_v48 }
 0x1fb   :  { %3667 = vmatpush3.bf16.xpose.msra.mxu1 %v590_v49  ;;  %3668 = vmatprep.mubr.msk.bf16.mxu1 %vm4456_vm0, %v4455_v1 }
 0x1fc   :  { %3672 = vmatprep.subr.bf16.mxu1 %v4455_v1 }
 0x202   :  { %3669 = vmatmul.mubr.msk.bf16.vlgmr.msra.gmra.mrb[8].mxu1 %vm539_vm3, %v4866_v51 }
 0x203   :  { %3674 = vmatprep.mubr.msk.bf16.mxu1 %vm4456_vm0, %v4455_v1  ;;  %3673 = vmatpush3.bf16.msra.mxu1 %v666_v61 }
 0x204   :  { %3678 = vmatprep.subr.bf16.mxu1 %v4455_v1 }
 0x2cd   :  { %v580_v3 = vpop.f32.mrb[4].mxu1 }
 0x2ce   :  { %v632_v4 = vmul.f32 0.17677669, %v580_v3  ;;  %v3664_v5 = vpop.f32.mrb[5].mxu1 }
 0x2cf   :  { %v583_v6 = vpop.f32.mrb[6].mxu1 }
 0x2d0   :  { %v3665_v7 = vpop.f32.mrb[7].mxu1  ;;  %v634_v8 = vsel %vm4878_vm7, %v632_v4, -1e+10 }
 0x2d1   :  { %v637_v10 = vsel %vm636_vm8, %v634_v8, -inf }
 0x2d2   :  { %638 = vmax.xlane.f32.xlu1 %v637_v10 }
 0x2d5   :  { %v626_v11 = vpop.f32.mrb[8].mxu1 }
 0x2d6   :  { %v633_v12 = vmul.f32 0.17677669, %v626_v11  ;;  %v3670_v13 = vpop.f32.mrb[9].mxu1 }
 0x2d7   :  { %v629_v15 = vpop.f32.mrb[10].mxu1 }
 0x2d8   :  { %v3671_v16 = vpop.f32.mrb[11].mxu1  ;;  %v635_v17 = vsel %vm4886_vm10, %v633_v12, -1e+10 }
 0x2d9   :  { %v640_v18 = vsel %vm636_vm8, %v635_v17, -inf }
 0x2da   :  { %641 = vmax.xlane.f32.xlu1 %v640_v18 }
 0x2eb   :  { %758 = vrot.lane.b32.xlu1 %v4850_v43, %s4457_s2 }
 0x2ef   :  { %808 = vrot.lane.b32.xlu1 %v4855_v47, %s4457_s2 }
 0x35f   :  { %v639_v19 = vpop.xlane.xlu1 %638 }
 0x360   :  { %v643_v20 = vsub.f32 %v634_v8, %v639_v19 }
 0x362   :  { %v645_v21 = vmul.f32 1.442695, %v643_v20 }
 0x364   :  { %4058 = vpow2.f32 %v645_v21 }
 0x367   :  { %v642_v22 = vpop.xlane.xlu1 %641 }
 0x368   :  { %v644_v23 = vsub.f32 %v635_v17, %v642_v22 }
 0x36a   :  { %v647_v24 = vmul.f32 1.442695, %v644_v23 }
 0x36b   :  { %v759_v25 = vpop.permute.xlu1 %758 }
 0x36c   :  { %4060 = vpow2.f32 %v647_v24  ;;  %v764_v26 = vsel %vm539_vm3, %v759_v25, 0 }
 0x36d   :  { %3685 = vmatpush3.bf16.xpose.msra.mxu0 %v764_v26 }
 0x36e   :  { %v4059_v27 = vpop.eup %4058  ;;  %3696 = vmatprep.subr.bf16.mxu0 %v4455_v1 }
 0x36f   :  { %v649_v28 = vsel %vm636_vm8, %v4059_v27, 0.0  ;;  %v809_v32 = vpop.permute.xlu1 %808 }
 0x370   :  { %650 = vadd.xlane.f32.xlu0 %v649_v28  ;;  %v814_v46 = vsel %vm539_vm3, %v809_v32, 0 }
 0x376   :  { %v4061_v29 = vpop.eup %4060 }
 0x377   :  { %v652_v30 = vsel %vm636_vm8, %v4061_v29, 0.0 }
 0x378   :  { %653 = vadd.xlane.f32.xlu1 %v652_v30 }
 0x389   :  { %756 = vrot.lane.b32.xlu1 %v4857_v48, %s4457_s2 }
 0x38d   :  { %806 = vrot.lane.b32.xlu1 %v4866_v51, %s4457_s2 }
 0x3fd   :  { %v651_v31 = vpop.xlane.xlu0 %650 }
 0x3fe   :  { %4062 = vrcp.f32 %v651_v31 }
 0x405   :  { %v654_v34 = vpop.xlane.xlu1 %653 }
 0x406   :  { %4064 = vrcp.f32 %v654_v34 }
 0x408   :  { %v4063_v35 = vpop.eup %4062 }
 0x409   :  { %v656_v38 = vmul.f32 %v4063_v35, %v4059_v27  ;;  %v757_v39 = vpop.permute.xlu1 %756 }
 0x40a   :  { %3687 = vmatmul.mubr.msk.bf16.vlgmr.msra.gmra.mrb[4].mxu0 %vm539_vm3, %v757_v39 }
 0x40b   :  { %v659_v40 = vpack.c.bf16 %v656_v38, %v656_v38  ;;  %3698 = vmatprep.mubr.msk.bf16.mxu0 %vm4456_vm0, %v4455_v1 }
 0x40d   :  { %3675 = vmatmul.mubr.msk.bf16.vlgmr.msra.gmra.mrb[12].mxu1 %vm636_vm8, %v659_v40  ;;  %v807_v49 = vpop.permute.xlu1 %806 }
 0x40e   :  { %3679 = vmatpush3.bf16.msra.mxu1 %v712_v41  ;;  %3680 = vmatprep.mubr.msk.bf16.mxu1 %vm4456_vm0, %v4455_v1 }
 0x40f   :  { %3690 = vmatprep.subr.bf16.mxu1 %v4455_v1 }
 0x410   :  { %v4065_v42 = vpop.eup %4064 }
 0x411   :  { %v658_v44 = vmul.f32 %v4065_v42, %v4061_v29 }
 0x413   :  { %v660_v45 = vpack.c.bf16 %v658_v44, %v658_v44 }
 0x415   :  { %3681 = vmatmul.mubr.msk.bf16.vlgmr.msra.gmra.mrb[16].mxu1 %vm636_vm8, %v660_v45 }
 0x416   :  { %3692 = vmatprep.mubr.msk.bf16.mxu1 %vm4456_vm0, %v4455_v1 }
 0x417   :  { %3691 = vmatpush3.bf16.xpose.msra.mxu1 %v814_v46 }
 0x418   :  { %3702 = vmatprep.subr.bf16.mxu1 %v4455_v1 }
 0x41e   :  { %3693 = vmatmul.mubr.msk.bf16.vlgmr.msra.gmra.mrb[20].mxu1 %vm539_vm3, %v807_v49 }
 0x41f   :  { %3704 = vmatprep.mubr.msk.bf16.mxu1 %vm4456_vm0, %v4455_v1 }
 0x4dd   :  { %v800_v50 = vpop.f32.mrb[4].mxu0 }
 0x4de   :  { %v856_v52 = vmul.f32 0.17677669, %v800_v50  ;;  %v3688_v53 = vpop.f32.mrb[5].mxu0 }
 0x4df   :  { %v803_v54 = vpop.f32.mrb[6].mxu0 }
 0x4e0   :  { %v702_v55 = vpop.f32.mrb[12].mxu1  ;;  %v3689_v56 = vpop.f32.mrb[7].mxu0  ;;  %v858_v57 = vsel %vm4878_vm7, %v856_v52, -1e+10 }
 0x4e1   :  { %754 = vst.msk [vmem:[#allocation2] sm:$0xff] %vm539_vm3, %v702_v55  ;;  %v3676_v59 = vpop.f32.mrb[13].mxu1  ;;  %v860_v60 = vsel %vm636_vm8, %v858_v57, -inf }
 0x4e2   :  { %861 = vmax.xlane.f32.xlu0 %v860_v60  ;;  %v705_v61 = vpop.f32.mrb[14].mxu1 }
 0x4e3   :  { %v3677_v62 = vpop.f32.mrb[15].mxu1 }
 0x4e8   :  { %v748_v63 = vpop.f32.mrb[16].mxu1 }
 0x4e9   :  { %755 = vst.msk [vmem:[#allocation2 + $0x8] sm:$0xff] %vm539_vm3, %v748_v63  ;;  %v3682_v3 = vpop.f32.mrb[17].mxu1 }
 0x4ea   :  { %v751_v4 = vpop.f32.mrb[18].mxu1 }
 0x4eb   :  { %v3683_v5 = vpop.f32.mrb[19].mxu1 }
 0x4f1   :  { %v850_v6 = vpop.f32.mrb[20].mxu1 }
 0x4f2   :  { %v857_v7 = vmul.f32 0.17677669, %v850_v6  ;;  %v3694_v8 = vpop.f32.mrb[21].mxu1 }
 0x4f3   :  { %v853_v9 = vpop.f32.mrb[22].mxu1 }
 0x4f4   :  { %v3695_v10 = vpop.f32.mrb[23].mxu1  ;;  %v859_v11 = vsel %vm4886_vm10, %v857_v7, -1e+10 }
 0x4f5   :  { %v863_v12 = vsel %vm636_vm8, %v859_v11, -inf }
 0x4f6   :  { %864 = vmax.xlane.f32.xlu1 %v863_v12 }
 0x507   :  { %1043 = vrot.lane.b32.xlu1 %v4855_v47, %s4441_s24 }
 0x56f   :  { %v862_v13 = vpop.xlane.xlu0 %861 }
 0x570   :  { %v866_v15 = vsub.f32 %v858_v57, %v862_v13 }
 0x572   :  { %v868_v16 = vmul.f32 1.442695, %v866_v15 }
 0x574   :  { %4066 = vpow2.f32 %v868_v16 }
 0x57e   :  { %v4067_v17 = vpop.eup %4066 }
 0x57f   :  { %v872_v18 = vsel %vm636_vm8, %v4067_v17, 0.0 }
 0x580   :  { %873 = vadd.xlane.f32.xlu0 %v872_v18 }
 0x583   :  { %v865_v19 = vpop.xlane.xlu1 %864 }
 0x584   :  { %v867_v20 = vsub.f32 %v859_v11, %v865_v19 }
 0x586   :  { %v870_v21 = vmul.f32 1.442695, %v867_v20 }
 0x587   :  { %v1044_v41 = vpop.permute.xlu1 %1043 }
 0x588   :  { %4068 = vpow2.f32 %v870_v21  ;;  %v1049_v44 = vsel %vm539_vm3, %v1044_v41, 0 }
 0x592   :  { %v4069_v22 = vpop.eup %4068 }
 0x593   :  { %v875_v23 = vsel %vm636_vm8, %v4069_v22, 0.0 }
 0x596   :  { %884 = vrot.lane.b32.xlu0 %v4872_v58, %s4457_s2 }
 0x59a   :  { %932 = vrot.lane.b32.xlu0 %v4905_v37, %s4457_s2 }
 0x5b9   :  { %876 = vadd.xlane.f32.xlu0 %v875_v23 }
 0x5cf   :  { %993 = vrot.lane.b32.xlu0 %v4850_v43, %s4441_s24 }
 0x5d3   :  { %991 = vrot.lane.b32.xlu0 %v4857_v48, %s4441_s24 }
 0x5d7   :  { %1041 = vrot.lane.b32.xlu0 %v4866_v51, %s4441_s24 }
 0x60d   :  { %v874_v24 = vpop.xlane.xlu0 %873 }
 0x60e   :  { %4070 = vrcp.f32 %v874_v24 }
 0x611   :  { %v885_v25 = vpop.permute.xlu0 %884 }
 0x612   :  { %v890_v26 = vsel %vm664_vm4, %v885_v25, 0 }
 0x613   :  { %3697 = vmatpush3.bf16.msra.mxu0 %v890_v26 }
 0x614   :  { %3708 = vmatprep.subr.bf16.mxu0 %v4455_v1 }
 0x615   :  { %v933_v27 = vpop.permute.xlu0 %932 }
 0x616   :  { %v938_v28 = vsel %vm664_vm4, %v933_v27, 0 }
 0x617   :  { %3703 = vmatpush3.bf16.msra.mxu1 %v938_v28 }
 0x618   :  { %v4071_v29 = vpop.eup %4070  ;;  %3714 = vmatprep.subr.bf16.mxu1 %v4455_v1 }
 0x619   :  { %v879_v30 = vmul.f32 %v4071_v29, %v4067_v17 }
 0x61b   :  { %v882_v31 = vpack.c.bf16 %v879_v30, %v879_v30 }
 0x61d   :  { %3699 = vmatmul.mubr.msk.bf16.vlgmr.msra.gmra.mrb[8].mxu0 %vm636_vm8, %v882_v31 }
 0x61e   :  { %3710 = vmatprep.mubr.msk.bf16.mxu0 %vm4456_vm0, %v4455_v1 }
 0x646   :  { %v877_v32 = vpop.xlane.xlu0 %876 }
 0x647   :  { %4072 = vrcp.f32 %v877_v32 }
 0x64a   :  { %v994_v34 = vpop.permute.xlu0 %993 }
 0x64b   :  { %v999_v35 = vsel %vm539_vm3, %v994_v34, 0 }
 0x64c   :  { %3709 = vmatpush3.bf16.xpose.msra.mxu0 %v999_v35 }
 0x64d   :  { %3720 = vmatprep.subr.bf16.mxu0 %v4455_v1 }
 0x64e   :  { %v992_v40 = vpop.permute.xlu0 %991 }
 0x651   :  { %v4073_v38 = vpop.eup %4072 }
 0x652   :  { %v881_v39 = vmul.f32 %v4073_v38, %v4069_v22  ;;  %v1042_v45 = vpop.permute.xlu0 %1041 }
 0x653   :  { %3711 = vmatmul.mubr.msk.bf16.vlgmr.msra.gmra.mrb[12].mxu0 %vm539_vm3, %v992_v40 }
 0x654   :  { %v883_v42 = vpack.c.bf16 %v881_v39, %v881_v39  ;;  %3722 = vmatprep.mubr.msk.bf16.mxu0 %vm4456_vm0, %v4455_v1 }
 0x656   :  { %3705 = vmatmul.mubr.msk.bf16.vlgmr.msra.gmra.mrb[24].mxu1 %vm636_vm8, %v883_v42 }
 0x657   :  { %3715 = vmatpush3.bf16.xpose.msra.mxu1 %v1049_v44  ;;  %3716 = vmatprep.mubr.msk.bf16.mxu1 %vm4456_vm0, %v4455_v1 }
 0x658   :  { %3726 = vmatprep.subr.bf16.mxu1 %v4455_v1 }
 0x65e   :  { %3717 = vmatmul.mubr.msk.bf16.vlgmr.msra.gmra.mrb[28].mxu1 %vm539_vm3, %v1042_v45 }
 0x65f   :  { %3728 = vmatprep.mubr.msk.bf16.mxu1 %vm4456_vm0, %v4455_v1 }
 0x6f0   :  { %v4966_v46 = vpop.f32.mrb[8].mxu0 }
 0x6f1   :  { %v3700_v49 = vpop.f32.mrb[9].mxu0 }
 0x6f2   :  { %v929_v50 = vpop.f32.mrb[10].mxu0 }
 0x6f3   :  { %v3701_v52 = vpop.f32.mrb[11].mxu0 }
 0x726   :  { %v1035_v53 = vpop.f32.mrb[12].mxu0 }
 0x727   :  { %v1091_v54 = vmul.f32 0.17677669, %v1035_v53  ;;  %v3712_v55 = vpop.f32.mrb[13].mxu0 }
 0x728   :  { %v1038_v56 = vpop.f32.mrb[14].mxu0 }
 0x729   :  { %v4968_v57 = vpop.f32.mrb[24].mxu1  ;;  %v3713_v59 = vpop.f32.mrb[15].mxu0  ;;  %v1093_v60 = vsel %vm4878_vm7, %v1091_v54, -1e+10 }
 0x72a   :  { %v3706_v61 = vpop.f32.mrb[25].mxu1  ;;  %v1095_v62 = vsel %vm636_vm8, %v1093_v60, -inf }
 0x72b   :  { %1096 = vmax.xlane.f32.xlu0 %v1095_v62  ;;  %v977_v63 = vpop.f32.mrb[26].mxu1 }
 0x72c   :  { %v3707_v3 = vpop.f32.mrb[27].mxu1 }
 0x731   :  { %v1085_v4 = vpop.f32.mrb[28].mxu1 }
 0x732   :  { %v1092_v5 = vmul.f32 0.17677669, %v1085_v4  ;;  %v3718_v6 = vpop.f32.mrb[29].mxu1 }
 0x733   :  { %v1088_v7 = vpop.f32.mrb[30].mxu1 }
 0x734   :  { %v3719_v8 = vpop.f32.mrb[31].mxu1  ;;  %v1094_v9 = vsel %vm4886_vm10, %v1092_v5, -1e+10 }
 0x735   :  { %v1098_v10 = vsel %vm636_vm8, %v1094_v9, -inf }
 0x736   :  { %1099 = vmax.xlane.f32.xlu1 %v1098_v10 }
 0x747   :  { %1167 = vrot.lane.b32.xlu1 %v4905_v37, %s4441_s24 }
 0x74b   :  { %1228 = vrot.lane.b32.xlu1 %v4850_v43, %s4458_s3 }
 0x74f   :  { %1226 = vrot.lane.b32.xlu1 %v4857_v48, %s4458_s3 }
 0x7b8   :  { %v1097_v11 = vpop.xlane.xlu0 %1096 }
 0x7b9   :  { %v1101_v12 = vsub.f32 %v1093_v60, %v1097_v11 }
 0x7bb   :  { %v1103_v13 = vmul.f32 1.442695, %v1101_v12 }
 0x7bd   :  { %4074 = vpow2.f32 %v1103_v13 }
 0x7c3   :  { %v1100_v15 = vpop.xlane.xlu1 %1099 }
 0x7c4   :  { %v1102_v43 = vsub.f32 %v1094_v9, %v1100_v15 }
 0x7c6   :  { %v1105_v48 = vmul.f32 1.442695, %v1102_v43 }
 0x7c7   :  { %v4075_v16 = vpop.eup %4074  ;;  %v1168_v17 = vpop.permute.xlu1 %1167 }
 0x7c8   :  { %v1173_v18 = vsel %vm664_vm4, %v1168_v17, 0  ;;  %v1107_v19 = vsel %vm636_vm8, %v4075_v16, 0.0  ;;  %4076 = vpow2.f32 %v1105_v48 }
 0x7c9   :  { %1108 = vadd.xlane.f32.xlu0 %v1107_v19  ;;  %3727 = vmatpush3.bf16.msra.mxu1 %v1173_v18 }
 0x7ca   :  { %3738 = vmatprep.subr.bf16.mxu1 %v4455_v1 }
 0x7cb   :  { %v1229_v27 = vpop.permute.xlu1 %1228 }
 0x7cc   :  { %v1234_v29 = vsel %vm539_vm3, %v1229_v27, 0  ;;  %v3969_v27 = vld [vmem:[%s5391_s6 + $0x8] sm:$0xff]  }
 0x7d2   :  { %v4077_v20 = vpop.eup %4076 }
 0x7d3   :  { %v1110_v21 = vsel %vm636_vm8, %v4077_v20, 0.0 }
 0x7df   :  { %1119 = vrot.lane.b32.xlu0 %v4872_v58, %s4441_s24 }
 0x7fe   :  { %1111 = vadd.xlane.f32.xlu0 %v1110_v21 }
 0x814   :  { %1278 = vrot.lane.b32.xlu0 %v4855_v47, %s4458_s3  ;;  %v1227_v47 = vpop.permute.xlu1 %1226 }
 0x818   :  { %1276 = vrot.lane.b32.xlu0 %v4866_v51, %s4458_s3 }
 0x856   :  { %v1109_v22 = vpop.xlane.xlu0 %1108 }
 0x857   :  { %4078 = vrcp.f32 %v1109_v22 }
 0x85a   :  { %v1120_v23 = vpop.permute.xlu0 %1119 }
 0x85b   :  { %v1125_v24 = vsel %vm664_vm4, %v1120_v23, 0 }
 0x85c   :  { %3721 = vmatpush3.bf16.msra.mxu0 %v1125_v24 }
 0x85d   :  { %3732 = vmatprep.subr.bf16.mxu0 %v4455_v1 }
 0x861   :  { %v4079_v25 = vpop.eup %4078 }
 0x862   :  { %v1114_v26 = vmul.f32 %v4079_v25, %v4075_v16 }
 0x864   :  { %v1117_v28 = vpack.c.bf16 %v1114_v26, %v1114_v26  ;;  %v3968_v26 = vld [vmem:[%s5391_s6] sm:$0xff]  }
 0x866   :  { %3723 = vmatmul.mubr.msk.bf16.vlgmr.msra.gmra.mrb[16].mxu0 %vm636_vm8, %v1117_v28  ;;  %v3970_v28 = vld [vmem:[%s5391_s6 + $0x10] sm:$0xff]  }
 0x867   :  { %3733 = vmatpush3.bf16.xpose.msra.mxu0 %v1234_v29  ;;  %3734 = vmatprep.mubr.msk.bf16.mxu0 %vm4456_vm0, %v4455_v1  ;;  %v3971_v29 = vld [vmem:[%s5391_s6 + $0x18] sm:$0xff]  }
 0x868   :  { %3744 = vmatprep.subr.bf16.mxu0 %v4455_v1 }
 0x86e   :  { %3735 = vmatmul.mubr.msk.bf16.vlgmr.msra.gmra.mrb[20].mxu0 %vm539_vm3, %v1227_v47 }
 0x86f   :  { %3746 = vmatprep.mubr.msk.bf16.mxu0 %vm4456_vm0, %v4455_v1 }
 0x88b   :  { %v1112_v51 = vpop.xlane.xlu0 %1111 }
 0x88c   :  { %4080 = vrcp.f32 %v1112_v51 }
 0x88f   :  { %v1279_v32 = vpop.permute.xlu0 %1278 }
 0x890   :  { %v1284_v35 = vsel %vm539_vm3, %v1279_v32, 0 }
 0x893   :  { %v1277_v38 = vpop.permute.xlu0 %1276 }
 0x896   :  { %v4081_v30 = vpop.eup %4080 }
 0x897   :  { %v1116_v31 = vmul.f32 %v4081_v30, %v4077_v20 }
 0x899   :  { %v1118_v34 = vpack.c.bf16 %v1116_v31, %v1116_v31  ;;  %v3972_v31 = vld [vmem:[%s5391_s6 + $0x20] sm:$0xff]  }
 0x89b   :  { %3729 = vmatmul.mubr.msk.bf16.vlgmr.msra.gmra.mrb[32].mxu1 %vm636_vm8, %v1118_v34  ;;  %v3973_v34 = vld [vmem:[%s5391_s6 + $0x28] sm:$0xff]  }
 0x89c   :  { %3739 = vmatpush3.bf16.xpose.msra.mxu1 %v1284_v35  ;;  %3740 = vmatprep.mubr.msk.bf16.mxu1 %vm4456_vm0, %v4455_v1  ;;  %v3974_v35 = vld [vmem:[%s5391_s6 + $0x30] sm:$0xff]  }
 0x89d   :  { %3750 = vmatprep.subr.bf16.mxu1 %v4455_v1 }
 0x8a3   :  { %3741 = vmatmul.mubr.msk.bf16.vlgmr.msra.gmra.mrb[36].mxu1 %vm539_vm3, %v1277_v38  ;;  %v3975_v38 = vld [vmem:[%s5391_s6 + $0x38] sm:$0xff]  }
 0x8a4   :  { %3752 = vmatprep.mubr.msk.bf16.mxu1 %vm4456_vm0, %v4455_v1 }
 0x939   :  { %v1161_v39 = vpop.f32.mrb[16].mxu0 }
 0x93a   :  { %v3724_v40 = vpop.f32.mrb[17].mxu0 }
 0x93b   :  { %v1164_v41 = vpop.f32.mrb[18].mxu0 }
 0x93c   :  { %v3725_v42 = vpop.f32.mrb[19].mxu0 }
 0x941   :  { %v1270_v44 = vpop.f32.mrb[20].mxu0 }
 0x942   :  { %v1326_v45 = vmul.f32 0.17677669, %v1270_v44  ;;  %v3736_v49 = vpop.f32.mrb[21].mxu0 }
 0x943   :  { %v1273_v50 = vpop.f32.mrb[22].mxu0 }
 0x944   :  { %v3737_v52 = vpop.f32.mrb[23].mxu0  ;;  %v1328_v53 = vsel %vm4878_vm7, %v1326_v45, -1e+10 }
 0x945   :  { %v1330_v54 = vsel %vm636_vm8, %v1328_v53, -inf }
 0x946   :  { %1331 = vmax.xlane.f32.xlu1 %v1330_v54  ;;  %v4134_v54 = vld [vmem:[%s5416_s1] sm:$0xff]  }
 0x96e   :  { %v1209_v55 = vpop.f32.mrb[32].mxu1 }
 0x96f   :  { %v3730_v56 = vpop.f32.mrb[33].mxu1 }
 0x970   :  { %v1212_v59 = vpop.f32.mrb[34].mxu1 }
 0x971   :  { %v3731_v60 = vpop.f32.mrb[35].mxu1 }
 0x976   :  { %v1320_v61 = vpop.f32.mrb[36].mxu1 }
 0x977   :  { %v1327_v62 = vmul.f32 0.17677669, %v1320_v61  ;;  %v3742_v63 = vpop.f32.mrb[37].mxu1  ;;  %v227_v61 = vunpack.c.h.bf16 %v4134_v54 }
 0x978   :  { %v1323_v3 = vpop.f32.mrb[38].mxu1 }
 0x979   :  { %v3743_v4 = vpop.f32.mrb[39].mxu1  ;;  %v1329_v5 = vsel %vm4886_vm10, %v1327_v62, -1e+10 }
 0x97a   :  { %v1333_v6 = vsel %vm636_vm8, %v1329_v5, -inf }
 0x97b   :  { %1334 = vmax.xlane.f32.xlu0 %v1333_v6  ;;  %v3976_v6 = vld [vmem:[%s5395_s10] ss:$8 sps:$4 sm:$0xff]  }
 0x9d3   :  { %v1332_v2 = vpop.xlane.xlu1 %1331 }
 0x9d4   :  { %v1336_v7 = vsub.f32 %v1328_v53, %v1332_v2  ;;  %v3400_v53 = vld [vmem:[#allocation5] ss:$0 sm:$0xff]  ;;  %v3978_v2 = vld [vmem:[%s5395_s10 + $0x4] ss:$8 sps:$4 sm:$0xff]  }
 0x9d6   :  { %v1338_v8 = vmul.f32 1.442695, %v1336_v7  ;;  %v3981_v7 = vld [vmem:[%s5395_s10 + $0x14] ss:$8 sps:$4 sm:$0xff]  }
 0x9d8   :  { %4082 = vpow2.f32 %v1338_v8  ;;  %v3985_v8 = vld [vmem:[#allocation7] sm:$0xff]  }
 0x9e2   :  { %v4083_v9 = vpop.eup %4082 }
 0x9e3   :  { %v1342_v10 = vsel %vm636_vm8, %v4083_v9, 0.0 }
 0x9e4   :  { %1343 = vadd.xlane.f32.xlu0 %v1342_v10  ;;  %v3984_v10 = vld [vmem:[%s5395_s10 + $0x24] ss:$8 sps:$4 sm:$0xff]  }
 0x9fa   :  { %1354 = vrot.lane.b32.xlu0 %v4872_v58, %s4458_s3 }
 0x9fe   :  { %984 = vrot.lane.b32.xlu0 %v4968_v57, %s4458_s3 }
 0xa02   :  { %1219 = vrot.lane.b32.xlu0 %v1209_v55, %s4441_s24  ;;  %v226_v55 = vunpack.c.l.bf16 %v4134_v54 }
 0xa08   :  { %v1335_v14 = vpop.xlane.xlu0 %1334 }
 0xa09   :  { %v1337_v11 = vsub.f32 %v1329_v5, %v1335_v14  ;;  %v3989_v14 = vld [vmem:[#allocation7 + $0x8] sm:$0xff]  }
 0xa0b   :  { %v1340_v12 = vmul.f32 1.442695, %v1337_v11  ;;  %v3982_v11 = vld [vmem:[%s5395_s10 + $0x20] ss:$8 sps:$4 sm:$0xff]  }
 0xa0d   :  { %4084 = vpow2.f32 %v1340_v12  ;;  %v3988_v12 = vld [vmem:[%s5395_s10 + $0x34] ss:$8 sps:$4 sm:$0xff]  }
 0xa17   :  { %v4085_v13 = vpop.eup %4084 }
 0xa18   :  { %v1345_v15 = vsel %vm636_vm8, %v4085_v13, 0.0 }
 0xa19   :  { %1346 = vadd.xlane.f32.xlu1 %v1345_v15  ;;  %v3992_v15 = vld [vmem:[%s5395_s10 + $0x44] ss:$8 sps:$4 sm:$0xff]  }
 0xa2a   :  { %1402 = vrot.lane.b32.xlu1 %v4905_v37, %s4458_s3 }
 0xa2e   :  { %982 = vrot.lane.b32.xlu1 %v4966_v46, %s4458_s3 }
 0xa32   :  { %1217 = vrot.lane.b32.xlu1 %v1161_v39, %s4441_s24 }
 0xa71   :  { %v1344_v58 = vpop.xlane.xlu0 %1343 }
 0xa72   :  { %4086 = vrcp.f32 %v1344_v58  ;;  %v3990_v58 = vld [vmem:[%s5395_s10 + $0x40] ss:$8 sps:$4 sm:$0xff]  }
 0xa75   :  { %v1355_v57 = vpop.permute.xlu0 %1354 }
 0xa76   :  { %v1360_v16 = vsel %vm664_vm4, %v1355_v57, 0 }
 0xa77   :  { %3745 = vmatpush3.bf16.msra.mxu0 %v1360_v16 }
 0xa78   :  { %3756 = vmatprep.subr.bf16.mxu0 %v4455_v1 }
 0xa79   :  { %v985_v17 = vpop.permute.xlu0 %984 }
 0xa7a   :  { %990 = vst.msk [vmem:[#allocation2 + $0x8] sm:$0xff] %vm988_vm11, %v985_v17 }
 0xa7c   :  { %v4087_v18 = vpop.eup %4086 }
 0xa7d   :  { %v1349_v37 = vmul.f32 %v4087_v18, %v4083_v9  ;;  %v1220_v19 = vpop.permute.xlu0 %1219  ;;  %v3979_v9 = vld [vmem:[%s5395_s10 + $0x10] ss:$8 sps:$4 sm:$0xff]  }
 0xa7e   :  { %1225 = vst.msk [vmem:[#allocation2 + $0x8] sm:$0xff] %vm1223_vm12, %v1220_v19 }
 0xa7f   :  { %v1352_v46 = vpack.c.bf16 %v1349_v37, %v1349_v37 }
 0xa81   :  { %3747 = vmatmul.mubr.msk.bf16.vlgmr.msra.gmra.mrb[24].mxu0 %vm636_vm8, %v1352_v46 }
 0xa82   :  { %3772 = vmatprep.mubr.msk.bf16.mxu0 %vm4456_vm0, %v4455_v1  ;;  %3757 = vmatpush3.bf16.msra.mxu0 %v3968_v26  ;;  %v4004_v26 = vld [vmem:[%s5395_s10 + $0x74] ss:$8 sps:$4 sm:$0xff]  }
 0xa83   :  { %3758 = vmatprep.subr.bf16.mxu0 %v4455_v1 }
 0xa86   :  { %3759 = vmatpush3.bf16.msra.mxu0 %v3969_v27  ;;  %v4002_v27 = vld [vmem:[%s5395_s10 + $0x70] ss:$8 sps:$4 sm:$0xff]  }
 0xa87   :  { %3760 = vmatprep.subr.bf16.mxu0 %v4455_v1 }
 0xa8a   :  { %3761 = vmatpush3.bf16.msra.mxu0 %v3970_v28  ;;  %v4005_v28 = vld [vmem:[#allocation7 + $0x28] sm:$0xff]  }
 0xa8b   :  { %3762 = vmatprep.subr.bf16.mxu0 %v4455_v1 }
 0xa8e   :  { %3763 = vmatpush3.bf16.msra.mxu0 %v3971_v29  ;;  %v4006_v29 = vld [vmem:[%s5422_s21] sm:$0xff]  }
 0xa8f   :  { %3764 = vmatprep.subr.bf16.mxu0 %v4455_v1 }
 0xa92   :  { %3765 = vmatpush3.bf16.msra.mxu0 %v3972_v31 }
 0xa93   :  { %3766 = vmatprep.subr.bf16.mxu0 %v4455_v1 }
 0xa96   :  { %3767 = vmatpush3.bf16.msra.mxu0 %v3973_v34 }
 0xa97   :  { %3768 = vmatprep.subr.bf16.mxu0 %v4455_v1 }
 0xa9a   :  { %3769 = vmatpush3.bf16.msra.mxu0 %v3974_v35 }
 0xa9b   :  { %3770 = vmatprep.subr.bf16.mxu0 %v4455_v1 }
 0xa9e   :  { %3771 = vmatpush3.bf16.msra.mxu0 %v3975_v38 }
 0xa9f   :  { %1844 = vmatprep.subr.bf16.mxu0 %v3978_v2 }
 0xaa6   :  { %v1347_v43 = vpop.xlane.xlu1 %1346 }
 0xaa7   :  { %4088 = vrcp.f32 %v1347_v43 }
 0xaaa   :  { %v1403_v48 = vpop.permute.xlu1 %1402 }
 0xaab   :  { %v1408_v20 = vsel %vm664_vm4, %v1403_v48, 0  ;;  %v3993_v48 = vld [vmem:[#allocation7 + $0x10] sm:$0xff]  }
 0xaac   :  { %3751 = vmatpush3.bf16.msra.mxu1 %v1408_v20  ;;  %v3996_v20 = vld [vmem:[%s5395_s10 + $0x54] ss:$8 sps:$4 sm:$0xff]  }
 0xaad   :  { %3776 = vmatprep.subr.bf16.mxu1 %v4455_v1 }
 0xaae   :  { %v983_v21 = vpop.permute.xlu1 %982 }
 0xaaf   :  { %989 = vst.msk [vmem:[#allocation2] sm:$0xff] %vm988_vm11, %v983_v21  ;;  %v3994_v21 = vld [vmem:[%s5395_s10 + $0x50] ss:$8 sps:$4 sm:$0xff]  }
 0xab1   :  { %v4089_v22 = vpop.eup %4088 }
 0xab2   :  { %v1351_v23 = vmul.f32 %v4089_v22, %v4085_v13  ;;  %v1218_v24 = vpop.permute.xlu1 %1217  ;;  %v3986_v13 = vld [vmem:[%s5395_s10 + $0x30] ss:$8 sps:$4 sm:$0xff]  }
 0xab3   :  { %1224 = vst.msk [vmem:[#allocation2] sm:$0xff] %vm1223_vm12, %v1218_v24  ;;  %v3997_v22 = vld [vmem:[#allocation7 + $0x18] sm:$0xff]   ;;  %v3998_v24 = vld [vmem:[%s5395_s10 + $0x60] ss:$8 sps:$4 sm:$0xff]  }
 0xab4   :  { %v1353_v25 = vpack.c.bf16 %v1351_v23, %v1351_v23  ;;  %v4000_v23 = vld [vmem:[%s5395_s10 + $0x64] ss:$8 sps:$4 sm:$0xff]  }
 0xab6   :  { %3753 = vmatmul.mubr.msk.bf16.vlgmr.msra.gmra.mrb[40].mxu1 %vm636_vm8, %v1353_v25  ;;  %v4001_v25 = vld [vmem:[#allocation7 + $0x20] sm:$0xff]  }
 0xab7   :  { %3792 = vmatprep.mubr.msk.bf16.mxu1 %vm4456_vm0, %v4455_v1  ;;  %3777 = vmatpush3.bf16.msra.mxu1 %v3985_v8 }
 0xab8   :  { %3778 = vmatprep.subr.bf16.mxu1 %v4455_v1 }
 0xabb   :  { %3779 = vmatpush3.bf16.msra.mxu1 %v3989_v14 }
 0xabc   :  { %3780 = vmatprep.subr.bf16.mxu1 %v4455_v1 }
 0xabf   :  { %3781 = vmatpush3.bf16.msra.mxu1 %v3993_v48 }
 0xac0   :  { %3782 = vmatprep.subr.bf16.mxu1 %v4455_v1 }
 0xac3   :  { %3783 = vmatpush3.bf16.msra.mxu1 %v3997_v22 }
 0xac4   :  { %3784 = vmatprep.subr.bf16.mxu1 %v4455_v1 }
 0xac7   :  { %3785 = vmatpush3.bf16.msra.mxu1 %v4001_v25 }
 0xac8   :  { %3786 = vmatprep.subr.bf16.mxu1 %v4455_v1 }
 0xacb   :  { %3787 = vmatpush3.bf16.msra.mxu1 %v4005_v28 }
 0xacc   :  { %3788 = vmatprep.subr.bf16.mxu1 %v4455_v1 }
 0xb54   :  { %v1396_v47 = vpop.f32.mrb[24].mxu0 }
 0xb55   :  { %1452 = vrot.lane.b32.xlu1 %v1396_v47, %s4457_s2  ;;  %v3748_v51 = vpop.f32.mrb[25].mxu0  ;;  %v4007_v47 = vld [vmem:[#allocation7 + $0x30] sm:$0xff]  }
 0xb56   :  { %v1399_v30 = vpop.f32.mrb[26].mxu0  ;;  %3789 = vmatpush3.bf16.msra.mxu1 %v4007_v47  ;;  %v4008_v51 = vld [vmem:[#allocation7 + $0x38] sm:$0xff]  }
 0xb57   :  { %v3749_v32 = vpop.f32.mrb[27].mxu0  ;;  %3790 = vmatprep.subr.bf16.mxu1 %v4455_v1 }
 0xb5a   :  { %3791 = vmatpush3.bf16.msra.mxu1 %v4008_v51 }
 0xb5b   :  { %3796 = vmatprep.subr.bf16.mxu1 %v4455_v1 }
 0xb89   :  { %v1444_v39 = vpop.f32.mrb[40].mxu1 }
 0xb8a   :  { %1454 = vrot.lane.b32.xlu0 %v1444_v39, %s4457_s2  ;;  %v3754_v40 = vpop.f32.mrb[41].mxu1 }
 0xb8b   :  { %v1447_v41 = vpop.f32.mrb[42].mxu1  ;;  %v5143_v40 = vld [vmem:[#allocation20] ss:$0 sm:$0xff] }
 0xb8c   :  { %v3755_v42 = vpop.f32.mrb[43].mxu1 }
 0xbc7   :  { %v1453_v44 = vpop.permute.xlu1 %1452 }
 0xbc8   :  { %1459 = vst.msk [vmem:[#allocation2] sm:$0xff] %vm1458_vm13, %v1453_v44 }
 0xbcf   :  { %v1461_v49 = vld [vmem:[#allocation2] sm:$0xff] }
 0xbfc   :  { %v1455_v45 = vpop.permute.xlu0 %1454 }
 0xbfd   :  { %1460 = vst.msk [vmem:[#allocation2 + $0x8] sm:$0xff] %vm1458_vm13, %v1455_v45 }
 0xc04   :  { %v1462_v50 = vld [vmem:[#allocation2 + $0x8] sm:$0xff] }
 0xc05   :  { %v1463_v52 = vpack.c.bf16 %v1462_v50, %v1461_v49  ;;  %v5146_v49 = vld [vmem:[#allocation22] ss:$0 sm:$0xff] }
 0xc07   :  { %3773 = vmatmul.mubr.bf16.vlgmr.msra.gmra.mrb[28].mxu0 %v1463_v52 }
 0xc08   :  { %1876 = vmatprep.mubr.bf16.mxu0 %v4454_v0  ;;  %1845 = vmatpush1.bf16.msra.mxu0 %v3976_v6 }
 0xc09   :  { %1846 = vmatprep.subr.bf16.mxu0 %v3981_v7  ;;  %v3411_v7 = vld [vmem:[#allocation8] ss:$0 sm:$0xff] }
 0xc0c   :  { %1847 = vmatpush1.bf16.msra.mxu0 %v3979_v9 }
 0xc0d   :  { %1848 = vmatprep.subr.bf16.mxu0 %v3984_v10 }
 0xc10   :  { %1849 = vmatpush1.bf16.msra.mxu0 %v3982_v11 }
 0xc11   :  { %1850 = vmatprep.subr.bf16.mxu0 %v3988_v12 }
 0xc14   :  { %1851 = vmatpush1.bf16.msra.mxu0 %v3986_v13 }
 0xc15   :  { %1852 = vmatprep.subr.bf16.mxu0 %v3992_v15 }
 0xc18   :  { %1853 = vmatpush1.bf16.msra.mxu0 %v3990_v58 }
 0xc19   :  { %1854 = vmatprep.subr.bf16.mxu0 %v3996_v20 }
 0xc1c   :  { %1855 = vmatpush1.bf16.msra.mxu0 %v3994_v21 }
 0xc1d   :  { %1856 = vmatprep.subr.bf16.mxu0 %v4000_v23 }
 0xc20   :  { %1857 = vmatpush1.bf16.msra.mxu0 %v3998_v24 }
 0xc21   :  { %1858 = vmatprep.subr.bf16.mxu0 %v4004_v26 }
 0xc24   :  { %1859 = vmatpush1.bf16.msra.mxu0 %v4002_v27 }
 0xc25   :  { %3820 = vmatprep.subr.bf16.mxu0 %v4455_v1 }
 0xc27   :  { %1877 = vmatmul.mubr.bf16.vlgmr.msra.gmra.mrb[32].mxu0 %v4006_v29 }
 0xc28   :  { %3822 = vmatprep.mubr.msk.bf16.mxu0 %vm4456_vm0, %v4455_v1 }
 0xcda   :  { %v1569_v56 = vpop.f32.mrb[28].mxu0 }
 0xcdb   :  { %v1570_v59 = vadd.f32 %v3400_v53, %v1569_v56  ;;  %v3774_v60 = vpop.f32.mrb[29].mxu0 }
 0xcdc   :  { %v1572_v62 = vpop.f32.mrb[30].mxu0 }
 0xcdd   :  { %v1573_v63 = vadd.f32 %v3400_v53, %v1572_v62  ;;  %v3775_v3 = vpop.f32.mrb[31].mxu0  ;;  %v1576_v4 = vadd.f32 %v1570_v59, %v226_v55  ;;  %v1746_v55 = vld [vmem:[#allocation10] sm:$0x3] }
 0xcde   :  { %v1751_v56 = vrot.slane %v1746_v55, %v4847_v36  ;;  %v1755_v60 = vrot.slane %v1746_v55, %v4844_v33 }
 0xcdf   :  { %1578 = vadd.xlane.f32.xlu1 %v1576_v4  ;;  %v1577_v5 = vadd.f32 %v1573_v63, %v227_v61 }
 0xce1   :  { %1580 = vadd.xlane.f32.xlu0 %v1577_v5 }
 0xcfa   :  { %v1878_v59 = vpop.f32.mrb[32].mxu0 }
 0xcfb   :  { %v1879_v61 = vadd.f32 %v1878_v59, %v1751_v56  ;;  %v1880_v62 = vpop.f32.mrb[33].mxu0 }
 0xcfc   :  { %v1882_v63 = vpop.f32.mrb[34].mxu0  ;;  %v1881_v15 = vadd.f32 %v1880_v62, %v1755_v60 }
 0xcfd   :  { %v5161_v3 = vpack.c.bf16 %v1879_v61, %v1879_v61 }
 0xcff   :  { %v1909_v2 = vsel %vm539_vm3, %v5161_v3, 0 }
 0xd6c   :  { %v1579_v57 = vpop.xlane.xlu1 %1578 }
 0xd6d   :  { %v1583_v16 = vmul.f32 0.0078125, %v1579_v57 }
 0xd6e   :  { %v1581_v17 = vpop.xlane.xlu0 %1580 }
 0xd6f   :  { %v1585_v18 = vsub.f32 %v1576_v4, %v1583_v16  ;;  %v1584_v37 = vmul.f32 0.0078125, %v1581_v17  ;;  %v1883_v4 = vadd.f32 %v1882_v63, %v1751_v56  ;;  %v5179_v16 = vpack.c.bf16 %v1881_v15, %v1881_v15 }
 0xd71   :  { %v1586_v19 = vsub.f32 %v1577_v5, %v1584_v37  ;;  %v1587_v46 = vmul.f32 %v1585_v18, %v1585_v18  ;;  %v1884_v5 = vpop.f32.mrb[35].mxu0  ;;  %v5168_v9 = vpack.c.bf16 %v1883_v4, %v1883_v4  ;;  %v253_v37 = vld [vmem:[%s5423_s5] sm:$0x1] }
 0xd72   :  { %v5163_v6 = vadd.f32 %v1884_v5, %v1755_v60  ;;  %vm255_vm14 = vcmp.ne.s32.totalorder %v253_v37, 0 }
 0xd73   :  { %1589 = vadd.xlane.f32.xlu0 %v1587_v46  ;;  %v1588_v43 = vmul.f32 %v1586_v19, %v1586_v19  ;;  %v1955_v58 = vsel %vm539_vm3, %v5168_v9, 0  ;;  %v254_v46 = vld [vmem:[%s5423_s5 + $0x1] sm:$0x1] }
 0xd74   :  { %vm256_vm15 = vcmp.ne.s32.totalorder %v254_v46, 0  ;;  %v5228_v4 = vpack.c.bf16 %v5163_v6, %v5163_v6 }
 0xd75   :  { %1591 = vadd.xlane.f32.xlu1 %v1588_v43  ;;  %v2000_v23 = vsel %vm256_vm15, 1, %v4454_v0 }
 0xd76   :  { %v2008_v28 = vrot.slane %v2000_v23, %v4847_v36 }
 0xd78   :  { %vm5207_vm2 = vcmp.eq.s32.totalorder %v2008_v28, 1 }
 0xe00   :  { %v1590_v30 = vpop.xlane.xlu0 %1589 }
 0xe01   :  { %v1593_v31 = vmul.f32 0.0078125, %v1590_v30 }
 0xe02   :  { %v1592_v32 = vpop.xlane.xlu1 %1591 }
 0xe03   :  { %v1595_v34 = vadd.f32 1e-05, %v1593_v31  ;;  %v1594_v35 = vmul.f32 0.0078125, %v1592_v32 }
 0xe05   :  { %4090 = vrsqrt.f32 %v1595_v34  ;;  %v1596_v38 = vadd.f32 1e-05, %v1594_v35 }
 0xe07   :  { %4092 = vrsqrt.f32 %v1596_v38 }
 0xe0f   :  { %v4091_v39 = vpop.eup %4090 }
 0xe10   :  { %v1599_v41 = vmul.f32 %v4091_v39, %v1585_v18  ;;  %v2041_v18 = vsel %vm664_vm4, %v5179_v16, 0 }
 0xe11   :  { %v4093_v42 = vpop.eup %4092 }
 0xe12   :  { %v1600_v44 = vmul.f32 %v4093_v42, %v1586_v19  ;;  %v1607_v45 = vmul.f32 %v5143_v40, %v1599_v41  ;;  %v1999_v19 = vsel %vm255_vm14, 1, %v4454_v0 }
 0xe13   :  { %v2004_v43 = vrot.slane %v1999_v19, %v4847_v36 }
 0xe14   :  { %v1608_v50 = vmul.f32 %v5143_v40, %v1600_v44  ;;  %v5150_v52 = vadd.f32 %v5146_v49, %v1607_v45 }
 0xe15   :  { %vm5198_vm1 = vcmp.eq.s32.totalorder %v2004_v43, 1 }
 0xe16   :  { %v5153_v53 = vadd.f32 %v5146_v49, %v1608_v50 }
 0xe18   :  { %v1617_v54 = vpack.c.bf16 %v5153_v53, %v5150_v52 }
 0xe1a   :  { %3793 = vmatmul.mubr.bf16.vlgmr.msra.gmra.mrb[44].mxu1 %v1617_v54 }
 0xe1b   :  { %3798 = vmatprep.mubr.msk.bf16.mxu1 %vm4456_vm0, %v4455_v1  ;;  %3797 = vmatpush3.bf16.xpose.msra.mxu1 %v1909_v2 }
 0xe1c   :  { %3802 = vmatprep.subr.bf16.mxu1 %v4455_v1 }
 0xeed   :  { %v1723_v8 = vpop.f32.mrb[44].mxu1 }
 0xeee   :  { %v1724_v10 = vadd.f32 %v3411_v7, %v1723_v8  ;;  %v3794_v14 = vpop.f32.mrb[45].mxu1  ;;  %v2087_v8 = vsel %vm664_vm4, %v5228_v4, 0 }
 0xeef   :  { %v1726_v11 = vpop.f32.mrb[46].mxu1 }
 0xef0   :  { %v5170_v12 = vpack.c.bf16 %v1724_v10, %v1724_v10  ;;  %v3795_v13 = vpop.f32.mrb[47].mxu1  ;;  %v1727_v57 = vadd.f32 %v3411_v7, %v1726_v11 }
 0xef2   :  { %3799 = vmatmul.mubr.msk.bf16.vlgmr.msra.gmra.mrb[48].mxu1 %vm539_vm3, %v5170_v12  ;;  %v5181_v17 = vpack.c.bf16 %v1727_v57, %v1727_v57 }
 0xef3   :  { %3803 = vmatpush3.bf16.xpose.msra.mxu1 %v1955_v58  ;;  %3804 = vmatprep.mubr.msk.bf16.mxu1 %vm4456_vm0, %v4455_v1 }
 0xef4   :  { %3808 = vmatprep.subr.bf16.mxu1 %v4455_v1 }
 0xefa   :  { %3805 = vmatmul.mubr.msk.bf16.vlgmr.msra.gmra.mrb[52].mxu1 %vm539_vm3, %v5181_v17 }
 0xefb   :  { %3809 = vmatpush3.bf16.msra.mxu1 %v2041_v18  ;;  %3810 = vmatprep.mubr.msk.bf16.mxu1 %vm4456_vm0, %v4455_v1 }
 0xefc   :  { %3814 = vmatprep.subr.bf16.mxu1 %v4455_v1 }
 0xfc5   :  { %v1945_v48 = vpop.f32.mrb[48].mxu1 }
 0xfc6   :  { %v1997_v21 = vmul.f32 0.17677669, %v1945_v48  ;;  %v3800_v22 = vpop.f32.mrb[49].mxu1 }
 0xfc7   :  { %v1948_v24 = vpop.f32.mrb[50].mxu1 }
 0xfc8   :  { %v3801_v25 = vpop.f32.mrb[51].mxu1  ;;  %v2011_v26 = vsel %vm5198_vm1, %v1997_v21, -1e+10 }
 0xfc9   :  { %v2013_v27 = vsel %vm636_vm8, %v2011_v26, -inf }
 0xfca   :  { %2014 = vmax.xlane.f32.xlu0 %v2013_v27 }
 0xfcd   :  { %v1991_v29 = vpop.f32.mrb[52].mxu1 }
 0xfce   :  { %v1998_v51 = vmul.f32 0.17677669, %v1991_v29  ;;  %v3806_v30 = vpop.f32.mrb[53].mxu1 }
 0xfcf   :  { %v1994_v31 = vpop.f32.mrb[54].mxu1 }
 0xfd0   :  { %v3807_v32 = vpop.f32.mrb[55].mxu1  ;;  %v2012_v34 = vsel %vm5207_vm2, %v1998_v51, -1e+10 }
 0xfd1   :  { %v2016_v35 = vsel %vm636_vm8, %v2012_v34, -inf }
 0xfd2   :  { %2017 = vmax.xlane.f32.xlu1 %v2016_v35 }
0x1057   :  { %v2015_v38 = vpop.xlane.xlu0 %2014 }
0x1058   :  { %v2019_v39 = vsub.f32 %v2011_v26, %v2015_v38 }
0x105a   :  { %v2021_v41 = vmul.f32 1.442695, %v2019_v39 }
0x105c   :  { %4094 = vpow2.f32 %v2021_v41 }
0x105f   :  { %v2018_v42 = vpop.xlane.xlu1 %2017 }
0x1060   :  { %v2020_v44 = vsub.f32 %v2012_v34, %v2018_v42 }
0x1062   :  { %v2023_v45 = vmul.f32 1.442695, %v2020_v44 }
0x1064   :  { %4096 = vpow2.f32 %v2023_v45 }
0x1066   :  { %v4095_v50 = vpop.eup %4094 }
0x1067   :  { %v2025_v54 = vsel %vm636_vm8, %v4095_v50, 0.0 }
0x1068   :  { %2026 = vadd.xlane.f32.xlu0 %v2025_v54 }
0x106e   :  { %v4097_v55 = vpop.eup %4096 }
0x106f   :  { %v2028_v56 = vsel %vm636_vm8, %v4097_v55, 0.0 }
0x1070   :  { %2029 = vadd.xlane.f32.xlu1 %v2028_v56 }
0x107e   :  { %2133 = vrot.lane.b32.xlu0 %v5161_v3, %s4457_s2 }
0x1081   :  { %2183 = vrot.lane.b32.xlu1 %v5168_v9, %s4457_s2 }
0x1082   :  { %2181 = vrot.lane.b32.xlu0 %v5181_v17, %s4457_s2 }
0x1085   :  { %2131 = vrot.lane.b32.xlu1 %v5170_v12, %s4457_s2 }
0x10f5   :  { %v2027_v59 = vpop.xlane.xlu0 %2026 }
0x10f6   :  { %4098 = vrcp.f32 %v2027_v59 }
0x10f9   :  { %v2134_v60 = vpop.permute.xlu0 %2133 }
0x10fa   :  { %v2139_v61 = vsel %vm539_vm3, %v2134_v60, 0 }
0x10fb   :  { %3821 = vmatpush3.bf16.xpose.msra.mxu0 %v2139_v61 }
0x10fc   :  { %3832 = vmatprep.subr.bf16.mxu0 %v4455_v1 }
0x10fd   :  { %v2030_v62 = vpop.xlane.xlu1 %2029  ;;  %v2182_v15 = vpop.permute.xlu0 %2181 }
0x10fe   :  { %4100 = vrcp.f32 %v2030_v62 }
0x1100   :  { %v4099_v63 = vpop.eup %4098 }
0x1101   :  { %v2032_v5 = vmul.f32 %v4099_v63, %v4095_v50  ;;  %v2184_v2 = vpop.permute.xlu1 %2183 }
0x1102   :  { %v2189_v13 = vsel %vm539_vm3, %v2184_v2, 0 }
0x1103   :  { %v2035_v7 = vpack.c.bf16 %v2032_v5, %v2032_v5 }
0x1105   :  { %3811 = vmatmul.mubr.msk.bf16.vlgmr.msra.gmra.mrb[56].mxu1 %vm636_vm8, %v2035_v7  ;;  %v2132_v10 = vpop.permute.xlu1 %2131 }
0x1106   :  { %3815 = vmatpush3.bf16.msra.mxu1 %v2087_v8  ;;  %3823 = vmatmul.mubr.msk.bf16.vlgmr.msra.gmra.mrb[36].mxu0 %vm539_vm3, %v2132_v10 }
0x1107   :  { %3816 = vmatprep.mubr.msk.bf16.mxu1 %vm4456_vm0, %v4455_v1  ;;  %3826 = vmatprep.subr.bf16.mxu1 %v4455_v1 }
0x1108   :  { %v4101_v14 = vpop.eup %4100  ;;  %3834 = vmatprep.mubr.msk.bf16.mxu0 %vm4456_vm0, %v4455_v1 }
0x1109   :  { %v2034_v6 = vmul.f32 %v4101_v14, %v4097_v55 }
0x110b   :  { %v2036_v11 = vpack.c.bf16 %v2034_v6, %v2034_v6 }
0x110d   :  { %3817 = vmatmul.mubr.msk.bf16.vlgmr.msra.gmra.mrb[60].mxu1 %vm636_vm8, %v2036_v11 }
0x110e   :  { %3828 = vmatprep.mubr.msk.bf16.mxu1 %vm4456_vm0, %v4455_v1 }
0x110f   :  { %3827 = vmatpush3.bf16.xpose.msra.mxu1 %v2189_v13 }
0x1110   :  { %3838 = vmatprep.subr.bf16.mxu1 %v4455_v1 }
0x1116   :  { %3829 = vmatmul.mubr.msk.bf16.vlgmr.msra.gmra.mrb[64].mxu1 %vm539_vm3, %v2182_v15 }
0x1117   :  { %3840 = vmatprep.mubr.msk.bf16.mxu1 %vm4456_vm0, %v4455_v1 }
0x11d8   :  { %v2077_v58 = vpop.f32.mrb[56].mxu1 }
0x11d9   :  { %2129 = vst.msk [vmem:[#allocation2] sm:$0xff] %vm539_vm3, %v2077_v58  ;;  %v3812_v57 = vpop.f32.mrb[57].mxu1  ;;  %v2175_v18 = vpop.f32.mrb[36].mxu0 }
0x11da   :  { %v2231_v37 = vmul.f32 0.17677669, %v2175_v18  ;;  %v2080_v19 = vpop.f32.mrb[58].mxu1  ;;  %v3824_v46 = vpop.f32.mrb[37].mxu0 }
0x11db   :  { %v3813_v43 = vpop.f32.mrb[59].mxu1  ;;  %v2178_v48 = vpop.f32.mrb[38].mxu0 }
0x11dc   :  { %v3825_v21 = vpop.f32.mrb[39].mxu0  ;;  %v2233_v22 = vsel %vm5198_vm1, %v2231_v37, -1e+10 }
0x11dd   :  { %v2235_v23 = vsel %vm636_vm8, %v2233_v22, -inf }
0x11de   :  { %2236 = vmax.xlane.f32.xlu1 %v2235_v23 }
0x11e0   :  { %v2123_v24 = vpop.f32.mrb[60].mxu1 }
0x11e1   :  { %2130 = vst.msk [vmem:[#allocation2 + $0x8] sm:$0xff] %vm539_vm3, %v2123_v24  ;;  %v3818_v25 = vpop.f32.mrb[61].mxu1 }
0x11e2   :  { %v2126_v26 = vpop.f32.mrb[62].mxu1 }
0x11e3   :  { %v3819_v27 = vpop.f32.mrb[63].mxu1 }
0x11e9   :  { %v2225_v28 = vpop.f32.mrb[64].mxu1 }
0x11ea   :  { %v2232_v29 = vmul.f32 0.17677669, %v2225_v28  ;;  %v3830_v51 = vpop.f32.mrb[65].mxu1 }
0x11eb   :  { %v2228_v30 = vpop.f32.mrb[66].mxu1 }
0x11ec   :  { %v3831_v31 = vpop.f32.mrb[67].mxu1  ;;  %v2234_v32 = vsel %vm5207_vm2, %v2232_v29, -1e+10 }
0x11ed   :  { %v2238_v34 = vsel %vm636_vm8, %v2234_v32, -inf }
0x11ee   :  { %2239 = vmax.xlane.f32.xlu0 %v2238_v34 }
0x11ef   :  { %2307 = vrot.lane.b32.xlu1 %v5228_v4, %s4457_s2 }
0x126b   :  { %v2237_v35 = vpop.xlane.xlu1 %2236 }
0x126c   :  { %v2241_v38 = vsub.f32 %v2233_v22, %v2237_v35 }
0x126e   :  { %v2243_v39 = vmul.f32 1.442695, %v2241_v38 }
0x126f   :  { %v2308_v41 = vpop.permute.xlu1 %2307 }
0x1270   :  { %4102 = vpow2.f32 %v2243_v39  ;;  %v2313_v42 = vsel %vm664_vm4, %v2308_v41, 0 }
0x1271   :  { %3839 = vmatpush3.bf16.msra.mxu1 %v2313_v42 }
0x1272   :  { %3850 = vmatprep.subr.bf16.mxu1 %v4455_v1 }
0x127a   :  { %v4103_v44 = vpop.eup %4102 }
0x127b   :  { %v2240_v45 = vpop.xlane.xlu0 %2239  ;;  %v2247_v50 = vsel %vm636_vm8, %v4103_v44, 0.0 }
0x127c   :  { %v2242_v54 = vsub.f32 %v2234_v32, %v2240_v45  ;;  %2248 = vadd.xlane.f32.xlu0 %v2247_v50 }
0x127e   :  { %v2245_v55 = vmul.f32 1.442695, %v2242_v54 }
0x1280   :  { %4104 = vpow2.f32 %v2245_v55 }
0x128a   :  { %v4105_v56 = vpop.eup %4104 }
0x128b   :  { %v2250_v59 = vsel %vm636_vm8, %v4105_v56, 0.0 }
0x128c   :  { %2251 = vadd.xlane.f32.xlu1 %v2250_v59 }
0x1292   :  { %2259 = vrot.lane.b32.xlu0 %v5179_v16, %s4457_s2 }
0x1296   :  { %2417 = vrot.lane.b32.xlu0 %v5168_v9, %s4441_s24 }
0x129a   :  { %2415 = vrot.lane.b32.xlu0 %v5181_v17, %s4441_s24 }
0x129d   :  { %2367 = vrot.lane.b32.xlu1 %v5161_v3, %s4441_s24 }
0x12a1   :  { %2365 = vrot.lane.b32.xlu1 %v5170_v12, %s4441_s24 }
0x1309   :  { %v2249_v60 = vpop.xlane.xlu0 %2248 }
0x130a   :  { %4106 = vrcp.f32 %v2249_v60 }
0x130d   :  { %v2260_v61 = vpop.permute.xlu0 %2259 }
0x130e   :  { %v2265_v62 = vsel %vm664_vm4, %v2260_v61, 0 }
0x130f   :  { %3833 = vmatpush3.bf16.msra.mxu0 %v2265_v62 }
0x1310   :  { %3844 = vmatprep.subr.bf16.mxu0 %v4455_v1 }
0x1311   :  { %v2418_v13 = vpop.permute.xlu0 %2417 }
0x1312   :  { %v2423_v58 = vsel %vm539_vm3, %v2418_v13, 0 }
0x1314   :  { %v4107_v63 = vpop.eup %4106 }
0x1315   :  { %v2254_v5 = vmul.f32 %v4107_v63, %v4103_v44  ;;  %v2416_v57 = vpop.permute.xlu0 %2415 }
0x1317   :  { %v2257_v2 = vpack.c.bf16 %v2254_v5, %v2254_v5 }
0x1319   :  { %v2252_v7 = vpop.xlane.xlu1 %2251  ;;  %3835 = vmatmul.mubr.msk.bf16.vlgmr.msra.gmra.mrb[40].mxu0 %vm636_vm8, %v2257_v2 }
0x131a   :  { %4108 = vrcp.f32 %v2252_v7  ;;  %3846 = vmatprep.mubr.msk.bf16.mxu0 %vm4456_vm0, %v4455_v1 }
0x131d   :  { %v2368_v8 = vpop.permute.xlu1 %2367 }
0x131e   :  { %v2373_v10 = vsel %vm539_vm3, %v2368_v8, 0 }
0x131f   :  { %3845 = vmatpush3.bf16.xpose.msra.mxu0 %v2373_v10 }
0x1320   :  { %3856 = vmatprep.subr.bf16.mxu0 %v4455_v1 }
0x1321   :  { %v2366_v11 = vpop.permute.xlu1 %2365 }
0x1324   :  { %v4109_v14 = vpop.eup %4108 }
0x1325   :  { %v2256_v6 = vmul.f32 %v4109_v14, %v4105_v56 }
0x1326   :  { %3847 = vmatmul.mubr.msk.bf16.vlgmr.msra.gmra.mrb[44].mxu0 %vm539_vm3, %v2366_v11 }
0x1327   :  { %v2258_v15 = vpack.c.bf16 %v2256_v6, %v2256_v6  ;;  %3858 = vmatprep.mubr.msk.bf16.mxu0 %vm4456_vm0, %v4455_v1 }
0x1329   :  { %3841 = vmatmul.mubr.msk.bf16.vlgmr.msra.gmra.mrb[68].mxu1 %vm636_vm8, %v2258_v15 }
0x132a   :  { %3851 = vmatpush3.bf16.xpose.msra.mxu1 %v2423_v58  ;;  %3852 = vmatprep.mubr.msk.bf16.mxu1 %vm4456_vm0, %v4455_v1 }
0x132b   :  { %3862 = vmatprep.subr.bf16.mxu1 %v4455_v1 }
0x1331   :  { %3853 = vmatmul.mubr.msk.bf16.vlgmr.msra.gmra.mrb[72].mxu1 %vm539_vm3, %v2416_v57 }
0x1332   :  { %3864 = vmatprep.mubr.msk.bf16.mxu1 %vm4456_vm0, %v4455_v1 }
0x13ec   :  { %v5289_v18 = vpop.f32.mrb[40].mxu0 }
0x13ed   :  { %v3836_v37 = vpop.f32.mrb[41].mxu0 }
0x13ee   :  { %v2304_v19 = vpop.f32.mrb[42].mxu0 }
0x13ef   :  { %v3837_v46 = vpop.f32.mrb[43].mxu0 }
0x13f9   :  { %v2409_v43 = vpop.f32.mrb[44].mxu0 }
0x13fa   :  { %v2465_v48 = vmul.f32 0.17677669, %v2409_v43  ;;  %v3848_v21 = vpop.f32.mrb[45].mxu0 }
0x13fb   :  { %v2412_v22 = vpop.f32.mrb[46].mxu0 }
0x13fc   :  { %v5291_v23 = vpop.f32.mrb[68].mxu1  ;;  %v3849_v24 = vpop.f32.mrb[47].mxu0  ;;  %v2467_v25 = vsel %vm5198_vm1, %v2465_v48, -1e+10 }
0x13fd   :  { %v3842_v26 = vpop.f32.mrb[69].mxu1  ;;  %v2469_v27 = vsel %vm636_vm8, %v2467_v25, -inf }
0x13fe   :  { %2470 = vmax.xlane.f32.xlu1 %v2469_v27  ;;  %v2352_v28 = vpop.f32.mrb[70].mxu1 }
0x13ff   :  { %v3843_v29 = vpop.f32.mrb[71].mxu1 }
0x1404   :  { %v2459_v51 = vpop.f32.mrb[72].mxu1 }
0x1405   :  { %v2466_v30 = vmul.f32 0.17677669, %v2459_v51  ;;  %v3854_v31 = vpop.f32.mrb[73].mxu1 }
0x1406   :  { %v2462_v32 = vpop.f32.mrb[74].mxu1 }
0x1407   :  { %v3855_v34 = vpop.f32.mrb[75].mxu1  ;;  %v2468_v35 = vsel %vm5207_vm2, %v2466_v30, -1e+10 }
0x1408   :  { %v2472_v38 = vsel %vm636_vm8, %v2468_v35, -inf }
0x1409   :  { %2473 = vmax.xlane.f32.xlu0 %v2472_v38 }
0x140f   :  { %2541 = vrot.lane.b32.xlu1 %v5228_v4, %s4441_s24 }
0x148b   :  { %v2471_v39 = vpop.xlane.xlu1 %2470 }
0x148c   :  { %v2475_v41 = vsub.f32 %v2467_v25, %v2471_v39 }
0x148e   :  { %v2477_v42 = vmul.f32 1.442695, %v2475_v41 }
0x148f   :  { %v2542_v44 = vpop.permute.xlu1 %2541 }
0x1490   :  { %4110 = vpow2.f32 %v2477_v42  ;;  %v2547_v45 = vsel %vm664_vm4, %v2542_v44, 0 }
0x1491   :  { %3863 = vmatpush3.bf16.msra.mxu1 %v2547_v45 }
0x1492   :  { %3874 = vmatprep.subr.bf16.mxu1 %v4455_v1 }
0x1496   :  { %v2474_v50 = vpop.xlane.xlu0 %2473 }
0x1497   :  { %v2476_v54 = vsub.f32 %v2468_v35, %v2474_v50 }
0x1499   :  { %v2479_v55 = vmul.f32 1.442695, %v2476_v54 }
0x149a   :  { %v4111_v56 = vpop.eup %4110 }
0x149b   :  { %4112 = vpow2.f32 %v2479_v55  ;;  %v2481_v59 = vsel %vm636_vm8, %v4111_v56, 0.0 }
0x149c   :  { %2482 = vadd.xlane.f32.xlu0 %v2481_v59 }
0x14a5   :  { %v4113_v60 = vpop.eup %4112 }
0x14a6   :  { %v2484_v61 = vsel %vm636_vm8, %v4113_v60, 0.0 }
0x14a7   :  { %2485 = vadd.xlane.f32.xlu1 %v2484_v61 }
0x14b2   :  { %2493 = vrot.lane.b32.xlu0 %v5179_v16, %s4441_s24 }
0x14b6   :  { %2651 = vrot.lane.b32.xlu0 %v5168_v9, %s4458_s3 }
0x14b8   :  { %2601 = vrot.lane.b32.xlu1 %v5161_v3, %s4458_s3 }
0x14ba   :  { %2649 = vrot.lane.b32.xlu0 %v5181_v17, %s4458_s3 }
0x14bc   :  { %2599 = vrot.lane.b32.xlu1 %v5170_v12, %s4458_s3 }
0x1529   :  { %v2483_v62 = vpop.xlane.xlu0 %2482 }
0x152a   :  { %4114 = vrcp.f32 %v2483_v62 }
0x152d   :  { %v2494_v63 = vpop.permute.xlu0 %2493 }
0x152e   :  { %v2499_v5 = vsel %vm664_vm4, %v2494_v63, 0 }
0x152f   :  { %3857 = vmatpush3.bf16.msra.mxu0 %v2499_v5 }
0x1530   :  { %3868 = vmatprep.subr.bf16.mxu0 %v4455_v1 }
0x1531   :  { %v2652_v6 = vpop.permute.xlu0 %2651 }
0x1532   :  { %v2657_v13 = vsel %vm539_vm3, %v2652_v6, 0  ;;  %v4013_v6 = vld [vmem:[#allocation11 + $0x20] sm:$0xff]  }
0x1534   :  { %v4115_v2 = vpop.eup %4114  ;;  %v2486_v7 = vpop.xlane.xlu1 %2485 }
0x1535   :  { %v2488_v9 = vmul.f32 %v4115_v2, %v4111_v56  ;;  %4116 = vrcp.f32 %v2486_v7  ;;  %v2650_v15 = vpop.permute.xlu0 %2649 }
0x1537   :  { %v2491_v8 = vpack.c.bf16 %v2488_v9, %v2488_v9 }
0x1538   :  { %v2602_v3 = vpop.permute.xlu1 %2601 }
0x1539   :  { %v2607_v10 = vsel %vm539_vm3, %v2602_v3, 0  ;;  %3859 = vmatmul.mubr.msk.bf16.vlgmr.msra.gmra.mrb[48].mxu0 %vm636_vm8, %v2491_v8 }
0x153a   :  { %3869 = vmatpush3.bf16.xpose.msra.mxu0 %v2607_v10  ;;  %3870 = vmatprep.mubr.msk.bf16.mxu0 %vm4456_vm0, %v4455_v1  ;;  %v4009_v10 = vld [vmem:[#allocation11] sm:$0xff]  }
0x153b   :  { %3880 = vmatprep.subr.bf16.mxu0 %v4455_v1 }
0x153c   :  { %v2600_v14 = vpop.permute.xlu1 %2599 }
0x153f   :  { %v4117_v12 = vpop.eup %4116 }
0x1540   :  { %v2490_v17 = vmul.f32 %v4117_v12, %v4113_v60  ;;  %v4010_v12 = vld [vmem:[#allocation11 + $0x8] sm:$0xff]  }
0x1541   :  { %3871 = vmatmul.mubr.msk.bf16.vlgmr.msra.gmra.mrb[52].mxu0 %vm539_vm3, %v2600_v14  ;;  %v4012_v14 = vld [vmem:[#allocation11 + $0x18] sm:$0xff]  }
0x1542   :  { %v2492_v11 = vpack.c.bf16 %v2490_v17, %v2490_v17  ;;  %3882 = vmatprep.mubr.msk.bf16.mxu0 %vm4456_vm0, %v4455_v1  ;;  %v4011_v17 = vld [vmem:[#allocation11 + $0x10] sm:$0xff]  }
0x1544   :  { %3865 = vmatmul.mubr.msk.bf16.vlgmr.msra.gmra.mrb[76].mxu1 %vm636_vm8, %v2492_v11  ;;  %v4014_v11 = vld [vmem:[#allocation11 + $0x28] sm:$0xff]  }
0x1545   :  { %3875 = vmatpush3.bf16.xpose.msra.mxu1 %v2657_v13  ;;  %3876 = vmatprep.mubr.msk.bf16.mxu1 %vm4456_vm0, %v4455_v1 }
0x1546   :  { %3886 = vmatprep.subr.bf16.mxu1 %v4455_v1 }
0x154c   :  { %3877 = vmatmul.mubr.msk.bf16.vlgmr.msra.gmra.mrb[80].mxu1 %vm539_vm3, %v2650_v15 }
0x154d   :  { %3888 = vmatprep.mubr.msk.bf16.mxu1 %vm4456_vm0, %v4455_v1 }
0x160c   :  { %v2535_v58 = vpop.f32.mrb[48].mxu0 }
0x160d   :  { %v3860_v57 = vpop.f32.mrb[49].mxu0 }
0x160e   :  { %v2538_v37 = vpop.f32.mrb[50].mxu0  ;;  %v4016_v57 = vld [vmem:[#allocation11 + $0x38] sm:$0xff]  }
0x160f   :  { %v3861_v19 = vpop.f32.mrb[51].mxu0 }
0x1614   :  { %v2643_v46 = vpop.f32.mrb[52].mxu0 }
0x1615   :  { %v2699_v43 = vmul.f32 0.17677669, %v2643_v46  ;;  %v3872_v48 = vpop.f32.mrb[53].mxu0 }
0x1616   :  { %v2646_v21 = vpop.f32.mrb[54].mxu0 }
0x1617   :  { %v2583_v22 = vpop.f32.mrb[76].mxu1  ;;  %v3873_v24 = vpop.f32.mrb[55].mxu0  ;;  %v2701_v25 = vsel %vm5198_vm1, %v2699_v43, -1e+10 }
0x1618   :  { %v3866_v26 = vpop.f32.mrb[77].mxu1  ;;  %v2703_v27 = vsel %vm636_vm8, %v2701_v25, -inf }
0x1619   :  { %2704 = vmax.xlane.f32.xlu1 %v2703_v27  ;;  %v2586_v28 = vpop.f32.mrb[78].mxu1  ;;  %v3459_v27 = vld [vmem:[#allocation13] ss:$0 sm:$0xff] }
0x161a   :  { %v3867_v29 = vpop.f32.mrb[79].mxu1 }
0x161f   :  { %v2693_v51 = vpop.f32.mrb[80].mxu1 }
0x1620   :  { %v2700_v30 = vmul.f32 0.17677669, %v2693_v51  ;;  %v3878_v31 = vpop.f32.mrb[81].mxu1 }
0x1621   :  { %v2696_v32 = vpop.f32.mrb[82].mxu1 }
0x1622   :  { %v3879_v34 = vpop.f32.mrb[83].mxu1  ;;  %v2702_v35 = vsel %vm5207_vm2, %v2700_v30, -1e+10 }
0x1623   :  { %v2706_v38 = vsel %vm636_vm8, %v2702_v35, -inf }
0x1624   :  { %2707 = vmax.xlane.f32.xlu0 %v2706_v38  ;;  %v4019_v38 = vld [vmem:[#allocation14 + $0x4] ss:$8 sps:$4 sm:$0xff]  }
0x16a6   :  { %v2705_v39 = vpop.xlane.xlu1 %2704 }
0x16a7   :  { %v2709_v20 = vsub.f32 %v2701_v25, %v2705_v39  ;;  %v4022_v39 = vld [vmem:[#allocation14 + $0x14] ss:$8 sps:$4 sm:$0xff]  }
0x16a9   :  { %v2711_v41 = vmul.f32 1.442695, %v2709_v20  ;;  %v4020_v20 = vld [vmem:[#allocation14 + $0x10] ss:$8 sps:$4 sm:$0xff]  }
0x16ab   :  { %4118 = vpow2.f32 %v2711_v41 }
0x16b1   :  { %v2708_v42 = vpop.xlane.xlu0 %2707 }
0x16b2   :  { %v2710_v44 = vsub.f32 %v2702_v35, %v2708_v42  ;;  %v4017_v35 = vld [vmem:[#allocation14] ss:$8 sps:$4 sm:$0xff]  }
0x16b4   :  { %v2713_v45 = vmul.f32 1.442695, %v2710_v44 }
0x16b5   :  { %v4119_v50 = vpop.eup %4118 }
0x16b6   :  { %4120 = vpow2.f32 %v2713_v45  ;;  %v2715_v54 = vsel %vm636_vm8, %v4119_v50, 0.0 }
0x16b7   :  { %2716 = vadd.xlane.f32.xlu0 %v2715_v54 }
0x16c0   :  { %v4121_v55 = vpop.eup %4120 }
0x16c1   :  { %v2718_v56 = vsel %vm636_vm8, %v4121_v55, 0.0 }
0x16c2   :  { %2719 = vadd.xlane.f32.xlu1 %v2718_v56  ;;  %v4023_v56 = vld [vmem:[#allocation14 + $0x20] ss:$8 sps:$4 sm:$0xff]  }
0x16cd   :  { %2727 = vrot.lane.b32.xlu0 %v5179_v16, %s4458_s3 }
0x16d1   :  { %2359 = vrot.lane.b32.xlu0 %v5291_v23, %s4458_s3 }
0x16d3   :  { %2775 = vrot.lane.b32.xlu1 %v5228_v4, %s4458_s3 }
0x16d5   :  { %2593 = vrot.lane.b32.xlu0 %v2583_v22, %s4441_s24 }
0x16d7   :  { %2357 = vrot.lane.b32.xlu1 %v5289_v18, %s4458_s3 }
0x16db   :  { %2591 = vrot.lane.b32.xlu1 %v2535_v58, %s4441_s24 }
0x1744   :  { %v2717_v47 = vpop.xlane.xlu0 %2716 }
0x1745   :  { %4122 = vrcp.f32 %v2717_v47  ;;  %v4028_v47 = vld [vmem:[#allocation14 + $0x34] ss:$8 sps:$4 sm:$0xff]  }
0x1748   :  { %v2728_v59 = vpop.permute.xlu0 %2727 }
0x1749   :  { %v2733_v60 = vsel %vm664_vm4, %v2728_v59, 0  ;;  %v4026_v59 = vld [vmem:[#allocation14 + $0x30] ss:$8 sps:$4 sm:$0xff]  }
0x174a   :  { %3881 = vmatpush3.bf16.msra.mxu0 %v2733_v60  ;;  %v4031_v60 = vld [vmem:[#allocation14 + $0x44] ss:$8 sps:$4 sm:$0xff]  }
0x174b   :  { %3892 = vmatprep.subr.bf16.mxu0 %v4455_v1 }
0x174c   :  { %v2360_v16 = vpop.permute.xlu0 %2359 }
0x174d   :  { %2364 = vst.msk [vmem:[#allocation2 + $0x8] sm:$0xff] %vm988_vm11, %v2360_v16  ;;  %v4029_v16 = vld [vmem:[#allocation14 + $0x40] ss:$8 sps:$4 sm:$0xff]  }
0x174f   :  { %v4123_v23 = vpop.eup %4122  ;;  %v2720_v4 = vpop.xlane.xlu1 %2719 }
0x1750   :  { %v2722_v61 = vmul.f32 %v4123_v23, %v4119_v50  ;;  %4124 = vrcp.f32 %v2720_v4  ;;  %v2594_v62 = vpop.permute.xlu0 %2593  ;;  %v4034_v23 = vld [vmem:[#allocation14 + $0x54] ss:$8 sps:$4 sm:$0xff]   ;;  %v4032_v4 = vld [vmem:[#allocation14 + $0x50] ss:$8 sps:$4 sm:$0xff]  }
0x1751   :  { %2598 = vst.msk [vmem:[#allocation2 + $0x8] sm:$0xff] %vm1223_vm12, %v2594_v62  ;;  %v4035_v62 = vld [vmem:[#allocation14 + $0x60] ss:$8 sps:$4 sm:$0xff]  }
0x1752   :  { %v2725_v18 = vpack.c.bf16 %v2722_v61, %v2722_v61  ;;  %v4037_v61 = vld [vmem:[#allocation14 + $0x64] ss:$8 sps:$4 sm:$0xff]  }
0x1753   :  { %v2776_v63 = vpop.permute.xlu1 %2775 }
0x1754   :  { %v2781_v5 = vsel %vm664_vm4, %v2776_v63, 0  ;;  %3883 = vmatmul.mubr.msk.bf16.vlgmr.msra.gmra.mrb[56].mxu0 %vm636_vm8, %v2725_v18  ;;  %v4040_v18 = vld [vmem:[#allocation14 + $0x74] ss:$8 sps:$4 sm:$0xff]   ;;  %v4038_v63 = vld [vmem:[#allocation14 + $0x70] ss:$8 sps:$4 sm:$0xff]  }
0x1755   :  { %3887 = vmatpush3.bf16.msra.mxu1 %v2781_v5  ;;  %3908 = vmatprep.mubr.msk.bf16.mxu0 %vm4456_vm0, %v4455_v1  ;;  %v4041_v5 = vld [vmem:[#allocation17 + $0x40] sm:$0xff]  }
0x1756   :  { %3893 = vmatpush3.bf16.msra.mxu0 %v4009_v10  ;;  %3085 = vmatprep.subr.bf16.mxu1 %v4019_v38  ;;  %v4047_v10 = vld [vmem:[#allocation17 + $0x58] sm:$0xff]  }
0x1757   :  { %v2358_v2 = vpop.permute.xlu1 %2357  ;;  %3894 = vmatprep.subr.bf16.mxu0 %v4455_v1 }
0x1758   :  { %2363 = vst.msk [vmem:[#allocation2] sm:$0xff] %vm988_vm11, %v2358_v2  ;;  %v4042_v2 = vld [vmem:[#allocation17] sm:$0xff]  }
0x175a   :  { %v4125_v7 = vpop.eup %4124  ;;  %3895 = vmatpush3.bf16.msra.mxu0 %v4010_v12  ;;  %v4048_v12 = vld [vmem:[#allocation17 + $0x18] sm:$0xff]  }
0x175b   :  { %v2724_v9 = vmul.f32 %v4125_v7, %v4121_v55  ;;  %v2592_v8 = vpop.permute.xlu1 %2591  ;;  %3896 = vmatprep.subr.bf16.mxu0 %v4455_v1  ;;  %v4043_v7 = vld [vmem:[#allocation17 + $0x48] sm:$0xff]  }
0x175c   :  { %2597 = vst.msk [vmem:[#allocation2] sm:$0xff] %vm1223_vm12, %v2592_v8  ;;  %v4045_v8 = vld [vmem:[#allocation17 + $0x50] sm:$0xff]  }
0x175d   :  { %v2726_v3 = vpack.c.bf16 %v2724_v9, %v2724_v9  ;;  %v4044_v9 = vld [vmem:[#allocation17 + $0x8] sm:$0xff]  }
0x175e   :  { %3897 = vmatpush3.bf16.msra.mxu0 %v4011_v17  ;;  %v4049_v17 = vld [vmem:[#allocation17 + $0x60] sm:$0xff]  }
0x175f   :  { %3889 = vmatmul.mubr.msk.bf16.vlgmr.msra.gmra.mrb[84].mxu1 %vm636_vm8, %v2726_v3  ;;  %3898 = vmatprep.subr.bf16.mxu0 %v4455_v1  ;;  %v4046_v3 = vld [vmem:[#allocation17 + $0x10] sm:$0xff]  }
0x1760   :  { %3117 = vmatprep.mubr.bf16.mxu1 %v4454_v0  ;;  %v4015_v0 = vld [vmem:[#allocation11 + $0x30] sm:$0xff]   ;;  %3086 = vmatpush1.bf16.msra.mxu1 %v4017_v35 }
0x1761   :  { %3087 = vmatprep.subr.bf16.mxu1 %v4022_v39 }
0x1762   :  { %3899 = vmatpush3.bf16.msra.mxu0 %v4012_v14  ;;  %v4050_v14 = vld [vmem:[#allocation17 + $0x20] sm:$0xff]  }
0x1763   :  { %3900 = vmatprep.subr.bf16.mxu0 %v4455_v1 }
0x1764   :  { %3088 = vmatpush1.bf16.msra.mxu1 %v4020_v20 }
0x1766   :  { %3901 = vmatpush3.bf16.msra.mxu0 %v4013_v6  ;;  %v4051_v6 = vld [vmem:[#allocation17 + $0x68] sm:$0xff]  }
0x1767   :  { %3902 = vmatprep.subr.bf16.mxu0 %v4455_v1 }
0x176a   :  { %3903 = vmatpush3.bf16.msra.mxu0 %v4014_v11 }
0x176b   :  { %3904 = vmatprep.subr.bf16.mxu0 %v4455_v1 }
0x176e   :  { %3905 = vmatpush3.bf16.msra.mxu0 %v4015_v0 }
0x176f   :  { %3906 = vmatprep.subr.bf16.mxu0 %v4455_v1 }
0x1772   :  { %3907 = vmatpush3.bf16.msra.mxu0 %v4016_v57 }
0x1773   :  { %3618 = vmatprep.subr.bf16.mxu0 %v4041_v5 }
0x1827   :  { %v2769_v13 = vpop.f32.mrb[56].mxu0 }
0x1828   :  { %2825 = vrot.lane.b32.xlu1 %v2769_v13, %s4457_s2  ;;  %v3884_v15 = vpop.f32.mrb[57].mxu0 }
0x1829   :  { %v2772_v58 = vpop.f32.mrb[58].mxu0 }
0x182a   :  { %v3885_v37 = vpop.f32.mrb[59].mxu0 }
0x1832   :  { %v2817_v19 = vpop.f32.mrb[84].mxu1 }
0x1833   :  { %2827 = vrot.lane.b32.xlu0 %v2817_v19, %s4457_s2  ;;  %v3890_v46 = vpop.f32.mrb[85].mxu1 }
0x1834   :  { %v2820_v43 = vpop.f32.mrb[86].mxu1 }
0x1835   :  { %v3891_v48 = vpop.f32.mrb[87].mxu1 }
0x189a   :  { %v2826_v21 = vpop.permute.xlu1 %2825 }
0x189b   :  { %2831 = vst.msk [vmem:[#allocation2] sm:$0xff] %vm1458_vm13, %v2826_v21 }
0x18a2   :  { %v2833_v24 = vld [vmem:[#allocation2] sm:$0xff] }
0x18a5   :  { %v2828_v22 = vpop.permute.xlu0 %2827 }
0x18a6   :  { %2832 = vst.msk [vmem:[#allocation2 + $0x8] sm:$0xff] %vm1458_vm13, %v2828_v22 }
0x18ad   :  { %v2834_v25 = vld [vmem:[#allocation2 + $0x8] sm:$0xff] }
0x18ae   :  { %v2835_v26 = vpack.c.bf16 %v2834_v25, %v2833_v24 }
0x18b0   :  { %3909 = vmatmul.mubr.bf16.vlgmr.msra.gmra.mrb[60].mxu0 %v2835_v26  ;;  %v4052_v26 = vld [vmem:[#allocation17 + $0x28] sm:$0xff]  }
0x18b1   :  { %3619 = vmatpush3.bf16.msra.mxu0 %v4042_v2 }
0x18b2   :  { %3620 = vmatprep.subr.bf16.mxu0 %v4043_v7 }
0x18b5   :  { %3621 = vmatpush3.bf16.msra.mxu0 %v4044_v9 }
0x18b6   :  { %3622 = vmatprep.subr.bf16.mxu0 %v4045_v8 }
0x18b9   :  { %3623 = vmatpush3.bf16.msra.mxu0 %v4046_v3 }
0x18ba   :  { %3624 = vmatprep.subr.bf16.mxu0 %v4047_v10 }
0x18bd   :  { %3625 = vmatpush3.bf16.msra.mxu0 %v4048_v12 }
0x18be   :  { %3626 = vmatprep.subr.bf16.mxu0 %v4049_v17 }
0x18c1   :  { %3627 = vmatpush3.bf16.msra.mxu0 %v4050_v14 }
0x18c2   :  { %3628 = vmatprep.subr.bf16.mxu0 %v4051_v6 }
0x18c5   :  { %3629 = vmatpush3.bf16.msra.mxu0 %v4052_v26 }
0x1983   :  { %v2941_v28 = vpop.f32.mrb[60].mxu0 }
0x1984   :  { %v2942_v1 = vadd.f32 %v3459_v27, %v2941_v28  ;;  %v3910_v29 = vpop.f32.mrb[61].mxu0  ;;  %v4054_v28 = vld [vmem:[#allocation17 + $0x30] sm:$0xff]  }
0x1985   :  { %v2944_v51 = vpop.f32.mrb[62].mxu0  ;;  %v4056_v29 = vld [vmem:[#allocation17 + $0x38] sm:$0xff]  }
0x1986   :  { %v2945_v30 = vadd.f32 %v3459_v27, %v2944_v51  ;;  %v3911_v31 = vpop.f32.mrb[63].mxu0  ;;  %v2948_v32 = vadd.f32 %v2942_v1, %v5150_v52  ;;  %v4053_v27 = vld [vmem:[#allocation17 + $0x70] sm:$0xff]   ;;  %v4055_v1 = vld [vmem:[#allocation17 + $0x78] sm:$0xff]  }
0x1987   :  { %3630 = vmatprep.subr.bf16.mxu0 %v4053_v27  ;;  %v2993_v51 = vld [vmem:[#allocation16] sm:$0x3] }
0x1988   :  { %2950 = vadd.xlane.f32.xlu1 %v2948_v32  ;;  %v2949_v34 = vadd.f32 %v2945_v30, %v5153_v53  ;;  %v4025_v53 = vld [vmem:[#allocation14 + $0x24] ss:$8 sps:$4 sm:$0xff]   ;;  %3631 = vmatpush3.bf16.msra.mxu0 %v4054_v28  ;;  %v2998_v30 = vrot.slane %v2993_v51, %v4847_v36  ;;  %v3484_v36 = vld [vmem:[#allocation19] ss:$0 sm:$0xff] }
0x1989   :  { %3089 = vmatprep.subr.bf16.mxu1 %v4025_v53  ;;  %3632 = vmatprep.subr.bf16.mxu0 %v4055_v1 }
0x198a   :  { %2952 = vadd.xlane.f32.xlu0 %v2949_v34  ;;  %3090 = vmatpush1.bf16.msra.mxu1 %v4023_v56 }
0x198b   :  { %3091 = vmatprep.subr.bf16.mxu1 %v4028_v47 }
0x198c   :  { %3633 = vmatpush3.bf16.msra.mxu0 %v4056_v29 }
0x198e   :  { %3092 = vmatpush1.bf16.msra.mxu1 %v4026_v59 }
0x198f   :  { %3093 = vmatprep.subr.bf16.mxu1 %v4031_v60 }
0x1992   :  { %3094 = vmatpush1.bf16.msra.mxu1 %v4029_v16 }
0x1993   :  { %3095 = vmatprep.subr.bf16.mxu1 %v4034_v23 }
0x1996   :  { %3096 = vmatpush1.bf16.msra.mxu1 %v4032_v4 }
0x1997   :  { %3097 = vmatprep.subr.bf16.mxu1 %v4037_v61 }
0x199a   :  { %3098 = vmatpush1.bf16.msra.mxu1 %v4035_v62 }
0x199b   :  { %3099 = vmatprep.subr.bf16.mxu1 %v4040_v18 }
0x199e   :  { %3100 = vmatpush1.bf16.msra.mxu1 %v4038_v63 }
0x1a15   :  { %v2951_v41 = vpop.xlane.xlu1 %2950 }
0x1a16   :  { %v2954_v42 = vmul.f32 0.0078125, %v2951_v41 }
0x1a17   :  { %v2953_v44 = vpop.xlane.xlu0 %2952 }
0x1a18   :  { %v2956_v45 = vsub.f32 %v2948_v32, %v2954_v42  ;;  %v2955_v50 = vmul.f32 0.0078125, %v2953_v44 }
0x1a1a   :  { %v2957_v54 = vsub.f32 %v2949_v34, %v2955_v50  ;;  %v2958_v55 = vmul.f32 %v2956_v45, %v2956_v45 }
0x1a1c   :  { %2960 = vadd.xlane.f32.xlu0 %v2958_v55  ;;  %v2959_v52 = vmul.f32 %v2957_v54, %v2957_v54 }
0x1a1e   :  { %2962 = vadd.xlane.f32.xlu1 %v2959_v52 }
0x1aa9   :  { %v2961_v11 = vpop.xlane.xlu0 %2960 }
0x1aaa   :  { %v2964_v0 = vmul.f32 0.0078125, %v2961_v11 }
0x1aab   :  { %v2963_v13 = vpop.xlane.xlu1 %2962 }
0x1aac   :  { %v2966_v15 = vadd.f32 1e-05, %v2964_v0  ;;  %v2965_v58 = vmul.f32 0.0078125, %v2963_v13  ;;  %v4135_v0 = vld [vmem:[#allocation20] ss:$0 sm:$0xff] }
0x1aae   :  { %4126 = vrsqrt.f32 %v2966_v15  ;;  %v2967_v57 = vadd.f32 1e-05, %v2965_v58 }
0x1ab0   :  { %4128 = vrsqrt.f32 %v2967_v57  ;;  %v4136_v57 = vld [vmem:[#allocation22] ss:$0 sm:$0xff] }
0x1ab8   :  { %v4127_v37 = vpop.eup %4126 }
0x1ab9   :  { %v2970_v19 = vmul.f32 %v4127_v37, %v2956_v45 }
0x1aba   :  { %v4129_v46 = vpop.eup %4128 }
0x1abb   :  { %v2971_v43 = vmul.f32 %v4129_v46, %v2957_v54  ;;  %v2972_v48 = vmul.f32 %v5143_v40, %v2970_v19 }
0x1abd   :  { %v2973_v21 = vmul.f32 %v5143_v40, %v2971_v43  ;;  %v2974_v22 = vadd.f32 %v5146_v49, %v2972_v48  ;;  %v3002_v40 = vrot.slane %v2993_v51, %v4844_v33 }
0x1abf   :  { %v2975_v24 = vadd.f32 %v5146_v49, %v2973_v21 }
0x1ac1   :  { %v2976_v25 = vpack.c.bf16 %v2975_v24, %v2974_v22 }
0x1ac3   :  { %3118 = vmatmul.mubr.bf16.vlgmr.msra.gmra.mrb[88].mxu1 %v2976_v25 }
0x1b96   :  { %v3119_v31 = vpop.f32.mrb[88].mxu1 }
0x1b97   :  { %v3120_v32 = vadd.f32 %v3119_v31, %v2998_v30  ;;  %v3121_v49 = vpop.f32.mrb[89].mxu1 }
0x1b98   :  { %v3122_v34 = vadd.f32 %v3121_v49, %v3002_v40  ;;  %v3123_v35 = vpop.f32.mrb[90].mxu1 }
0x1b99   :  { %v3124_v38 = vadd.f32 %v3123_v35, %v2998_v30  ;;  %v3125_v39 = vpop.f32.mrb[91].mxu1  ;;  %v3128_v41 = vmax.f32 %v3120_v32, 0.0 }
0x1b9a   :  { %v3126_v20 = vadd.f32 %v3125_v39, %v3002_v40  ;;  %v3129_v44 = vmax.f32 %v3122_v34, 0.0 }
0x1b9b   :  { %v3130_v42 = vmax.f32 %v3124_v38, 0.0 }
0x1b9c   :  { %v3131_v45 = vmax.f32 %v3126_v20, 0.0 }
0x1b9d   :  { %v3132_v50 = vpack.c.bf16 %v3130_v42, %v3128_v41 }
0x1b9e   :  { %v3133_v54 = vpack.c.bf16 %v3131_v45, %v3129_v44 }
0x1ba0   :  { %3301 = vmatprep.mubr.bf16.mxu0 %v3133_v54 }
0x1ba1   :  { %3302 = vmatmul.mubr.bf16.vlgmr.msra.gmra.mrb[64].mxu0 %v3132_v50 }
0x1c74   :  { %v3634_v55 = vpop.f32.mrb[64].mxu0 }
0x1c75   :  { %v3635_v52 = vpop.f32.mrb[65].mxu0 }
0x1c76   :  { %v3636_v33 = vadd.f32 %v3635_v52, %v3634_v55  ;;  %v3637_v53 = vpop.f32.mrb[66].mxu0 }
0x1c77   :  { %v3638_v56 = vpop.f32.mrb[67].mxu0 }
0x1c78   :  { %v3304_v47 = vadd.f32 %v3636_v33, %v3484_v36  ;;  %v3639_v59 = vadd.f32 %v3638_v56, %v3637_v53 }
0x1c7a   :  { %v3307_v60 = vadd.f32 %v3639_v59, %v3484_v36  ;;  %v3310_v16 = vadd.f32 %v3304_v47, %v2974_v22 }
0x1c7c   :  { %3312 = vadd.xlane.f32.xlu0 %v3310_v16  ;;  %v3311_v23 = vadd.f32 %v3307_v60, %v2975_v24 }
0x1c7e   :  { %3314 = vadd.xlane.f32.xlu1 %v3311_v23 }
0x1d09   :  { %v3313_v4 = vpop.xlane.xlu0 %3312 }
0x1d0a   :  { %v3316_v61 = vmul.f32 0.0078125, %v3313_v4 }
0x1d0b   :  { %v3315_v62 = vpop.xlane.xlu1 %3314 }
0x1d0c   :  { %v3318_v18 = vsub.f32 %v3310_v16, %v3316_v61  ;;  %v3317_v63 = vmul.f32 0.0078125, %v3315_v62 }
0x1d0e   :  { %v3319_v5 = vsub.f32 %v3311_v23, %v3317_v63  ;;  %v3320_v2 = vmul.f32 %v3318_v18, %v3318_v18 }
0x1d10   :  { %3322 = vadd.xlane.f32.xlu0 %v3320_v2  ;;  %v3321_v7 = vmul.f32 %v3319_v5, %v3319_v5 }
0x1d12   :  { %3324 = vadd.xlane.f32.xlu1 %v3321_v7 }
0x1d9d   :  { %v3323_v9 = vpop.xlane.xlu0 %3322 }
0x1d9e   :  { %v3326_v8 = vmul.f32 0.0078125, %v3323_v9 }
0x1d9f   :  { %v3325_v3 = vpop.xlane.xlu1 %3324 }
0x1da0   :  { %v3328_v10 = vadd.f32 1e-05, %v3326_v8  ;;  %v3327_v12 = vmul.f32 0.0078125, %v3325_v3 }
0x1da2   :  { %4130 = vrsqrt.f32 %v3328_v10  ;;  %v3329_v17 = vadd.f32 1e-05, %v3327_v12 }
0x1da4   :  { %4132 = vrsqrt.f32 %v3329_v17 }
0x1dac   :  { %v4131_v14 = vpop.eup %4130 }
0x1dad   :  { %v3332_v6 = vmul.f32 %v4131_v14, %v3318_v18 }
0x1dae   :  { %v4133_v11 = vpop.eup %4132 }
0x1daf   :  { %v3334_v13 = vmul.f32 %v4135_v0, %v3332_v6  ;;  %v3333_v15 = vmul.f32 %v4133_v11, %v3319_v5 }
0x1db1   :  { %v3335_v58 = vmul.f32 %v4135_v0, %v3333_v15  ;;  %v3336_v37 = vadd.f32 %v4136_v57, %v3334_v13 }
0x1db3   :  { %v3337_v19 = vadd.f32 %v4136_v57, %v3335_v58 }
0x1db5   :  { %v3516_v46 = vpack.c.bf16 %v3337_v19, %v3336_v37 }
0x1db7   :  { %3517 = vst [vmem:[%s5405_s20] sm:$0xff] %v3516_v46  }
0x1db8   :  { %3346 = vsyncpa [#allocation4], 1 }
0x1db9   :  { %3347 = vsyncpa [#allocation6], 1 }
0x1dba   :  { %3348 = vsyncpa [#allocation9], 1 }
0x1dbb   :  { %3349 = vsyncpa [#allocation12], 1 }
0x1dbc   :  { %3350 = vsyncpa [#allocation15], 1 }
0x1dbd   :  { %3351 = vsyncpa [#allocation18], 1 }
0x1dbe   :  { %3352 = vsyncpa [#allocation21], 1 }

// kernel: decoder_forward.4
= control target key start
LH: loop header
LB: loop body
LE: loop exit
PB: predicated region body
PF: predicated region fallthrough
CT: control target
= control target key end

     0   :  { %v3955_v1 = vmov 0   ;;  %v3956_v2 = vmov 0.0   ;;  %vm3957_vm0 = vmmov 0   ;;  %v72_v31 = vlaneseq  ;;  %s3960_s25 = smov 32   ;;  %s4898_s4 = inlined_call_operand.vmem [shape: bf16[128,384], index: 4, kind: input, shape index: {}]   ;;  %s4899_s0 = inlined_call_operand.vmem [shape: bf16[2,8,128], index: 0, kind: input, shape index: {}]   ;;  %s4900_s2 = inlined_call_operand.vmem [shape: s32[2,8,1], index: 2, kind: input, shape index: {}]   ;;  %s4901_s5 = inlined_call_operand.vmem [shape: f32[1,384], index: 5, kind: input, shape index: {}]   ;;  %s4902_s6 = inlined_call_operand.vmem [shape: bf16[128,128], index: 6, kind: input, shape index: {}]   ;;  %s4903_s7 = inlined_call_operand.vmem [shape: f32[1,128], index: 7, kind: input, shape index: {}]   ;;  %s4904_s10 = inlined_call_operand.vmem [shape: bf16[128,256], index: 10, kind: input, shape index: {}]   ;;  %s4905_s8 = inlined_call_operand.vmem [shape: bf16[128,128], index: 8, kind: input, shape index: {}]   ;;  %s4906_s1 = inlined_call_operand.vmem [shape: bf16[2,8,128], index: 1, kind: input, shape index: {}]   ;;  %s4907_s18 = inlined_call_operand.vmem [shape: f32[1,128], index: 18, kind: input, shape index: {}]   ;;  %s4908_s19 = inlined_call_operand.vmem [shape: f32[1,128], index: 19, kind: input, shape index: {}]   ;;  %s4909_s11 = inlined_call_operand.vmem [shape: f32[1,256], index: 11, kind: input, shape index: {}]   ;;  %s4910_s9 = inlined_call_operand.vmem [shape: f32[1,128], index: 9, kind: input, shape index: {}]   ;;  %s4911_s3 = inlined_call_operand.vmem [shape: s32[2,1,8], index: 3, kind: input, shape index: {}]   ;;  %s4912_s12 = inlined_call_operand.vmem [shape: bf16[128,128], index: 12, kind: input, shape index: {}]   ;;  %s4913_s13 = inlined_call_operand.vmem [shape: f32[1,128], index: 13, kind: input, shape index: {}]   ;;  %s4914_s14 = inlined_call_operand.vmem [shape: bf16[128,256], index: 14, kind: input, shape index: {}]   ;;  %s4915_s16 = inlined_call_operand.vmem [shape: bf16[256,128], index: 16, kind: input, shape index: {}]   ;;  %s4916_s15 = inlined_call_operand.vmem [shape: f32[1,256], index: 15, kind: input, shape index: {}]   ;;  %s4917_s17 = inlined_call_operand.vmem [shape: f32[1,128], index: 17, kind: input, shape index: {}]   ;;  %s4918_s20 = inlined_call_operand.vmem [shape: bf16[2,8,128], index: 20, kind: output, shape index: {}]  }
   0x1   :  { %4922 = sst [smem:[#allocation3_spill]] %s4898_s4  ;;  %311 = vmatprep.mubr.bf16.mxu0 %v3955_v1  ;;  %3475 = vmatprep.subr.bf16.mxu1 %v3956_v2  ;;  %vm381_vm3 = vcmask 261120   ;;  %vm506_vm4 = vcmask 1043456   ;;  %vm478_vm8 = vcmask 64512   ;;  %vm830_vm11 = vcmask 523520  }
   0x2   :  { %4923 = sst [smem:[#allocation4_spill]] %s4899_s0  ;;  %s4927_s23 = sld [smem:[#allocation3_spill]]  ;;  %3753 = vset.pattern.permute.xlu0 %v3955_v1  ;;  %3491 = vmatprep.mubr.msk.bf16.mxu1 %vm3957_vm0, %v3956_v2  ;;  %v73_v32 = vshrl.u32 %v72_v31, 7  ;;  %v75_v62 = vand.u32 127, %v72_v31  ;;  %vm1065_vm12 = vcmask 785920   ;;  %vm1300_vm13 = vcmask 1048320  }
   0x3   :  { %4924 = sst [smem:[#allocation5_spill]] %s4900_s2  ;;  %s4928_s24 = sld [smem:[#allocation4_spill]] }
   0x4   :  { %4925 = sst [smem:[#allocation6_spill]] %s4901_s5  ;;  %v4171_v33 = vsub.s32 1, %v73_v32  ;;  %v4177_v36 = vsub.s32 0, %v73_v32  ;;  %v146_v52 = vsub.s32 2, %v73_v32  ;;  %vm76_vm5 = vcmp.ge.s32.totalorder %v73_v32, %v75_v62  ;;  %s3959_s2 = smov 64  }
   0x5   :  { %4926 = sst [smem:[#allocation7_spill]] %s4902_s6  ;;  %s4930_s22 = sld [smem:[#allocation6_spill]] }
   0x6   :  { %s4935_s27 = sld [smem:[#allocation7_spill]] }
   0x8   :  { %v3754_v0 = vld [vmem:[%s4927_s23 + $0x4] ss:$12 sps:$4 sm:$0xff]   ;;  %v3756_v3 = vld [vmem:[%s4927_s23] ss:$12 sps:$4 sm:$0xff]   ;;  %v3757_v4 = vld [vmem:[%s4927_s23 + $0x1c] ss:$12 sps:$4 sm:$0xff]  }
   0x9   :  { %279 = vmatprep.subr.bf16.mxu0 %v3754_v0  ;;  %v3759_v5 = vld [vmem:[%s4927_s23 + $0x18] ss:$12 sps:$4 sm:$0xff]   ;;  %v3760_v6 = vld [vmem:[%s4927_s23 + $0x34] ss:$12 sps:$4 sm:$0xff]   ;;  %v3762_v7 = vld [vmem:[%s4927_s23 + $0x30] ss:$12 sps:$4 sm:$0xff]  }
   0xa   :  { %280 = vmatpush1.bf16.msra.mxu0 %v3756_v3  ;;  %v3763_v8 = vld [vmem:[%s4927_s23 + $0x4c] ss:$12 sps:$4 sm:$0xff]   ;;  %v3765_v9 = vld [vmem:[%s4927_s23 + $0x48] ss:$12 sps:$4 sm:$0xff]   ;;  %v3766_v11 = vld [vmem:[%s4927_s23 + $0x64] ss:$12 sps:$4 sm:$0xff]  }
   0xb   :  { %281 = vmatprep.subr.bf16.mxu0 %v3757_v4  ;;  %v3779_v10 = vld [vmem:[%s4927_s23 + $0x8] ss:$12 sps:$4 sm:$0xff]   ;;  %v3780_v12 = vld [vmem:[%s4927_s23 + $0x20] ss:$12 sps:$4 sm:$0xff]   ;;  %v3781_v15 = vld [vmem:[%s4927_s23 + $0x38] ss:$12 sps:$4 sm:$0xff]  }
   0xc   :  { %3476 = vmatpush3.bf16.msra.mxu1 %v3779_v10  ;;  %v3768_v13 = vld [vmem:[%s4927_s23 + $0x60] ss:$12 sps:$4 sm:$0xff]   ;;  %v3769_v14 = vld [vmem:[%s4927_s23 + $0x7c] ss:$12 sps:$4 sm:$0xff]   ;;  %v3771_v16 = vld [vmem:[%s4927_s23 + $0x78] ss:$12 sps:$4 sm:$0xff]  }
   0xd   :  { %3477 = vmatprep.subr.bf16.mxu1 %v3956_v2  ;;  %v3772_v17 = vld [vmem:[%s4927_s23 + $0x94] ss:$12 sps:$4 sm:$0xff]   ;;  %v3782_v18 = vld [vmem:[%s4927_s23 + $0x50] ss:$12 sps:$4 sm:$0xff]   ;;  %v3775_v20 = vld [vmem:[%s4927_s23 + $0xac] ss:$12 sps:$4 sm:$0xff]  }
   0xe   :  { %282 = vmatpush1.bf16.msra.mxu0 %v3759_v5  ;;  %v3774_v19 = vld [vmem:[%s4927_s23 + $0x90] ss:$12 sps:$4 sm:$0xff]   ;;  %v3783_v21 = vld [vmem:[%s4927_s23 + $0x68] ss:$12 sps:$4 sm:$0xff]   ;;  %v4139_v23 = vld [vmem:[%s4928_s24] sm:$0xff]   ;;  %s3958_s24 = smov 96  }
   0xf   :  { %283 = vmatprep.subr.bf16.mxu0 %v3760_v6  ;;  %v3777_v22 = vld [vmem:[%s4927_s23 + $0xa8] ss:$12 sps:$4 sm:$0xff]   ;;  %v3784_v24 = vld [vmem:[%s4927_s23 + $0x80] ss:$12 sps:$4 sm:$0xff]   ;;  %v3785_v25 = vld [vmem:[%s4927_s23 + $0x98] ss:$12 sps:$4 sm:$0xff]  }
  0x10   :  { %3478 = vmatpush3.bf16.msra.mxu1 %v3780_v12  ;;  %v3786_v26 = vld [vmem:[%s4927_s23 + $0xb0] ss:$12 sps:$4 sm:$0xff]   ;;  %s4929_s23 = sld [smem:[#allocation5_spill]]  ;;  %v134_v34 = vld [vmem:[%s4930_s22] sm:$0x7] }
  0x11   :  { %3479 = vmatprep.subr.bf16.mxu1 %v3956_v2  ;;  %v143_v35 = vrot.slane %v134_v34, %v4171_v33  ;;  %v139_v42 = vrot.slane %v134_v34, %v4177_v36  ;;  %v147_v53 = vrot.slane %v134_v34, %v146_v52 }
  0x12   :  { %284 = vmatpush1.bf16.msra.mxu0 %v3762_v7 }
  0x13   :  { %285 = vmatprep.subr.bf16.mxu0 %v3763_v8 }
  0x14   :  { %3480 = vmatpush3.bf16.msra.mxu1 %v3781_v15 }
  0x15   :  { %3481 = vmatprep.subr.bf16.mxu1 %v3956_v2 }
  0x16   :  { %286 = vmatpush1.bf16.msra.mxu0 %v3765_v9  ;;  %v77_v27 = vld [vmem:[%s4929_s23] sm:$0xff]  ;;  %v78_v28 = vld [vmem:[%s4929_s23 + $0x8] sm:$0xff] }
  0x17   :  { %287 = vmatprep.subr.bf16.mxu0 %v3766_v11  ;;  %vm79_vm1 = vcmp.ne.s32.totalorder %v77_v27, 0  ;;  %vm80_vm2 = vcmp.ne.s32.totalorder %v78_v28, 0 }
  0x18   :  { %3482 = vmatpush3.bf16.msra.mxu1 %v3782_v18  ;;  %v81_v29 = vsel %vm79_vm1, 1, %v3955_v1  ;;  %v82_v30 = vsel %vm80_vm2, 1, %v3955_v1 }
  0x19   :  { %3483 = vmatprep.subr.bf16.mxu1 %v3956_v2  ;;  %84 = vperm.xlu0 %3753, %v81_v29  }
  0x1a   :  { %288 = vmatpush1.bf16.msra.mxu0 %v3768_v13 }
  0x1b   :  { %289 = vmatprep.subr.bf16.mxu0 %v3769_v14 }
  0x1c   :  { %3484 = vmatpush3.bf16.msra.mxu1 %v3783_v21 }
  0x1d   :  { %3485 = vmatprep.subr.bf16.mxu1 %v3956_v2  ;;  %87 = vperm.xlu0 %3753, %v82_v30  }
  0x1e   :  { %290 = vmatpush1.bf16.msra.mxu0 %v3771_v16 }
  0x1f   :  { %291 = vmatprep.subr.bf16.mxu0 %v3772_v17 }
  0x20   :  { %3486 = vmatpush3.bf16.msra.mxu1 %v3784_v24 }
  0x21   :  { %3487 = vmatprep.subr.bf16.mxu1 %v3956_v2 }
  0x22   :  { %292 = vmatpush1.bf16.msra.mxu0 %v3774_v19 }
  0x23   :  { %293 = vmatprep.subr.bf16.mxu0 %v3775_v20 }
  0x24   :  { %3488 = vmatpush3.bf16.msra.mxu1 %v3785_v25 }
  0x25   :  { %3489 = vmatprep.subr.bf16.mxu1 %v3956_v2 }
  0x26   :  { %294 = vmatpush1.bf16.msra.mxu0 %v3777_v22 }
  0x27   :  { %3519 = vmatprep.subr.bf16.mxu0 %v3956_v2 }
  0x28   :  { %3490 = vmatpush3.bf16.msra.mxu1 %v3786_v26 }
  0x29   :  { %312 = vmatmul.mubr.bf16.vlgmr.msra.gmra.mrb[0].mxu0 %v4139_v23  ;;  %3495 = vmatprep.subr.bf16.mxu1 %v3956_v2 }
  0x2a   :  { %3521 = vmatprep.mubr.msk.bf16.mxu0 %vm3957_vm0, %v3956_v2 }
  0x2b   :  { %3492 = vmatmul.mubr.bf16.vlgmr.msra.gmra.mrb[0].mxu1 %v4139_v23 }
  0x2c   :  { %3497 = vmatprep.mubr.msk.bf16.mxu1 %vm3957_vm0, %v3956_v2 }
  0x98   :  { %v85_v63 = vpop.permute.xlu0 %84 }
  0x99   :  { %vm89_vm6 = vcmp.eq.s32.totalorder %v85_v63, 1 }
  0x9a   :  { %vm4208_vm7 = vmand %vm89_vm6, %vm76_vm5 }
  0x9c   :  { %v88_v9 = vpop.permute.xlu0 %87 }
  0x9d   :  { %vm90_vm9 = vcmp.eq.s32.totalorder %v88_v9, 1 }
  0x9e   :  { %vm4216_vm10 = vmand %vm90_vm9, %vm76_vm5 }
  0xfc   :  { %v313_v37 = vpop.f32.mrb[0].mxu0 }
  0xfd   :  { %v315_v38 = vpop.f32.mrb[1].mxu0  ;;  %v314_v46 = vadd.f32 %v313_v37, %v139_v42 }
  0xfe   :  { %v316_v39 = vadd.f32 %v315_v38, %v143_v35  ;;  %v317_v40 = vpop.f32.mrb[2].mxu0  ;;  %v356_v54 = vpop.f32.mrb[0].mxu1 }
  0xff   :  { %v319_v41 = vpop.f32.mrb[3].mxu0  ;;  %v4187_v48 = vpack.c.bf16 %v314_v46, %v314_v46  ;;  %v318_v50 = vadd.f32 %v317_v40, %v139_v42  ;;  %v357_v55 = vadd.f32 %v356_v54, %v147_v53  ;;  %v3493_v56 = vpop.f32.mrb[1].mxu1 }
 0x100   :  { %v4180_v43 = vpack.c.bf16 %v316_v39, %v316_v39  ;;  %v320_v44 = vadd.f32 %v319_v41, %v143_v35  ;;  %v359_v57 = vpop.f32.mrb[2].mxu1 }
 0x101   :  { %v4196_v51 = vpack.c.bf16 %v318_v50, %v318_v50  ;;  %v4202_v58 = vpack.c.bf16 %v357_v55, %v357_v55  ;;  %v360_v59 = vadd.f32 %v359_v57, %v147_v53  ;;  %v3494_v60 = vpop.f32.mrb[3].mxu1 }
 0x102   :  { %v386_v45 = vsel %vm381_vm3, %v4180_v43, 0  ;;  %v4185_v47 = vpack.c.bf16 %v320_v44, %v320_v44 }
 0x103   :  { %3496 = vmatpush3.bf16.xpose.msra.mxu1 %v386_v45  ;;  %v508_v61 = vsel %vm506_vm4, %v4202_v58, 0  ;;  %v4235_v38 = vpack.c.bf16 %v360_v59, %v360_v59 }
 0x104   :  { %3501 = vmatprep.subr.bf16.mxu1 %v3956_v2  ;;  %v432_v49 = vsel %vm381_vm3, %v4185_v47, 0 }
 0x105   :  { %v554_v42 = vsel %vm506_vm4, %v4235_v38, 0 }
 0x10a   :  { %3498 = vmatmul.mubr.msk.bf16.vlgmr.msra.gmra.mrb[4].mxu1 %vm381_vm3, %v4187_v48 }
 0x10b   :  { %3502 = vmatpush3.bf16.xpose.msra.mxu1 %v432_v49  ;;  %3503 = vmatprep.mubr.msk.bf16.mxu1 %vm3957_vm0, %v3956_v2 }
 0x10c   :  { %3507 = vmatprep.subr.bf16.mxu1 %v3956_v2 }
 0x112   :  { %3504 = vmatmul.mubr.msk.bf16.vlgmr.msra.gmra.mrb[8].mxu1 %vm381_vm3, %v4196_v51 }
 0x113   :  { %3509 = vmatprep.mubr.msk.bf16.mxu1 %vm3957_vm0, %v3956_v2  ;;  %3508 = vmatpush3.bf16.msra.mxu1 %v508_v61 }
 0x114   :  { %3513 = vmatprep.subr.bf16.mxu1 %v3956_v2 }
 0x1dd   :  { %v422_v3 = vpop.f32.mrb[4].mxu1 }
 0x1de   :  { %v474_v4 = vmul.f32 0.17677669, %v422_v3  ;;  %v3499_v5 = vpop.f32.mrb[5].mxu1 }
 0x1df   :  { %v425_v6 = vpop.f32.mrb[6].mxu1 }
 0x1e0   :  { %v3500_v7 = vpop.f32.mrb[7].mxu1  ;;  %v476_v8 = vsel %vm4208_vm7, %v474_v4, -1e+10 }
 0x1e1   :  { %v479_v10 = vsel %vm478_vm8, %v476_v8, -inf }
 0x1e2   :  { %480 = vmax.xlane.f32.xlu1 %v479_v10 }
 0x1e5   :  { %v468_v11 = vpop.f32.mrb[8].mxu1 }
 0x1e6   :  { %v475_v12 = vmul.f32 0.17677669, %v468_v11  ;;  %v3505_v13 = vpop.f32.mrb[9].mxu1 }
 0x1e7   :  { %v471_v15 = vpop.f32.mrb[10].mxu1 }
 0x1e8   :  { %v3506_v16 = vpop.f32.mrb[11].mxu1  ;;  %v477_v17 = vsel %vm4216_vm10, %v475_v12, -1e+10 }
 0x1e9   :  { %v482_v18 = vsel %vm478_vm8, %v477_v17, -inf }
 0x1ea   :  { %483 = vmax.xlane.f32.xlu1 %v482_v18 }
 0x1fb   :  { %600 = vrot.lane.b32.xlu1 %v4180_v43, %s3958_s24 }
 0x1ff   :  { %650 = vrot.lane.b32.xlu1 %v4185_v47, %s3958_s24 }
 0x26f   :  { %v481_v19 = vpop.xlane.xlu1 %480 }
 0x270   :  { %v485_v20 = vsub.f32 %v476_v8, %v481_v19 }
 0x272   :  { %v487_v21 = vmul.f32 1.442695, %v485_v20 }
 0x274   :  { %3877 = vpow2.f32 %v487_v21 }
 0x277   :  { %v484_v22 = vpop.xlane.xlu1 %483 }
 0x278   :  { %v486_v24 = vsub.f32 %v477_v17, %v484_v22 }
 0x27a   :  { %v489_v25 = vmul.f32 1.442695, %v486_v24 }
 0x27b   :  { %v601_v26 = vpop.permute.xlu1 %600 }
 0x27c   :  { %3879 = vpow2.f32 %v489_v25  ;;  %v606_v27 = vsel %vm381_vm3, %v601_v26, 0 }
 0x27d   :  { %3520 = vmatpush3.bf16.xpose.msra.mxu0 %v606_v27 }
 0x27e   :  { %v3878_v28 = vpop.eup %3877  ;;  %3531 = vmatprep.subr.bf16.mxu0 %v3956_v2 }
 0x27f   :  { %v491_v29 = vsel %vm478_vm8, %v3878_v28, 0.0  ;;  %v651_v34 = vpop.permute.xlu1 %650 }
 0x280   :  { %492 = vadd.xlane.f32.xlu0 %v491_v29  ;;  %v656_v49 = vsel %vm381_vm3, %v651_v34, 0 }
 0x286   :  { %v3880_v30 = vpop.eup %3879 }
 0x287   :  { %v494_v31 = vsel %vm478_vm8, %v3880_v30, 0.0 }
 0x288   :  { %495 = vadd.xlane.f32.xlu1 %v494_v31 }
 0x299   :  { %598 = vrot.lane.b32.xlu1 %v4187_v48, %s3958_s24 }
 0x29d   :  { %648 = vrot.lane.b32.xlu1 %v4196_v51, %s3958_s24 }
 0x30d   :  { %v493_v32 = vpop.xlane.xlu0 %492 }
 0x30e   :  { %3881 = vrcp.f32 %v493_v32 }
 0x315   :  { %v496_v35 = vpop.xlane.xlu1 %495 }
 0x316   :  { %3883 = vrcp.f32 %v496_v35 }
 0x318   :  { %v3882_v37 = vpop.eup %3881 }
 0x319   :  { %v498_v39 = vmul.f32 %v3882_v37, %v3878_v28  ;;  %v599_v40 = vpop.permute.xlu1 %598 }
 0x31a   :  { %3522 = vmatmul.mubr.msk.bf16.vlgmr.msra.gmra.mrb[4].mxu0 %vm381_vm3, %v599_v40 }
 0x31b   :  { %v501_v41 = vpack.c.bf16 %v498_v39, %v498_v39  ;;  %3533 = vmatprep.mubr.msk.bf16.mxu0 %vm3957_vm0, %v3956_v2 }
 0x31d   :  { %3510 = vmatmul.mubr.msk.bf16.vlgmr.msra.gmra.mrb[12].mxu1 %vm478_vm8, %v501_v41  ;;  %v649_v50 = vpop.permute.xlu1 %648 }
 0x31e   :  { %3514 = vmatpush3.bf16.msra.mxu1 %v554_v42  ;;  %3515 = vmatprep.mubr.msk.bf16.mxu1 %vm3957_vm0, %v3956_v2 }
 0x31f   :  { %3525 = vmatprep.subr.bf16.mxu1 %v3956_v2 }
 0x320   :  { %v3884_v44 = vpop.eup %3883 }
 0x321   :  { %v500_v45 = vmul.f32 %v3884_v44, %v3880_v30 }
 0x323   :  { %v502_v46 = vpack.c.bf16 %v500_v45, %v500_v45 }
 0x325   :  { %3516 = vmatmul.mubr.msk.bf16.vlgmr.msra.gmra.mrb[16].mxu1 %vm478_vm8, %v502_v46 }
 0x326   :  { %3527 = vmatprep.mubr.msk.bf16.mxu1 %vm3957_vm0, %v3956_v2 }
 0x327   :  { %3526 = vmatpush3.bf16.xpose.msra.mxu1 %v656_v49 }
 0x328   :  { %3537 = vmatprep.subr.bf16.mxu1 %v3956_v2 }
 0x32e   :  { %3528 = vmatmul.mubr.msk.bf16.vlgmr.msra.gmra.mrb[20].mxu1 %vm381_vm3, %v649_v50 }
 0x32f   :  { %3539 = vmatprep.mubr.msk.bf16.mxu1 %vm3957_vm0, %v3956_v2 }
 0x3ed   :  { %v642_v52 = vpop.f32.mrb[4].mxu0 }
 0x3ee   :  { %v698_v53 = vmul.f32 0.17677669, %v642_v52  ;;  %v3523_v54 = vpop.f32.mrb[5].mxu0 }
 0x3ef   :  { %v645_v55 = vpop.f32.mrb[6].mxu0 }
 0x3f0   :  { %v544_v56 = vpop.f32.mrb[12].mxu1  ;;  %v3524_v57 = vpop.f32.mrb[7].mxu0  ;;  %v700_v59 = vsel %vm4208_vm7, %v698_v53, -1e+10 }
 0x3f1   :  { %596 = vst.msk [vmem:[#allocation2] sm:$0xff] %vm381_vm3, %v544_v56  ;;  %v3511_v60 = vpop.f32.mrb[13].mxu1  ;;  %v702_v61 = vsel %vm478_vm8, %v700_v59, -inf }
 0x3f2   :  { %703 = vmax.xlane.f32.xlu0 %v702_v61  ;;  %v547_v62 = vpop.f32.mrb[14].mxu1 }
 0x3f3   :  { %v3512_v63 = vpop.f32.mrb[15].mxu1 }
 0x3f8   :  { %v590_v3 = vpop.f32.mrb[16].mxu1 }
 0x3f9   :  { %597 = vst.msk [vmem:[#allocation2 + $0x8] sm:$0xff] %vm381_vm3, %v590_v3  ;;  %v3517_v4 = vpop.f32.mrb[17].mxu1 }
 0x3fa   :  { %v593_v5 = vpop.f32.mrb[18].mxu1 }
 0x3fb   :  { %v3518_v6 = vpop.f32.mrb[19].mxu1 }
 0x401   :  { %v692_v7 = vpop.f32.mrb[20].mxu1 }
 0x402   :  { %v699_v8 = vmul.f32 0.17677669, %v692_v7  ;;  %v3529_v9 = vpop.f32.mrb[21].mxu1 }
 0x403   :  { %v695_v10 = vpop.f32.mrb[22].mxu1 }
 0x404   :  { %v3530_v11 = vpop.f32.mrb[23].mxu1  ;;  %v701_v12 = vsel %vm4216_vm10, %v699_v8, -1e+10 }
 0x405   :  { %v705_v13 = vsel %vm478_vm8, %v701_v12, -inf }
 0x406   :  { %706 = vmax.xlane.f32.xlu1 %v705_v13 }
 0x417   :  { %885 = vrot.lane.b32.xlu1 %v4185_v47, %s3959_s2 }
 0x47f   :  { %v704_v15 = vpop.xlane.xlu0 %703 }
 0x480   :  { %v708_v16 = vsub.f32 %v700_v59, %v704_v15 }
 0x482   :  { %v710_v17 = vmul.f32 1.442695, %v708_v16 }
 0x484   :  { %3885 = vpow2.f32 %v710_v17 }
 0x48e   :  { %v3886_v18 = vpop.eup %3885 }
 0x48f   :  { %v714_v19 = vsel %vm478_vm8, %v3886_v18, 0.0 }
 0x490   :  { %715 = vadd.xlane.f32.xlu0 %v714_v19 }
 0x493   :  { %v707_v20 = vpop.xlane.xlu1 %706 }
 0x494   :  { %v709_v21 = vsub.f32 %v701_v12, %v707_v20 }
 0x496   :  { %v712_v22 = vmul.f32 1.442695, %v709_v21 }
 0x497   :  { %v886_v44 = vpop.permute.xlu1 %885 }
 0x498   :  { %3887 = vpow2.f32 %v712_v22  ;;  %v891_v46 = vsel %vm381_vm3, %v886_v44, 0 }
 0x4a2   :  { %v3888_v24 = vpop.eup %3887 }
 0x4a3   :  { %v717_v25 = vsel %vm478_vm8, %v3888_v24, 0.0 }
 0x4a6   :  { %726 = vrot.lane.b32.xlu0 %v4202_v58, %s3958_s24 }
 0x4aa   :  { %774 = vrot.lane.b32.xlu0 %v4235_v38, %s3958_s24 }
 0x4c9   :  { %718 = vadd.xlane.f32.xlu0 %v717_v25 }
 0x4df   :  { %835 = vrot.lane.b32.xlu0 %v4180_v43, %s3959_s2 }
 0x4e3   :  { %833 = vrot.lane.b32.xlu0 %v4187_v48, %s3959_s2 }
 0x4e7   :  { %883 = vrot.lane.b32.xlu0 %v4196_v51, %s3959_s2 }
 0x51d   :  { %v716_v26 = vpop.xlane.xlu0 %715 }
 0x51e   :  { %3889 = vrcp.f32 %v716_v26 }
 0x521   :  { %v727_v27 = vpop.permute.xlu0 %726 }
 0x522   :  { %v732_v28 = vsel %vm506_vm4, %v727_v27, 0 }
 0x523   :  { %3532 = vmatpush3.bf16.msra.mxu0 %v732_v28 }
 0x524   :  { %3543 = vmatprep.subr.bf16.mxu0 %v3956_v2 }
 0x525   :  { %v775_v29 = vpop.permute.xlu0 %774 }
 0x526   :  { %v780_v30 = vsel %vm506_vm4, %v775_v29, 0 }
 0x527   :  { %3538 = vmatpush3.bf16.msra.mxu1 %v780_v30 }
 0x528   :  { %v3890_v31 = vpop.eup %3889  ;;  %3549 = vmatprep.subr.bf16.mxu1 %v3956_v2 }
 0x529   :  { %v721_v32 = vmul.f32 %v3890_v31, %v3886_v18 }
 0x52b   :  { %v724_v34 = vpack.c.bf16 %v721_v32, %v721_v32 }
 0x52d   :  { %3534 = vmatmul.mubr.msk.bf16.vlgmr.msra.gmra.mrb[8].mxu0 %vm478_vm8, %v724_v34 }
 0x52e   :  { %3545 = vmatprep.mubr.msk.bf16.mxu0 %vm3957_vm0, %v3956_v2 }
 0x556   :  { %v719_v35 = vpop.xlane.xlu0 %718 }
 0x557   :  { %3891 = vrcp.f32 %v719_v35 }
 0x55a   :  { %v836_v37 = vpop.permute.xlu0 %835 }
 0x55b   :  { %v841_v39 = vsel %vm381_vm3, %v836_v37, 0 }
 0x55c   :  { %3544 = vmatpush3.bf16.xpose.msra.mxu0 %v841_v39 }
 0x55d   :  { %3555 = vmatprep.subr.bf16.mxu0 %v3956_v2 }
 0x55e   :  { %v834_v42 = vpop.permute.xlu0 %833 }
 0x561   :  { %v3892_v40 = vpop.eup %3891 }
 0x562   :  { %v723_v41 = vmul.f32 %v3892_v40, %v3888_v24  ;;  %v884_v49 = vpop.permute.xlu0 %883 }
 0x563   :  { %3546 = vmatmul.mubr.msk.bf16.vlgmr.msra.gmra.mrb[12].mxu0 %vm381_vm3, %v834_v42 }
 0x564   :  { %v725_v45 = vpack.c.bf16 %v723_v41, %v723_v41  ;;  %3557 = vmatprep.mubr.msk.bf16.mxu0 %vm3957_vm0, %v3956_v2 }
 0x566   :  { %3540 = vmatmul.mubr.msk.bf16.vlgmr.msra.gmra.mrb[24].mxu1 %vm478_vm8, %v725_v45 }
 0x567   :  { %3550 = vmatpush3.bf16.xpose.msra.mxu1 %v891_v46  ;;  %3551 = vmatprep.mubr.msk.bf16.mxu1 %vm3957_vm0, %v3956_v2 }
 0x568   :  { %3561 = vmatprep.subr.bf16.mxu1 %v3956_v2 }
 0x56e   :  { %3552 = vmatmul.mubr.msk.bf16.vlgmr.msra.gmra.mrb[28].mxu1 %vm381_vm3, %v884_v49 }
 0x56f   :  { %3563 = vmatprep.mubr.msk.bf16.mxu1 %vm3957_vm0, %v3956_v2 }
 0x600   :  { %v4296_v50 = vpop.f32.mrb[8].mxu0 }
 0x601   :  { %v3535_v52 = vpop.f32.mrb[9].mxu0 }
 0x602   :  { %v771_v53 = vpop.f32.mrb[10].mxu0 }
 0x603   :  { %v3536_v54 = vpop.f32.mrb[11].mxu0 }
 0x636   :  { %v877_v55 = vpop.f32.mrb[12].mxu0 }
 0x637   :  { %v933_v56 = vmul.f32 0.17677669, %v877_v55  ;;  %v3547_v57 = vpop.f32.mrb[13].mxu0 }
 0x638   :  { %v880_v59 = vpop.f32.mrb[14].mxu0 }
 0x639   :  { %v4298_v60 = vpop.f32.mrb[24].mxu1  ;;  %v3548_v61 = vpop.f32.mrb[15].mxu0  ;;  %v935_v62 = vsel %vm4208_vm7, %v933_v56, -1e+10 }
 0x63a   :  { %v3541_v63 = vpop.f32.mrb[25].mxu1  ;;  %v937_v3 = vsel %vm478_vm8, %v935_v62, -inf }
 0x63b   :  { %938 = vmax.xlane.f32.xlu0 %v937_v3  ;;  %v819_v4 = vpop.f32.mrb[26].mxu1 }
 0x63c   :  { %v3542_v5 = vpop.f32.mrb[27].mxu1 }
 0x641   :  { %v927_v6 = vpop.f32.mrb[28].mxu1 }
 0x642   :  { %v934_v7 = vmul.f32 0.17677669, %v927_v6  ;;  %v3553_v8 = vpop.f32.mrb[29].mxu1 }
 0x643   :  { %v930_v9 = vpop.f32.mrb[30].mxu1 }
 0x644   :  { %v3554_v10 = vpop.f32.mrb[31].mxu1  ;;  %v936_v11 = vsel %vm4216_vm10, %v934_v7, -1e+10 }
 0x645   :  { %v940_v12 = vsel %vm478_vm8, %v936_v11, -inf }
 0x646   :  { %941 = vmax.xlane.f32.xlu1 %v940_v12 }
 0x657   :  { %1009 = vrot.lane.b32.xlu1 %v4235_v38, %s3959_s2 }
 0x65b   :  { %1070 = vrot.lane.b32.xlu1 %v4180_v43, %s3960_s25 }
 0x65f   :  { %1068 = vrot.lane.b32.xlu1 %v4187_v48, %s3960_s25 }
 0x6c8   :  { %v939_v13 = vpop.xlane.xlu0 %938 }
 0x6c9   :  { %v943_v15 = vsub.f32 %v935_v62, %v939_v13 }
 0x6cb   :  { %v945_v16 = vmul.f32 1.442695, %v943_v15 }
 0x6cd   :  { %3893 = vpow2.f32 %v945_v16 }
 0x6d3   :  { %v942_v17 = vpop.xlane.xlu1 %941 }
 0x6d4   :  { %v944_v43 = vsub.f32 %v936_v11, %v942_v17 }
 0x6d6   :  { %v947_v48 = vmul.f32 1.442695, %v944_v43 }
 0x6d7   :  { %v3894_v18 = vpop.eup %3893  ;;  %v1010_v19 = vpop.permute.xlu1 %1009 }
 0x6d8   :  { %v1015_v20 = vsel %vm506_vm4, %v1010_v19, 0  ;;  %v949_v21 = vsel %vm478_vm8, %v3894_v18, 0.0  ;;  %3895 = vpow2.f32 %v947_v48 }
 0x6d9   :  { %950 = vadd.xlane.f32.xlu0 %v949_v21  ;;  %3562 = vmatpush3.bf16.msra.mxu1 %v1015_v20 }
 0x6da   :  { %3573 = vmatprep.subr.bf16.mxu1 %v3956_v2 }
 0x6db   :  { %v1071_v30 = vpop.permute.xlu1 %1070 }
 0x6dc   :  { %v1076_v32 = vsel %vm381_vm3, %v1071_v30, 0  ;;  %v3787_v30 = vld [vmem:[%s4935_s27] sm:$0xff]  }
 0x6e2   :  { %v3896_v22 = vpop.eup %3895 }
 0x6e3   :  { %v952_v24 = vsel %vm478_vm8, %v3896_v22, 0.0 }
 0x6ef   :  { %961 = vrot.lane.b32.xlu0 %v4202_v58, %s3959_s2 }
 0x70e   :  { %953 = vadd.xlane.f32.xlu0 %v952_v24 }
 0x724   :  { %1120 = vrot.lane.b32.xlu0 %v4185_v47, %s3960_s25  ;;  %v1069_v47 = vpop.permute.xlu1 %1068 }
 0x728   :  { %1118 = vrot.lane.b32.xlu0 %v4196_v51, %s3960_s25 }
 0x766   :  { %v951_v25 = vpop.xlane.xlu0 %950 }
 0x767   :  { %3897 = vrcp.f32 %v951_v25 }
 0x76a   :  { %v962_v26 = vpop.permute.xlu0 %961 }
 0x76b   :  { %v967_v27 = vsel %vm506_vm4, %v962_v26, 0 }
 0x76c   :  { %3556 = vmatpush3.bf16.msra.mxu0 %v967_v27 }
 0x76d   :  { %3567 = vmatprep.subr.bf16.mxu0 %v3956_v2 }
 0x771   :  { %v3898_v28 = vpop.eup %3897 }
 0x772   :  { %v956_v29 = vmul.f32 %v3898_v28, %v3894_v18 }
 0x774   :  { %v959_v31 = vpack.c.bf16 %v956_v29, %v956_v29 }
 0x776   :  { %3558 = vmatmul.mubr.msk.bf16.vlgmr.msra.gmra.mrb[16].mxu0 %vm478_vm8, %v959_v31  ;;  %v3788_v31 = vld [vmem:[%s4935_s27 + $0x8] sm:$0xff]  }
 0x777   :  { %3568 = vmatpush3.bf16.xpose.msra.mxu0 %v1076_v32  ;;  %3569 = vmatprep.mubr.msk.bf16.mxu0 %vm3957_vm0, %v3956_v2  ;;  %v3789_v32 = vld [vmem:[%s4935_s27 + $0x10] sm:$0xff]  }
 0x778   :  { %3579 = vmatprep.subr.bf16.mxu0 %v3956_v2 }
 0x77e   :  { %3570 = vmatmul.mubr.msk.bf16.vlgmr.msra.gmra.mrb[20].mxu0 %vm381_vm3, %v1069_v47  ;;  %v3790_v47 = vld [vmem:[%s4935_s27 + $0x18] sm:$0xff]  }
 0x77f   :  { %3581 = vmatprep.mubr.msk.bf16.mxu0 %vm3957_vm0, %v3956_v2 }
 0x79b   :  { %v954_v51 = vpop.xlane.xlu0 %953 }
 0x79c   :  { %3899 = vrcp.f32 %v954_v51 }
 0x79f   :  { %v1121_v37 = vpop.permute.xlu0 %1120 }
 0x7a0   :  { %v1126_v40 = vsel %vm381_vm3, %v1121_v37, 0 }
 0x7a3   :  { %v1119_v41 = vpop.permute.xlu0 %1118 }
 0x7a6   :  { %v3900_v34 = vpop.eup %3899 }
 0x7a7   :  { %v958_v35 = vmul.f32 %v3900_v34, %v3896_v22 }
 0x7a9   :  { %v960_v39 = vpack.c.bf16 %v958_v35, %v958_v35 }
 0x7ab   :  { %3564 = vmatmul.mubr.msk.bf16.vlgmr.msra.gmra.mrb[32].mxu1 %vm478_vm8, %v960_v39  ;;  %v3791_v39 = vld [vmem:[%s4935_s27 + $0x20] sm:$0xff]  }
 0x7ac   :  { %3574 = vmatpush3.bf16.xpose.msra.mxu1 %v1126_v40  ;;  %3575 = vmatprep.mubr.msk.bf16.mxu1 %vm3957_vm0, %v3956_v2  ;;  %v3792_v40 = vld [vmem:[%s4935_s27 + $0x28] sm:$0xff]  }
 0x7ad   :  { %3585 = vmatprep.subr.bf16.mxu1 %v3956_v2 }
 0x7b3   :  { %3576 = vmatmul.mubr.msk.bf16.vlgmr.msra.gmra.mrb[36].mxu1 %vm381_vm3, %v1119_v41  ;;  %v3793_v41 = vld [vmem:[%s4935_s27 + $0x30] sm:$0xff]  }
 0x7b4   :  { %3587 = vmatprep.mubr.msk.bf16.mxu1 %vm3957_vm0, %v3956_v2 }
 0x849   :  { %v1003_v42 = vpop.f32.mrb[16].mxu0 }
 0x84a   :  { %v3559_v44 = vpop.f32.mrb[17].mxu0 }
 0x84b   :  { %v1006_v45 = vpop.f32.mrb[18].mxu0 }
 0x84c   :  { %v3560_v46 = vpop.f32.mrb[19].mxu0 }
 0x851   :  { %v1112_v49 = vpop.f32.mrb[20].mxu0 }
 0x852   :  { %v1168_v52 = vmul.f32 0.17677669, %v1112_v49  ;;  %v3571_v53 = vpop.f32.mrb[21].mxu0 }
 0x853   :  { %v1115_v54 = vpop.f32.mrb[22].mxu0 }
 0x854   :  { %v3572_v55 = vpop.f32.mrb[23].mxu0  ;;  %v1170_v56 = vsel %vm4208_vm7, %v1168_v52, -1e+10 }
 0x855   :  { %v1172_v57 = vsel %vm478_vm8, %v1170_v56, -inf }
 0x856   :  { %1173 = vmax.xlane.f32.xlu1 %v1172_v57  ;;  %v3235_v57 = vld [vmem:[%s4903_s7] ss:$0 sm:$0xff] }
 0x87e   :  { %v1051_v59 = vpop.f32.mrb[32].mxu1 }
 0x87f   :  { %v3565_v61 = vpop.f32.mrb[33].mxu1 }
 0x880   :  { %v1054_v62 = vpop.f32.mrb[34].mxu1 }
 0x881   :  { %v3566_v63 = vpop.f32.mrb[35].mxu1 }
 0x886   :  { %v1162_v3 = vpop.f32.mrb[36].mxu1 }
 0x887   :  { %v1169_v4 = vmul.f32 0.17677669, %v1162_v3  ;;  %v3577_v5 = vpop.f32.mrb[37].mxu1  ;;  %v69_v3 = vunpack.c.h.bf16 %v4139_v23 }
 0x888   :  { %v1165_v6 = vpop.f32.mrb[38].mxu1 }
 0x889   :  { %v3578_v7 = vpop.f32.mrb[39].mxu1  ;;  %v1171_v8 = vsel %vm4216_vm10, %v1169_v4, -1e+10 }
 0x88a   :  { %v1175_v9 = vsel %vm478_vm8, %v1171_v8, -inf }
 0x88b   :  { %1176 = vmax.xlane.f32.xlu0 %v1175_v9  ;;  %v3795_v9 = vld [vmem:[%s4904_s10] ss:$8 sps:$4 sm:$0xff]  }
 0x8e3   :  { %v1174_v0 = vpop.xlane.xlu1 %1173 }
 0x8e4   :  { %v1178_v10 = vsub.f32 %v1170_v56, %v1174_v0  ;;  %v3797_v0 = vld [vmem:[%s4904_s10 + $0x4] ss:$8 sps:$4 sm:$0xff]  }
 0x8e6   :  { %v1180_v11 = vmul.f32 1.442695, %v1178_v10  ;;  %v3800_v10 = vld [vmem:[%s4904_s10 + $0x14] ss:$8 sps:$4 sm:$0xff]  }
 0x8e8   :  { %3901 = vpow2.f32 %v1180_v11  ;;  %v3804_v11 = vld [vmem:[%s4905_s8] sm:$0xff]  }
 0x8f2   :  { %v3902_v12 = vpop.eup %3901 }
 0x8f3   :  { %v1184_v13 = vsel %vm478_vm8, %v3902_v12, 0.0 }
 0x8f4   :  { %1185 = vadd.xlane.f32.xlu0 %v1184_v13  ;;  %v3808_v13 = vld [vmem:[%s4905_s8 + $0x8] sm:$0xff]  }
 0x90a   :  { %1196 = vrot.lane.b32.xlu0 %v4202_v58, %s3960_s25 }
 0x90e   :  { %826 = vrot.lane.b32.xlu0 %v4298_v60, %s3960_s25 }
 0x912   :  { %1061 = vrot.lane.b32.xlu0 %v1051_v59, %s3959_s2  ;;  %v68_v59 = vunpack.c.l.bf16 %v4139_v23  ;;  %v3798_v23 = vld [vmem:[%s4904_s10 + $0x10] ss:$8 sps:$4 sm:$0xff]  }
 0x918   :  { %v1177_v14 = vpop.xlane.xlu0 %1176 }
 0x919   :  { %v1179_v15 = vsub.f32 %v1171_v8, %v1177_v14  ;;  %v3801_v14 = vld [vmem:[%s4904_s10 + $0x20] ss:$8 sps:$4 sm:$0xff]  }
 0x91b   :  { %v1182_v16 = vmul.f32 1.442695, %v1179_v15  ;;  %v3807_v15 = vld [vmem:[%s4904_s10 + $0x34] ss:$8 sps:$4 sm:$0xff]  }
 0x91d   :  { %3903 = vpow2.f32 %v1182_v16  ;;  %v3805_v16 = vld [vmem:[%s4904_s10 + $0x30] ss:$8 sps:$4 sm:$0xff]  }
 0x927   :  { %v3904_v17 = vpop.eup %3903 }
 0x928   :  { %v1187_v18 = vsel %vm478_vm8, %v3904_v17, 0.0 }
 0x929   :  { %1188 = vadd.xlane.f32.xlu1 %v1187_v18  ;;  %v3809_v18 = vld [vmem:[%s4904_s10 + $0x40] ss:$8 sps:$4 sm:$0xff]  }
 0x93a   :  { %1244 = vrot.lane.b32.xlu1 %v4235_v38, %s3960_s25 }
 0x93e   :  { %824 = vrot.lane.b32.xlu1 %v4296_v50, %s3960_s25 }
 0x942   :  { %1059 = vrot.lane.b32.xlu1 %v1003_v42, %s3959_s2  ;;  %v3794_v42 = vld [vmem:[%s4935_s27 + $0x38] sm:$0xff]  }
 0x981   :  { %v1186_v58 = vpop.xlane.xlu0 %1185 }
 0x982   :  { %3905 = vrcp.f32 %v1186_v58 }
 0x985   :  { %v1197_v60 = vpop.permute.xlu0 %1196 }
 0x986   :  { %v1202_v19 = vsel %vm506_vm4, %v1197_v60, 0 }
 0x987   :  { %3580 = vmatpush3.bf16.msra.mxu0 %v1202_v19 }
 0x988   :  { %3591 = vmatprep.subr.bf16.mxu0 %v3956_v2 }
 0x989   :  { %v827_v20 = vpop.permute.xlu0 %826 }
 0x98a   :  { %832 = vst.msk [vmem:[#allocation2 + $0x8] sm:$0xff] %vm830_vm11, %v827_v20 }
 0x98c   :  { %v3906_v21 = vpop.eup %3905 }
 0x98d   :  { %v1191_v38 = vmul.f32 %v3906_v21, %v3902_v12  ;;  %v1062_v43 = vpop.permute.xlu0 %1061  ;;  %v3803_v12 = vld [vmem:[%s4904_s10 + $0x24] ss:$8 sps:$4 sm:$0xff]  }
 0x98e   :  { %1067 = vst.msk [vmem:[#allocation2 + $0x8] sm:$0xff] %vm1065_vm12, %v1062_v43 }
 0x98f   :  { %v1194_v50 = vpack.c.bf16 %v1191_v38, %v1191_v38 }
 0x991   :  { %3582 = vmatmul.mubr.msk.bf16.vlgmr.msra.gmra.mrb[24].mxu0 %vm478_vm8, %v1194_v50 }
 0x992   :  { %3607 = vmatprep.mubr.msk.bf16.mxu0 %vm3957_vm0, %v3956_v2  ;;  %3592 = vmatpush3.bf16.msra.mxu0 %v3787_v30  ;;  %v3821_v30 = vld [vmem:[%s4904_s10 + $0x70] ss:$8 sps:$4 sm:$0xff]  }
 0x993   :  { %3593 = vmatprep.subr.bf16.mxu0 %v3956_v2 }
 0x996   :  { %3594 = vmatpush3.bf16.msra.mxu0 %v3788_v31  ;;  %v3824_v31 = vld [vmem:[%s4905_s8 + $0x28] sm:$0xff]  }
 0x997   :  { %3595 = vmatprep.subr.bf16.mxu0 %v3956_v2 }
 0x99a   :  { %3596 = vmatpush3.bf16.msra.mxu0 %v3789_v32  ;;  %v3825_v32 = vld [vmem:[%s4906_s1] sm:$0xff]  }
 0x99b   :  { %3597 = vmatprep.subr.bf16.mxu0 %v3956_v2 }
 0x99e   :  { %3598 = vmatpush3.bf16.msra.mxu0 %v3790_v47  ;;  %v3826_v47 = vld [vmem:[%s4905_s8 + $0x30] sm:$0xff]  }
 0x99f   :  { %3599 = vmatprep.subr.bf16.mxu0 %v3956_v2 }
 0x9a2   :  { %3600 = vmatpush3.bf16.msra.mxu0 %v3791_v39 }
 0x9a3   :  { %3601 = vmatprep.subr.bf16.mxu0 %v3956_v2 }
 0x9a6   :  { %3602 = vmatpush3.bf16.msra.mxu0 %v3792_v40 }
 0x9a7   :  { %3603 = vmatprep.subr.bf16.mxu0 %v3956_v2 }
 0x9aa   :  { %3604 = vmatpush3.bf16.msra.mxu0 %v3793_v41 }
 0x9ab   :  { %3605 = vmatprep.subr.bf16.mxu0 %v3956_v2 }
 0x9ae   :  { %3606 = vmatpush3.bf16.msra.mxu0 %v3794_v42 }
 0x9af   :  { %1686 = vmatprep.subr.bf16.mxu0 %v3797_v0 }
 0x9b6   :  { %v1189_v48 = vpop.xlane.xlu1 %1188 }
 0x9b7   :  { %3907 = vrcp.f32 %v1189_v48  ;;  %v3812_v48 = vld [vmem:[%s4905_s8 + $0x10] sm:$0xff]  }
 0x9ba   :  { %v1245_v22 = vpop.permute.xlu1 %1244 }
 0x9bb   :  { %v1250_v24 = vsel %vm506_vm4, %v1245_v22, 0  ;;  %v3815_v22 = vld [vmem:[%s4904_s10 + $0x54] ss:$8 sps:$4 sm:$0xff]  }
 0x9bc   :  { %3586 = vmatpush3.bf16.msra.mxu1 %v1250_v24  ;;  %v3813_v24 = vld [vmem:[%s4904_s10 + $0x50] ss:$8 sps:$4 sm:$0xff]  }
 0x9bd   :  { %3611 = vmatprep.subr.bf16.mxu1 %v3956_v2 }
 0x9be   :  { %v825_v25 = vpop.permute.xlu1 %824 }
 0x9bf   :  { %831 = vst.msk [vmem:[#allocation2] sm:$0xff] %vm830_vm11, %v825_v25  ;;  %v3816_v25 = vld [vmem:[%s4905_s8 + $0x18] sm:$0xff]  }
 0x9c1   :  { %v3908_v26 = vpop.eup %3907 }
 0x9c2   :  { %v1193_v27 = vmul.f32 %v3908_v26, %v3904_v17  ;;  %v1060_v28 = vpop.permute.xlu1 %1059  ;;  %v3811_v17 = vld [vmem:[%s4904_s10 + $0x44] ss:$8 sps:$4 sm:$0xff]  }
 0x9c3   :  { %1066 = vst.msk [vmem:[#allocation2] sm:$0xff] %vm1065_vm12, %v1060_v28  ;;  %v3819_v26 = vld [vmem:[%s4904_s10 + $0x64] ss:$8 sps:$4 sm:$0xff]  }
 0x9c4   :  { %v1195_v29 = vpack.c.bf16 %v1193_v27, %v1193_v27  ;;  %v3817_v27 = vld [vmem:[%s4904_s10 + $0x60] ss:$8 sps:$4 sm:$0xff]  }
 0x9c5   :  { %v3820_v28 = vld [vmem:[%s4905_s8 + $0x20] sm:$0xff]  }
 0x9c6   :  { %3588 = vmatmul.mubr.msk.bf16.vlgmr.msra.gmra.mrb[40].mxu1 %vm478_vm8, %v1195_v29  ;;  %v3823_v29 = vld [vmem:[%s4904_s10 + $0x74] ss:$8 sps:$4 sm:$0xff]  }
 0x9c7   :  { %3627 = vmatprep.mubr.msk.bf16.mxu1 %vm3957_vm0, %v3956_v2  ;;  %3612 = vmatpush3.bf16.msra.mxu1 %v3804_v11 }
 0x9c8   :  { %3613 = vmatprep.subr.bf16.mxu1 %v3956_v2 }
 0x9cb   :  { %3614 = vmatpush3.bf16.msra.mxu1 %v3808_v13 }
 0x9cc   :  { %3615 = vmatprep.subr.bf16.mxu1 %v3956_v2 }
 0x9cf   :  { %3616 = vmatpush3.bf16.msra.mxu1 %v3812_v48 }
 0x9d0   :  { %3617 = vmatprep.subr.bf16.mxu1 %v3956_v2 }
 0x9d3   :  { %3618 = vmatpush3.bf16.msra.mxu1 %v3816_v25 }
 0x9d4   :  { %3619 = vmatprep.subr.bf16.mxu1 %v3956_v2 }
 0x9d7   :  { %3620 = vmatpush3.bf16.msra.mxu1 %v3820_v28 }
 0x9d8   :  { %3621 = vmatprep.subr.bf16.mxu1 %v3956_v2 }
 0x9db   :  { %3622 = vmatpush3.bf16.msra.mxu1 %v3824_v31 }
 0x9dc   :  { %3623 = vmatprep.subr.bf16.mxu1 %v3956_v2 }
 0x9df   :  { %3624 = vmatpush3.bf16.msra.mxu1 %v3826_v47 }
 0x9e0   :  { %3625 = vmatprep.subr.bf16.mxu1 %v3956_v2 }
 0xa64   :  { %v1238_v51 = vpop.f32.mrb[24].mxu0 }
 0xa65   :  { %1294 = vrot.lane.b32.xlu1 %v1238_v51, %s3958_s24  ;;  %v3583_v34 = vpop.f32.mrb[25].mxu0  ;;  %v3827_v51 = vld [vmem:[%s4905_s8 + $0x38] sm:$0xff]  }
 0xa66   :  { %v1241_v35 = vpop.f32.mrb[26].mxu0  ;;  %3626 = vmatpush3.bf16.msra.mxu1 %v3827_v51 }
 0xa67   :  { %v3584_v37 = vpop.f32.mrb[27].mxu0  ;;  %3631 = vmatprep.subr.bf16.mxu1 %v3956_v2 }
 0xa99   :  { %v1286_v44 = vpop.f32.mrb[40].mxu1 }
 0xa9a   :  { %1296 = vrot.lane.b32.xlu0 %v1286_v44, %s3958_s24  ;;  %v3589_v45 = vpop.f32.mrb[41].mxu1  ;;  %v3244_v44 = vld [vmem:[%s4907_s18] ss:$0 sm:$0xff] }
 0xa9b   :  { %v1289_v46 = vpop.f32.mrb[42].mxu1 }
 0xa9c   :  { %v3590_v49 = vpop.f32.mrb[43].mxu1 }
 0xad7   :  { %v1295_v52 = vpop.permute.xlu1 %1294 }
 0xad8   :  { %1301 = vst.msk [vmem:[#allocation2] sm:$0xff] %vm1300_vm13, %v1295_v52 }
 0xadf   :  { %v1303_v54 = vld [vmem:[#allocation2] sm:$0xff] }
 0xb0c   :  { %v1297_v53 = vpop.permute.xlu0 %1296 }
 0xb0d   :  { %1302 = vst.msk [vmem:[#allocation2 + $0x8] sm:$0xff] %vm1300_vm13, %v1297_v53  ;;  %v3245_v53 = vld [vmem:[%s4908_s19] ss:$0 sm:$0xff] }
 0xb14   :  { %v1304_v55 = vld [vmem:[#allocation2 + $0x8] sm:$0xff] }
 0xb15   :  { %v1305_v56 = vpack.c.bf16 %v1304_v55, %v1303_v54 }
 0xb17   :  { %3608 = vmatmul.mubr.bf16.vlgmr.msra.gmra.mrb[28].mxu0 %v1305_v56 }
 0xb18   :  { %1718 = vmatprep.mubr.bf16.mxu0 %v3955_v1  ;;  %1687 = vmatpush1.bf16.msra.mxu0 %v3795_v9 }
 0xb19   :  { %1688 = vmatprep.subr.bf16.mxu0 %v3800_v10  ;;  %v3246_v10 = vld [vmem:[%s4910_s9] ss:$0 sm:$0xff] }
 0xb1c   :  { %1689 = vmatpush1.bf16.msra.mxu0 %v3798_v23 }
 0xb1d   :  { %1690 = vmatprep.subr.bf16.mxu0 %v3803_v12 }
 0xb20   :  { %1691 = vmatpush1.bf16.msra.mxu0 %v3801_v14 }
 0xb21   :  { %1692 = vmatprep.subr.bf16.mxu0 %v3807_v15 }
 0xb24   :  { %1693 = vmatpush1.bf16.msra.mxu0 %v3805_v16 }
 0xb25   :  { %1694 = vmatprep.subr.bf16.mxu0 %v3811_v17 }
 0xb28   :  { %1695 = vmatpush1.bf16.msra.mxu0 %v3809_v18 }
 0xb29   :  { %1696 = vmatprep.subr.bf16.mxu0 %v3815_v22 }
 0xb2c   :  { %1697 = vmatpush1.bf16.msra.mxu0 %v3813_v24 }
 0xb2d   :  { %1698 = vmatprep.subr.bf16.mxu0 %v3819_v26 }
 0xb30   :  { %1699 = vmatpush1.bf16.msra.mxu0 %v3817_v27 }
 0xb31   :  { %1700 = vmatprep.subr.bf16.mxu0 %v3823_v29 }
 0xb34   :  { %1701 = vmatpush1.bf16.msra.mxu0 %v3821_v30 }
 0xb35   :  { %3655 = vmatprep.subr.bf16.mxu0 %v3956_v2 }
 0xb37   :  { %1719 = vmatmul.mubr.bf16.vlgmr.msra.gmra.mrb[32].mxu0 %v3825_v32 }
 0xb38   :  { %3657 = vmatprep.mubr.msk.bf16.mxu0 %vm3957_vm0, %v3956_v2 }
 0xbea   :  { %v1411_v61 = vpop.f32.mrb[28].mxu0 }
 0xbeb   :  { %v1412_v62 = vadd.f32 %v3235_v57, %v1411_v61  ;;  %v3609_v63 = vpop.f32.mrb[29].mxu0 }
 0xbec   :  { %v1414_v4 = vpop.f32.mrb[30].mxu0 }
 0xbed   :  { %v1415_v5 = vadd.f32 %v3235_v57, %v1414_v4  ;;  %v3610_v6 = vpop.f32.mrb[31].mxu0  ;;  %v1418_v7 = vadd.f32 %v1412_v62, %v68_v59  ;;  %v1588_v59 = vld [vmem:[%s4909_s11] sm:$0x3] }
 0xbee   :  { %v1593_v61 = vrot.slane %v1588_v59, %v4177_v36  ;;  %v1597_v63 = vrot.slane %v1588_v59, %v4171_v33 }
 0xbef   :  { %1420 = vadd.xlane.f32.xlu1 %v1418_v7  ;;  %v1419_v8 = vadd.f32 %v1415_v5, %v69_v3 }
 0xbf1   :  { %1422 = vadd.xlane.f32.xlu0 %v1419_v8 }
 0xc0a   :  { %v1720_v62 = vpop.f32.mrb[32].mxu0 }
 0xc0b   :  { %v1721_v3 = vadd.f32 %v1720_v62, %v1593_v61  ;;  %v1722_v4 = vpop.f32.mrb[33].mxu0 }
 0xc0c   :  { %v1724_v5 = vpop.f32.mrb[34].mxu0  ;;  %v1723_v17 = vadd.f32 %v1722_v4, %v1597_v63 }
 0xc0d   :  { %v4518_v6 = vpack.c.bf16 %v1721_v3, %v1721_v3 }
 0xc0f   :  { %v1751_v0 = vsel %vm381_vm3, %v4518_v6, 0 }
 0xc7c   :  { %v1421_v58 = vpop.xlane.xlu1 %1420 }
 0xc7d   :  { %v1425_v60 = vmul.f32 0.0078125, %v1421_v58 }
 0xc7e   :  { %v1423_v19 = vpop.xlane.xlu0 %1422 }
 0xc7f   :  { %v1427_v20 = vsub.f32 %v1418_v7, %v1425_v60  ;;  %v1426_v21 = vmul.f32 0.0078125, %v1423_v19  ;;  %v1725_v7 = vadd.f32 %v1724_v5, %v1593_v61  ;;  %v4539_v60 = vpack.c.bf16 %v1723_v17, %v1723_v17 }
 0xc81   :  { %v1428_v38 = vsub.f32 %v1419_v8, %v1426_v21  ;;  %v1429_v43 = vmul.f32 %v1427_v20, %v1427_v20  ;;  %v1726_v8 = vpop.f32.mrb[35].mxu0  ;;  %v4528_v11 = vpack.c.bf16 %v1725_v7, %v1725_v7  ;;  %v95_v21 = vld [vmem:[%s4911_s3] sm:$0x1] }
 0xc82   :  { %v4520_v9 = vadd.f32 %v1726_v8, %v1597_v63  ;;  %vm97_vm14 = vcmp.ne.s32.totalorder %v95_v21, 0 }
 0xc83   :  { %1431 = vadd.xlane.f32.xlu0 %v1429_v43  ;;  %v1430_v50 = vmul.f32 %v1428_v38, %v1428_v38  ;;  %v1797_v18 = vsel %vm381_vm3, %v4528_v11, 0  ;;  %v96_v43 = vld [vmem:[%s4911_s3 + $0x1] sm:$0x1] }
 0xc84   :  { %vm98_vm15 = vcmp.ne.s32.totalorder %v96_v43, 0  ;;  %v4588_v4 = vpack.c.bf16 %v4520_v9, %v4520_v9 }
 0xc85   :  { %1433 = vadd.xlane.f32.xlu1 %v1430_v50  ;;  %v1842_v26 = vsel %vm98_vm15, 1, %v3955_v1 }
 0xc86   :  { %v1850_v31 = vrot.slane %v1842_v26, %v4177_v36 }
 0xc88   :  { %vm4567_vm2 = vcmp.eq.s32.totalorder %v1850_v31, 1 }
 0xd10   :  { %v1432_v34 = vpop.xlane.xlu0 %1431 }
 0xd11   :  { %v1435_v35 = vmul.f32 0.0078125, %v1432_v34 }
 0xd12   :  { %v1434_v37 = vpop.xlane.xlu1 %1433 }
 0xd13   :  { %v1437_v39 = vadd.f32 1e-05, %v1435_v35  ;;  %v1436_v40 = vmul.f32 0.0078125, %v1434_v37 }
 0xd15   :  { %3909 = vrsqrt.f32 %v1437_v39  ;;  %v1438_v41 = vadd.f32 1e-05, %v1436_v40 }
 0xd17   :  { %3911 = vrsqrt.f32 %v1438_v41 }
 0xd1f   :  { %v3910_v42 = vpop.eup %3909 }
 0xd20   :  { %v1441_v45 = vmul.f32 %v3910_v42, %v1427_v20  ;;  %v1883_v20 = vsel %vm506_vm4, %v4539_v60, 0 }
 0xd21   :  { %v3912_v46 = vpop.eup %3911 }
 0xd22   :  { %v1442_v49 = vmul.f32 %v3912_v46, %v1428_v38  ;;  %v1449_v52 = vmul.f32 %v3244_v44, %v1441_v45  ;;  %v1841_v38 = vsel %vm97_vm14, 1, %v3955_v1 }
 0xd23   :  { %v1846_v50 = vrot.slane %v1841_v38, %v4177_v36 }
 0xd24   :  { %v1450_v54 = vmul.f32 %v3244_v44, %v1442_v49  ;;  %v4505_v55 = vadd.f32 %v3245_v53, %v1449_v52 }
 0xd25   :  { %vm4558_vm1 = vcmp.eq.s32.totalorder %v1846_v50, 1 }
 0xd26   :  { %v4507_v56 = vadd.f32 %v3245_v53, %v1450_v54 }
 0xd28   :  { %v1459_v57 = vpack.c.bf16 %v4507_v56, %v4505_v55 }
 0xd2a   :  { %3628 = vmatmul.mubr.bf16.vlgmr.msra.gmra.mrb[44].mxu1 %v1459_v57 }
 0xd2b   :  { %3633 = vmatprep.mubr.msk.bf16.mxu1 %vm3957_vm0, %v3956_v2  ;;  %3632 = vmatpush3.bf16.xpose.msra.mxu1 %v1751_v0  ;;  %v1929_v0 = vsel %vm506_vm4, %v4588_v4, 0 }
 0xd2c   :  { %3637 = vmatprep.subr.bf16.mxu1 %v3956_v2 }
 0xdfd   :  { %v1565_v23 = vpop.f32.mrb[44].mxu1 }
 0xdfe   :  { %v1566_v12 = vadd.f32 %v3246_v10, %v1565_v23  ;;  %v3629_v13 = vpop.f32.mrb[45].mxu1 }
 0xdff   :  { %v1568_v14 = vpop.f32.mrb[46].mxu1 }
 0xe00   :  { %v4530_v15 = vpack.c.bf16 %v1566_v12, %v1566_v12  ;;  %v3630_v16 = vpop.f32.mrb[47].mxu1  ;;  %v1569_v58 = vadd.f32 %v3246_v10, %v1568_v14 }
 0xe02   :  { %3634 = vmatmul.mubr.msk.bf16.vlgmr.msra.gmra.mrb[48].mxu1 %vm381_vm3, %v4530_v15  ;;  %v4541_v19 = vpack.c.bf16 %v1569_v58, %v1569_v58 }
 0xe03   :  { %3638 = vmatpush3.bf16.xpose.msra.mxu1 %v1797_v18  ;;  %3639 = vmatprep.mubr.msk.bf16.mxu1 %vm3957_vm0, %v3956_v2 }
 0xe04   :  { %3643 = vmatprep.subr.bf16.mxu1 %v3956_v2 }
 0xe0a   :  { %3640 = vmatmul.mubr.msk.bf16.vlgmr.msra.gmra.mrb[52].mxu1 %vm381_vm3, %v4541_v19 }
 0xe0b   :  { %3644 = vmatpush3.bf16.msra.mxu1 %v1883_v20  ;;  %3645 = vmatprep.mubr.msk.bf16.mxu1 %vm3957_vm0, %v3956_v2 }
 0xe0c   :  { %3649 = vmatprep.subr.bf16.mxu1 %v3956_v2 }
 0xed5   :  { %v1787_v48 = vpop.f32.mrb[48].mxu1 }
 0xed6   :  { %v1839_v24 = vmul.f32 0.17677669, %v1787_v48  ;;  %v3635_v25 = vpop.f32.mrb[49].mxu1 }
 0xed7   :  { %v1790_v27 = vpop.f32.mrb[50].mxu1 }
 0xed8   :  { %v3636_v28 = vpop.f32.mrb[51].mxu1  ;;  %v1853_v29 = vsel %vm4558_vm1, %v1839_v24, -1e+10 }
 0xed9   :  { %v1855_v30 = vsel %vm478_vm8, %v1853_v29, -inf }
 0xeda   :  { %1856 = vmax.xlane.f32.xlu0 %v1855_v30 }
 0xedd   :  { %v1833_v32 = vpop.f32.mrb[52].mxu1 }
 0xede   :  { %v1840_v51 = vmul.f32 0.17677669, %v1833_v32  ;;  %v3641_v34 = vpop.f32.mrb[53].mxu1 }
 0xedf   :  { %v1836_v35 = vpop.f32.mrb[54].mxu1 }
 0xee0   :  { %v3642_v37 = vpop.f32.mrb[55].mxu1  ;;  %v1854_v39 = vsel %vm4567_vm2, %v1840_v51, -1e+10 }
 0xee1   :  { %v1858_v40 = vsel %vm478_vm8, %v1854_v39, -inf }
 0xee2   :  { %1859 = vmax.xlane.f32.xlu1 %v1858_v40 }
 0xf67   :  { %v1857_v41 = vpop.xlane.xlu0 %1856 }
 0xf68   :  { %v1861_v42 = vsub.f32 %v1853_v29, %v1857_v41 }
 0xf6a   :  { %v1863_v44 = vmul.f32 1.442695, %v1861_v42 }
 0xf6c   :  { %3913 = vpow2.f32 %v1863_v44 }
 0xf6f   :  { %v1860_v45 = vpop.xlane.xlu1 %1859 }
 0xf70   :  { %v1862_v46 = vsub.f32 %v1854_v39, %v1860_v45 }
 0xf72   :  { %v1865_v49 = vmul.f32 1.442695, %v1862_v46 }
 0xf74   :  { %3915 = vpow2.f32 %v1865_v49 }
 0xf76   :  { %v3914_v52 = vpop.eup %3913 }
 0xf77   :  { %v1867_v53 = vsel %vm478_vm8, %v3914_v52, 0.0 }
 0xf78   :  { %1868 = vadd.xlane.f32.xlu0 %v1867_v53 }
 0xf7e   :  { %v3916_v54 = vpop.eup %3915 }
 0xf7f   :  { %v1870_v57 = vsel %vm478_vm8, %v3916_v54, 0.0 }
 0xf80   :  { %1871 = vadd.xlane.f32.xlu1 %v1870_v57 }
 0xf8e   :  { %1975 = vrot.lane.b32.xlu0 %v4518_v6, %s3958_s24 }
 0xf91   :  { %2025 = vrot.lane.b32.xlu1 %v4528_v11, %s3958_s24 }
 0xf92   :  { %2023 = vrot.lane.b32.xlu0 %v4541_v19, %s3958_s24 }
 0xf95   :  { %1973 = vrot.lane.b32.xlu1 %v4530_v15, %s3958_s24 }
0x1005   :  { %v1869_v59 = vpop.xlane.xlu0 %1868 }
0x1006   :  { %3917 = vrcp.f32 %v1869_v59 }
0x1009   :  { %v1976_v61 = vpop.permute.xlu0 %1975 }
0x100a   :  { %v1981_v62 = vsel %vm381_vm3, %v1976_v61, 0 }
0x100b   :  { %3656 = vmatpush3.bf16.xpose.msra.mxu0 %v1981_v62 }
0x100c   :  { %3667 = vmatprep.subr.bf16.mxu0 %v3956_v2 }
0x100d   :  { %v1872_v63 = vpop.xlane.xlu1 %1871  ;;  %v2024_v14 = vpop.permute.xlu0 %2023 }
0x100e   :  { %3919 = vrcp.f32 %v1872_v63 }
0x1010   :  { %v3918_v3 = vpop.eup %3917 }
0x1011   :  { %v1874_v5 = vmul.f32 %v3918_v3, %v3914_v52  ;;  %v2026_v7 = vpop.permute.xlu1 %2025 }
0x1012   :  { %v2031_v13 = vsel %vm381_vm3, %v2026_v7, 0 }
0x1013   :  { %v1877_v8 = vpack.c.bf16 %v1874_v5, %v1874_v5 }
0x1015   :  { %3646 = vmatmul.mubr.msk.bf16.vlgmr.msra.gmra.mrb[56].mxu1 %vm478_vm8, %v1877_v8  ;;  %v1974_v10 = vpop.permute.xlu1 %1973 }
0x1016   :  { %3650 = vmatpush3.bf16.msra.mxu1 %v1929_v0  ;;  %3658 = vmatmul.mubr.msk.bf16.vlgmr.msra.gmra.mrb[36].mxu0 %vm381_vm3, %v1974_v10 }
0x1017   :  { %3651 = vmatprep.mubr.msk.bf16.mxu1 %vm3957_vm0, %v3956_v2  ;;  %3661 = vmatprep.subr.bf16.mxu1 %v3956_v2 }
0x1018   :  { %v3920_v23 = vpop.eup %3919  ;;  %3669 = vmatprep.mubr.msk.bf16.mxu0 %vm3957_vm0, %v3956_v2 }
0x1019   :  { %v1876_v9 = vmul.f32 %v3920_v23, %v3916_v54 }
0x101b   :  { %v1878_v12 = vpack.c.bf16 %v1876_v9, %v1876_v9 }
0x101d   :  { %3652 = vmatmul.mubr.msk.bf16.vlgmr.msra.gmra.mrb[60].mxu1 %vm478_vm8, %v1878_v12 }
0x101e   :  { %3663 = vmatprep.mubr.msk.bf16.mxu1 %vm3957_vm0, %v3956_v2 }
0x101f   :  { %3662 = vmatpush3.bf16.xpose.msra.mxu1 %v2031_v13 }
0x1020   :  { %3673 = vmatprep.subr.bf16.mxu1 %v3956_v2 }
0x1026   :  { %3664 = vmatmul.mubr.msk.bf16.vlgmr.msra.gmra.mrb[64].mxu1 %vm381_vm3, %v2024_v14 }
0x1027   :  { %3675 = vmatprep.mubr.msk.bf16.mxu1 %vm3957_vm0, %v3956_v2 }
0x10e8   :  { %v1919_v16 = vpop.f32.mrb[56].mxu1 }
0x10e9   :  { %1971 = vst.msk [vmem:[#allocation2] sm:$0xff] %vm381_vm3, %v1919_v16  ;;  %v3647_v17 = vpop.f32.mrb[57].mxu1  ;;  %v2017_v18 = vpop.f32.mrb[36].mxu0 }
0x10ea   :  { %v2073_v58 = vmul.f32 0.17677669, %v2017_v18  ;;  %v1922_v20 = vpop.f32.mrb[58].mxu1  ;;  %v3659_v21 = vpop.f32.mrb[37].mxu0 }
0x10eb   :  { %v3648_v38 = vpop.f32.mrb[59].mxu1  ;;  %v2020_v43 = vpop.f32.mrb[38].mxu0 }
0x10ec   :  { %v3660_v50 = vpop.f32.mrb[39].mxu0  ;;  %v2075_v48 = vsel %vm4558_vm1, %v2073_v58, -1e+10 }
0x10ed   :  { %v2077_v24 = vsel %vm478_vm8, %v2075_v48, -inf }
0x10ee   :  { %2078 = vmax.xlane.f32.xlu1 %v2077_v24 }
0x10f0   :  { %v1965_v25 = vpop.f32.mrb[60].mxu1 }
0x10f1   :  { %1972 = vst.msk [vmem:[#allocation2 + $0x8] sm:$0xff] %vm381_vm3, %v1965_v25  ;;  %v3653_v26 = vpop.f32.mrb[61].mxu1 }
0x10f2   :  { %v1968_v27 = vpop.f32.mrb[62].mxu1 }
0x10f3   :  { %v3654_v28 = vpop.f32.mrb[63].mxu1 }
0x10f9   :  { %v2067_v29 = vpop.f32.mrb[64].mxu1 }
0x10fa   :  { %v2074_v30 = vmul.f32 0.17677669, %v2067_v29  ;;  %v3665_v31 = vpop.f32.mrb[65].mxu1 }
0x10fb   :  { %v2070_v32 = vpop.f32.mrb[66].mxu1 }
0x10fc   :  { %v3666_v51 = vpop.f32.mrb[67].mxu1  ;;  %v2076_v34 = vsel %vm4567_vm2, %v2074_v30, -1e+10 }
0x10fd   :  { %v2080_v35 = vsel %vm478_vm8, %v2076_v34, -inf }
0x10fe   :  { %2081 = vmax.xlane.f32.xlu0 %v2080_v35 }
0x10ff   :  { %2149 = vrot.lane.b32.xlu1 %v4588_v4, %s3958_s24 }
0x117b   :  { %v2079_v37 = vpop.xlane.xlu1 %2078 }
0x117c   :  { %v2083_v39 = vsub.f32 %v2075_v48, %v2079_v37 }
0x117e   :  { %v2085_v40 = vmul.f32 1.442695, %v2083_v39 }
0x117f   :  { %v2150_v41 = vpop.permute.xlu1 %2149 }
0x1180   :  { %3921 = vpow2.f32 %v2085_v40  ;;  %v2155_v42 = vsel %vm506_vm4, %v2150_v41, 0 }
0x1181   :  { %3674 = vmatpush3.bf16.msra.mxu1 %v2155_v42 }
0x1182   :  { %3685 = vmatprep.subr.bf16.mxu1 %v3956_v2 }
0x118a   :  { %v3922_v44 = vpop.eup %3921 }
0x118b   :  { %v2082_v45 = vpop.xlane.xlu0 %2081  ;;  %v2089_v46 = vsel %vm478_vm8, %v3922_v44, 0.0 }
0x118c   :  { %v2084_v49 = vsub.f32 %v2076_v34, %v2082_v45  ;;  %2090 = vadd.xlane.f32.xlu0 %v2089_v46 }
0x118e   :  { %v2087_v52 = vmul.f32 1.442695, %v2084_v49 }
0x1190   :  { %3923 = vpow2.f32 %v2087_v52 }
0x119a   :  { %v3924_v53 = vpop.eup %3923 }
0x119b   :  { %v2092_v54 = vsel %vm478_vm8, %v3924_v53, 0.0 }
0x119c   :  { %2093 = vadd.xlane.f32.xlu1 %v2092_v54 }
0x11a2   :  { %2101 = vrot.lane.b32.xlu0 %v4539_v60, %s3958_s24 }
0x11a6   :  { %2259 = vrot.lane.b32.xlu0 %v4528_v11, %s3959_s2 }
0x11aa   :  { %2257 = vrot.lane.b32.xlu0 %v4541_v19, %s3959_s2 }
0x11ad   :  { %2209 = vrot.lane.b32.xlu1 %v4518_v6, %s3959_s2 }
0x11b1   :  { %2207 = vrot.lane.b32.xlu1 %v4530_v15, %s3959_s2 }
0x1219   :  { %v2091_v57 = vpop.xlane.xlu0 %2090 }
0x121a   :  { %3925 = vrcp.f32 %v2091_v57 }
0x121d   :  { %v2102_v59 = vpop.permute.xlu0 %2101 }
0x121e   :  { %v2107_v61 = vsel %vm506_vm4, %v2102_v59, 0 }
0x121f   :  { %3668 = vmatpush3.bf16.msra.mxu0 %v2107_v61 }
0x1220   :  { %3679 = vmatprep.subr.bf16.mxu0 %v3956_v2 }
0x1221   :  { %v2260_v9 = vpop.permute.xlu0 %2259 }
0x1222   :  { %v2265_v13 = vsel %vm381_vm3, %v2260_v9, 0 }
0x1224   :  { %v3926_v62 = vpop.eup %3925 }
0x1225   :  { %v2096_v63 = vmul.f32 %v3926_v62, %v3922_v44  ;;  %v2258_v14 = vpop.permute.xlu0 %2257 }
0x1227   :  { %v2099_v3 = vpack.c.bf16 %v2096_v63, %v2096_v63 }
0x1229   :  { %v2094_v5 = vpop.xlane.xlu1 %2093  ;;  %3670 = vmatmul.mubr.msk.bf16.vlgmr.msra.gmra.mrb[40].mxu0 %vm478_vm8, %v2099_v3 }
0x122a   :  { %3927 = vrcp.f32 %v2094_v5  ;;  %3681 = vmatprep.mubr.msk.bf16.mxu0 %vm3957_vm0, %v3956_v2 }
0x122d   :  { %v2210_v7 = vpop.permute.xlu1 %2209 }
0x122e   :  { %v2215_v8 = vsel %vm381_vm3, %v2210_v7, 0 }
0x122f   :  { %3680 = vmatpush3.bf16.xpose.msra.mxu0 %v2215_v8 }
0x1230   :  { %3691 = vmatprep.subr.bf16.mxu0 %v3956_v2 }
0x1231   :  { %v2208_v23 = vpop.permute.xlu1 %2207 }
0x1234   :  { %v3928_v0 = vpop.eup %3927 }
0x1235   :  { %v2098_v10 = vmul.f32 %v3928_v0, %v3924_v53 }
0x1236   :  { %3682 = vmatmul.mubr.msk.bf16.vlgmr.msra.gmra.mrb[44].mxu0 %vm381_vm3, %v2208_v23 }
0x1237   :  { %v2100_v12 = vpack.c.bf16 %v2098_v10, %v2098_v10  ;;  %3693 = vmatprep.mubr.msk.bf16.mxu0 %vm3957_vm0, %v3956_v2 }
0x1239   :  { %3676 = vmatmul.mubr.msk.bf16.vlgmr.msra.gmra.mrb[68].mxu1 %vm478_vm8, %v2100_v12 }
0x123a   :  { %3686 = vmatpush3.bf16.xpose.msra.mxu1 %v2265_v13  ;;  %3687 = vmatprep.mubr.msk.bf16.mxu1 %vm3957_vm0, %v3956_v2 }
0x123b   :  { %3697 = vmatprep.subr.bf16.mxu1 %v3956_v2 }
0x1241   :  { %3688 = vmatmul.mubr.msk.bf16.vlgmr.msra.gmra.mrb[72].mxu1 %vm381_vm3, %v2258_v14 }
0x1242   :  { %3699 = vmatprep.mubr.msk.bf16.mxu1 %vm3957_vm0, %v3956_v2 }
0x12fc   :  { %v4649_v16 = vpop.f32.mrb[40].mxu0 }
0x12fd   :  { %v3671_v17 = vpop.f32.mrb[41].mxu0 }
0x12fe   :  { %v2146_v18 = vpop.f32.mrb[42].mxu0 }
0x12ff   :  { %v3672_v58 = vpop.f32.mrb[43].mxu0 }
0x1309   :  { %v2251_v20 = vpop.f32.mrb[44].mxu0 }
0x130a   :  { %v2307_v21 = vmul.f32 0.17677669, %v2251_v20  ;;  %v3683_v38 = vpop.f32.mrb[45].mxu0 }
0x130b   :  { %v2254_v43 = vpop.f32.mrb[46].mxu0 }
0x130c   :  { %v4651_v50 = vpop.f32.mrb[68].mxu1  ;;  %v3684_v48 = vpop.f32.mrb[47].mxu0  ;;  %v2309_v24 = vsel %vm4558_vm1, %v2307_v21, -1e+10 }
0x130d   :  { %v3677_v25 = vpop.f32.mrb[69].mxu1  ;;  %v2311_v26 = vsel %vm478_vm8, %v2309_v24, -inf }
0x130e   :  { %2312 = vmax.xlane.f32.xlu1 %v2311_v26  ;;  %v2194_v27 = vpop.f32.mrb[70].mxu1 }
0x130f   :  { %v3678_v28 = vpop.f32.mrb[71].mxu1 }
0x1314   :  { %v2301_v29 = vpop.f32.mrb[72].mxu1 }
0x1315   :  { %v2308_v30 = vmul.f32 0.17677669, %v2301_v29  ;;  %v3689_v31 = vpop.f32.mrb[73].mxu1 }
0x1316   :  { %v2304_v32 = vpop.f32.mrb[74].mxu1 }
0x1317   :  { %v3690_v51 = vpop.f32.mrb[75].mxu1  ;;  %v2310_v34 = vsel %vm4567_vm2, %v2308_v30, -1e+10 }
0x1318   :  { %v2314_v35 = vsel %vm478_vm8, %v2310_v34, -inf }
0x1319   :  { %2315 = vmax.xlane.f32.xlu0 %v2314_v35 }
0x131f   :  { %2383 = vrot.lane.b32.xlu1 %v4588_v4, %s3959_s2 }
0x139b   :  { %v2313_v37 = vpop.xlane.xlu1 %2312 }
0x139c   :  { %v2317_v39 = vsub.f32 %v2309_v24, %v2313_v37 }
0x139e   :  { %v2319_v40 = vmul.f32 1.442695, %v2317_v39 }
0x139f   :  { %v2384_v41 = vpop.permute.xlu1 %2383 }
0x13a0   :  { %3929 = vpow2.f32 %v2319_v40  ;;  %v2389_v42 = vsel %vm506_vm4, %v2384_v41, 0 }
0x13a1   :  { %3698 = vmatpush3.bf16.msra.mxu1 %v2389_v42 }
0x13a2   :  { %3709 = vmatprep.subr.bf16.mxu1 %v3956_v2 }
0x13a6   :  { %v2316_v44 = vpop.xlane.xlu0 %2315 }
0x13a7   :  { %v2318_v45 = vsub.f32 %v2310_v34, %v2316_v44 }
0x13a9   :  { %v2321_v46 = vmul.f32 1.442695, %v2318_v45 }
0x13aa   :  { %v3930_v49 = vpop.eup %3929 }
0x13ab   :  { %3931 = vpow2.f32 %v2321_v46  ;;  %v2323_v52 = vsel %vm478_vm8, %v3930_v49, 0.0 }
0x13ac   :  { %2324 = vadd.xlane.f32.xlu0 %v2323_v52 }
0x13b5   :  { %v3932_v53 = vpop.eup %3931 }
0x13b6   :  { %v2326_v54 = vsel %vm478_vm8, %v3932_v53, 0.0 }
0x13b7   :  { %2327 = vadd.xlane.f32.xlu1 %v2326_v54 }
0x13c2   :  { %2335 = vrot.lane.b32.xlu0 %v4539_v60, %s3959_s2 }
0x13c6   :  { %2493 = vrot.lane.b32.xlu0 %v4528_v11, %s3960_s25 }
0x13c8   :  { %2443 = vrot.lane.b32.xlu1 %v4518_v6, %s3960_s25 }
0x13ca   :  { %2491 = vrot.lane.b32.xlu0 %v4541_v19, %s3960_s25 }
0x13cc   :  { %2441 = vrot.lane.b32.xlu1 %v4530_v15, %s3960_s25 }
0x1439   :  { %v2325_v57 = vpop.xlane.xlu0 %2324 }
0x143a   :  { %3933 = vrcp.f32 %v2325_v57 }
0x143d   :  { %v2336_v59 = vpop.permute.xlu0 %2335 }
0x143e   :  { %v2341_v61 = vsel %vm506_vm4, %v2336_v59, 0 }
0x143f   :  { %3692 = vmatpush3.bf16.msra.mxu0 %v2341_v61 }
0x1440   :  { %3703 = vmatprep.subr.bf16.mxu0 %v3956_v2 }
0x1441   :  { %v2494_v8 = vpop.permute.xlu0 %2493 }
0x1442   :  { %v2499_v10 = vsel %vm381_vm3, %v2494_v8, 0 }
0x1444   :  { %v3934_v62 = vpop.eup %3933  ;;  %v2328_v63 = vpop.xlane.xlu1 %2327 }
0x1445   :  { %v2330_v11 = vmul.f32 %v3934_v62, %v3930_v49  ;;  %3935 = vrcp.f32 %v2328_v63  ;;  %v2492_v23 = vpop.permute.xlu0 %2491 }
0x1447   :  { %v2333_v3 = vpack.c.bf16 %v2330_v11, %v2330_v11 }
0x1448   :  { %v2444_v6 = vpop.permute.xlu1 %2443 }
0x1449   :  { %v2449_v5 = vsel %vm381_vm3, %v2444_v6, 0  ;;  %3694 = vmatmul.mubr.msk.bf16.vlgmr.msra.gmra.mrb[48].mxu0 %vm478_vm8, %v2333_v3  ;;  %v3828_v3 = vld [vmem:[%s4912_s12] sm:$0xff]   ;;  %v3829_v6 = vld [vmem:[%s4912_s12 + $0x8] sm:$0xff]  }
0x144a   :  { %3704 = vmatpush3.bf16.xpose.msra.mxu0 %v2449_v5  ;;  %3705 = vmatprep.mubr.msk.bf16.mxu0 %vm3957_vm0, %v3956_v2  ;;  %v3830_v5 = vld [vmem:[%s4912_s12 + $0x10] sm:$0xff]  }
0x144b   :  { %3715 = vmatprep.subr.bf16.mxu0 %v3956_v2 }
0x144c   :  { %v2442_v7 = vpop.permute.xlu1 %2441 }
0x144f   :  { %v3936_v15 = vpop.eup %3935 }
0x1450   :  { %v2332_v19 = vmul.f32 %v3936_v15, %v3932_v53  ;;  %v3832_v15 = vld [vmem:[%s4912_s12 + $0x20] sm:$0xff]  }
0x1451   :  { %3706 = vmatmul.mubr.msk.bf16.vlgmr.msra.gmra.mrb[52].mxu0 %vm381_vm3, %v2442_v7  ;;  %v3834_v7 = vld [vmem:[%s4912_s12 + $0x30] sm:$0xff]  }
0x1452   :  { %v2334_v0 = vpack.c.bf16 %v2332_v19, %v2332_v19  ;;  %3717 = vmatprep.mubr.msk.bf16.mxu0 %vm3957_vm0, %v3956_v2  ;;  %v3833_v19 = vld [vmem:[%s4912_s12 + $0x28] sm:$0xff]  }
0x1454   :  { %3700 = vmatmul.mubr.msk.bf16.vlgmr.msra.gmra.mrb[76].mxu1 %vm478_vm8, %v2334_v0 }
0x1455   :  { %3710 = vmatpush3.bf16.xpose.msra.mxu1 %v2499_v10  ;;  %3711 = vmatprep.mubr.msk.bf16.mxu1 %vm3957_vm0, %v3956_v2 }
0x1456   :  { %3721 = vmatprep.subr.bf16.mxu1 %v3956_v2 }
0x145c   :  { %3712 = vmatmul.mubr.msk.bf16.vlgmr.msra.gmra.mrb[80].mxu1 %vm381_vm3, %v2492_v23  ;;  %v3835_v23 = vld [vmem:[%s4912_s12 + $0x38] sm:$0xff]  }
0x145d   :  { %3723 = vmatprep.mubr.msk.bf16.mxu1 %vm3957_vm0, %v3956_v2 }
0x151c   :  { %v2377_v9 = vpop.f32.mrb[48].mxu0 }
0x151d   :  { %v3695_v12 = vpop.f32.mrb[49].mxu0 }
0x151e   :  { %v2380_v13 = vpop.f32.mrb[50].mxu0 }
0x151f   :  { %v3696_v14 = vpop.f32.mrb[51].mxu0 }
0x1524   :  { %v2485_v17 = vpop.f32.mrb[52].mxu0 }
0x1525   :  { %v2541_v18 = vmul.f32 0.17677669, %v2485_v17  ;;  %v3707_v58 = vpop.f32.mrb[53].mxu0 }
0x1526   :  { %v2488_v20 = vpop.f32.mrb[54].mxu0 }
0x1527   :  { %v2425_v21 = vpop.f32.mrb[76].mxu1  ;;  %v3708_v38 = vpop.f32.mrb[55].mxu0  ;;  %v2543_v43 = vsel %vm4558_vm1, %v2541_v18, -1e+10 }
0x1528   :  { %v3701_v48 = vpop.f32.mrb[77].mxu1  ;;  %v2545_v24 = vsel %vm478_vm8, %v2543_v43, -inf }
0x1529   :  { %2546 = vmax.xlane.f32.xlu1 %v2545_v24  ;;  %v2428_v25 = vpop.f32.mrb[78].mxu1 }
0x152a   :  { %v3702_v26 = vpop.f32.mrb[79].mxu1 }
0x152f   :  { %v2535_v27 = vpop.f32.mrb[80].mxu1 }
0x1530   :  { %v2542_v28 = vmul.f32 0.17677669, %v2535_v27  ;;  %v3713_v29 = vpop.f32.mrb[81].mxu1 }
0x1531   :  { %v2538_v30 = vpop.f32.mrb[82].mxu1 }
0x1532   :  { %v3714_v31 = vpop.f32.mrb[83].mxu1  ;;  %v2544_v32 = vsel %vm4567_vm2, %v2542_v28, -1e+10  ;;  %v3836_v30 = vld [vmem:[%s4914_s14] ss:$8 sps:$4 sm:$0xff]  }
0x1533   :  { %v2548_v51 = vsel %vm478_vm8, %v2544_v32, -inf  ;;  %v3838_v31 = vld [vmem:[%s4914_s14 + $0x4] ss:$8 sps:$4 sm:$0xff]  }
0x1534   :  { %2549 = vmax.xlane.f32.xlu0 %v2548_v51 }
0x15b6   :  { %v2547_v34 = vpop.xlane.xlu1 %2546 }
0x15b7   :  { %v2551_v22 = vsub.f32 %v2543_v43, %v2547_v34 }
0x15b9   :  { %v2553_v35 = vmul.f32 1.442695, %v2551_v22 }
0x15bb   :  { %3937 = vpow2.f32 %v2553_v35 }
0x15c1   :  { %v2550_v37 = vpop.xlane.xlu0 %2549 }
0x15c2   :  { %v2552_v39 = vsub.f32 %v2544_v32, %v2550_v37  ;;  %v3839_v32 = vld [vmem:[%s4914_s14 + $0x10] ss:$8 sps:$4 sm:$0xff]  }
0x15c4   :  { %v2555_v40 = vmul.f32 1.442695, %v2552_v39 }
0x15c5   :  { %v3938_v41 = vpop.eup %3937 }
0x15c6   :  { %3939 = vpow2.f32 %v2555_v40  ;;  %v2557_v42 = vsel %vm478_vm8, %v3938_v41, 0.0 }
0x15c7   :  { %2558 = vadd.xlane.f32.xlu0 %v2557_v42  ;;  %v3842_v42 = vld [vmem:[%s4914_s14 + $0x20] ss:$8 sps:$4 sm:$0xff]  }
0x15d0   :  { %v3940_v44 = vpop.eup %3939 }
0x15d1   :  { %v2560_v45 = vsel %vm478_vm8, %v3940_v44, 0.0 }
0x15d2   :  { %2561 = vadd.xlane.f32.xlu1 %v2560_v45  ;;  %v3845_v45 = vld [vmem:[%s4914_s14 + $0x30] ss:$8 sps:$4 sm:$0xff]  }
0x15dd   :  { %2569 = vrot.lane.b32.xlu0 %v4539_v60, %s3960_s25 }
0x15e1   :  { %2201 = vrot.lane.b32.xlu0 %v4651_v50, %s3960_s25 }
0x15e3   :  { %2617 = vrot.lane.b32.xlu1 %v4588_v4, %s3960_s25 }
0x15e5   :  { %2435 = vrot.lane.b32.xlu0 %v2425_v21, %s3959_s2 }
0x15e7   :  { %2199 = vrot.lane.b32.xlu1 %v4649_v16, %s3960_s25 }
0x15eb   :  { %2433 = vrot.lane.b32.xlu1 %v2377_v9, %s3959_s2 }
0x1654   :  { %v2559_v47 = vpop.xlane.xlu0 %2558 }
0x1655   :  { %3941 = vrcp.f32 %v2559_v47  ;;  %v3850_v47 = vld [vmem:[%s4914_s14 + $0x44] ss:$8 sps:$4 sm:$0xff]  }
0x1658   :  { %v2570_v46 = vpop.permute.xlu0 %2569 }
0x1659   :  { %v2575_v49 = vsel %vm506_vm4, %v2570_v46, 0  ;;  %v3848_v46 = vld [vmem:[%s4914_s14 + $0x40] ss:$8 sps:$4 sm:$0xff]  }
0x165a   :  { %3716 = vmatpush3.bf16.msra.mxu0 %v2575_v49  ;;  %v3853_v49 = vld [vmem:[%s4914_s14 + $0x54] ss:$8 sps:$4 sm:$0xff]  }
0x165b   :  { %3727 = vmatprep.subr.bf16.mxu0 %v3956_v2 }
0x165c   :  { %v2202_v60 = vpop.permute.xlu0 %2201 }
0x165d   :  { %2206 = vst.msk [vmem:[#allocation2 + $0x8] sm:$0xff] %vm830_vm11, %v2202_v60  ;;  %v3851_v60 = vld [vmem:[%s4914_s14 + $0x50] ss:$8 sps:$4 sm:$0xff]  }
0x165f   :  { %v3942_v50 = vpop.eup %3941  ;;  %v2562_v4 = vpop.xlane.xlu1 %2561 }
0x1660   :  { %v2564_v52 = vmul.f32 %v3942_v50, %v3938_v41  ;;  %3943 = vrcp.f32 %v2562_v4  ;;  %v2436_v53 = vpop.permute.xlu0 %2435  ;;  %v3844_v41 = vld [vmem:[%s4914_s14 + $0x24] ss:$8 sps:$4 sm:$0xff]   ;;  %v3854_v4 = vld [vmem:[%s4914_s14 + $0x60] ss:$8 sps:$4 sm:$0xff]  }
0x1661   :  { %2440 = vst.msk [vmem:[#allocation2 + $0x8] sm:$0xff] %vm1065_vm12, %v2436_v53  ;;  %v3856_v50 = vld [vmem:[%s4914_s14 + $0x64] ss:$8 sps:$4 sm:$0xff]   ;;  %v3857_v53 = vld [vmem:[%s4914_s14 + $0x70] ss:$8 sps:$4 sm:$0xff]  }
0x1662   :  { %v2567_v16 = vpack.c.bf16 %v2564_v52, %v2564_v52  ;;  %v3859_v52 = vld [vmem:[%s4914_s14 + $0x74] ss:$8 sps:$4 sm:$0xff]  }
0x1663   :  { %v2618_v54 = vpop.permute.xlu1 %2617 }
0x1664   :  { %v2623_v57 = vsel %vm506_vm4, %v2618_v54, 0  ;;  %3718 = vmatmul.mubr.msk.bf16.vlgmr.msra.gmra.mrb[56].mxu0 %vm478_vm8, %v2567_v16  ;;  %v3860_v16 = vld [vmem:[%s4915_s16 + $0x40] sm:$0xff]  }
0x1665   :  { %3722 = vmatpush3.bf16.msra.mxu1 %v2623_v57  ;;  %3743 = vmatprep.mubr.msk.bf16.mxu0 %vm3957_vm0, %v3956_v2  ;;  %v3861_v54 = vld [vmem:[%s4915_s16] sm:$0xff]   ;;  %v3862_v57 = vld [vmem:[%s4915_s16 + $0x48] sm:$0xff]  }
0x1666   :  { %3728 = vmatpush3.bf16.msra.mxu0 %v3828_v3  ;;  %2927 = vmatprep.subr.bf16.mxu1 %v3838_v31  ;;  %v3868_v3 = vld [vmem:[%s4915_s16 + $0x60] sm:$0xff]  }
0x1667   :  { %v2200_v59 = vpop.permute.xlu1 %2199  ;;  %3729 = vmatprep.subr.bf16.mxu0 %v3956_v2 }
0x1668   :  { %2205 = vst.msk [vmem:[#allocation2] sm:$0xff] %vm830_vm11, %v2200_v59  ;;  %v3863_v59 = vld [vmem:[%s4915_s16 + $0x8] sm:$0xff]  }
0x166a   :  { %v3944_v61 = vpop.eup %3943  ;;  %3730 = vmatpush3.bf16.msra.mxu0 %v3829_v6  ;;  %v3869_v6 = vld [vmem:[%s4915_s16 + $0x20] sm:$0xff]  }
0x166b   :  { %v2566_v62 = vmul.f32 %v3944_v61, %v3940_v44  ;;  %v2434_v63 = vpop.permute.xlu1 %2433  ;;  %3731 = vmatprep.subr.bf16.mxu0 %v3956_v2  ;;  %v3847_v44 = vld [vmem:[%s4914_s14 + $0x34] ss:$8 sps:$4 sm:$0xff]  }
0x166c   :  { %2439 = vst.msk [vmem:[#allocation2] sm:$0xff] %vm1065_vm12, %v2434_v63  ;;  %v3864_v61 = vld [vmem:[%s4915_s16 + $0x50] sm:$0xff]   ;;  %v3866_v63 = vld [vmem:[%s4915_s16 + $0x58] sm:$0xff]  }
0x166d   :  { %v2568_v11 = vpack.c.bf16 %v2566_v62, %v2566_v62  ;;  %v3865_v62 = vld [vmem:[%s4915_s16 + $0x10] sm:$0xff]  }
0x166e   :  { %3732 = vmatpush3.bf16.msra.mxu0 %v3830_v5  ;;  %v3870_v5 = vld [vmem:[%s4915_s16 + $0x68] sm:$0xff]  }
0x166f   :  { %3724 = vmatmul.mubr.msk.bf16.vlgmr.msra.gmra.mrb[84].mxu1 %vm478_vm8, %v2568_v11  ;;  %3733 = vmatprep.subr.bf16.mxu0 %v3956_v2  ;;  %v3867_v11 = vld [vmem:[%s4915_s16 + $0x18] sm:$0xff]  }
0x1670   :  { %2959 = vmatprep.mubr.bf16.mxu1 %v3955_v1  ;;  %v3831_v1 = vld [vmem:[%s4912_s12 + $0x18] sm:$0xff]   ;;  %2928 = vmatpush1.bf16.msra.mxu1 %v3836_v30 }
0x1672   :  { %3734 = vmatpush3.bf16.msra.mxu0 %v3831_v1 }
0x1673   :  { %3735 = vmatprep.subr.bf16.mxu0 %v3956_v2 }
0x1676   :  { %3736 = vmatpush3.bf16.msra.mxu0 %v3832_v15 }
0x1677   :  { %3737 = vmatprep.subr.bf16.mxu0 %v3956_v2 }
0x167a   :  { %3738 = vmatpush3.bf16.msra.mxu0 %v3833_v19 }
0x167b   :  { %3739 = vmatprep.subr.bf16.mxu0 %v3956_v2 }
0x167e   :  { %3740 = vmatpush3.bf16.msra.mxu0 %v3834_v7 }
0x167f   :  { %3741 = vmatprep.subr.bf16.mxu0 %v3956_v2  ;;  %v3294_v2 = vld [vmem:[%s4913_s13] ss:$0 sm:$0xff] }
0x1682   :  { %3742 = vmatpush3.bf16.msra.mxu0 %v3835_v23 }
0x1683   :  { %3453 = vmatprep.subr.bf16.mxu0 %v3860_v16 }
0x1737   :  { %v2611_v8 = vpop.f32.mrb[56].mxu0 }
0x1738   :  { %2667 = vrot.lane.b32.xlu1 %v2611_v8, %s3958_s24  ;;  %v3719_v0 = vpop.f32.mrb[57].mxu0 }
0x1739   :  { %v2614_v10 = vpop.f32.mrb[58].mxu0 }
0x173a   :  { %v3720_v9 = vpop.f32.mrb[59].mxu0 }
0x1742   :  { %v2659_v12 = vpop.f32.mrb[84].mxu1 }
0x1743   :  { %2669 = vrot.lane.b32.xlu0 %v2659_v12, %s3958_s24  ;;  %v3725_v13 = vpop.f32.mrb[85].mxu1 }
0x1744   :  { %v2662_v14 = vpop.f32.mrb[86].mxu1  ;;  %v4857_v13 = vld [vmem:[%s4907_s18] ss:$0 sm:$0xff] }
0x1745   :  { %v3726_v17 = vpop.f32.mrb[87].mxu1 }
0x17aa   :  { %v2668_v18 = vpop.permute.xlu1 %2667 }
0x17ab   :  { %2673 = vst.msk [vmem:[#allocation2] sm:$0xff] %vm1300_vm13, %v2668_v18  ;;  %v4864_v18 = vld [vmem:[%s4908_s19] ss:$0 sm:$0xff] }
0x17b2   :  { %v2675_v20 = vld [vmem:[#allocation2] sm:$0xff] }
0x17b5   :  { %v2670_v58 = vpop.permute.xlu0 %2669 }
0x17b6   :  { %2674 = vst.msk [vmem:[#allocation2 + $0x8] sm:$0xff] %vm1300_vm13, %v2670_v58 }
0x17bd   :  { %v2676_v21 = vld [vmem:[#allocation2 + $0x8] sm:$0xff] }
0x17be   :  { %v2677_v38 = vpack.c.bf16 %v2676_v21, %v2675_v20 }
0x17c0   :  { %3744 = vmatmul.mubr.bf16.vlgmr.msra.gmra.mrb[60].mxu0 %v2677_v38  ;;  %v3871_v38 = vld [vmem:[%s4915_s16 + $0x28] sm:$0xff]  }
0x17c1   :  { %3454 = vmatpush3.bf16.msra.mxu0 %v3861_v54 }
0x17c2   :  { %3455 = vmatprep.subr.bf16.mxu0 %v3862_v57 }
0x17c5   :  { %3456 = vmatpush3.bf16.msra.mxu0 %v3863_v59 }
0x17c6   :  { %3457 = vmatprep.subr.bf16.mxu0 %v3864_v61 }
0x17c9   :  { %3458 = vmatpush3.bf16.msra.mxu0 %v3865_v62 }
0x17ca   :  { %3459 = vmatprep.subr.bf16.mxu0 %v3866_v63 }
0x17cd   :  { %3460 = vmatpush3.bf16.msra.mxu0 %v3867_v11 }
0x17ce   :  { %3461 = vmatprep.subr.bf16.mxu0 %v3868_v3 }
0x17d1   :  { %3462 = vmatpush3.bf16.msra.mxu0 %v3869_v6 }
0x17d2   :  { %3463 = vmatprep.subr.bf16.mxu0 %v3870_v5 }
0x17d5   :  { %3464 = vmatpush3.bf16.msra.mxu0 %v3871_v38 }
0x1893   :  { %v2783_v43 = vpop.f32.mrb[60].mxu0 }
0x1894   :  { %v2784_v48 = vadd.f32 %v3294_v2, %v2783_v43  ;;  %v3745_v24 = vpop.f32.mrb[61].mxu0  ;;  %v3873_v43 = vld [vmem:[%s4915_s16 + $0x30] sm:$0xff]  }
0x1895   :  { %v2786_v25 = vpop.f32.mrb[62].mxu0  ;;  %v3875_v24 = vld [vmem:[%s4915_s16 + $0x38] sm:$0xff]  }
0x1896   :  { %v2787_v26 = vadd.f32 %v3294_v2, %v2786_v25  ;;  %v3746_v27 = vpop.f32.mrb[63].mxu0  ;;  %v2790_v28 = vadd.f32 %v2784_v48, %v4505_v55  ;;  %v3841_v55 = vld [vmem:[%s4914_s14 + $0x14] ss:$8 sps:$4 sm:$0xff]   ;;  %v2835_v25 = vld [vmem:[%s4916_s15] sm:$0x3] }
0x1897   :  { %2929 = vmatprep.subr.bf16.mxu1 %v3841_v55  ;;  %v3872_v2 = vld [vmem:[%s4915_s16 + $0x70] sm:$0xff]   ;;  %v3874_v48 = vld [vmem:[%s4915_s16 + $0x78] sm:$0xff]   ;;  %v2844_v27 = vrot.slane %v2835_v25, %v4171_v33  ;;  %v3319_v33 = vld [vmem:[%s4917_s17] ss:$0 sm:$0xff] }
0x1898   :  { %2792 = vadd.xlane.f32.xlu1 %v2790_v28  ;;  %v2791_v29 = vadd.f32 %v2787_v26, %v4507_v56  ;;  %2930 = vmatpush1.bf16.msra.mxu1 %v3839_v32  ;;  %v2840_v26 = vrot.slane %v2835_v25, %v4177_v36 }
0x1899   :  { %2931 = vmatprep.subr.bf16.mxu1 %v3844_v41  ;;  %3465 = vmatprep.subr.bf16.mxu0 %v3872_v2 }
0x189a   :  { %2794 = vadd.xlane.f32.xlu0 %v2791_v29  ;;  %3466 = vmatpush3.bf16.msra.mxu0 %v3873_v43 }
0x189b   :  { %3467 = vmatprep.subr.bf16.mxu0 %v3874_v48 }
0x189c   :  { %2932 = vmatpush1.bf16.msra.mxu1 %v3842_v42 }
0x189d   :  { %2933 = vmatprep.subr.bf16.mxu1 %v3847_v44 }
0x189e   :  { %3468 = vmatpush3.bf16.msra.mxu0 %v3875_v24 }
0x18a0   :  { %2934 = vmatpush1.bf16.msra.mxu1 %v3845_v45 }
0x18a1   :  { %2935 = vmatprep.subr.bf16.mxu1 %v3850_v47 }
0x18a4   :  { %2936 = vmatpush1.bf16.msra.mxu1 %v3848_v46 }
0x18a5   :  { %2937 = vmatprep.subr.bf16.mxu1 %v3853_v49 }
0x18a8   :  { %2938 = vmatpush1.bf16.msra.mxu1 %v3851_v60 }
0x18a9   :  { %2939 = vmatprep.subr.bf16.mxu1 %v3856_v50 }
0x18ac   :  { %2940 = vmatpush1.bf16.msra.mxu1 %v3854_v4 }
0x18ad   :  { %2941 = vmatprep.subr.bf16.mxu1 %v3859_v52 }
0x18b0   :  { %2942 = vmatpush1.bf16.msra.mxu1 %v3857_v53 }
0x1925   :  { %v2793_v56 = vpop.xlane.xlu1 %2792 }
0x1926   :  { %v2796_v51 = vmul.f32 0.0078125, %v2793_v56 }
0x1927   :  { %v2795_v34 = vpop.xlane.xlu0 %2794 }
0x1928   :  { %v4775_v22 = vsub.f32 %v2790_v28, %v2796_v51  ;;  %v2797_v35 = vmul.f32 0.0078125, %v2795_v34 }
0x192a   :  { %v4777_v37 = vsub.f32 %v2791_v29, %v2797_v35  ;;  %v2800_v39 = vmul.f32 %v4775_v22, %v4775_v22 }
0x192c   :  { %2802 = vadd.xlane.f32.xlu0 %v2800_v39  ;;  %v2801_v40 = vmul.f32 %v4777_v37, %v4777_v37 }
0x192e   :  { %2804 = vadd.xlane.f32.xlu1 %v2801_v40 }
0x19b9   :  { %v2803_v1 = vpop.xlane.xlu0 %2802 }
0x19ba   :  { %v2806_v15 = vmul.f32 0.0078125, %v2803_v1 }
0x19bb   :  { %v2805_v19 = vpop.xlane.xlu1 %2804 }
0x19bc   :  { %v2808_v7 = vadd.f32 1e-05, %v2806_v15  ;;  %v2807_v8 = vmul.f32 0.0078125, %v2805_v19 }
0x19be   :  { %3945 = vrsqrt.f32 %v2808_v7  ;;  %v2809_v0 = vadd.f32 1e-05, %v2807_v8 }
0x19c0   :  { %3947 = vrsqrt.f32 %v2809_v0 }
0x19c8   :  { %v3946_v10 = vpop.eup %3945 }
0x19c9   :  { %v2812_v23 = vmul.f32 %v3946_v10, %v4775_v22 }
0x19ca   :  { %v3948_v9 = vpop.eup %3947 }
0x19cb   :  { %v2813_v12 = vmul.f32 %v3948_v9, %v4777_v37  ;;  %v2814_v14 = vmul.f32 %v4857_v13, %v2812_v23 }
0x19cd   :  { %v2815_v17 = vmul.f32 %v4857_v13, %v2813_v12  ;;  %v2816_v58 = vadd.f32 %v4864_v18, %v2814_v14 }
0x19cf   :  { %v2817_v20 = vadd.f32 %v4864_v18, %v2815_v17 }
0x19d1   :  { %v2818_v21 = vpack.c.bf16 %v2817_v20, %v2816_v58 }
0x19d3   :  { %2960 = vmatmul.mubr.bf16.vlgmr.msra.gmra.mrb[88].mxu1 %v2818_v21 }
0x1aa6   :  { %v2961_v28 = vpop.f32.mrb[88].mxu1 }
0x1aa7   :  { %v2962_v29 = vadd.f32 %v2961_v28, %v2840_v26  ;;  %v2963_v30 = vpop.f32.mrb[89].mxu1 }
0x1aa8   :  { %v2964_v31 = vadd.f32 %v2963_v30, %v2844_v27  ;;  %v2965_v32 = vpop.f32.mrb[90].mxu1 }
0x1aa9   :  { %v2966_v55 = vadd.f32 %v2965_v32, %v2840_v26  ;;  %v2967_v56 = vpop.f32.mrb[91].mxu1  ;;  %v2970_v34 = vmax.f32 %v2962_v29, 0.0 }
0x1aaa   :  { %v2968_v51 = vadd.f32 %v2967_v56, %v2844_v27  ;;  %v2971_v35 = vmax.f32 %v2964_v31, 0.0 }
0x1aab   :  { %v2972_v22 = vmax.f32 %v2966_v55, 0.0 }
0x1aac   :  { %v2973_v37 = vmax.f32 %v2968_v51, 0.0 }
0x1aad   :  { %v2974_v39 = vpack.c.bf16 %v2972_v22, %v2970_v34 }
0x1aae   :  { %v2975_v40 = vpack.c.bf16 %v2973_v37, %v2971_v35 }
0x1ab0   :  { %3143 = vmatprep.mubr.bf16.mxu0 %v2975_v40 }
0x1ab1   :  { %3144 = vmatmul.mubr.bf16.vlgmr.msra.gmra.mrb[64].mxu0 %v2974_v39 }
0x1b84   :  { %v3469_v41 = vpop.f32.mrb[64].mxu0 }
0x1b85   :  { %v3470_v36 = vpop.f32.mrb[65].mxu0 }
0x1b86   :  { %v3471_v42 = vadd.f32 %v3470_v36, %v3469_v41  ;;  %v3472_v44 = vpop.f32.mrb[66].mxu0 }
0x1b87   :  { %v3473_v45 = vpop.f32.mrb[67].mxu0 }
0x1b88   :  { %v3146_v47 = vadd.f32 %v3471_v42, %v3319_v33  ;;  %v3474_v46 = vadd.f32 %v3473_v45, %v3472_v44 }
0x1b8a   :  { %v3149_v49 = vadd.f32 %v3474_v46, %v3319_v33  ;;  %v3152_v60 = vadd.f32 %v3146_v47, %v2816_v58 }
0x1b8c   :  { %3154 = vadd.xlane.f32.xlu0 %v3152_v60  ;;  %v3153_v50 = vadd.f32 %v3149_v49, %v2817_v20 }
0x1b8e   :  { %3156 = vadd.xlane.f32.xlu1 %v3153_v50 }
0x1c19   :  { %v3155_v4 = vpop.xlane.xlu0 %3154 }
0x1c1a   :  { %v3158_v52 = vmul.f32 0.0078125, %v3155_v4 }
0x1c1b   :  { %v3157_v53 = vpop.xlane.xlu1 %3156 }
0x1c1c   :  { %v3160_v16 = vsub.f32 %v3152_v60, %v3158_v52  ;;  %v3159_v54 = vmul.f32 0.0078125, %v3157_v53 }
0x1c1e   :  { %v3161_v57 = vsub.f32 %v3153_v50, %v3159_v54  ;;  %v3162_v59 = vmul.f32 %v3160_v16, %v3160_v16 }
0x1c20   :  { %3164 = vadd.xlane.f32.xlu0 %v3162_v59  ;;  %v3163_v61 = vmul.f32 %v3161_v57, %v3161_v57 }
0x1c22   :  { %3166 = vadd.xlane.f32.xlu1 %v3163_v61 }
0x1cad   :  { %v3165_v62 = vpop.xlane.xlu0 %3164 }
0x1cae   :  { %v3168_v63 = vmul.f32 0.0078125, %v3165_v62 }
0x1caf   :  { %v3167_v11 = vpop.xlane.xlu1 %3166 }
0x1cb0   :  { %v3170_v3 = vadd.f32 1e-05, %v3168_v63  ;;  %v3169_v6 = vmul.f32 0.0078125, %v3167_v11 }
0x1cb2   :  { %3949 = vrsqrt.f32 %v3170_v3  ;;  %v3171_v5 = vadd.f32 1e-05, %v3169_v6 }
0x1cb4   :  { %3951 = vrsqrt.f32 %v3171_v5 }
0x1cbc   :  { %v3950_v1 = vpop.eup %3949 }
0x1cbd   :  { %v3174_v15 = vmul.f32 %v3950_v1, %v3160_v16 }
0x1cbe   :  { %v3952_v19 = vpop.eup %3951 }
0x1cbf   :  { %v3176_v7 = vmul.f32 %v4857_v13, %v3174_v15  ;;  %v3175_v8 = vmul.f32 %v3952_v19, %v3161_v57 }
0x1cc1   :  { %v3177_v0 = vmul.f32 %v4857_v13, %v3175_v8  ;;  %v3178_v10 = vadd.f32 %v4864_v18, %v3176_v7 }
0x1cc3   :  { %v3179_v23 = vadd.f32 %v4864_v18, %v3177_v0 }
0x1cc5   :  { %v3351_v9 = vpack.c.bf16 %v3179_v23, %v3178_v10 }
0x1cc7   :  { %3352 = vst [vmem:[%s4918_s20] sm:$0xff] %v3351_v9  }

</bundles_post_ra>
